<compile_context>
chip_gen: v6e
topology: v6e:2x2x1
jax: 0.10.0
libtpu: 0.0.40
codegen_flags: <defaults>
</compile_context>

<pallas_src>
import functools
import math

import jax
import jax.numpy as jnp
from jax.experimental import pallas as pl
from jax.experimental.pallas import tpu as pltpu

# ----------------------------- configuration --------------------------------
D_MODEL = 32          # torch default is 512; scaled down for the test
D_FF = 64             # torch default is 2048; scaled down for the test
N_ENC_LAYERS = 1      # fixed by the module spec (single encoder layer in-kernel)
N_DEC_LAYERS = 6      # torch default
EPS = 1e-5
ACTIVATION = "relu"   # constructor arg `activation`
BIAS = True           # constructor arg `bias`
# batch_first=True, norm_first=False (post-norm) are baked into the kernel.


# ------------------------------ fused kernel ---------------------------------
def _transformer_kernel(
    # activations
    src_ref, tgt_ref,
    # encoder layer (single layer, fused QKV)
    e_wqkv_ref, e_bqkv_ref, e_wo_ref, e_bo_ref,
    e_w1_ref, e_b1_ref, e_w2_ref, e_b2_ref,
    e_ln_g_ref, e_ln_b_ref, enc_norm_g_ref, enc_norm_b_ref,
    # decoder layers stacked along leading dim (N_DEC_LAYERS, ...)
    d_sa_wqkv_ref, d_sa_bqkv_ref, d_sa_wo_ref, d_sa_bo_ref,
    d_ca_wq_ref, d_ca_bq_ref, d_ca_wkv_ref, d_ca_bkv_ref,
    d_ca_wo_ref, d_ca_bo_ref,
    d_w1_ref, d_b1_ref, d_w2_ref, d_b2_ref,
    d_ln_g_ref, d_ln_b_ref, dec_norm_g_ref, dec_norm_b_ref,
    # output
    out_ref,
):
    B, Ss, D = src_ref.shape
    St = tgt_ref.shape[1]
    scale = 1.0 / math.sqrt(D)  # nhead=1 -> head_dim == d_model

    def linear(x2, w, b, act=None):
        """x2:(M,K) @ w:(K,N) + b:(1,N), optional activation."""
        y = jnp.dot(x2, w, preferred_element_type=jnp.float32) + b
        if act == "relu":
            y = jnp.maximum(y, 0.0)
        elif act == "gelu":
            y = 0.5 * y * (1.0 + jax.lax.erf(y * jnp.float32(1.0 / math.sqrt(2.0))))
        return y

    def layer_norm(x2, g, b):
        """LayerNorm over last axis; x2:(M,D), g/b broadcastable to (M,D)."""
        mu = jnp.mean(x2, axis=-1, keepdims=True)
        var = jnp.mean(jnp.square(x2 - mu), axis=-1, keepdims=True)
        return (x2 - mu) * jax.lax.rsqrt(var + EPS) * g + b

    def attention(q3, k3, v3):
        """Single-head SDPA; q3:(B,Sq,D) k3,v3:(B,Sk,D) -> (B,Sq,D)."""
        s = jax.lax.dot_general(
            q3, k3,
            dimension_numbers=(((2,), (2,)), ((0,), (0,))),
            preferred_element_type=jnp.float32) * scale
        m = jnp.max(s, axis=-1, keepdims=True)
        p = jnp.exp(s - m)
        denom = jnp.sum(p, axis=-1, keepdims=True)
        p = p * pl.reciprocal(denom, approx=True)
        return jax.lax.dot_general(
            p, v3,
            dimension_numbers=(((2,), (1,)), ((0,), (0,))),
            preferred_element_type=jnp.float32)

    # -------------------------- encoder (1 layer, post-norm) -----------------
    x2 = src_ref[...].reshape(B * Ss, D).astype(jnp.float32)
    e_ln_g = e_ln_g_ref[...]
    e_ln_b = e_ln_b_ref[...]

    # self-attention with fused QKV projection
    qkv = linear(x2, e_wqkv_ref[...], e_bqkv_ref[...])          # (B*Ss, 3D)
    q = qkv[:, 0:D].reshape(B, Ss, D)
    k = qkv[:, D:2 * D].reshape(B, Ss, D)
    v = qkv[:, 2 * D:3 * D].reshape(B, Ss, D)
    ctx = attention(q, k, v).reshape(B * Ss, D)
    sa = linear(ctx, e_wo_ref[...], e_bo_ref[...])
    x2 = layer_norm(x2 + sa, e_ln_g[0:1], e_ln_b[0:1])

    # feed-forward
    h = linear(x2, e_w1_ref[...], e_b1_ref[...], act=ACTIVATION)
    ff = linear(h, e_w2_ref[...], e_b2_ref[...])
    x2 = layer_norm(x2 + ff, e_ln_g[1:2], e_ln_b[1:2])

    # final encoder norm (nn.Transformer always adds it)
    mem2 = layer_norm(x2, enc_norm_g_ref[...], enc_norm_b_ref[...])   # (B*Ss, D)

    # -------------------------- decoder stack (post-norm) --------------------
    y2 = tgt_ref[...].reshape(B * St, D).astype(jnp.float32)
    n_layers = d_sa_wqkv_ref.shape[0]
    for l in range(n_layers):
        g = d_ln_g_ref[l]      # (3, D)
        bl = d_ln_b_ref[l]     # (3, D)

        # self-attention (fused QKV)
        qkv = linear(y2, d_sa_wqkv_ref[l], d_sa_bqkv_ref[l])     # (B*St, 3D)
        q = qkv[:, 0:D].reshape(B, St, D)
        k = qkv[:, D:2 * D].reshape(B, St, D)
        v = qkv[:, 2 * D:3 * D].reshape(B, St, D)
        ctx = attention(q, k, v).reshape(B * St, D)
        sa = linear(ctx, d_sa_wo_ref[l], d_sa_bo_ref[l])
        y2 = layer_norm(y2 + sa, g[0:1], bl[0:1])

        # cross-attention: queries from decoder, fused K/V from encoder memory
        q = linear(y2, d_ca_wq_ref[l], d_ca_bq_ref[l]).reshape(B, St, D)
        kv = linear(mem2, d_ca_wkv_ref[l], d_ca_bkv_ref[l])      # (B*Ss, 2D)
        k = kv[:, 0:D].reshape(B, Ss, D)
        v = kv[:, D:2 * D].reshape(B, Ss, D)
        ctx = attention(q, k, v).reshape(B * St, D)
        ca = linear(ctx, d_ca_wo_ref[l], d_ca_bo_ref[l])
        y2 = layer_norm(y2 + ca, g[1:2], bl[1:2])

        # feed-forward
        h = linear(y2, d_w1_ref[l], d_b1_ref[l], act=ACTIVATION)
        ff = linear(h, d_w2_ref[l], d_b2_ref[l])
        y2 = layer_norm(y2 + ff, g[2:3], bl[2:3])

    # final decoder norm
    y2 = layer_norm(y2, dec_norm_g_ref[...], dec_norm_b_ref[...])
    out_ref[...] = y2.reshape(B, St, D).astype(out_ref.dtype)


# ------------------------------ wrapper ---------------------------------------
def transformer_forward(params, src, tgt):
    p = params
    args = (
        src, tgt,
        p["e_wqkv"], p["e_bqkv"], p["e_wo"], p["e_bo"],
        p["e_w1"], p["e_b1"], p["e_w2"], p["e_b2"],
        p["e_ln_g"], p["e_ln_b"], p["enc_norm_g"], p["enc_norm_b"],
        p["d_sa_wqkv"], p["d_sa_bqkv"], p["d_sa_wo"], p["d_sa_bo"],
        p["d_ca_wq"], p["d_ca_bq"], p["d_ca_wkv"], p["d_ca_bkv"],
        p["d_ca_wo"], p["d_ca_bo"],
        p["d_w1"], p["d_b1"], p["d_w2"], p["d_b2"],
        p["d_ln_g"], p["d_ln_b"], p["dec_norm_g"], p["dec_norm_b"],
    )
    vmem_spec = pl.BlockSpec(memory_space=pltpu.MemorySpace.VMEM)
    return pl.pallas_call(
        _transformer_kernel,
        out_shape=jax.ShapeDtypeStruct(tgt.shape, tgt.dtype),
        in_specs=[vmem_spec for _ in args],
        out_specs=vmem_spec,
    )(*args)


# ------------------------------- param init ----------------------------------
def init_params(key):
    keys = iter(jax.random.split(key, 64))

    def nxt():
        return next(keys)

    def xavier(shape):
        fan_in, fan_out = shape[-2], shape[-1]
        limit = math.sqrt(6.0 / (fan_in + fan_out))
        return jax.random.uniform(nxt(), shape, jnp.float32, -limit, limit)

    def vec(shape):
        if BIAS:
            return 0.01 * jax.random.normal(nxt(), shape, jnp.float32)
        return jnp.zeros(shape, jnp.float32)

    L, D, F = N_DEC_LAYERS, D_MODEL, D_FF
    return {
        # encoder layer (fused QKV)
        "e_wqkv": xavier((D, 3 * D)), "e_bqkv": vec((1, 3 * D)),
        "e_wo": xavier((D, D)), "e_bo": vec((1, D)),
        "e_w1": xavier((D, F)), "e_b1": vec((1, F)),
        "e_w2": xavier((F, D)), "e_b2": vec((1, D)),
        "e_ln_g": jnp.ones((2, D), jnp.float32),
        "e_ln_b": jnp.zeros((2, D), jnp.float32),
        "enc_norm_g": jnp.ones((1, D), jnp.float32),
        "enc_norm_b": jnp.zeros((1, D), jnp.float32),
        # decoder layers, stacked along the leading (layer) dim
        "d_sa_wqkv": xavier((L, D, 3 * D)), "d_sa_bqkv": vec((L, 1, 3 * D)),
        "d_sa_wo": xavier((L, D, D)), "d_sa_bo": vec((L, 1, D)),
        "d_ca_wq": xavier((L, D, D)), "d_ca_bq": vec((L, 1, D)),
        "d_ca_wkv": xavier((L, D, 2 * D)), "d_ca_bkv": vec((L, 1, 2 * D)),
        "d_ca_wo": xavier((L, D, D)), "d_ca_bo": vec((L, 1, D)),
        "d_w1": xavier((L, D, F)), "d_b1": vec((L, 1, F)),
        "d_w2": xavier((L, F, D)), "d_b2": vec((L, 1, D)),
        "d_ln_g": jnp.ones((L, 3, D), jnp.float32),
        "d_ln_b": jnp.zeros((L, 3, D), jnp.float32),
        "dec_norm_g": jnp.ones((1, D), jnp.float32),
        "dec_norm_b": jnp.zeros((1, D), jnp.float32),
    }


# ---------------------------------- main --------------------------------------
if __name__ == "__main__":
    key = jax.random.PRNGKey(0)
    k_src, k_tgt, k_par = jax.random.split(key, 3)

    B, S_SRC, S_TGT = 2, 8, 8
    src = jax.random.normal(k_src, (B, S_SRC, D_MODEL), jnp.float32)
    tgt = jax.random.normal(k_tgt, (B, S_TGT, D_MODEL), jnp.float32)

    params = init_params(k_par)

    fwd = jax.jit(functools.partial(transformer_forward, params))
    out = jax.block_until_ready(fwd(src, tgt))

    assert out.shape == (B, S_TGT, D_MODEL), out.shape
    assert bool(jnp.all(jnp.isfinite(out)))
    print("KERNEL_OK")
</pallas_src>

<mosaic_0001>
module attributes {stable_mosaic.version = 11 : i64} {
  func.func @_transformer_kernel(%arg0: memref<2x8x32xf32, #tpu.memory_space<vmem>>, %arg1: memref<2x8x32xf32, #tpu.memory_space<vmem>>, %arg2: memref<32x96xf32, #tpu.memory_space<vmem>>, %arg3: memref<1x96xf32, #tpu.memory_space<vmem>>, %arg4: memref<32x32xf32, #tpu.memory_space<vmem>>, %arg5: memref<1x32xf32, #tpu.memory_space<vmem>>, %arg6: memref<32x64xf32, #tpu.memory_space<vmem>>, %arg7: memref<1x64xf32, #tpu.memory_space<vmem>>, %arg8: memref<64x32xf32, #tpu.memory_space<vmem>>, %arg9: memref<1x32xf32, #tpu.memory_space<vmem>>, %arg10: memref<2x32xf32, #tpu.memory_space<vmem>>, %arg11: memref<2x32xf32, #tpu.memory_space<vmem>>, %arg12: memref<1x32xf32, #tpu.memory_space<vmem>>, %arg13: memref<1x32xf32, #tpu.memory_space<vmem>>, %arg14: memref<6x32x96xf32, #tpu.memory_space<vmem>>, %arg15: memref<6x1x96xf32, #tpu.memory_space<vmem>>, %arg16: memref<6x32x32xf32, #tpu.memory_space<vmem>>, %arg17: memref<6x1x32xf32, #tpu.memory_space<vmem>>, %arg18: memref<6x32x32xf32, #tpu.memory_space<vmem>>, %arg19: memref<6x1x32xf32, #tpu.memory_space<vmem>>, %arg20: memref<6x32x64xf32, #tpu.memory_space<vmem>>, %arg21: memref<6x1x64xf32, #tpu.memory_space<vmem>>, %arg22: memref<6x32x32xf32, #tpu.memory_space<vmem>>, %arg23: memref<6x1x32xf32, #tpu.memory_space<vmem>>, %arg24: memref<6x32x64xf32, #tpu.memory_space<vmem>>, %arg25: memref<6x1x64xf32, #tpu.memory_space<vmem>>, %arg26: memref<6x64x32xf32, #tpu.memory_space<vmem>>, %arg27: memref<6x1x32xf32, #tpu.memory_space<vmem>>, %arg28: memref<6x3x32xf32, #tpu.memory_space<vmem>>, %arg29: memref<6x3x32xf32, #tpu.memory_space<vmem>>, %arg30: memref<1x32xf32, #tpu.memory_space<vmem>>, %arg31: memref<1x32xf32, #tpu.memory_space<vmem>>, %arg32: memref<2x8x32xf32, #tpu.memory_space<vmem>>) attributes {dimension_semantics = [], scalar_prefetch = 0 : i64, scratch_operands = 0 : i64, tpu.core_type = #tpu.core_type<tc>} {
    %c0 = arith.constant 0 : index
    %c0_0 = arith.constant 0 : index
    %c0_1 = arith.constant 0 : index
    %0 = vector.load %arg0[%c0, %c0_0, %c0_1] : memref<2x8x32xf32, #tpu.memory_space<vmem>>, vector<2x8x32xf32>
    %1 = vector.shape_cast %0 : vector<2x8x32xf32> to vector<16x32xf32>
    %c0_2 = arith.constant 0 : index
    %c0_3 = arith.constant 0 : index
    %2 = vector.load %arg10[%c0_2, %c0_3] : memref<2x32xf32, #tpu.memory_space<vmem>>, vector<2x32xf32>
    %c0_4 = arith.constant 0 : index
    %c0_5 = arith.constant 0 : index
    %3 = vector.load %arg11[%c0_4, %c0_5] : memref<2x32xf32, #tpu.memory_space<vmem>>, vector<2x32xf32>
    %c0_6 = arith.constant 0 : index
    %c0_7 = arith.constant 0 : index
    %4 = vector.load %arg2[%c0_6, %c0_7] : memref<32x96xf32, #tpu.memory_space<vmem>>, vector<32x96xf32>
    %c0_8 = arith.constant 0 : index
    %c0_9 = arith.constant 0 : index
    %5 = vector.load %arg3[%c0_8, %c0_9] : memref<1x96xf32, #tpu.memory_space<vmem>>, vector<1x96xf32>
    %cst = arith.constant dense<0.000000e+00> : vector<16x96xf32>
    %6 = tpu.matmul %1, %4, %cst {dimension_numbers = #tpu.dot_dimension_numbers<[1], [0], [0], [1], [0, 0, 1, 1], [], []>} : vector<16x32xf32>, vector<32x96xf32>, vector<16x96xf32> -> vector<16x96xf32>
    %7 = vector.broadcast %5 : vector<1x96xf32> to vector<16x96xf32>
    %8 = arith.addf %6, %7 : vector<16x96xf32>
    %9 = vector.extract_strided_slice %8 {offsets = [0, 0], sizes = [16, 32], strides = [1, 1]} : vector<16x96xf32> to vector<16x32xf32>
    %10 = vector.shape_cast %9 : vector<16x32xf32> to vector<2x8x32xf32>
    %11 = vector.extract_strided_slice %8 {offsets = [0, 32], sizes = [16, 32], strides = [1, 1]} : vector<16x96xf32> to vector<16x32xf32>
    %12 = vector.shape_cast %11 : vector<16x32xf32> to vector<2x8x32xf32>
    %13 = vector.extract_strided_slice %8 {offsets = [0, 64], sizes = [16, 32], strides = [1, 1]} : vector<16x96xf32> to vector<16x32xf32>
    %14 = vector.shape_cast %13 : vector<16x32xf32> to vector<2x8x32xf32>
    %cst_10 = arith.constant dense<0.000000e+00> : vector<2x8x8xf32>
    %15 = tpu.matmul %10, %12, %cst_10 {dimension_numbers = #tpu.dot_dimension_numbers<[2], [2], [1], [1], [0, 0, 0, 1, 1, 1], [0], [0]>} : vector<2x8x32xf32>, vector<2x8x32xf32>, vector<2x8x8xf32> -> vector<2x8x8xf32>
    %cst_11 = arith.constant 0.176776692 : f32
    %16 = vector.broadcast %cst_11 : f32 to vector<2x8x8xf32>
    %17 = arith.mulf %15, %16 : vector<2x8x8xf32>
    %cst_12 = arith.constant dense<0xFF800000> : vector<2x8xf32>
    %18 = vector.multi_reduction <maximumf>, %17, %cst_12 [2] : vector<2x8x8xf32> to vector<2x8xf32>
    %19 = vector.shape_cast %18 : vector<2x8xf32> to vector<2x8x1xf32>
    %20 = vector.broadcast %19 : vector<2x8x1xf32> to vector<2x8x8xf32>
    %21 = arith.subf %17, %20 : vector<2x8x8xf32>
    %22 = math.exp %21 : vector<2x8x8xf32>
    %cst_13 = arith.constant dense<0.000000e+00> : vector<2x8xf32>
    %23 = vector.multi_reduction <add>, %22, %cst_13 [2] : vector<2x8x8xf32> to vector<2x8xf32>
    %24 = vector.shape_cast %23 : vector<2x8xf32> to vector<2x8x1xf32>
    %25 = tpu.reciprocal %24 {approx = true} : vector<2x8x1xf32> -> vector<2x8x1xf32>
    %26 = vector.broadcast %25 : vector<2x8x1xf32> to vector<2x8x8xf32>
    %27 = arith.mulf %22, %26 : vector<2x8x8xf32>
    %cst_14 = arith.constant dense<0.000000e+00> : vector<2x8x32xf32>
    %28 = tpu.matmul %27, %14, %cst_14 {dimension_numbers = #tpu.dot_dimension_numbers<[2], [1], [1], [2], [0, 0, 0, 1, 1, 2], [0], [0]>} : vector<2x8x8xf32>, vector<2x8x32xf32>, vector<2x8x32xf32> -> vector<2x8x32xf32>
    %29 = vector.shape_cast %28 : vector<2x8x32xf32> to vector<16x32xf32>
    %c0_15 = arith.constant 0 : index
    %c0_16 = arith.constant 0 : index
    %30 = vector.load %arg4[%c0_15, %c0_16] : memref<32x32xf32, #tpu.memory_space<vmem>>, vector<32x32xf32>
    %c0_17 = arith.constant 0 : index
    %c0_18 = arith.constant 0 : index
    %31 = vector.load %arg5[%c0_17, %c0_18] : memref<1x32xf32, #tpu.memory_space<vmem>>, vector<1x32xf32>
    %cst_19 = arith.constant dense<0.000000e+00> : vector<16x32xf32>
    %32 = tpu.matmul %29, %30, %cst_19 {dimension_numbers = #tpu.dot_dimension_numbers<[1], [0], [0], [1], [0, 0, 1, 1], [], []>} : vector<16x32xf32>, vector<32x32xf32>, vector<16x32xf32> -> vector<16x32xf32>
    %33 = vector.broadcast %31 : vector<1x32xf32> to vector<16x32xf32>
    %34 = arith.addf %32, %33 : vector<16x32xf32>
    %35 = arith.addf %1, %34 : vector<16x32xf32>
    %36 = vector.extract_strided_slice %2 {offsets = [0, 0], sizes = [1, 32], strides = [1, 1]} : vector<2x32xf32> to vector<1x32xf32>
    %37 = vector.extract_strided_slice %3 {offsets = [0, 0], sizes = [1, 32], strides = [1, 1]} : vector<2x32xf32> to vector<1x32xf32>
    %cst_20 = arith.constant dense<0.000000e+00> : vector<16xf32>
    %38 = vector.multi_reduction <add>, %35, %cst_20 [1] : vector<16x32xf32> to vector<16xf32>
    %39 = vector.shape_cast %38 : vector<16xf32> to vector<16x1xf32>
    %cst_21 = arith.constant 3.200000e+01 : f32
    %40 = vector.broadcast %cst_21 : f32 to vector<16x1xf32>
    %41 = arith.divf %39, %40 : vector<16x1xf32>
    %42 = vector.broadcast %41 : vector<16x1xf32> to vector<16x32xf32>
    %43 = arith.subf %35, %42 : vector<16x32xf32>
    %44 = arith.mulf %43, %43 : vector<16x32xf32>
    %cst_22 = arith.constant dense<0.000000e+00> : vector<16xf32>
    %45 = vector.multi_reduction <add>, %44, %cst_22 [1] : vector<16x32xf32> to vector<16xf32>
    %46 = vector.shape_cast %45 : vector<16xf32> to vector<16x1xf32>
    %cst_23 = arith.constant 3.200000e+01 : f32
    %47 = vector.broadcast %cst_23 : f32 to vector<16x1xf32>
    %48 = arith.divf %46, %47 : vector<16x1xf32>
    %49 = vector.broadcast %41 : vector<16x1xf32> to vector<16x32xf32>
    %50 = arith.subf %35, %49 : vector<16x32xf32>
    %cst_24 = arith.constant 9.99999974E-6 : f32
    %51 = vector.broadcast %cst_24 : f32 to vector<16x1xf32>
    %52 = arith.addf %48, %51 : vector<16x1xf32>
    %53 = math.rsqrt %52 : vector<16x1xf32>
    %54 = vector.broadcast %53 : vector<16x1xf32> to vector<16x32xf32>
    %55 = arith.mulf %50, %54 : vector<16x32xf32>
    %56 = vector.broadcast %36 : vector<1x32xf32> to vector<16x32xf32>
    %57 = arith.mulf %55, %56 : vector<16x32xf32>
    %58 = vector.broadcast %37 : vector<1x32xf32> to vector<16x32xf32>
    %59 = arith.addf %57, %58 : vector<16x32xf32>
    %c0_25 = arith.constant 0 : index
    %c0_26 = arith.constant 0 : index
    %60 = vector.load %arg6[%c0_25, %c0_26] : memref<32x64xf32, #tpu.memory_space<vmem>>, vector<32x64xf32>
    %c0_27 = arith.constant 0 : index
    %c0_28 = arith.constant 0 : index
    %61 = vector.load %arg7[%c0_27, %c0_28] : memref<1x64xf32, #tpu.memory_space<vmem>>, vector<1x64xf32>
    %cst_29 = arith.constant dense<0.000000e+00> : vector<16x64xf32>
    %62 = tpu.matmul %59, %60, %cst_29 {dimension_numbers = #tpu.dot_dimension_numbers<[1], [0], [0], [1], [0, 0, 1, 1], [], []>} : vector<16x32xf32>, vector<32x64xf32>, vector<16x64xf32> -> vector<16x64xf32>
    %63 = vector.broadcast %61 : vector<1x64xf32> to vector<16x64xf32>
    %64 = arith.addf %62, %63 : vector<16x64xf32>
    %cst_30 = arith.constant 0.000000e+00 : f32
    %65 = vector.broadcast %cst_30 : f32 to vector<16x64xf32>
    %66 = arith.maximumf %64, %65 : vector<16x64xf32>
    %c0_31 = arith.constant 0 : index
    %c0_32 = arith.constant 0 : index
    %67 = vector.load %arg8[%c0_31, %c0_32] : memref<64x32xf32, #tpu.memory_space<vmem>>, vector<64x32xf32>
    %c0_33 = arith.constant 0 : index
    %c0_34 = arith.constant 0 : index
    %68 = vector.load %arg9[%c0_33, %c0_34] : memref<1x32xf32, #tpu.memory_space<vmem>>, vector<1x32xf32>
    %cst_35 = arith.constant dense<0.000000e+00> : vector<16x32xf32>
    %69 = tpu.matmul %66, %67, %cst_35 {dimension_numbers = #tpu.dot_dimension_numbers<[1], [0], [0], [1], [0, 0, 1, 1], [], []>} : vector<16x64xf32>, vector<64x32xf32>, vector<16x32xf32> -> vector<16x32xf32>
    %70 = vector.broadcast %68 : vector<1x32xf32> to vector<16x32xf32>
    %71 = arith.addf %69, %70 : vector<16x32xf32>
    %72 = arith.addf %59, %71 : vector<16x32xf32>
    %73 = vector.extract_strided_slice %2 {offsets = [1, 0], sizes = [1, 32], strides = [1, 1]} : vector<2x32xf32> to vector<1x32xf32>
    %74 = vector.extract_strided_slice %3 {offsets = [1, 0], sizes = [1, 32], strides = [1, 1]} : vector<2x32xf32> to vector<1x32xf32>
    %cst_36 = arith.constant dense<0.000000e+00> : vector<16xf32>
    %75 = vector.multi_reduction <add>, %72, %cst_36 [1] : vector<16x32xf32> to vector<16xf32>
    %76 = vector.shape_cast %75 : vector<16xf32> to vector<16x1xf32>
    %cst_37 = arith.constant 3.200000e+01 : f32
    %77 = vector.broadcast %cst_37 : f32 to vector<16x1xf32>
    %78 = arith.divf %76, %77 : vector<16x1xf32>
    %79 = vector.broadcast %78 : vector<16x1xf32> to vector<16x32xf32>
    %80 = arith.subf %72, %79 : vector<16x32xf32>
    %81 = arith.mulf %80, %80 : vector<16x32xf32>
    %cst_38 = arith.constant dense<0.000000e+00> : vector<16xf32>
    %82 = vector.multi_reduction <add>, %81, %cst_38 [1] : vector<16x32xf32> to vector<16xf32>
    %83 = vector.shape_cast %82 : vector<16xf32> to vector<16x1xf32>
    %cst_39 = arith.constant 3.200000e+01 : f32
    %84 = vector.broadcast %cst_39 : f32 to vector<16x1xf32>
    %85 = arith.divf %83, %84 : vector<16x1xf32>
    %86 = vector.broadcast %78 : vector<16x1xf32> to vector<16x32xf32>
    %87 = arith.subf %72, %86 : vector<16x32xf32>
    %cst_40 = arith.constant 9.99999974E-6 : f32
    %88 = vector.broadcast %cst_40 : f32 to vector<16x1xf32>
    %89 = arith.addf %85, %88 : vector<16x1xf32>
    %90 = math.rsqrt %89 : vector<16x1xf32>
    %91 = vector.broadcast %90 : vector<16x1xf32> to vector<16x32xf32>
    %92 = arith.mulf %87, %91 : vector<16x32xf32>
    %93 = vector.broadcast %73 : vector<1x32xf32> to vector<16x32xf32>
    %94 = arith.mulf %92, %93 : vector<16x32xf32>
    %95 = vector.broadcast %74 : vector<1x32xf32> to vector<16x32xf32>
    %96 = arith.addf %94, %95 : vector<16x32xf32>
    %c0_41 = arith.constant 0 : index
    %c0_42 = arith.constant 0 : index
    %97 = vector.load %arg12[%c0_41, %c0_42] : memref<1x32xf32, #tpu.memory_space<vmem>>, vector<1x32xf32>
    %c0_43 = arith.constant 0 : index
    %c0_44 = arith.constant 0 : index
    %98 = vector.load %arg13[%c0_43, %c0_44] : memref<1x32xf32, #tpu.memory_space<vmem>>, vector<1x32xf32>
    %cst_45 = arith.constant dense<0.000000e+00> : vector<16xf32>
    %99 = vector.multi_reduction <add>, %96, %cst_45 [1] : vector<16x32xf32> to vector<16xf32>
    %100 = vector.shape_cast %99 : vector<16xf32> to vector<16x1xf32>
    %cst_46 = arith.constant 3.200000e+01 : f32
    %101 = vector.broadcast %cst_46 : f32 to vector<16x1xf32>
    %102 = arith.divf %100, %101 : vector<16x1xf32>
    %103 = vector.broadcast %102 : vector<16x1xf32> to vector<16x32xf32>
    %104 = arith.subf %96, %103 : vector<16x32xf32>
    %105 = arith.mulf %104, %104 : vector<16x32xf32>
    %cst_47 = arith.constant dense<0.000000e+00> : vector<16xf32>
    %106 = vector.multi_reduction <add>, %105, %cst_47 [1] : vector<16x32xf32> to vector<16xf32>
    %107 = vector.shape_cast %106 : vector<16xf32> to vector<16x1xf32>
    %cst_48 = arith.constant 3.200000e+01 : f32
    %108 = vector.broadcast %cst_48 : f32 to vector<16x1xf32>
    %109 = arith.divf %107, %108 : vector<16x1xf32>
    %110 = vector.broadcast %102 : vector<16x1xf32> to vector<16x32xf32>
    %111 = arith.subf %96, %110 : vector<16x32xf32>
    %cst_49 = arith.constant 9.99999974E-6 : f32
    %112 = vector.broadcast %cst_49 : f32 to vector<16x1xf32>
    %113 = arith.addf %109, %112 : vector<16x1xf32>
    %114 = math.rsqrt %113 : vector<16x1xf32>
    %115 = vector.broadcast %114 : vector<16x1xf32> to vector<16x32xf32>
    %116 = arith.mulf %111, %115 : vector<16x32xf32>
    %117 = vector.broadcast %97 : vector<1x32xf32> to vector<16x32xf32>
    %118 = arith.mulf %116, %117 : vector<16x32xf32>
    %119 = vector.broadcast %98 : vector<1x32xf32> to vector<16x32xf32>
    %120 = arith.addf %118, %119 : vector<16x32xf32>
    %c0_50 = arith.constant 0 : index
    %c0_51 = arith.constant 0 : index
    %c0_52 = arith.constant 0 : index
    %121 = vector.load %arg1[%c0_50, %c0_51, %c0_52] : memref<2x8x32xf32, #tpu.memory_space<vmem>>, vector<2x8x32xf32>
    %122 = vector.shape_cast %121 : vector<2x8x32xf32> to vector<16x32xf32>
    %c0_53 = arith.constant 0 : index
    %c0_54 = arith.constant 0 : index
    %c0_55 = arith.constant 0 : index
    %123 = vector.load %arg28[%c0_53, %c0_54, %c0_55] : memref<6x3x32xf32, #tpu.memory_space<vmem>>, vector<1x3x32xf32>
    %124 = vector.shape_cast %123 : vector<1x3x32xf32> to vector<3x32xf32>
    %c0_56 = arith.constant 0 : index
    %c0_57 = arith.constant 0 : index
    %c0_58 = arith.constant 0 : index
    %125 = vector.load %arg29[%c0_56, %c0_57, %c0_58] : memref<6x3x32xf32, #tpu.memory_space<vmem>>, vector<1x3x32xf32>
    %126 = vector.shape_cast %125 : vector<1x3x32xf32> to vector<3x32xf32>
    %c0_59 = arith.constant 0 : index
    %c0_60 = arith.constant 0 : index
    %c0_61 = arith.constant 0 : index
    %127 = vector.load %arg14[%c0_59, %c0_60, %c0_61] : memref<6x32x96xf32, #tpu.memory_space<vmem>>, vector<1x32x96xf32>
    %128 = vector.shape_cast %127 : vector<1x32x96xf32> to vector<32x96xf32>
    %c0_62 = arith.constant 0 : index
    %c0_63 = arith.constant 0 : index
    %c0_64 = arith.constant 0 : index
    %129 = vector.load %arg15[%c0_62, %c0_63, %c0_64] : memref<6x1x96xf32, #tpu.memory_space<vmem>>, vector<1x1x96xf32>
    %130 = vector.shape_cast %129 : vector<1x1x96xf32> to vector<1x96xf32>
    %cst_65 = arith.constant dense<0.000000e+00> : vector<16x96xf32>
    %131 = tpu.matmul %122, %128, %cst_65 {dimension_numbers = #tpu.dot_dimension_numbers<[1], [0], [0], [1], [0, 0, 1, 1], [], []>} : vector<16x32xf32>, vector<32x96xf32>, vector<16x96xf32> -> vector<16x96xf32>
    %132 = vector.broadcast %130 : vector<1x96xf32> to vector<16x96xf32>
    %133 = arith.addf %131, %132 : vector<16x96xf32>
    %134 = vector.extract_strided_slice %133 {offsets = [0, 0], sizes = [16, 32], strides = [1, 1]} : vector<16x96xf32> to vector<16x32xf32>
    %135 = vector.shape_cast %134 : vector<16x32xf32> to vector<2x8x32xf32>
    %136 = vector.extract_strided_slice %133 {offsets = [0, 32], sizes = [16, 32], strides = [1, 1]} : vector<16x96xf32> to vector<16x32xf32>
    %137 = vector.shape_cast %136 : vector<16x32xf32> to vector<2x8x32xf32>
    %138 = vector.extract_strided_slice %133 {offsets = [0, 64], sizes = [16, 32], strides = [1, 1]} : vector<16x96xf32> to vector<16x32xf32>
    %139 = vector.shape_cast %138 : vector<16x32xf32> to vector<2x8x32xf32>
    %cst_66 = arith.constant dense<0.000000e+00> : vector<2x8x8xf32>
    %140 = tpu.matmul %135, %137, %cst_66 {dimension_numbers = #tpu.dot_dimension_numbers<[2], [2], [1], [1], [0, 0, 0, 1, 1, 1], [0], [0]>} : vector<2x8x32xf32>, vector<2x8x32xf32>, vector<2x8x8xf32> -> vector<2x8x8xf32>
    %cst_67 = arith.constant 0.176776692 : f32
    %141 = vector.broadcast %cst_67 : f32 to vector<2x8x8xf32>
    %142 = arith.mulf %140, %141 : vector<2x8x8xf32>
    %cst_68 = arith.constant dense<0xFF800000> : vector<2x8xf32>
    %143 = vector.multi_reduction <maximumf>, %142, %cst_68 [2] : vector<2x8x8xf32> to vector<2x8xf32>
    %144 = vector.shape_cast %143 : vector<2x8xf32> to vector<2x8x1xf32>
    %145 = vector.broadcast %144 : vector<2x8x1xf32> to vector<2x8x8xf32>
    %146 = arith.subf %142, %145 : vector<2x8x8xf32>
    %147 = math.exp %146 : vector<2x8x8xf32>
    %cst_69 = arith.constant dense<0.000000e+00> : vector<2x8xf32>
    %148 = vector.multi_reduction <add>, %147, %cst_69 [2] : vector<2x8x8xf32> to vector<2x8xf32>
    %149 = vector.shape_cast %148 : vector<2x8xf32> to vector<2x8x1xf32>
    %150 = tpu.reciprocal %149 {approx = true} : vector<2x8x1xf32> -> vector<2x8x1xf32>
    %151 = vector.broadcast %150 : vector<2x8x1xf32> to vector<2x8x8xf32>
    %152 = arith.mulf %147, %151 : vector<2x8x8xf32>
    %cst_70 = arith.constant dense<0.000000e+00> : vector<2x8x32xf32>
    %153 = tpu.matmul %152, %139, %cst_70 {dimension_numbers = #tpu.dot_dimension_numbers<[2], [1], [1], [2], [0, 0, 0, 1, 1, 2], [0], [0]>} : vector<2x8x8xf32>, vector<2x8x32xf32>, vector<2x8x32xf32> -> vector<2x8x32xf32>
    %154 = vector.shape_cast %153 : vector<2x8x32xf32> to vector<16x32xf32>
    %c0_71 = arith.constant 0 : index
    %c0_72 = arith.constant 0 : index
    %c0_73 = arith.constant 0 : index
    %155 = vector.load %arg16[%c0_71, %c0_72, %c0_73] : memref<6x32x32xf32, #tpu.memory_space<vmem>>, vector<1x32x32xf32>
    %156 = vector.shape_cast %155 : vector<1x32x32xf32> to vector<32x32xf32>
    %c0_74 = arith.constant 0 : index
    %c0_75 = arith.constant 0 : index
    %c0_76 = arith.constant 0 : index
    %157 = vector.load %arg17[%c0_74, %c0_75, %c0_76] : memref<6x1x32xf32, #tpu.memory_space<vmem>>, vector<1x1x32xf32>
    %158 = vector.shape_cast %157 : vector<1x1x32xf32> to vector<1x32xf32>
    %cst_77 = arith.constant dense<0.000000e+00> : vector<16x32xf32>
    %159 = tpu.matmul %154, %156, %cst_77 {dimension_numbers = #tpu.dot_dimension_numbers<[1], [0], [0], [1], [0, 0, 1, 1], [], []>} : vector<16x32xf32>, vector<32x32xf32>, vector<16x32xf32> -> vector<16x32xf32>
    %160 = vector.broadcast %158 : vector<1x32xf32> to vector<16x32xf32>
    %161 = arith.addf %159, %160 : vector<16x32xf32>
    %162 = arith.addf %122, %161 : vector<16x32xf32>
    %163 = vector.extract_strided_slice %124 {offsets = [0, 0], sizes = [1, 32], strides = [1, 1]} : vector<3x32xf32> to vector<1x32xf32>
    %164 = vector.extract_strided_slice %126 {offsets = [0, 0], sizes = [1, 32], strides = [1, 1]} : vector<3x32xf32> to vector<1x32xf32>
    %cst_78 = arith.constant dense<0.000000e+00> : vector<16xf32>
    %165 = vector.multi_reduction <add>, %162, %cst_78 [1] : vector<16x32xf32> to vector<16xf32>
    %166 = vector.shape_cast %165 : vector<16xf32> to vector<16x1xf32>
    %cst_79 = arith.constant 3.200000e+01 : f32
    %167 = vector.broadcast %cst_79 : f32 to vector<16x1xf32>
    %168 = arith.divf %166, %167 : vector<16x1xf32>
    %169 = vector.broadcast %168 : vector<16x1xf32> to vector<16x32xf32>
    %170 = arith.subf %162, %169 : vector<16x32xf32>
    %171 = arith.mulf %170, %170 : vector<16x32xf32>
    %cst_80 = arith.constant dense<0.000000e+00> : vector<16xf32>
    %172 = vector.multi_reduction <add>, %171, %cst_80 [1] : vector<16x32xf32> to vector<16xf32>
    %173 = vector.shape_cast %172 : vector<16xf32> to vector<16x1xf32>
    %cst_81 = arith.constant 3.200000e+01 : f32
    %174 = vector.broadcast %cst_81 : f32 to vector<16x1xf32>
    %175 = arith.divf %173, %174 : vector<16x1xf32>
    %176 = vector.broadcast %168 : vector<16x1xf32> to vector<16x32xf32>
    %177 = arith.subf %162, %176 : vector<16x32xf32>
    %cst_82 = arith.constant 9.99999974E-6 : f32
    %178 = vector.broadcast %cst_82 : f32 to vector<16x1xf32>
    %179 = arith.addf %175, %178 : vector<16x1xf32>
    %180 = math.rsqrt %179 : vector<16x1xf32>
    %181 = vector.broadcast %180 : vector<16x1xf32> to vector<16x32xf32>
    %182 = arith.mulf %177, %181 : vector<16x32xf32>
    %183 = vector.broadcast %163 : vector<1x32xf32> to vector<16x32xf32>
    %184 = arith.mulf %182, %183 : vector<16x32xf32>
    %185 = vector.broadcast %164 : vector<1x32xf32> to vector<16x32xf32>
    %186 = arith.addf %184, %185 : vector<16x32xf32>
    %c0_83 = arith.constant 0 : index
    %c0_84 = arith.constant 0 : index
    %c0_85 = arith.constant 0 : index
    %187 = vector.load %arg18[%c0_83, %c0_84, %c0_85] : memref<6x32x32xf32, #tpu.memory_space<vmem>>, vector<1x32x32xf32>
    %188 = vector.shape_cast %187 : vector<1x32x32xf32> to vector<32x32xf32>
    %c0_86 = arith.constant 0 : index
    %c0_87 = arith.constant 0 : index
    %c0_88 = arith.constant 0 : index
    %189 = vector.load %arg19[%c0_86, %c0_87, %c0_88] : memref<6x1x32xf32, #tpu.memory_space<vmem>>, vector<1x1x32xf32>
    %190 = vector.shape_cast %189 : vector<1x1x32xf32> to vector<1x32xf32>
    %cst_89 = arith.constant dense<0.000000e+00> : vector<16x32xf32>
    %191 = tpu.matmul %186, %188, %cst_89 {dimension_numbers = #tpu.dot_dimension_numbers<[1], [0], [0], [1], [0, 0, 1, 1], [], []>} : vector<16x32xf32>, vector<32x32xf32>, vector<16x32xf32> -> vector<16x32xf32>
    %192 = vector.broadcast %190 : vector<1x32xf32> to vector<16x32xf32>
    %193 = arith.addf %191, %192 : vector<16x32xf32>
    %194 = vector.shape_cast %193 : vector<16x32xf32> to vector<2x8x32xf32>
    %c0_90 = arith.constant 0 : index
    %c0_91 = arith.constant 0 : index
    %c0_92 = arith.constant 0 : index
    %195 = vector.load %arg20[%c0_90, %c0_91, %c0_92] : memref<6x32x64xf32, #tpu.memory_space<vmem>>, vector<1x32x64xf32>
    %196 = vector.shape_cast %195 : vector<1x32x64xf32> to vector<32x64xf32>
    %c0_93 = arith.constant 0 : index
    %c0_94 = arith.constant 0 : index
    %c0_95 = arith.constant 0 : index
    %197 = vector.load %arg21[%c0_93, %c0_94, %c0_95] : memref<6x1x64xf32, #tpu.memory_space<vmem>>, vector<1x1x64xf32>
    %198 = vector.shape_cast %197 : vector<1x1x64xf32> to vector<1x64xf32>
    %cst_96 = arith.constant dense<0.000000e+00> : vector<16x64xf32>
    %199 = tpu.matmul %120, %196, %cst_96 {dimension_numbers = #tpu.dot_dimension_numbers<[1], [0], [0], [1], [0, 0, 1, 1], [], []>} : vector<16x32xf32>, vector<32x64xf32>, vector<16x64xf32> -> vector<16x64xf32>
    %200 = vector.broadcast %198 : vector<1x64xf32> to vector<16x64xf32>
    %201 = arith.addf %199, %200 : vector<16x64xf32>
    %202 = vector.extract_strided_slice %201 {offsets = [0, 0], sizes = [16, 32], strides = [1, 1]} : vector<16x64xf32> to vector<16x32xf32>
    %203 = vector.shape_cast %202 : vector<16x32xf32> to vector<2x8x32xf32>
    %204 = vector.extract_strided_slice %201 {offsets = [0, 32], sizes = [16, 32], strides = [1, 1]} : vector<16x64xf32> to vector<16x32xf32>
    %205 = vector.shape_cast %204 : vector<16x32xf32> to vector<2x8x32xf32>
    %cst_97 = arith.constant dense<0.000000e+00> : vector<2x8x8xf32>
    %206 = tpu.matmul %194, %203, %cst_97 {dimension_numbers = #tpu.dot_dimension_numbers<[2], [2], [1], [1], [0, 0, 0, 1, 1, 1], [0], [0]>} : vector<2x8x32xf32>, vector<2x8x32xf32>, vector<2x8x8xf32> -> vector<2x8x8xf32>
    %cst_98 = arith.constant 0.176776692 : f32
    %207 = vector.broadcast %cst_98 : f32 to vector<2x8x8xf32>
    %208 = arith.mulf %206, %207 : vector<2x8x8xf32>
    %cst_99 = arith.constant dense<0xFF800000> : vector<2x8xf32>
    %209 = vector.multi_reduction <maximumf>, %208, %cst_99 [2] : vector<2x8x8xf32> to vector<2x8xf32>
    %210 = vector.shape_cast %209 : vector<2x8xf32> to vector<2x8x1xf32>
    %211 = vector.broadcast %210 : vector<2x8x1xf32> to vector<2x8x8xf32>
    %212 = arith.subf %208, %211 : vector<2x8x8xf32>
    %213 = math.exp %212 : vector<2x8x8xf32>
    %cst_100 = arith.constant dense<0.000000e+00> : vector<2x8xf32>
    %214 = vector.multi_reduction <add>, %213, %cst_100 [2] : vector<2x8x8xf32> to vector<2x8xf32>
    %215 = vector.shape_cast %214 : vector<2x8xf32> to vector<2x8x1xf32>
    %216 = tpu.reciprocal %215 {approx = true} : vector<2x8x1xf32> -> vector<2x8x1xf32>
    %217 = vector.broadcast %216 : vector<2x8x1xf32> to vector<2x8x8xf32>
    %218 = arith.mulf %213, %217 : vector<2x8x8xf32>
    %cst_101 = arith.constant dense<0.000000e+00> : vector<2x8x32xf32>
    %219 = tpu.matmul %218, %205, %cst_101 {dimension_numbers = #tpu.dot_dimension_numbers<[2], [1], [1], [2], [0, 0, 0, 1, 1, 2], [0], [0]>} : vector<2x8x8xf32>, vector<2x8x32xf32>, vector<2x8x32xf32> -> vector<2x8x32xf32>
    %220 = vector.shape_cast %219 : vector<2x8x32xf32> to vector<16x32xf32>
    %c0_102 = arith.constant 0 : index
    %c0_103 = arith.constant 0 : index
    %c0_104 = arith.constant 0 : index
    %221 = vector.load %arg22[%c0_102, %c0_103, %c0_104] : memref<6x32x32xf32, #tpu.memory_space<vmem>>, vector<1x32x32xf32>
    %222 = vector.shape_cast %221 : vector<1x32x32xf32> to vector<32x32xf32>
    %c0_105 = arith.constant 0 : index
    %c0_106 = arith.constant 0 : index
    %c0_107 = arith.constant 0 : index
    %223 = vector.load %arg23[%c0_105, %c0_106, %c0_107] : memref<6x1x32xf32, #tpu.memory_space<vmem>>, vector<1x1x32xf32>
    %224 = vector.shape_cast %223 : vector<1x1x32xf32> to vector<1x32xf32>
    %cst_108 = arith.constant dense<0.000000e+00> : vector<16x32xf32>
    %225 = tpu.matmul %220, %222, %cst_108 {dimension_numbers = #tpu.dot_dimension_numbers<[1], [0], [0], [1], [0, 0, 1, 1], [], []>} : vector<16x32xf32>, vector<32x32xf32>, vector<16x32xf32> -> vector<16x32xf32>
    %226 = vector.broadcast %224 : vector<1x32xf32> to vector<16x32xf32>
    %227 = arith.addf %225, %226 : vector<16x32xf32>
    %228 = arith.addf %186, %227 : vector<16x32xf32>
    %229 = vector.extract_strided_slice %124 {offsets = [1, 0], sizes = [1, 32], strides = [1, 1]} : vector<3x32xf32> to vector<1x32xf32>
    %230 = vector.extract_strided_slice %126 {offsets = [1, 0], sizes = [1, 32], strides = [1, 1]} : vector<3x32xf32> to vector<1x32xf32>
    %cst_109 = arith.constant dense<0.000000e+00> : vector<16xf32>
    %231 = vector.multi_reduction <add>, %228, %cst_109 [1] : vector<16x32xf32> to vector<16xf32>
    %232 = vector.shape_cast %231 : vector<16xf32> to vector<16x1xf32>
    %cst_110 = arith.constant 3.200000e+01 : f32
    %233 = vector.broadcast %cst_110 : f32 to vector<16x1xf32>
    %234 = arith.divf %232, %233 : vector<16x1xf32>
    %235 = vector.broadcast %234 : vector<16x1xf32> to vector<16x32xf32>
    %236 = arith.subf %228, %235 : vector<16x32xf32>
    %237 = arith.mulf %236, %236 : vector<16x32xf32>
    %cst_111 = arith.constant dense<0.000000e+00> : vector<16xf32>
    %238 = vector.multi_reduction <add>, %237, %cst_111 [1] : vector<16x32xf32> to vector<16xf32>
    %239 = vector.shape_cast %238 : vector<16xf32> to vector<16x1xf32>
    %cst_112 = arith.constant 3.200000e+01 : f32
    %240 = vector.broadcast %cst_112 : f32 to vector<16x1xf32>
    %241 = arith.divf %239, %240 : vector<16x1xf32>
    %242 = vector.broadcast %234 : vector<16x1xf32> to vector<16x32xf32>
    %243 = arith.subf %228, %242 : vector<16x32xf32>
    %cst_113 = arith.constant 9.99999974E-6 : f32
    %244 = vector.broadcast %cst_113 : f32 to vector<16x1xf32>
    %245 = arith.addf %241, %244 : vector<16x1xf32>
    %246 = math.rsqrt %245 : vector<16x1xf32>
    %247 = vector.broadcast %246 : vector<16x1xf32> to vector<16x32xf32>
    %248 = arith.mulf %243, %247 : vector<16x32xf32>
    %249 = vector.broadcast %229 : vector<1x32xf32> to vector<16x32xf32>
    %250 = arith.mulf %248, %249 : vector<16x32xf32>
    %251 = vector.broadcast %230 : vector<1x32xf32> to vector<16x32xf32>
    %252 = arith.addf %250, %251 : vector<16x32xf32>
    %c0_114 = arith.constant 0 : index
    %c0_115 = arith.constant 0 : index
    %c0_116 = arith.constant 0 : index
    %253 = vector.load %arg24[%c0_114, %c0_115, %c0_116] : memref<6x32x64xf32, #tpu.memory_space<vmem>>, vector<1x32x64xf32>
    %254 = vector.shape_cast %253 : vector<1x32x64xf32> to vector<32x64xf32>
    %c0_117 = arith.constant 0 : index
    %c0_118 = arith.constant 0 : index
    %c0_119 = arith.constant 0 : index
    %255 = vector.load %arg25[%c0_117, %c0_118, %c0_119] : memref<6x1x64xf32, #tpu.memory_space<vmem>>, vector<1x1x64xf32>
    %256 = vector.shape_cast %255 : vector<1x1x64xf32> to vector<1x64xf32>
    %cst_120 = arith.constant dense<0.000000e+00> : vector<16x64xf32>
    %257 = tpu.matmul %252, %254, %cst_120 {dimension_numbers = #tpu.dot_dimension_numbers<[1], [0], [0], [1], [0, 0, 1, 1], [], []>} : vector<16x32xf32>, vector<32x64xf32>, vector<16x64xf32> -> vector<16x64xf32>
    %258 = vector.broadcast %256 : vector<1x64xf32> to vector<16x64xf32>
    %259 = arith.addf %257, %258 : vector<16x64xf32>
    %cst_121 = arith.constant 0.000000e+00 : f32
    %260 = vector.broadcast %cst_121 : f32 to vector<16x64xf32>
    %261 = arith.maximumf %259, %260 : vector<16x64xf32>
    %c0_122 = arith.constant 0 : index
    %c0_123 = arith.constant 0 : index
    %c0_124 = arith.constant 0 : index
    %262 = vector.load %arg26[%c0_122, %c0_123, %c0_124] : memref<6x64x32xf32, #tpu.memory_space<vmem>>, vector<1x64x32xf32>
    %263 = vector.shape_cast %262 : vector<1x64x32xf32> to vector<64x32xf32>
    %c0_125 = arith.constant 0 : index
    %c0_126 = arith.constant 0 : index
    %c0_127 = arith.constant 0 : index
    %264 = vector.load %arg27[%c0_125, %c0_126, %c0_127] : memref<6x1x32xf32, #tpu.memory_space<vmem>>, vector<1x1x32xf32>
    %265 = vector.shape_cast %264 : vector<1x1x32xf32> to vector<1x32xf32>
    %cst_128 = arith.constant dense<0.000000e+00> : vector<16x32xf32>
    %266 = tpu.matmul %261, %263, %cst_128 {dimension_numbers = #tpu.dot_dimension_numbers<[1], [0], [0], [1], [0, 0, 1, 1], [], []>} : vector<16x64xf32>, vector<64x32xf32>, vector<16x32xf32> -> vector<16x32xf32>
    %267 = vector.broadcast %265 : vector<1x32xf32> to vector<16x32xf32>
    %268 = arith.addf %266, %267 : vector<16x32xf32>
    %269 = arith.addf %252, %268 : vector<16x32xf32>
    %270 = vector.extract_strided_slice %124 {offsets = [2, 0], sizes = [1, 32], strides = [1, 1]} : vector<3x32xf32> to vector<1x32xf32>
    %271 = vector.extract_strided_slice %126 {offsets = [2, 0], sizes = [1, 32], strides = [1, 1]} : vector<3x32xf32> to vector<1x32xf32>
    %cst_129 = arith.constant dense<0.000000e+00> : vector<16xf32>
    %272 = vector.multi_reduction <add>, %269, %cst_129 [1] : vector<16x32xf32> to vector<16xf32>
    %273 = vector.shape_cast %272 : vector<16xf32> to vector<16x1xf32>
    %cst_130 = arith.constant 3.200000e+01 : f32
    %274 = vector.broadcast %cst_130 : f32 to vector<16x1xf32>
    %275 = arith.divf %273, %274 : vector<16x1xf32>
    %276 = vector.broadcast %275 : vector<16x1xf32> to vector<16x32xf32>
    %277 = arith.subf %269, %276 : vector<16x32xf32>
    %278 = arith.mulf %277, %277 : vector<16x32xf32>
    %cst_131 = arith.constant dense<0.000000e+00> : vector<16xf32>
    %279 = vector.multi_reduction <add>, %278, %cst_131 [1] : vector<16x32xf32> to vector<16xf32>
    %280 = vector.shape_cast %279 : vector<16xf32> to vector<16x1xf32>
    %cst_132 = arith.constant 3.200000e+01 : f32
    %281 = vector.broadcast %cst_132 : f32 to vector<16x1xf32>
    %282 = arith.divf %280, %281 : vector<16x1xf32>
    %283 = vector.broadcast %275 : vector<16x1xf32> to vector<16x32xf32>
    %284 = arith.subf %269, %283 : vector<16x32xf32>
    %cst_133 = arith.constant 9.99999974E-6 : f32
    %285 = vector.broadcast %cst_133 : f32 to vector<16x1xf32>
    %286 = arith.addf %282, %285 : vector<16x1xf32>
    %287 = math.rsqrt %286 : vector<16x1xf32>
    %288 = vector.broadcast %287 : vector<16x1xf32> to vector<16x32xf32>
    %289 = arith.mulf %284, %288 : vector<16x32xf32>
    %290 = vector.broadcast %270 : vector<1x32xf32> to vector<16x32xf32>
    %291 = arith.mulf %289, %290 : vector<16x32xf32>
    %292 = vector.broadcast %271 : vector<1x32xf32> to vector<16x32xf32>
    %293 = arith.addf %291, %292 : vector<16x32xf32>
    %c1 = arith.constant 1 : index
    %c0_134 = arith.constant 0 : index
    %c0_135 = arith.constant 0 : index
    %294 = vector.load %arg28[%c1, %c0_134, %c0_135] : memref<6x3x32xf32, #tpu.memory_space<vmem>>, vector<1x3x32xf32>
    %295 = vector.shape_cast %294 : vector<1x3x32xf32> to vector<3x32xf32>
    %c1_136 = arith.constant 1 : index
    %c0_137 = arith.constant 0 : index
    %c0_138 = arith.constant 0 : index
    %296 = vector.load %arg29[%c1_136, %c0_137, %c0_138] : memref<6x3x32xf32, #tpu.memory_space<vmem>>, vector<1x3x32xf32>
    %297 = vector.shape_cast %296 : vector<1x3x32xf32> to vector<3x32xf32>
    %c1_139 = arith.constant 1 : index
    %c0_140 = arith.constant 0 : index
    %c0_141 = arith.constant 0 : index
    %298 = vector.load %arg14[%c1_139, %c0_140, %c0_141] : memref<6x32x96xf32, #tpu.memory_space<vmem>>, vector<1x32x96xf32>
    %299 = vector.shape_cast %298 : vector<1x32x96xf32> to vector<32x96xf32>
    %c1_142 = arith.constant 1 : index
    %c0_143 = arith.constant 0 : index
    %c0_144 = arith.constant 0 : index
    %300 = vector.load %arg15[%c1_142, %c0_143, %c0_144] : memref<6x1x96xf32, #tpu.memory_space<vmem>>, vector<1x1x96xf32>
    %301 = vector.shape_cast %300 : vector<1x1x96xf32> to vector<1x96xf32>
    %cst_145 = arith.constant dense<0.000000e+00> : vector<16x96xf32>
    %302 = tpu.matmul %293, %299, %cst_145 {dimension_numbers = #tpu.dot_dimension_numbers<[1], [0], [0], [1], [0, 0, 1, 1], [], []>} : vector<16x32xf32>, vector<32x96xf32>, vector<16x96xf32> -> vector<16x96xf32>
    %303 = vector.broadcast %301 : vector<1x96xf32> to vector<16x96xf32>
    %304 = arith.addf %302, %303 : vector<16x96xf32>
    %305 = vector.extract_strided_slice %304 {offsets = [0, 0], sizes = [16, 32], strides = [1, 1]} : vector<16x96xf32> to vector<16x32xf32>
    %306 = vector.shape_cast %305 : vector<16x32xf32> to vector<2x8x32xf32>
    %307 = vector.extract_strided_slice %304 {offsets = [0, 32], sizes = [16, 32], strides = [1, 1]} : vector<16x96xf32> to vector<16x32xf32>
    %308 = vector.shape_cast %307 : vector<16x32xf32> to vector<2x8x32xf32>
    %309 = vector.extract_strided_slice %304 {offsets = [0, 64], sizes = [16, 32], strides = [1, 1]} : vector<16x96xf32> to vector<16x32xf32>
    %310 = vector.shape_cast %309 : vector<16x32xf32> to vector<2x8x32xf32>
    %cst_146 = arith.constant dense<0.000000e+00> : vector<2x8x8xf32>
    %311 = tpu.matmul %306, %308, %cst_146 {dimension_numbers = #tpu.dot_dimension_numbers<[2], [2], [1], [1], [0, 0, 0, 1, 1, 1], [0], [0]>} : vector<2x8x32xf32>, vector<2x8x32xf32>, vector<2x8x8xf32> -> vector<2x8x8xf32>
    %cst_147 = arith.constant 0.176776692 : f32
    %312 = vector.broadcast %cst_147 : f32 to vector<2x8x8xf32>
    %313 = arith.mulf %311, %312 : vector<2x8x8xf32>
    %cst_148 = arith.constant dense<0xFF800000> : vector<2x8xf32>
    %314 = vector.multi_reduction <maximumf>, %313, %cst_148 [2] : vector<2x8x8xf32> to vector<2x8xf32>
    %315 = vector.shape_cast %314 : vector<2x8xf32> to vector<2x8x1xf32>
    %316 = vector.broadcast %315 : vector<2x8x1xf32> to vector<2x8x8xf32>
    %317 = arith.subf %313, %316 : vector<2x8x8xf32>
    %318 = math.exp %317 : vector<2x8x8xf32>
    %cst_149 = arith.constant dense<0.000000e+00> : vector<2x8xf32>
    %319 = vector.multi_reduction <add>, %318, %cst_149 [2] : vector<2x8x8xf32> to vector<2x8xf32>
    %320 = vector.shape_cast %319 : vector<2x8xf32> to vector<2x8x1xf32>
    %321 = tpu.reciprocal %320 {approx = true} : vector<2x8x1xf32> -> vector<2x8x1xf32>
    %322 = vector.broadcast %321 : vector<2x8x1xf32> to vector<2x8x8xf32>
    %323 = arith.mulf %318, %322 : vector<2x8x8xf32>
    %cst_150 = arith.constant dense<0.000000e+00> : vector<2x8x32xf32>
    %324 = tpu.matmul %323, %310, %cst_150 {dimension_numbers = #tpu.dot_dimension_numbers<[2], [1], [1], [2], [0, 0, 0, 1, 1, 2], [0], [0]>} : vector<2x8x8xf32>, vector<2x8x32xf32>, vector<2x8x32xf32> -> vector<2x8x32xf32>
    %325 = vector.shape_cast %324 : vector<2x8x32xf32> to vector<16x32xf32>
    %c1_151 = arith.constant 1 : index
    %c0_152 = arith.constant 0 : index
    %c0_153 = arith.constant 0 : index
    %326 = vector.load %arg16[%c1_151, %c0_152, %c0_153] : memref<6x32x32xf32, #tpu.memory_space<vmem>>, vector<1x32x32xf32>
    %327 = vector.shape_cast %326 : vector<1x32x32xf32> to vector<32x32xf32>
    %c1_154 = arith.constant 1 : index
    %c0_155 = arith.constant 0 : index
    %c0_156 = arith.constant 0 : index
    %328 = vector.load %arg17[%c1_154, %c0_155, %c0_156] : memref<6x1x32xf32, #tpu.memory_space<vmem>>, vector<1x1x32xf32>
    %329 = vector.shape_cast %328 : vector<1x1x32xf32> to vector<1x32xf32>
    %cst_157 = arith.constant dense<0.000000e+00> : vector<16x32xf32>
    %330 = tpu.matmul %325, %327, %cst_157 {dimension_numbers = #tpu.dot_dimension_numbers<[1], [0], [0], [1], [0, 0, 1, 1], [], []>} : vector<16x32xf32>, vector<32x32xf32>, vector<16x32xf32> -> vector<16x32xf32>
    %331 = vector.broadcast %329 : vector<1x32xf32> to vector<16x32xf32>
    %332 = arith.addf %330, %331 : vector<16x32xf32>
    %333 = arith.addf %293, %332 : vector<16x32xf32>
    %334 = vector.extract_strided_slice %295 {offsets = [0, 0], sizes = [1, 32], strides = [1, 1]} : vector<3x32xf32> to vector<1x32xf32>
    %335 = vector.extract_strided_slice %297 {offsets = [0, 0], sizes = [1, 32], strides = [1, 1]} : vector<3x32xf32> to vector<1x32xf32>
    %cst_158 = arith.constant dense<0.000000e+00> : vector<16xf32>
    %336 = vector.multi_reduction <add>, %333, %cst_158 [1] : vector<16x32xf32> to vector<16xf32>
    %337 = vector.shape_cast %336 : vector<16xf32> to vector<16x1xf32>
    %cst_159 = arith.constant 3.200000e+01 : f32
    %338 = vector.broadcast %cst_159 : f32 to vector<16x1xf32>
    %339 = arith.divf %337, %338 : vector<16x1xf32>
    %340 = vector.broadcast %339 : vector<16x1xf32> to vector<16x32xf32>
    %341 = arith.subf %333, %340 : vector<16x32xf32>
    %342 = arith.mulf %341, %341 : vector<16x32xf32>
    %cst_160 = arith.constant dense<0.000000e+00> : vector<16xf32>
    %343 = vector.multi_reduction <add>, %342, %cst_160 [1] : vector<16x32xf32> to vector<16xf32>
    %344 = vector.shape_cast %343 : vector<16xf32> to vector<16x1xf32>
    %cst_161 = arith.constant 3.200000e+01 : f32
    %345 = vector.broadcast %cst_161 : f32 to vector<16x1xf32>
    %346 = arith.divf %344, %345 : vector<16x1xf32>
    %347 = vector.broadcast %339 : vector<16x1xf32> to vector<16x32xf32>
    %348 = arith.subf %333, %347 : vector<16x32xf32>
    %cst_162 = arith.constant 9.99999974E-6 : f32
    %349 = vector.broadcast %cst_162 : f32 to vector<16x1xf32>
    %350 = arith.addf %346, %349 : vector<16x1xf32>
    %351 = math.rsqrt %350 : vector<16x1xf32>
    %352 = vector.broadcast %351 : vector<16x1xf32> to vector<16x32xf32>
    %353 = arith.mulf %348, %352 : vector<16x32xf32>
    %354 = vector.broadcast %334 : vector<1x32xf32> to vector<16x32xf32>
    %355 = arith.mulf %353, %354 : vector<16x32xf32>
    %356 = vector.broadcast %335 : vector<1x32xf32> to vector<16x32xf32>
    %357 = arith.addf %355, %356 : vector<16x32xf32>
    %c1_163 = arith.constant 1 : index
    %c0_164 = arith.constant 0 : index
    %c0_165 = arith.constant 0 : index
    %358 = vector.load %arg18[%c1_163, %c0_164, %c0_165] : memref<6x32x32xf32, #tpu.memory_space<vmem>>, vector<1x32x32xf32>
    %359 = vector.shape_cast %358 : vector<1x32x32xf32> to vector<32x32xf32>
    %c1_166 = arith.constant 1 : index
    %c0_167 = arith.constant 0 : index
    %c0_168 = arith.constant 0 : index
    %360 = vector.load %arg19[%c1_166, %c0_167, %c0_168] : memref<6x1x32xf32, #tpu.memory_space<vmem>>, vector<1x1x32xf32>
    %361 = vector.shape_cast %360 : vector<1x1x32xf32> to vector<1x32xf32>
    %cst_169 = arith.constant dense<0.000000e+00> : vector<16x32xf32>
    %362 = tpu.matmul %357, %359, %cst_169 {dimension_numbers = #tpu.dot_dimension_numbers<[1], [0], [0], [1], [0, 0, 1, 1], [], []>} : vector<16x32xf32>, vector<32x32xf32>, vector<16x32xf32> -> vector<16x32xf32>
    %363 = vector.broadcast %361 : vector<1x32xf32> to vector<16x32xf32>
    %364 = arith.addf %362, %363 : vector<16x32xf32>
    %365 = vector.shape_cast %364 : vector<16x32xf32> to vector<2x8x32xf32>
    %c1_170 = arith.constant 1 : index
    %c0_171 = arith.constant 0 : index
    %c0_172 = arith.constant 0 : index
    %366 = vector.load %arg20[%c1_170, %c0_171, %c0_172] : memref<6x32x64xf32, #tpu.memory_space<vmem>>, vector<1x32x64xf32>
    %367 = vector.shape_cast %366 : vector<1x32x64xf32> to vector<32x64xf32>
    %c1_173 = arith.constant 1 : index
    %c0_174 = arith.constant 0 : index
    %c0_175 = arith.constant 0 : index
    %368 = vector.load %arg21[%c1_173, %c0_174, %c0_175] : memref<6x1x64xf32, #tpu.memory_space<vmem>>, vector<1x1x64xf32>
    %369 = vector.shape_cast %368 : vector<1x1x64xf32> to vector<1x64xf32>
    %cst_176 = arith.constant dense<0.000000e+00> : vector<16x64xf32>
    %370 = tpu.matmul %120, %367, %cst_176 {dimension_numbers = #tpu.dot_dimension_numbers<[1], [0], [0], [1], [0, 0, 1, 1], [], []>} : vector<16x32xf32>, vector<32x64xf32>, vector<16x64xf32> -> vector<16x64xf32>
    %371 = vector.broadcast %369 : vector<1x64xf32> to vector<16x64xf32>
    %372 = arith.addf %370, %371 : vector<16x64xf32>
    %373 = vector.extract_strided_slice %372 {offsets = [0, 0], sizes = [16, 32], strides = [1, 1]} : vector<16x64xf32> to vector<16x32xf32>
    %374 = vector.shape_cast %373 : vector<16x32xf32> to vector<2x8x32xf32>
    %375 = vector.extract_strided_slice %372 {offsets = [0, 32], sizes = [16, 32], strides = [1, 1]} : vector<16x64xf32> to vector<16x32xf32>
    %376 = vector.shape_cast %375 : vector<16x32xf32> to vector<2x8x32xf32>
    %cst_177 = arith.constant dense<0.000000e+00> : vector<2x8x8xf32>
    %377 = tpu.matmul %365, %374, %cst_177 {dimension_numbers = #tpu.dot_dimension_numbers<[2], [2], [1], [1], [0, 0, 0, 1, 1, 1], [0], [0]>} : vector<2x8x32xf32>, vector<2x8x32xf32>, vector<2x8x8xf32> -> vector<2x8x8xf32>
    %cst_178 = arith.constant 0.176776692 : f32
    %378 = vector.broadcast %cst_178 : f32 to vector<2x8x8xf32>
    %379 = arith.mulf %377, %378 : vector<2x8x8xf32>
    %cst_179 = arith.constant dense<0xFF800000> : vector<2x8xf32>
    %380 = vector.multi_reduction <maximumf>, %379, %cst_179 [2] : vector<2x8x8xf32> to vector<2x8xf32>
    %381 = vector.shape_cast %380 : vector<2x8xf32> to vector<2x8x1xf32>
    %382 = vector.broadcast %381 : vector<2x8x1xf32> to vector<2x8x8xf32>
    %383 = arith.subf %379, %382 : vector<2x8x8xf32>
    %384 = math.exp %383 : vector<2x8x8xf32>
    %cst_180 = arith.constant dense<0.000000e+00> : vector<2x8xf32>
    %385 = vector.multi_reduction <add>, %384, %cst_180 [2] : vector<2x8x8xf32> to vector<2x8xf32>
    %386 = vector.shape_cast %385 : vector<2x8xf32> to vector<2x8x1xf32>
    %387 = tpu.reciprocal %386 {approx = true} : vector<2x8x1xf32> -> vector<2x8x1xf32>
    %388 = vector.broadcast %387 : vector<2x8x1xf32> to vector<2x8x8xf32>
    %389 = arith.mulf %384, %388 : vector<2x8x8xf32>
    %cst_181 = arith.constant dense<0.000000e+00> : vector<2x8x32xf32>
    %390 = tpu.matmul %389, %376, %cst_181 {dimension_numbers = #tpu.dot_dimension_numbers<[2], [1], [1], [2], [0, 0, 0, 1, 1, 2], [0], [0]>} : vector<2x8x8xf32>, vector<2x8x32xf32>, vector<2x8x32xf32> -> vector<2x8x32xf32>
    %391 = vector.shape_cast %390 : vector<2x8x32xf32> to vector<16x32xf32>
    %c1_182 = arith.constant 1 : index
    %c0_183 = arith.constant 0 : index
    %c0_184 = arith.constant 0 : index
    %392 = vector.load %arg22[%c1_182, %c0_183, %c0_184] : memref<6x32x32xf32, #tpu.memory_space<vmem>>, vector<1x32x32xf32>
    %393 = vector.shape_cast %392 : vector<1x32x32xf32> to vector<32x32xf32>
    %c1_185 = arith.constant 1 : index
    %c0_186 = arith.constant 0 : index
    %c0_187 = arith.constant 0 : index
    %394 = vector.load %arg23[%c1_185, %c0_186, %c0_187] : memref<6x1x32xf32, #tpu.memory_space<vmem>>, vector<1x1x32xf32>
    %395 = vector.shape_cast %394 : vector<1x1x32xf32> to vector<1x32xf32>
    %cst_188 = arith.constant dense<0.000000e+00> : vector<16x32xf32>
    %396 = tpu.matmul %391, %393, %cst_188 {dimension_numbers = #tpu.dot_dimension_numbers<[1], [0], [0], [1], [0, 0, 1, 1], [], []>} : vector<16x32xf32>, vector<32x32xf32>, vector<16x32xf32> -> vector<16x32xf32>
    %397 = vector.broadcast %395 : vector<1x32xf32> to vector<16x32xf32>
    %398 = arith.addf %396, %397 : vector<16x32xf32>
    %399 = arith.addf %357, %398 : vector<16x32xf32>
    %400 = vector.extract_strided_slice %295 {offsets = [1, 0], sizes = [1, 32], strides = [1, 1]} : vector<3x32xf32> to vector<1x32xf32>
    %401 = vector.extract_strided_slice %297 {offsets = [1, 0], sizes = [1, 32], strides = [1, 1]} : vector<3x32xf32> to vector<1x32xf32>
    %cst_189 = arith.constant dense<0.000000e+00> : vector<16xf32>
    %402 = vector.multi_reduction <add>, %399, %cst_189 [1] : vector<16x32xf32> to vector<16xf32>
    %403 = vector.shape_cast %402 : vector<16xf32> to vector<16x1xf32>
    %cst_190 = arith.constant 3.200000e+01 : f32
    %404 = vector.broadcast %cst_190 : f32 to vector<16x1xf32>
    %405 = arith.divf %403, %404 : vector<16x1xf32>
    %406 = vector.broadcast %405 : vector<16x1xf32> to vector<16x32xf32>
    %407 = arith.subf %399, %406 : vector<16x32xf32>
    %408 = arith.mulf %407, %407 : vector<16x32xf32>
    %cst_191 = arith.constant dense<0.000000e+00> : vector<16xf32>
    %409 = vector.multi_reduction <add>, %408, %cst_191 [1] : vector<16x32xf32> to vector<16xf32>
    %410 = vector.shape_cast %409 : vector<16xf32> to vector<16x1xf32>
    %cst_192 = arith.constant 3.200000e+01 : f32
    %411 = vector.broadcast %cst_192 : f32 to vector<16x1xf32>
    %412 = arith.divf %410, %411 : vector<16x1xf32>
    %413 = vector.broadcast %405 : vector<16x1xf32> to vector<16x32xf32>
    %414 = arith.subf %399, %413 : vector<16x32xf32>
    %cst_193 = arith.constant 9.99999974E-6 : f32
    %415 = vector.broadcast %cst_193 : f32 to vector<16x1xf32>
    %416 = arith.addf %412, %415 : vector<16x1xf32>
    %417 = math.rsqrt %416 : vector<16x1xf32>
    %418 = vector.broadcast %417 : vector<16x1xf32> to vector<16x32xf32>
    %419 = arith.mulf %414, %418 : vector<16x32xf32>
    %420 = vector.broadcast %400 : vector<1x32xf32> to vector<16x32xf32>
    %421 = arith.mulf %419, %420 : vector<16x32xf32>
    %422 = vector.broadcast %401 : vector<1x32xf32> to vector<16x32xf32>
    %423 = arith.addf %421, %422 : vector<16x32xf32>
    %c1_194 = arith.constant 1 : index
    %c0_195 = arith.constant 0 : index
    %c0_196 = arith.constant 0 : index
    %424 = vector.load %arg24[%c1_194, %c0_195, %c0_196] : memref<6x32x64xf32, #tpu.memory_space<vmem>>, vector<1x32x64xf32>
    %425 = vector.shape_cast %424 : vector<1x32x64xf32> to vector<32x64xf32>
    %c1_197 = arith.constant 1 : index
    %c0_198 = arith.constant 0 : index
    %c0_199 = arith.constant 0 : index
    %426 = vector.load %arg25[%c1_197, %c0_198, %c0_199] : memref<6x1x64xf32, #tpu.memory_space<vmem>>, vector<1x1x64xf32>
    %427 = vector.shape_cast %426 : vector<1x1x64xf32> to vector<1x64xf32>
    %cst_200 = arith.constant dense<0.000000e+00> : vector<16x64xf32>
    %428 = tpu.matmul %423, %425, %cst_200 {dimension_numbers = #tpu.dot_dimension_numbers<[1], [0], [0], [1], [0, 0, 1, 1], [], []>} : vector<16x32xf32>, vector<32x64xf32>, vector<16x64xf32> -> vector<16x64xf32>
    %429 = vector.broadcast %427 : vector<1x64xf32> to vector<16x64xf32>
    %430 = arith.addf %428, %429 : vector<16x64xf32>
    %cst_201 = arith.constant 0.000000e+00 : f32
    %431 = vector.broadcast %cst_201 : f32 to vector<16x64xf32>
    %432 = arith.maximumf %430, %431 : vector<16x64xf32>
    %c1_202 = arith.constant 1 : index
    %c0_203 = arith.constant 0 : index
    %c0_204 = arith.constant 0 : index
    %433 = vector.load %arg26[%c1_202, %c0_203, %c0_204] : memref<6x64x32xf32, #tpu.memory_space<vmem>>, vector<1x64x32xf32>
    %434 = vector.shape_cast %433 : vector<1x64x32xf32> to vector<64x32xf32>
    %c1_205 = arith.constant 1 : index
    %c0_206 = arith.constant 0 : index
    %c0_207 = arith.constant 0 : index
    %435 = vector.load %arg27[%c1_205, %c0_206, %c0_207] : memref<6x1x32xf32, #tpu.memory_space<vmem>>, vector<1x1x32xf32>
    %436 = vector.shape_cast %435 : vector<1x1x32xf32> to vector<1x32xf32>
    %cst_208 = arith.constant dense<0.000000e+00> : vector<16x32xf32>
    %437 = tpu.matmul %432, %434, %cst_208 {dimension_numbers = #tpu.dot_dimension_numbers<[1], [0], [0], [1], [0, 0, 1, 1], [], []>} : vector<16x64xf32>, vector<64x32xf32>, vector<16x32xf32> -> vector<16x32xf32>
    %438 = vector.broadcast %436 : vector<1x32xf32> to vector<16x32xf32>
    %439 = arith.addf %437, %438 : vector<16x32xf32>
    %440 = arith.addf %423, %439 : vector<16x32xf32>
    %441 = vector.extract_strided_slice %295 {offsets = [2, 0], sizes = [1, 32], strides = [1, 1]} : vector<3x32xf32> to vector<1x32xf32>
    %442 = vector.extract_strided_slice %297 {offsets = [2, 0], sizes = [1, 32], strides = [1, 1]} : vector<3x32xf32> to vector<1x32xf32>
    %cst_209 = arith.constant dense<0.000000e+00> : vector<16xf32>
    %443 = vector.multi_reduction <add>, %440, %cst_209 [1] : vector<16x32xf32> to vector<16xf32>
    %444 = vector.shape_cast %443 : vector<16xf32> to vector<16x1xf32>
    %cst_210 = arith.constant 3.200000e+01 : f32
    %445 = vector.broadcast %cst_210 : f32 to vector<16x1xf32>
    %446 = arith.divf %444, %445 : vector<16x1xf32>
    %447 = vector.broadcast %446 : vector<16x1xf32> to vector<16x32xf32>
    %448 = arith.subf %440, %447 : vector<16x32xf32>
    %449 = arith.mulf %448, %448 : vector<16x32xf32>
    %cst_211 = arith.constant dense<0.000000e+00> : vector<16xf32>
    %450 = vector.multi_reduction <add>, %449, %cst_211 [1] : vector<16x32xf32> to vector<16xf32>
    %451 = vector.shape_cast %450 : vector<16xf32> to vector<16x1xf32>
    %cst_212 = arith.constant 3.200000e+01 : f32
    %452 = vector.broadcast %cst_212 : f32 to vector<16x1xf32>
    %453 = arith.divf %451, %452 : vector<16x1xf32>
    %454 = vector.broadcast %446 : vector<16x1xf32> to vector<16x32xf32>
    %455 = arith.subf %440, %454 : vector<16x32xf32>
    %cst_213 = arith.constant 9.99999974E-6 : f32
    %456 = vector.broadcast %cst_213 : f32 to vector<16x1xf32>
    %457 = arith.addf %453, %456 : vector<16x1xf32>
    %458 = math.rsqrt %457 : vector<16x1xf32>
    %459 = vector.broadcast %458 : vector<16x1xf32> to vector<16x32xf32>
    %460 = arith.mulf %455, %459 : vector<16x32xf32>
    %461 = vector.broadcast %441 : vector<1x32xf32> to vector<16x32xf32>
    %462 = arith.mulf %460, %461 : vector<16x32xf32>
    %463 = vector.broadcast %442 : vector<1x32xf32> to vector<16x32xf32>
    %464 = arith.addf %462, %463 : vector<16x32xf32>
    %c2 = arith.constant 2 : index
    %c0_214 = arith.constant 0 : index
    %c0_215 = arith.constant 0 : index
    %465 = vector.load %arg28[%c2, %c0_214, %c0_215] : memref<6x3x32xf32, #tpu.memory_space<vmem>>, vector<1x3x32xf32>
    %466 = vector.shape_cast %465 : vector<1x3x32xf32> to vector<3x32xf32>
    %c2_216 = arith.constant 2 : index
    %c0_217 = arith.constant 0 : index
    %c0_218 = arith.constant 0 : index
    %467 = vector.load %arg29[%c2_216, %c0_217, %c0_218] : memref<6x3x32xf32, #tpu.memory_space<vmem>>, vector<1x3x32xf32>
    %468 = vector.shape_cast %467 : vector<1x3x32xf32> to vector<3x32xf32>
    %c2_219 = arith.constant 2 : index
    %c0_220 = arith.constant 0 : index
    %c0_221 = arith.constant 0 : index
    %469 = vector.load %arg14[%c2_219, %c0_220, %c0_221] : memref<6x32x96xf32, #tpu.memory_space<vmem>>, vector<1x32x96xf32>
    %470 = vector.shape_cast %469 : vector<1x32x96xf32> to vector<32x96xf32>
    %c2_222 = arith.constant 2 : index
    %c0_223 = arith.constant 0 : index
    %c0_224 = arith.constant 0 : index
    %471 = vector.load %arg15[%c2_222, %c0_223, %c0_224] : memref<6x1x96xf32, #tpu.memory_space<vmem>>, vector<1x1x96xf32>
    %472 = vector.shape_cast %471 : vector<1x1x96xf32> to vector<1x96xf32>
    %cst_225 = arith.constant dense<0.000000e+00> : vector<16x96xf32>
    %473 = tpu.matmul %464, %470, %cst_225 {dimension_numbers = #tpu.dot_dimension_numbers<[1], [0], [0], [1], [0, 0, 1, 1], [], []>} : vector<16x32xf32>, vector<32x96xf32>, vector<16x96xf32> -> vector<16x96xf32>
    %474 = vector.broadcast %472 : vector<1x96xf32> to vector<16x96xf32>
    %475 = arith.addf %473, %474 : vector<16x96xf32>
    %476 = vector.extract_strided_slice %475 {offsets = [0, 0], sizes = [16, 32], strides = [1, 1]} : vector<16x96xf32> to vector<16x32xf32>
    %477 = vector.shape_cast %476 : vector<16x32xf32> to vector<2x8x32xf32>
    %478 = vector.extract_strided_slice %475 {offsets = [0, 32], sizes = [16, 32], strides = [1, 1]} : vector<16x96xf32> to vector<16x32xf32>
    %479 = vector.shape_cast %478 : vector<16x32xf32> to vector<2x8x32xf32>
    %480 = vector.extract_strided_slice %475 {offsets = [0, 64], sizes = [16, 32], strides = [1, 1]} : vector<16x96xf32> to vector<16x32xf32>
    %481 = vector.shape_cast %480 : vector<16x32xf32> to vector<2x8x32xf32>
    %cst_226 = arith.constant dense<0.000000e+00> : vector<2x8x8xf32>
    %482 = tpu.matmul %477, %479, %cst_226 {dimension_numbers = #tpu.dot_dimension_numbers<[2], [2], [1], [1], [0, 0, 0, 1, 1, 1], [0], [0]>} : vector<2x8x32xf32>, vector<2x8x32xf32>, vector<2x8x8xf32> -> vector<2x8x8xf32>
    %cst_227 = arith.constant 0.176776692 : f32
    %483 = vector.broadcast %cst_227 : f32 to vector<2x8x8xf32>
    %484 = arith.mulf %482, %483 : vector<2x8x8xf32>
    %cst_228 = arith.constant dense<0xFF800000> : vector<2x8xf32>
    %485 = vector.multi_reduction <maximumf>, %484, %cst_228 [2] : vector<2x8x8xf32> to vector<2x8xf32>
    %486 = vector.shape_cast %485 : vector<2x8xf32> to vector<2x8x1xf32>
    %487 = vector.broadcast %486 : vector<2x8x1xf32> to vector<2x8x8xf32>
    %488 = arith.subf %484, %487 : vector<2x8x8xf32>
    %489 = math.exp %488 : vector<2x8x8xf32>
    %cst_229 = arith.constant dense<0.000000e+00> : vector<2x8xf32>
    %490 = vector.multi_reduction <add>, %489, %cst_229 [2] : vector<2x8x8xf32> to vector<2x8xf32>
    %491 = vector.shape_cast %490 : vector<2x8xf32> to vector<2x8x1xf32>
    %492 = tpu.reciprocal %491 {approx = true} : vector<2x8x1xf32> -> vector<2x8x1xf32>
    %493 = vector.broadcast %492 : vector<2x8x1xf32> to vector<2x8x8xf32>
    %494 = arith.mulf %489, %493 : vector<2x8x8xf32>
    %cst_230 = arith.constant dense<0.000000e+00> : vector<2x8x32xf32>
    %495 = tpu.matmul %494, %481, %cst_230 {dimension_numbers = #tpu.dot_dimension_numbers<[2], [1], [1], [2], [0, 0, 0, 1, 1, 2], [0], [0]>} : vector<2x8x8xf32>, vector<2x8x32xf32>, vector<2x8x32xf32> -> vector<2x8x32xf32>
    %496 = vector.shape_cast %495 : vector<2x8x32xf32> to vector<16x32xf32>
    %c2_231 = arith.constant 2 : index
    %c0_232 = arith.constant 0 : index
    %c0_233 = arith.constant 0 : index
    %497 = vector.load %arg16[%c2_231, %c0_232, %c0_233] : memref<6x32x32xf32, #tpu.memory_space<vmem>>, vector<1x32x32xf32>
    %498 = vector.shape_cast %497 : vector<1x32x32xf32> to vector<32x32xf32>
    %c2_234 = arith.constant 2 : index
    %c0_235 = arith.constant 0 : index
    %c0_236 = arith.constant 0 : index
    %499 = vector.load %arg17[%c2_234, %c0_235, %c0_236] : memref<6x1x32xf32, #tpu.memory_space<vmem>>, vector<1x1x32xf32>
    %500 = vector.shape_cast %499 : vector<1x1x32xf32> to vector<1x32xf32>
    %cst_237 = arith.constant dense<0.000000e+00> : vector<16x32xf32>
    %501 = tpu.matmul %496, %498, %cst_237 {dimension_numbers = #tpu.dot_dimension_numbers<[1], [0], [0], [1], [0, 0, 1, 1], [], []>} : vector<16x32xf32>, vector<32x32xf32>, vector<16x32xf32> -> vector<16x32xf32>
    %502 = vector.broadcast %500 : vector<1x32xf32> to vector<16x32xf32>
    %503 = arith.addf %501, %502 : vector<16x32xf32>
    %504 = arith.addf %464, %503 : vector<16x32xf32>
    %505 = vector.extract_strided_slice %466 {offsets = [0, 0], sizes = [1, 32], strides = [1, 1]} : vector<3x32xf32> to vector<1x32xf32>
    %506 = vector.extract_strided_slice %468 {offsets = [0, 0], sizes = [1, 32], strides = [1, 1]} : vector<3x32xf32> to vector<1x32xf32>
    %cst_238 = arith.constant dense<0.000000e+00> : vector<16xf32>
    %507 = vector.multi_reduction <add>, %504, %cst_238 [1] : vector<16x32xf32> to vector<16xf32>
    %508 = vector.shape_cast %507 : vector<16xf32> to vector<16x1xf32>
    %cst_239 = arith.constant 3.200000e+01 : f32
    %509 = vector.broadcast %cst_239 : f32 to vector<16x1xf32>
    %510 = arith.divf %508, %509 : vector<16x1xf32>
    %511 = vector.broadcast %510 : vector<16x1xf32> to vector<16x32xf32>
    %512 = arith.subf %504, %511 : vector<16x32xf32>
    %513 = arith.mulf %512, %512 : vector<16x32xf32>
    %cst_240 = arith.constant dense<0.000000e+00> : vector<16xf32>
    %514 = vector.multi_reduction <add>, %513, %cst_240 [1] : vector<16x32xf32> to vector<16xf32>
    %515 = vector.shape_cast %514 : vector<16xf32> to vector<16x1xf32>
    %cst_241 = arith.constant 3.200000e+01 : f32
    %516 = vector.broadcast %cst_241 : f32 to vector<16x1xf32>
    %517 = arith.divf %515, %516 : vector<16x1xf32>
    %518 = vector.broadcast %510 : vector<16x1xf32> to vector<16x32xf32>
    %519 = arith.subf %504, %518 : vector<16x32xf32>
    %cst_242 = arith.constant 9.99999974E-6 : f32
    %520 = vector.broadcast %cst_242 : f32 to vector<16x1xf32>
    %521 = arith.addf %517, %520 : vector<16x1xf32>
    %522 = math.rsqrt %521 : vector<16x1xf32>
    %523 = vector.broadcast %522 : vector<16x1xf32> to vector<16x32xf32>
    %524 = arith.mulf %519, %523 : vector<16x32xf32>
    %525 = vector.broadcast %505 : vector<1x32xf32> to vector<16x32xf32>
    %526 = arith.mulf %524, %525 : vector<16x32xf32>
    %527 = vector.broadcast %506 : vector<1x32xf32> to vector<16x32xf32>
    %528 = arith.addf %526, %527 : vector<16x32xf32>
    %c2_243 = arith.constant 2 : index
    %c0_244 = arith.constant 0 : index
    %c0_245 = arith.constant 0 : index
    %529 = vector.load %arg18[%c2_243, %c0_244, %c0_245] : memref<6x32x32xf32, #tpu.memory_space<vmem>>, vector<1x32x32xf32>
    %530 = vector.shape_cast %529 : vector<1x32x32xf32> to vector<32x32xf32>
    %c2_246 = arith.constant 2 : index
    %c0_247 = arith.constant 0 : index
    %c0_248 = arith.constant 0 : index
    %531 = vector.load %arg19[%c2_246, %c0_247, %c0_248] : memref<6x1x32xf32, #tpu.memory_space<vmem>>, vector<1x1x32xf32>
    %532 = vector.shape_cast %531 : vector<1x1x32xf32> to vector<1x32xf32>
    %cst_249 = arith.constant dense<0.000000e+00> : vector<16x32xf32>
    %533 = tpu.matmul %528, %530, %cst_249 {dimension_numbers = #tpu.dot_dimension_numbers<[1], [0], [0], [1], [0, 0, 1, 1], [], []>} : vector<16x32xf32>, vector<32x32xf32>, vector<16x32xf32> -> vector<16x32xf32>
    %534 = vector.broadcast %532 : vector<1x32xf32> to vector<16x32xf32>
    %535 = arith.addf %533, %534 : vector<16x32xf32>
    %536 = vector.shape_cast %535 : vector<16x32xf32> to vector<2x8x32xf32>
    %c2_250 = arith.constant 2 : index
    %c0_251 = arith.constant 0 : index
    %c0_252 = arith.constant 0 : index
    %537 = vector.load %arg20[%c2_250, %c0_251, %c0_252] : memref<6x32x64xf32, #tpu.memory_space<vmem>>, vector<1x32x64xf32>
    %538 = vector.shape_cast %537 : vector<1x32x64xf32> to vector<32x64xf32>
    %c2_253 = arith.constant 2 : index
    %c0_254 = arith.constant 0 : index
    %c0_255 = arith.constant 0 : index
    %539 = vector.load %arg21[%c2_253, %c0_254, %c0_255] : memref<6x1x64xf32, #tpu.memory_space<vmem>>, vector<1x1x64xf32>
    %540 = vector.shape_cast %539 : vector<1x1x64xf32> to vector<1x64xf32>
    %cst_256 = arith.constant dense<0.000000e+00> : vector<16x64xf32>
    %541 = tpu.matmul %120, %538, %cst_256 {dimension_numbers = #tpu.dot_dimension_numbers<[1], [0], [0], [1], [0, 0, 1, 1], [], []>} : vector<16x32xf32>, vector<32x64xf32>, vector<16x64xf32> -> vector<16x64xf32>
    %542 = vector.broadcast %540 : vector<1x64xf32> to vector<16x64xf32>
    %543 = arith.addf %541, %542 : vector<16x64xf32>
    %544 = vector.extract_strided_slice %543 {offsets = [0, 0], sizes = [16, 32], strides = [1, 1]} : vector<16x64xf32> to vector<16x32xf32>
    %545 = vector.shape_cast %544 : vector<16x32xf32> to vector<2x8x32xf32>
    %546 = vector.extract_strided_slice %543 {offsets = [0, 32], sizes = [16, 32], strides = [1, 1]} : vector<16x64xf32> to vector<16x32xf32>
    %547 = vector.shape_cast %546 : vector<16x32xf32> to vector<2x8x32xf32>
    %cst_257 = arith.constant dense<0.000000e+00> : vector<2x8x8xf32>
    %548 = tpu.matmul %536, %545, %cst_257 {dimension_numbers = #tpu.dot_dimension_numbers<[2], [2], [1], [1], [0, 0, 0, 1, 1, 1], [0], [0]>} : vector<2x8x32xf32>, vector<2x8x32xf32>, vector<2x8x8xf32> -> vector<2x8x8xf32>
    %cst_258 = arith.constant 0.176776692 : f32
    %549 = vector.broadcast %cst_258 : f32 to vector<2x8x8xf32>
    %550 = arith.mulf %548, %549 : vector<2x8x8xf32>
    %cst_259 = arith.constant dense<0xFF800000> : vector<2x8xf32>
    %551 = vector.multi_reduction <maximumf>, %550, %cst_259 [2] : vector<2x8x8xf32> to vector<2x8xf32>
    %552 = vector.shape_cast %551 : vector<2x8xf32> to vector<2x8x1xf32>
    %553 = vector.broadcast %552 : vector<2x8x1xf32> to vector<2x8x8xf32>
    %554 = arith.subf %550, %553 : vector<2x8x8xf32>
    %555 = math.exp %554 : vector<2x8x8xf32>
    %cst_260 = arith.constant dense<0.000000e+00> : vector<2x8xf32>
    %556 = vector.multi_reduction <add>, %555, %cst_260 [2] : vector<2x8x8xf32> to vector<2x8xf32>
    %557 = vector.shape_cast %556 : vector<2x8xf32> to vector<2x8x1xf32>
    %558 = tpu.reciprocal %557 {approx = true} : vector<2x8x1xf32> -> vector<2x8x1xf32>
    %559 = vector.broadcast %558 : vector<2x8x1xf32> to vector<2x8x8xf32>
    %560 = arith.mulf %555, %559 : vector<2x8x8xf32>
    %cst_261 = arith.constant dense<0.000000e+00> : vector<2x8x32xf32>
    %561 = tpu.matmul %560, %547, %cst_261 {dimension_numbers = #tpu.dot_dimension_numbers<[2], [1], [1], [2], [0, 0, 0, 1, 1, 2], [0], [0]>} : vector<2x8x8xf32>, vector<2x8x32xf32>, vector<2x8x32xf32> -> vector<2x8x32xf32>
    %562 = vector.shape_cast %561 : vector<2x8x32xf32> to vector<16x32xf32>
    %c2_262 = arith.constant 2 : index
    %c0_263 = arith.constant 0 : index
    %c0_264 = arith.constant 0 : index
    %563 = vector.load %arg22[%c2_262, %c0_263, %c0_264] : memref<6x32x32xf32, #tpu.memory_space<vmem>>, vector<1x32x32xf32>
    %564 = vector.shape_cast %563 : vector<1x32x32xf32> to vector<32x32xf32>
    %c2_265 = arith.constant 2 : index
    %c0_266 = arith.constant 0 : index
    %c0_267 = arith.constant 0 : index
    %565 = vector.load %arg23[%c2_265, %c0_266, %c0_267] : memref<6x1x32xf32, #tpu.memory_space<vmem>>, vector<1x1x32xf32>
    %566 = vector.shape_cast %565 : vector<1x1x32xf32> to vector<1x32xf32>
    %cst_268 = arith.constant dense<0.000000e+00> : vector<16x32xf32>
    %567 = tpu.matmul %562, %564, %cst_268 {dimension_numbers = #tpu.dot_dimension_numbers<[1], [0], [0], [1], [0, 0, 1, 1], [], []>} : vector<16x32xf32>, vector<32x32xf32>, vector<16x32xf32> -> vector<16x32xf32>
    %568 = vector.broadcast %566 : vector<1x32xf32> to vector<16x32xf32>
    %569 = arith.addf %567, %568 : vector<16x32xf32>
    %570 = arith.addf %528, %569 : vector<16x32xf32>
    %571 = vector.extract_strided_slice %466 {offsets = [1, 0], sizes = [1, 32], strides = [1, 1]} : vector<3x32xf32> to vector<1x32xf32>
    %572 = vector.extract_strided_slice %468 {offsets = [1, 0], sizes = [1, 32], strides = [1, 1]} : vector<3x32xf32> to vector<1x32xf32>
    %cst_269 = arith.constant dense<0.000000e+00> : vector<16xf32>
    %573 = vector.multi_reduction <add>, %570, %cst_269 [1] : vector<16x32xf32> to vector<16xf32>
    %574 = vector.shape_cast %573 : vector<16xf32> to vector<16x1xf32>
    %cst_270 = arith.constant 3.200000e+01 : f32
    %575 = vector.broadcast %cst_270 : f32 to vector<16x1xf32>
    %576 = arith.divf %574, %575 : vector<16x1xf32>
    %577 = vector.broadcast %576 : vector<16x1xf32> to vector<16x32xf32>
    %578 = arith.subf %570, %577 : vector<16x32xf32>
    %579 = arith.mulf %578, %578 : vector<16x32xf32>
    %cst_271 = arith.constant dense<0.000000e+00> : vector<16xf32>
    %580 = vector.multi_reduction <add>, %579, %cst_271 [1] : vector<16x32xf32> to vector<16xf32>
    %581 = vector.shape_cast %580 : vector<16xf32> to vector<16x1xf32>
    %cst_272 = arith.constant 3.200000e+01 : f32
    %582 = vector.broadcast %cst_272 : f32 to vector<16x1xf32>
    %583 = arith.divf %581, %582 : vector<16x1xf32>
    %584 = vector.broadcast %576 : vector<16x1xf32> to vector<16x32xf32>
    %585 = arith.subf %570, %584 : vector<16x32xf32>
    %cst_273 = arith.constant 9.99999974E-6 : f32
    %586 = vector.broadcast %cst_273 : f32 to vector<16x1xf32>
    %587 = arith.addf %583, %586 : vector<16x1xf32>
    %588 = math.rsqrt %587 : vector<16x1xf32>
    %589 = vector.broadcast %588 : vector<16x1xf32> to vector<16x32xf32>
    %590 = arith.mulf %585, %589 : vector<16x32xf32>
    %591 = vector.broadcast %571 : vector<1x32xf32> to vector<16x32xf32>
    %592 = arith.mulf %590, %591 : vector<16x32xf32>
    %593 = vector.broadcast %572 : vector<1x32xf32> to vector<16x32xf32>
    %594 = arith.addf %592, %593 : vector<16x32xf32>
    %c2_274 = arith.constant 2 : index
    %c0_275 = arith.constant 0 : index
    %c0_276 = arith.constant 0 : index
    %595 = vector.load %arg24[%c2_274, %c0_275, %c0_276] : memref<6x32x64xf32, #tpu.memory_space<vmem>>, vector<1x32x64xf32>
    %596 = vector.shape_cast %595 : vector<1x32x64xf32> to vector<32x64xf32>
    %c2_277 = arith.constant 2 : index
    %c0_278 = arith.constant 0 : index
    %c0_279 = arith.constant 0 : index
    %597 = vector.load %arg25[%c2_277, %c0_278, %c0_279] : memref<6x1x64xf32, #tpu.memory_space<vmem>>, vector<1x1x64xf32>
    %598 = vector.shape_cast %597 : vector<1x1x64xf32> to vector<1x64xf32>
    %cst_280 = arith.constant dense<0.000000e+00> : vector<16x64xf32>
    %599 = tpu.matmul %594, %596, %cst_280 {dimension_numbers = #tpu.dot_dimension_numbers<[1], [0], [0], [1], [0, 0, 1, 1], [], []>} : vector<16x32xf32>, vector<32x64xf32>, vector<16x64xf32> -> vector<16x64xf32>
    %600 = vector.broadcast %598 : vector<1x64xf32> to vector<16x64xf32>
    %601 = arith.addf %599, %600 : vector<16x64xf32>
    %cst_281 = arith.constant 0.000000e+00 : f32
    %602 = vector.broadcast %cst_281 : f32 to vector<16x64xf32>
    %603 = arith.maximumf %601, %602 : vector<16x64xf32>
    %c2_282 = arith.constant 2 : index
    %c0_283 = arith.constant 0 : index
    %c0_284 = arith.constant 0 : index
    %604 = vector.load %arg26[%c2_282, %c0_283, %c0_284] : memref<6x64x32xf32, #tpu.memory_space<vmem>>, vector<1x64x32xf32>
    %605 = vector.shape_cast %604 : vector<1x64x32xf32> to vector<64x32xf32>
    %c2_285 = arith.constant 2 : index
    %c0_286 = arith.constant 0 : index
    %c0_287 = arith.constant 0 : index
    %606 = vector.load %arg27[%c2_285, %c0_286, %c0_287] : memref<6x1x32xf32, #tpu.memory_space<vmem>>, vector<1x1x32xf32>
    %607 = vector.shape_cast %606 : vector<1x1x32xf32> to vector<1x32xf32>
    %cst_288 = arith.constant dense<0.000000e+00> : vector<16x32xf32>
    %608 = tpu.matmul %603, %605, %cst_288 {dimension_numbers = #tpu.dot_dimension_numbers<[1], [0], [0], [1], [0, 0, 1, 1], [], []>} : vector<16x64xf32>, vector<64x32xf32>, vector<16x32xf32> -> vector<16x32xf32>
    %609 = vector.broadcast %607 : vector<1x32xf32> to vector<16x32xf32>
    %610 = arith.addf %608, %609 : vector<16x32xf32>
    %611 = arith.addf %594, %610 : vector<16x32xf32>
    %612 = vector.extract_strided_slice %466 {offsets = [2, 0], sizes = [1, 32], strides = [1, 1]} : vector<3x32xf32> to vector<1x32xf32>
    %613 = vector.extract_strided_slice %468 {offsets = [2, 0], sizes = [1, 32], strides = [1, 1]} : vector<3x32xf32> to vector<1x32xf32>
    %cst_289 = arith.constant dense<0.000000e+00> : vector<16xf32>
    %614 = vector.multi_reduction <add>, %611, %cst_289 [1] : vector<16x32xf32> to vector<16xf32>
    %615 = vector.shape_cast %614 : vector<16xf32> to vector<16x1xf32>
    %cst_290 = arith.constant 3.200000e+01 : f32
    %616 = vector.broadcast %cst_290 : f32 to vector<16x1xf32>
    %617 = arith.divf %615, %616 : vector<16x1xf32>
    %618 = vector.broadcast %617 : vector<16x1xf32> to vector<16x32xf32>
    %619 = arith.subf %611, %618 : vector<16x32xf32>
    %620 = arith.mulf %619, %619 : vector<16x32xf32>
    %cst_291 = arith.constant dense<0.000000e+00> : vector<16xf32>
    %621 = vector.multi_reduction <add>, %620, %cst_291 [1] : vector<16x32xf32> to vector<16xf32>
    %622 = vector.shape_cast %621 : vector<16xf32> to vector<16x1xf32>
    %cst_292 = arith.constant 3.200000e+01 : f32
    %623 = vector.broadcast %cst_292 : f32 to vector<16x1xf32>
    %624 = arith.divf %622, %623 : vector<16x1xf32>
    %625 = vector.broadcast %617 : vector<16x1xf32> to vector<16x32xf32>
    %626 = arith.subf %611, %625 : vector<16x32xf32>
    %cst_293 = arith.constant 9.99999974E-6 : f32
    %627 = vector.broadcast %cst_293 : f32 to vector<16x1xf32>
    %628 = arith.addf %624, %627 : vector<16x1xf32>
    %629 = math.rsqrt %628 : vector<16x1xf32>
    %630 = vector.broadcast %629 : vector<16x1xf32> to vector<16x32xf32>
    %631 = arith.mulf %626, %630 : vector<16x32xf32>
    %632 = vector.broadcast %612 : vector<1x32xf32> to vector<16x32xf32>
    %633 = arith.mulf %631, %632 : vector<16x32xf32>
    %634 = vector.broadcast %613 : vector<1x32xf32> to vector<16x32xf32>
    %635 = arith.addf %633, %634 : vector<16x32xf32>
    %c3 = arith.constant 3 : index
    %c0_294 = arith.constant 0 : index
    %c0_295 = arith.constant 0 : index
    %636 = vector.load %arg28[%c3, %c0_294, %c0_295] : memref<6x3x32xf32, #tpu.memory_space<vmem>>, vector<1x3x32xf32>
    %637 = vector.shape_cast %636 : vector<1x3x32xf32> to vector<3x32xf32>
    %c3_296 = arith.constant 3 : index
    %c0_297 = arith.constant 0 : index
    %c0_298 = arith.constant 0 : index
    %638 = vector.load %arg29[%c3_296, %c0_297, %c0_298] : memref<6x3x32xf32, #tpu.memory_space<vmem>>, vector<1x3x32xf32>
    %639 = vector.shape_cast %638 : vector<1x3x32xf32> to vector<3x32xf32>
    %c3_299 = arith.constant 3 : index
    %c0_300 = arith.constant 0 : index
    %c0_301 = arith.constant 0 : index
    %640 = vector.load %arg14[%c3_299, %c0_300, %c0_301] : memref<6x32x96xf32, #tpu.memory_space<vmem>>, vector<1x32x96xf32>
    %641 = vector.shape_cast %640 : vector<1x32x96xf32> to vector<32x96xf32>
    %c3_302 = arith.constant 3 : index
    %c0_303 = arith.constant 0 : index
    %c0_304 = arith.constant 0 : index
    %642 = vector.load %arg15[%c3_302, %c0_303, %c0_304] : memref<6x1x96xf32, #tpu.memory_space<vmem>>, vector<1x1x96xf32>
    %643 = vector.shape_cast %642 : vector<1x1x96xf32> to vector<1x96xf32>
    %cst_305 = arith.constant dense<0.000000e+00> : vector<16x96xf32>
    %644 = tpu.matmul %635, %641, %cst_305 {dimension_numbers = #tpu.dot_dimension_numbers<[1], [0], [0], [1], [0, 0, 1, 1], [], []>} : vector<16x32xf32>, vector<32x96xf32>, vector<16x96xf32> -> vector<16x96xf32>
    %645 = vector.broadcast %643 : vector<1x96xf32> to vector<16x96xf32>
    %646 = arith.addf %644, %645 : vector<16x96xf32>
    %647 = vector.extract_strided_slice %646 {offsets = [0, 0], sizes = [16, 32], strides = [1, 1]} : vector<16x96xf32> to vector<16x32xf32>
    %648 = vector.shape_cast %647 : vector<16x32xf32> to vector<2x8x32xf32>
    %649 = vector.extract_strided_slice %646 {offsets = [0, 32], sizes = [16, 32], strides = [1, 1]} : vector<16x96xf32> to vector<16x32xf32>
    %650 = vector.shape_cast %649 : vector<16x32xf32> to vector<2x8x32xf32>
    %651 = vector.extract_strided_slice %646 {offsets = [0, 64], sizes = [16, 32], strides = [1, 1]} : vector<16x96xf32> to vector<16x32xf32>
    %652 = vector.shape_cast %651 : vector<16x32xf32> to vector<2x8x32xf32>
    %cst_306 = arith.constant dense<0.000000e+00> : vector<2x8x8xf32>
    %653 = tpu.matmul %648, %650, %cst_306 {dimension_numbers = #tpu.dot_dimension_numbers<[2], [2], [1], [1], [0, 0, 0, 1, 1, 1], [0], [0]>} : vector<2x8x32xf32>, vector<2x8x32xf32>, vector<2x8x8xf32> -> vector<2x8x8xf32>
    %cst_307 = arith.constant 0.176776692 : f32
    %654 = vector.broadcast %cst_307 : f32 to vector<2x8x8xf32>
    %655 = arith.mulf %653, %654 : vector<2x8x8xf32>
    %cst_308 = arith.constant dense<0xFF800000> : vector<2x8xf32>
    %656 = vector.multi_reduction <maximumf>, %655, %cst_308 [2] : vector<2x8x8xf32> to vector<2x8xf32>
    %657 = vector.shape_cast %656 : vector<2x8xf32> to vector<2x8x1xf32>
    %658 = vector.broadcast %657 : vector<2x8x1xf32> to vector<2x8x8xf32>
    %659 = arith.subf %655, %658 : vector<2x8x8xf32>
    %660 = math.exp %659 : vector<2x8x8xf32>
    %cst_309 = arith.constant dense<0.000000e+00> : vector<2x8xf32>
    %661 = vector.multi_reduction <add>, %660, %cst_309 [2] : vector<2x8x8xf32> to vector<2x8xf32>
    %662 = vector.shape_cast %661 : vector<2x8xf32> to vector<2x8x1xf32>
    %663 = tpu.reciprocal %662 {approx = true} : vector<2x8x1xf32> -> vector<2x8x1xf32>
    %664 = vector.broadcast %663 : vector<2x8x1xf32> to vector<2x8x8xf32>
    %665 = arith.mulf %660, %664 : vector<2x8x8xf32>
    %cst_310 = arith.constant dense<0.000000e+00> : vector<2x8x32xf32>
    %666 = tpu.matmul %665, %652, %cst_310 {dimension_numbers = #tpu.dot_dimension_numbers<[2], [1], [1], [2], [0, 0, 0, 1, 1, 2], [0], [0]>} : vector<2x8x8xf32>, vector<2x8x32xf32>, vector<2x8x32xf32> -> vector<2x8x32xf32>
    %667 = vector.shape_cast %666 : vector<2x8x32xf32> to vector<16x32xf32>
    %c3_311 = arith.constant 3 : index
    %c0_312 = arith.constant 0 : index
    %c0_313 = arith.constant 0 : index
    %668 = vector.load %arg16[%c3_311, %c0_312, %c0_313] : memref<6x32x32xf32, #tpu.memory_space<vmem>>, vector<1x32x32xf32>
    %669 = vector.shape_cast %668 : vector<1x32x32xf32> to vector<32x32xf32>
    %c3_314 = arith.constant 3 : index
    %c0_315 = arith.constant 0 : index
    %c0_316 = arith.constant 0 : index
    %670 = vector.load %arg17[%c3_314, %c0_315, %c0_316] : memref<6x1x32xf32, #tpu.memory_space<vmem>>, vector<1x1x32xf32>
    %671 = vector.shape_cast %670 : vector<1x1x32xf32> to vector<1x32xf32>
    %cst_317 = arith.constant dense<0.000000e+00> : vector<16x32xf32>
    %672 = tpu.matmul %667, %669, %cst_317 {dimension_numbers = #tpu.dot_dimension_numbers<[1], [0], [0], [1], [0, 0, 1, 1], [], []>} : vector<16x32xf32>, vector<32x32xf32>, vector<16x32xf32> -> vector<16x32xf32>
    %673 = vector.broadcast %671 : vector<1x32xf32> to vector<16x32xf32>
    %674 = arith.addf %672, %673 : vector<16x32xf32>
    %675 = arith.addf %635, %674 : vector<16x32xf32>
    %676 = vector.extract_strided_slice %637 {offsets = [0, 0], sizes = [1, 32], strides = [1, 1]} : vector<3x32xf32> to vector<1x32xf32>
    %677 = vector.extract_strided_slice %639 {offsets = [0, 0], sizes = [1, 32], strides = [1, 1]} : vector<3x32xf32> to vector<1x32xf32>
    %cst_318 = arith.constant dense<0.000000e+00> : vector<16xf32>
    %678 = vector.multi_reduction <add>, %675, %cst_318 [1] : vector<16x32xf32> to vector<16xf32>
    %679 = vector.shape_cast %678 : vector<16xf32> to vector<16x1xf32>
    %cst_319 = arith.constant 3.200000e+01 : f32
    %680 = vector.broadcast %cst_319 : f32 to vector<16x1xf32>
    %681 = arith.divf %679, %680 : vector<16x1xf32>
    %682 = vector.broadcast %681 : vector<16x1xf32> to vector<16x32xf32>
    %683 = arith.subf %675, %682 : vector<16x32xf32>
    %684 = arith.mulf %683, %683 : vector<16x32xf32>
    %cst_320 = arith.constant dense<0.000000e+00> : vector<16xf32>
    %685 = vector.multi_reduction <add>, %684, %cst_320 [1] : vector<16x32xf32> to vector<16xf32>
    %686 = vector.shape_cast %685 : vector<16xf32> to vector<16x1xf32>
    %cst_321 = arith.constant 3.200000e+01 : f32
    %687 = vector.broadcast %cst_321 : f32 to vector<16x1xf32>
    %688 = arith.divf %686, %687 : vector<16x1xf32>
    %689 = vector.broadcast %681 : vector<16x1xf32> to vector<16x32xf32>
    %690 = arith.subf %675, %689 : vector<16x32xf32>
    %cst_322 = arith.constant 9.99999974E-6 : f32
    %691 = vector.broadcast %cst_322 : f32 to vector<16x1xf32>
    %692 = arith.addf %688, %691 : vector<16x1xf32>
    %693 = math.rsqrt %692 : vector<16x1xf32>
    %694 = vector.broadcast %693 : vector<16x1xf32> to vector<16x32xf32>
    %695 = arith.mulf %690, %694 : vector<16x32xf32>
    %696 = vector.broadcast %676 : vector<1x32xf32> to vector<16x32xf32>
    %697 = arith.mulf %695, %696 : vector<16x32xf32>
    %698 = vector.broadcast %677 : vector<1x32xf32> to vector<16x32xf32>
    %699 = arith.addf %697, %698 : vector<16x32xf32>
    %c3_323 = arith.constant 3 : index
    %c0_324 = arith.constant 0 : index
    %c0_325 = arith.constant 0 : index
    %700 = vector.load %arg18[%c3_323, %c0_324, %c0_325] : memref<6x32x32xf32, #tpu.memory_space<vmem>>, vector<1x32x32xf32>
    %701 = vector.shape_cast %700 : vector<1x32x32xf32> to vector<32x32xf32>
    %c3_326 = arith.constant 3 : index
    %c0_327 = arith.constant 0 : index
    %c0_328 = arith.constant 0 : index
    %702 = vector.load %arg19[%c3_326, %c0_327, %c0_328] : memref<6x1x32xf32, #tpu.memory_space<vmem>>, vector<1x1x32xf32>
    %703 = vector.shape_cast %702 : vector<1x1x32xf32> to vector<1x32xf32>
    %cst_329 = arith.constant dense<0.000000e+00> : vector<16x32xf32>
    %704 = tpu.matmul %699, %701, %cst_329 {dimension_numbers = #tpu.dot_dimension_numbers<[1], [0], [0], [1], [0, 0, 1, 1], [], []>} : vector<16x32xf32>, vector<32x32xf32>, vector<16x32xf32> -> vector<16x32xf32>
    %705 = vector.broadcast %703 : vector<1x32xf32> to vector<16x32xf32>
    %706 = arith.addf %704, %705 : vector<16x32xf32>
    %707 = vector.shape_cast %706 : vector<16x32xf32> to vector<2x8x32xf32>
    %c3_330 = arith.constant 3 : index
    %c0_331 = arith.constant 0 : index
    %c0_332 = arith.constant 0 : index
    %708 = vector.load %arg20[%c3_330, %c0_331, %c0_332] : memref<6x32x64xf32, #tpu.memory_space<vmem>>, vector<1x32x64xf32>
    %709 = vector.shape_cast %708 : vector<1x32x64xf32> to vector<32x64xf32>
    %c3_333 = arith.constant 3 : index
    %c0_334 = arith.constant 0 : index
    %c0_335 = arith.constant 0 : index
    %710 = vector.load %arg21[%c3_333, %c0_334, %c0_335] : memref<6x1x64xf32, #tpu.memory_space<vmem>>, vector<1x1x64xf32>
    %711 = vector.shape_cast %710 : vector<1x1x64xf32> to vector<1x64xf32>
    %cst_336 = arith.constant dense<0.000000e+00> : vector<16x64xf32>
    %712 = tpu.matmul %120, %709, %cst_336 {dimension_numbers = #tpu.dot_dimension_numbers<[1], [0], [0], [1], [0, 0, 1, 1], [], []>} : vector<16x32xf32>, vector<32x64xf32>, vector<16x64xf32> -> vector<16x64xf32>
    %713 = vector.broadcast %711 : vector<1x64xf32> to vector<16x64xf32>
    %714 = arith.addf %712, %713 : vector<16x64xf32>
    %715 = vector.extract_strided_slice %714 {offsets = [0, 0], sizes = [16, 32], strides = [1, 1]} : vector<16x64xf32> to vector<16x32xf32>
    %716 = vector.shape_cast %715 : vector<16x32xf32> to vector<2x8x32xf32>
    %717 = vector.extract_strided_slice %714 {offsets = [0, 32], sizes = [16, 32], strides = [1, 1]} : vector<16x64xf32> to vector<16x32xf32>
    %718 = vector.shape_cast %717 : vector<16x32xf32> to vector<2x8x32xf32>
    %cst_337 = arith.constant dense<0.000000e+00> : vector<2x8x8xf32>
    %719 = tpu.matmul %707, %716, %cst_337 {dimension_numbers = #tpu.dot_dimension_numbers<[2], [2], [1], [1], [0, 0, 0, 1, 1, 1], [0], [0]>} : vector<2x8x32xf32>, vector<2x8x32xf32>, vector<2x8x8xf32> -> vector<2x8x8xf32>
    %cst_338 = arith.constant 0.176776692 : f32
    %720 = vector.broadcast %cst_338 : f32 to vector<2x8x8xf32>
    %721 = arith.mulf %719, %720 : vector<2x8x8xf32>
    %cst_339 = arith.constant dense<0xFF800000> : vector<2x8xf32>
    %722 = vector.multi_reduction <maximumf>, %721, %cst_339 [2] : vector<2x8x8xf32> to vector<2x8xf32>
    %723 = vector.shape_cast %722 : vector<2x8xf32> to vector<2x8x1xf32>
    %724 = vector.broadcast %723 : vector<2x8x1xf32> to vector<2x8x8xf32>
    %725 = arith.subf %721, %724 : vector<2x8x8xf32>
    %726 = math.exp %725 : vector<2x8x8xf32>
    %cst_340 = arith.constant dense<0.000000e+00> : vector<2x8xf32>
    %727 = vector.multi_reduction <add>, %726, %cst_340 [2] : vector<2x8x8xf32> to vector<2x8xf32>
    %728 = vector.shape_cast %727 : vector<2x8xf32> to vector<2x8x1xf32>
    %729 = tpu.reciprocal %728 {approx = true} : vector<2x8x1xf32> -> vector<2x8x1xf32>
    %730 = vector.broadcast %729 : vector<2x8x1xf32> to vector<2x8x8xf32>
    %731 = arith.mulf %726, %730 : vector<2x8x8xf32>
    %cst_341 = arith.constant dense<0.000000e+00> : vector<2x8x32xf32>
    %732 = tpu.matmul %731, %718, %cst_341 {dimension_numbers = #tpu.dot_dimension_numbers<[2], [1], [1], [2], [0, 0, 0, 1, 1, 2], [0], [0]>} : vector<2x8x8xf32>, vector<2x8x32xf32>, vector<2x8x32xf32> -> vector<2x8x32xf32>
    %733 = vector.shape_cast %732 : vector<2x8x32xf32> to vector<16x32xf32>
    %c3_342 = arith.constant 3 : index
    %c0_343 = arith.constant 0 : index
    %c0_344 = arith.constant 0 : index
    %734 = vector.load %arg22[%c3_342, %c0_343, %c0_344] : memref<6x32x32xf32, #tpu.memory_space<vmem>>, vector<1x32x32xf32>
    %735 = vector.shape_cast %734 : vector<1x32x32xf32> to vector<32x32xf32>
    %c3_345 = arith.constant 3 : index
    %c0_346 = arith.constant 0 : index
    %c0_347 = arith.constant 0 : index
    %736 = vector.load %arg23[%c3_345, %c0_346, %c0_347] : memref<6x1x32xf32, #tpu.memory_space<vmem>>, vector<1x1x32xf32>
    %737 = vector.shape_cast %736 : vector<1x1x32xf32> to vector<1x32xf32>
    %cst_348 = arith.constant dense<0.000000e+00> : vector<16x32xf32>
    %738 = tpu.matmul %733, %735, %cst_348 {dimension_numbers = #tpu.dot_dimension_numbers<[1], [0], [0], [1], [0, 0, 1, 1], [], []>} : vector<16x32xf32>, vector<32x32xf32>, vector<16x32xf32> -> vector<16x32xf32>
    %739 = vector.broadcast %737 : vector<1x32xf32> to vector<16x32xf32>
    %740 = arith.addf %738, %739 : vector<16x32xf32>
    %741 = arith.addf %699, %740 : vector<16x32xf32>
    %742 = vector.extract_strided_slice %637 {offsets = [1, 0], sizes = [1, 32], strides = [1, 1]} : vector<3x32xf32> to vector<1x32xf32>
    %743 = vector.extract_strided_slice %639 {offsets = [1, 0], sizes = [1, 32], strides = [1, 1]} : vector<3x32xf32> to vector<1x32xf32>
    %cst_349 = arith.constant dense<0.000000e+00> : vector<16xf32>
    %744 = vector.multi_reduction <add>, %741, %cst_349 [1] : vector<16x32xf32> to vector<16xf32>
    %745 = vector.shape_cast %744 : vector<16xf32> to vector<16x1xf32>
    %cst_350 = arith.constant 3.200000e+01 : f32
    %746 = vector.broadcast %cst_350 : f32 to vector<16x1xf32>
    %747 = arith.divf %745, %746 : vector<16x1xf32>
    %748 = vector.broadcast %747 : vector<16x1xf32> to vector<16x32xf32>
    %749 = arith.subf %741, %748 : vector<16x32xf32>
    %750 = arith.mulf %749, %749 : vector<16x32xf32>
    %cst_351 = arith.constant dense<0.000000e+00> : vector<16xf32>
    %751 = vector.multi_reduction <add>, %750, %cst_351 [1] : vector<16x32xf32> to vector<16xf32>
    %752 = vector.shape_cast %751 : vector<16xf32> to vector<16x1xf32>
    %cst_352 = arith.constant 3.200000e+01 : f32
    %753 = vector.broadcast %cst_352 : f32 to vector<16x1xf32>
    %754 = arith.divf %752, %753 : vector<16x1xf32>
    %755 = vector.broadcast %747 : vector<16x1xf32> to vector<16x32xf32>
    %756 = arith.subf %741, %755 : vector<16x32xf32>
    %cst_353 = arith.constant 9.99999974E-6 : f32
    %757 = vector.broadcast %cst_353 : f32 to vector<16x1xf32>
    %758 = arith.addf %754, %757 : vector<16x1xf32>
    %759 = math.rsqrt %758 : vector<16x1xf32>
    %760 = vector.broadcast %759 : vector<16x1xf32> to vector<16x32xf32>
    %761 = arith.mulf %756, %760 : vector<16x32xf32>
    %762 = vector.broadcast %742 : vector<1x32xf32> to vector<16x32xf32>
    %763 = arith.mulf %761, %762 : vector<16x32xf32>
    %764 = vector.broadcast %743 : vector<1x32xf32> to vector<16x32xf32>
    %765 = arith.addf %763, %764 : vector<16x32xf32>
    %c3_354 = arith.constant 3 : index
    %c0_355 = arith.constant 0 : index
    %c0_356 = arith.constant 0 : index
    %766 = vector.load %arg24[%c3_354, %c0_355, %c0_356] : memref<6x32x64xf32, #tpu.memory_space<vmem>>, vector<1x32x64xf32>
    %767 = vector.shape_cast %766 : vector<1x32x64xf32> to vector<32x64xf32>
    %c3_357 = arith.constant 3 : index
    %c0_358 = arith.constant 0 : index
    %c0_359 = arith.constant 0 : index
    %768 = vector.load %arg25[%c3_357, %c0_358, %c0_359] : memref<6x1x64xf32, #tpu.memory_space<vmem>>, vector<1x1x64xf32>
    %769 = vector.shape_cast %768 : vector<1x1x64xf32> to vector<1x64xf32>
    %cst_360 = arith.constant dense<0.000000e+00> : vector<16x64xf32>
    %770 = tpu.matmul %765, %767, %cst_360 {dimension_numbers = #tpu.dot_dimension_numbers<[1], [0], [0], [1], [0, 0, 1, 1], [], []>} : vector<16x32xf32>, vector<32x64xf32>, vector<16x64xf32> -> vector<16x64xf32>
    %771 = vector.broadcast %769 : vector<1x64xf32> to vector<16x64xf32>
    %772 = arith.addf %770, %771 : vector<16x64xf32>
    %cst_361 = arith.constant 0.000000e+00 : f32
    %773 = vector.broadcast %cst_361 : f32 to vector<16x64xf32>
    %774 = arith.maximumf %772, %773 : vector<16x64xf32>
    %c3_362 = arith.constant 3 : index
    %c0_363 = arith.constant 0 : index
    %c0_364 = arith.constant 0 : index
    %775 = vector.load %arg26[%c3_362, %c0_363, %c0_364] : memref<6x64x32xf32, #tpu.memory_space<vmem>>, vector<1x64x32xf32>
    %776 = vector.shape_cast %775 : vector<1x64x32xf32> to vector<64x32xf32>
    %c3_365 = arith.constant 3 : index
    %c0_366 = arith.constant 0 : index
    %c0_367 = arith.constant 0 : index
    %777 = vector.load %arg27[%c3_365, %c0_366, %c0_367] : memref<6x1x32xf32, #tpu.memory_space<vmem>>, vector<1x1x32xf32>
    %778 = vector.shape_cast %777 : vector<1x1x32xf32> to vector<1x32xf32>
    %cst_368 = arith.constant dense<0.000000e+00> : vector<16x32xf32>
    %779 = tpu.matmul %774, %776, %cst_368 {dimension_numbers = #tpu.dot_dimension_numbers<[1], [0], [0], [1], [0, 0, 1, 1], [], []>} : vector<16x64xf32>, vector<64x32xf32>, vector<16x32xf32> -> vector<16x32xf32>
    %780 = vector.broadcast %778 : vector<1x32xf32> to vector<16x32xf32>
    %781 = arith.addf %779, %780 : vector<16x32xf32>
    %782 = arith.addf %765, %781 : vector<16x32xf32>
    %783 = vector.extract_strided_slice %637 {offsets = [2, 0], sizes = [1, 32], strides = [1, 1]} : vector<3x32xf32> to vector<1x32xf32>
    %784 = vector.extract_strided_slice %639 {offsets = [2, 0], sizes = [1, 32], strides = [1, 1]} : vector<3x32xf32> to vector<1x32xf32>
    %cst_369 = arith.constant dense<0.000000e+00> : vector<16xf32>
    %785 = vector.multi_reduction <add>, %782, %cst_369 [1] : vector<16x32xf32> to vector<16xf32>
    %786 = vector.shape_cast %785 : vector<16xf32> to vector<16x1xf32>
    %cst_370 = arith.constant 3.200000e+01 : f32
    %787 = vector.broadcast %cst_370 : f32 to vector<16x1xf32>
    %788 = arith.divf %786, %787 : vector<16x1xf32>
    %789 = vector.broadcast %788 : vector<16x1xf32> to vector<16x32xf32>
    %790 = arith.subf %782, %789 : vector<16x32xf32>
    %791 = arith.mulf %790, %790 : vector<16x32xf32>
    %cst_371 = arith.constant dense<0.000000e+00> : vector<16xf32>
    %792 = vector.multi_reduction <add>, %791, %cst_371 [1] : vector<16x32xf32> to vector<16xf32>
    %793 = vector.shape_cast %792 : vector<16xf32> to vector<16x1xf32>
    %cst_372 = arith.constant 3.200000e+01 : f32
    %794 = vector.broadcast %cst_372 : f32 to vector<16x1xf32>
    %795 = arith.divf %793, %794 : vector<16x1xf32>
    %796 = vector.broadcast %788 : vector<16x1xf32> to vector<16x32xf32>
    %797 = arith.subf %782, %796 : vector<16x32xf32>
    %cst_373 = arith.constant 9.99999974E-6 : f32
    %798 = vector.broadcast %cst_373 : f32 to vector<16x1xf32>
    %799 = arith.addf %795, %798 : vector<16x1xf32>
    %800 = math.rsqrt %799 : vector<16x1xf32>
    %801 = vector.broadcast %800 : vector<16x1xf32> to vector<16x32xf32>
    %802 = arith.mulf %797, %801 : vector<16x32xf32>
    %803 = vector.broadcast %783 : vector<1x32xf32> to vector<16x32xf32>
    %804 = arith.mulf %802, %803 : vector<16x32xf32>
    %805 = vector.broadcast %784 : vector<1x32xf32> to vector<16x32xf32>
    %806 = arith.addf %804, %805 : vector<16x32xf32>
    %c4 = arith.constant 4 : index
    %c0_374 = arith.constant 0 : index
    %c0_375 = arith.constant 0 : index
    %807 = vector.load %arg28[%c4, %c0_374, %c0_375] : memref<6x3x32xf32, #tpu.memory_space<vmem>>, vector<1x3x32xf32>
    %808 = vector.shape_cast %807 : vector<1x3x32xf32> to vector<3x32xf32>
    %c4_376 = arith.constant 4 : index
    %c0_377 = arith.constant 0 : index
    %c0_378 = arith.constant 0 : index
    %809 = vector.load %arg29[%c4_376, %c0_377, %c0_378] : memref<6x3x32xf32, #tpu.memory_space<vmem>>, vector<1x3x32xf32>
    %810 = vector.shape_cast %809 : vector<1x3x32xf32> to vector<3x32xf32>
    %c4_379 = arith.constant 4 : index
    %c0_380 = arith.constant 0 : index
    %c0_381 = arith.constant 0 : index
    %811 = vector.load %arg14[%c4_379, %c0_380, %c0_381] : memref<6x32x96xf32, #tpu.memory_space<vmem>>, vector<1x32x96xf32>
    %812 = vector.shape_cast %811 : vector<1x32x96xf32> to vector<32x96xf32>
    %c4_382 = arith.constant 4 : index
    %c0_383 = arith.constant 0 : index
    %c0_384 = arith.constant 0 : index
    %813 = vector.load %arg15[%c4_382, %c0_383, %c0_384] : memref<6x1x96xf32, #tpu.memory_space<vmem>>, vector<1x1x96xf32>
    %814 = vector.shape_cast %813 : vector<1x1x96xf32> to vector<1x96xf32>
    %cst_385 = arith.constant dense<0.000000e+00> : vector<16x96xf32>
    %815 = tpu.matmul %806, %812, %cst_385 {dimension_numbers = #tpu.dot_dimension_numbers<[1], [0], [0], [1], [0, 0, 1, 1], [], []>} : vector<16x32xf32>, vector<32x96xf32>, vector<16x96xf32> -> vector<16x96xf32>
    %816 = vector.broadcast %814 : vector<1x96xf32> to vector<16x96xf32>
    %817 = arith.addf %815, %816 : vector<16x96xf32>
    %818 = vector.extract_strided_slice %817 {offsets = [0, 0], sizes = [16, 32], strides = [1, 1]} : vector<16x96xf32> to vector<16x32xf32>
    %819 = vector.shape_cast %818 : vector<16x32xf32> to vector<2x8x32xf32>
    %820 = vector.extract_strided_slice %817 {offsets = [0, 32], sizes = [16, 32], strides = [1, 1]} : vector<16x96xf32> to vector<16x32xf32>
    %821 = vector.shape_cast %820 : vector<16x32xf32> to vector<2x8x32xf32>
    %822 = vector.extract_strided_slice %817 {offsets = [0, 64], sizes = [16, 32], strides = [1, 1]} : vector<16x96xf32> to vector<16x32xf32>
    %823 = vector.shape_cast %822 : vector<16x32xf32> to vector<2x8x32xf32>
    %cst_386 = arith.constant dense<0.000000e+00> : vector<2x8x8xf32>
    %824 = tpu.matmul %819, %821, %cst_386 {dimension_numbers = #tpu.dot_dimension_numbers<[2], [2], [1], [1], [0, 0, 0, 1, 1, 1], [0], [0]>} : vector<2x8x32xf32>, vector<2x8x32xf32>, vector<2x8x8xf32> -> vector<2x8x8xf32>
    %cst_387 = arith.constant 0.176776692 : f32
    %825 = vector.broadcast %cst_387 : f32 to vector<2x8x8xf32>
    %826 = arith.mulf %824, %825 : vector<2x8x8xf32>
    %cst_388 = arith.constant dense<0xFF800000> : vector<2x8xf32>
    %827 = vector.multi_reduction <maximumf>, %826, %cst_388 [2] : vector<2x8x8xf32> to vector<2x8xf32>
    %828 = vector.shape_cast %827 : vector<2x8xf32> to vector<2x8x1xf32>
    %829 = vector.broadcast %828 : vector<2x8x1xf32> to vector<2x8x8xf32>
    %830 = arith.subf %826, %829 : vector<2x8x8xf32>
    %831 = math.exp %830 : vector<2x8x8xf32>
    %cst_389 = arith.constant dense<0.000000e+00> : vector<2x8xf32>
    %832 = vector.multi_reduction <add>, %831, %cst_389 [2] : vector<2x8x8xf32> to vector<2x8xf32>
    %833 = vector.shape_cast %832 : vector<2x8xf32> to vector<2x8x1xf32>
    %834 = tpu.reciprocal %833 {approx = true} : vector<2x8x1xf32> -> vector<2x8x1xf32>
    %835 = vector.broadcast %834 : vector<2x8x1xf32> to vector<2x8x8xf32>
    %836 = arith.mulf %831, %835 : vector<2x8x8xf32>
    %cst_390 = arith.constant dense<0.000000e+00> : vector<2x8x32xf32>
    %837 = tpu.matmul %836, %823, %cst_390 {dimension_numbers = #tpu.dot_dimension_numbers<[2], [1], [1], [2], [0, 0, 0, 1, 1, 2], [0], [0]>} : vector<2x8x8xf32>, vector<2x8x32xf32>, vector<2x8x32xf32> -> vector<2x8x32xf32>
    %838 = vector.shape_cast %837 : vector<2x8x32xf32> to vector<16x32xf32>
    %c4_391 = arith.constant 4 : index
    %c0_392 = arith.constant 0 : index
    %c0_393 = arith.constant 0 : index
    %839 = vector.load %arg16[%c4_391, %c0_392, %c0_393] : memref<6x32x32xf32, #tpu.memory_space<vmem>>, vector<1x32x32xf32>
    %840 = vector.shape_cast %839 : vector<1x32x32xf32> to vector<32x32xf32>
    %c4_394 = arith.constant 4 : index
    %c0_395 = arith.constant 0 : index
    %c0_396 = arith.constant 0 : index
    %841 = vector.load %arg17[%c4_394, %c0_395, %c0_396] : memref<6x1x32xf32, #tpu.memory_space<vmem>>, vector<1x1x32xf32>
    %842 = vector.shape_cast %841 : vector<1x1x32xf32> to vector<1x32xf32>
    %cst_397 = arith.constant dense<0.000000e+00> : vector<16x32xf32>
    %843 = tpu.matmul %838, %840, %cst_397 {dimension_numbers = #tpu.dot_dimension_numbers<[1], [0], [0], [1], [0, 0, 1, 1], [], []>} : vector<16x32xf32>, vector<32x32xf32>, vector<16x32xf32> -> vector<16x32xf32>
    %844 = vector.broadcast %842 : vector<1x32xf32> to vector<16x32xf32>
    %845 = arith.addf %843, %844 : vector<16x32xf32>
    %846 = arith.addf %806, %845 : vector<16x32xf32>
    %847 = vector.extract_strided_slice %808 {offsets = [0, 0], sizes = [1, 32], strides = [1, 1]} : vector<3x32xf32> to vector<1x32xf32>
    %848 = vector.extract_strided_slice %810 {offsets = [0, 0], sizes = [1, 32], strides = [1, 1]} : vector<3x32xf32> to vector<1x32xf32>
    %cst_398 = arith.constant dense<0.000000e+00> : vector<16xf32>
    %849 = vector.multi_reduction <add>, %846, %cst_398 [1] : vector<16x32xf32> to vector<16xf32>
    %850 = vector.shape_cast %849 : vector<16xf32> to vector<16x1xf32>
    %cst_399 = arith.constant 3.200000e+01 : f32
    %851 = vector.broadcast %cst_399 : f32 to vector<16x1xf32>
    %852 = arith.divf %850, %851 : vector<16x1xf32>
    %853 = vector.broadcast %852 : vector<16x1xf32> to vector<16x32xf32>
    %854 = arith.subf %846, %853 : vector<16x32xf32>
    %855 = arith.mulf %854, %854 : vector<16x32xf32>
    %cst_400 = arith.constant dense<0.000000e+00> : vector<16xf32>
    %856 = vector.multi_reduction <add>, %855, %cst_400 [1] : vector<16x32xf32> to vector<16xf32>
    %857 = vector.shape_cast %856 : vector<16xf32> to vector<16x1xf32>
    %cst_401 = arith.constant 3.200000e+01 : f32
    %858 = vector.broadcast %cst_401 : f32 to vector<16x1xf32>
    %859 = arith.divf %857, %858 : vector<16x1xf32>
    %860 = vector.broadcast %852 : vector<16x1xf32> to vector<16x32xf32>
    %861 = arith.subf %846, %860 : vector<16x32xf32>
    %cst_402 = arith.constant 9.99999974E-6 : f32
    %862 = vector.broadcast %cst_402 : f32 to vector<16x1xf32>
    %863 = arith.addf %859, %862 : vector<16x1xf32>
    %864 = math.rsqrt %863 : vector<16x1xf32>
    %865 = vector.broadcast %864 : vector<16x1xf32> to vector<16x32xf32>
    %866 = arith.mulf %861, %865 : vector<16x32xf32>
    %867 = vector.broadcast %847 : vector<1x32xf32> to vector<16x32xf32>
    %868 = arith.mulf %866, %867 : vector<16x32xf32>
    %869 = vector.broadcast %848 : vector<1x32xf32> to vector<16x32xf32>
    %870 = arith.addf %868, %869 : vector<16x32xf32>
    %c4_403 = arith.constant 4 : index
    %c0_404 = arith.constant 0 : index
    %c0_405 = arith.constant 0 : index
    %871 = vector.load %arg18[%c4_403, %c0_404, %c0_405] : memref<6x32x32xf32, #tpu.memory_space<vmem>>, vector<1x32x32xf32>
    %872 = vector.shape_cast %871 : vector<1x32x32xf32> to vector<32x32xf32>
    %c4_406 = arith.constant 4 : index
    %c0_407 = arith.constant 0 : index
    %c0_408 = arith.constant 0 : index
    %873 = vector.load %arg19[%c4_406, %c0_407, %c0_408] : memref<6x1x32xf32, #tpu.memory_space<vmem>>, vector<1x1x32xf32>
    %874 = vector.shape_cast %873 : vector<1x1x32xf32> to vector<1x32xf32>
    %cst_409 = arith.constant dense<0.000000e+00> : vector<16x32xf32>
    %875 = tpu.matmul %870, %872, %cst_409 {dimension_numbers = #tpu.dot_dimension_numbers<[1], [0], [0], [1], [0, 0, 1, 1], [], []>} : vector<16x32xf32>, vector<32x32xf32>, vector<16x32xf32> -> vector<16x32xf32>
    %876 = vector.broadcast %874 : vector<1x32xf32> to vector<16x32xf32>
    %877 = arith.addf %875, %876 : vector<16x32xf32>
    %878 = vector.shape_cast %877 : vector<16x32xf32> to vector<2x8x32xf32>
    %c4_410 = arith.constant 4 : index
    %c0_411 = arith.constant 0 : index
    %c0_412 = arith.constant 0 : index
    %879 = vector.load %arg20[%c4_410, %c0_411, %c0_412] : memref<6x32x64xf32, #tpu.memory_space<vmem>>, vector<1x32x64xf32>
    %880 = vector.shape_cast %879 : vector<1x32x64xf32> to vector<32x64xf32>
    %c4_413 = arith.constant 4 : index
    %c0_414 = arith.constant 0 : index
    %c0_415 = arith.constant 0 : index
    %881 = vector.load %arg21[%c4_413, %c0_414, %c0_415] : memref<6x1x64xf32, #tpu.memory_space<vmem>>, vector<1x1x64xf32>
    %882 = vector.shape_cast %881 : vector<1x1x64xf32> to vector<1x64xf32>
    %cst_416 = arith.constant dense<0.000000e+00> : vector<16x64xf32>
    %883 = tpu.matmul %120, %880, %cst_416 {dimension_numbers = #tpu.dot_dimension_numbers<[1], [0], [0], [1], [0, 0, 1, 1], [], []>} : vector<16x32xf32>, vector<32x64xf32>, vector<16x64xf32> -> vector<16x64xf32>
    %884 = vector.broadcast %882 : vector<1x64xf32> to vector<16x64xf32>
    %885 = arith.addf %883, %884 : vector<16x64xf32>
    %886 = vector.extract_strided_slice %885 {offsets = [0, 0], sizes = [16, 32], strides = [1, 1]} : vector<16x64xf32> to vector<16x32xf32>
    %887 = vector.shape_cast %886 : vector<16x32xf32> to vector<2x8x32xf32>
    %888 = vector.extract_strided_slice %885 {offsets = [0, 32], sizes = [16, 32], strides = [1, 1]} : vector<16x64xf32> to vector<16x32xf32>
    %889 = vector.shape_cast %888 : vector<16x32xf32> to vector<2x8x32xf32>
    %cst_417 = arith.constant dense<0.000000e+00> : vector<2x8x8xf32>
    %890 = tpu.matmul %878, %887, %cst_417 {dimension_numbers = #tpu.dot_dimension_numbers<[2], [2], [1], [1], [0, 0, 0, 1, 1, 1], [0], [0]>} : vector<2x8x32xf32>, vector<2x8x32xf32>, vector<2x8x8xf32> -> vector<2x8x8xf32>
    %cst_418 = arith.constant 0.176776692 : f32
    %891 = vector.broadcast %cst_418 : f32 to vector<2x8x8xf32>
    %892 = arith.mulf %890, %891 : vector<2x8x8xf32>
    %cst_419 = arith.constant dense<0xFF800000> : vector<2x8xf32>
    %893 = vector.multi_reduction <maximumf>, %892, %cst_419 [2] : vector<2x8x8xf32> to vector<2x8xf32>
    %894 = vector.shape_cast %893 : vector<2x8xf32> to vector<2x8x1xf32>
    %895 = vector.broadcast %894 : vector<2x8x1xf32> to vector<2x8x8xf32>
    %896 = arith.subf %892, %895 : vector<2x8x8xf32>
    %897 = math.exp %896 : vector<2x8x8xf32>
    %cst_420 = arith.constant dense<0.000000e+00> : vector<2x8xf32>
    %898 = vector.multi_reduction <add>, %897, %cst_420 [2] : vector<2x8x8xf32> to vector<2x8xf32>
    %899 = vector.shape_cast %898 : vector<2x8xf32> to vector<2x8x1xf32>
    %900 = tpu.reciprocal %899 {approx = true} : vector<2x8x1xf32> -> vector<2x8x1xf32>
    %901 = vector.broadcast %900 : vector<2x8x1xf32> to vector<2x8x8xf32>
    %902 = arith.mulf %897, %901 : vector<2x8x8xf32>
    %cst_421 = arith.constant dense<0.000000e+00> : vector<2x8x32xf32>
    %903 = tpu.matmul %902, %889, %cst_421 {dimension_numbers = #tpu.dot_dimension_numbers<[2], [1], [1], [2], [0, 0, 0, 1, 1, 2], [0], [0]>} : vector<2x8x8xf32>, vector<2x8x32xf32>, vector<2x8x32xf32> -> vector<2x8x32xf32>
    %904 = vector.shape_cast %903 : vector<2x8x32xf32> to vector<16x32xf32>
    %c4_422 = arith.constant 4 : index
    %c0_423 = arith.constant 0 : index
    %c0_424 = arith.constant 0 : index
    %905 = vector.load %arg22[%c4_422, %c0_423, %c0_424] : memref<6x32x32xf32, #tpu.memory_space<vmem>>, vector<1x32x32xf32>
    %906 = vector.shape_cast %905 : vector<1x32x32xf32> to vector<32x32xf32>
    %c4_425 = arith.constant 4 : index
    %c0_426 = arith.constant 0 : index
    %c0_427 = arith.constant 0 : index
    %907 = vector.load %arg23[%c4_425, %c0_426, %c0_427] : memref<6x1x32xf32, #tpu.memory_space<vmem>>, vector<1x1x32xf32>
    %908 = vector.shape_cast %907 : vector<1x1x32xf32> to vector<1x32xf32>
    %cst_428 = arith.constant dense<0.000000e+00> : vector<16x32xf32>
    %909 = tpu.matmul %904, %906, %cst_428 {dimension_numbers = #tpu.dot_dimension_numbers<[1], [0], [0], [1], [0, 0, 1, 1], [], []>} : vector<16x32xf32>, vector<32x32xf32>, vector<16x32xf32> -> vector<16x32xf32>
    %910 = vector.broadcast %908 : vector<1x32xf32> to vector<16x32xf32>
    %911 = arith.addf %909, %910 : vector<16x32xf32>
    %912 = arith.addf %870, %911 : vector<16x32xf32>
    %913 = vector.extract_strided_slice %808 {offsets = [1, 0], sizes = [1, 32], strides = [1, 1]} : vector<3x32xf32> to vector<1x32xf32>
    %914 = vector.extract_strided_slice %810 {offsets = [1, 0], sizes = [1, 32], strides = [1, 1]} : vector<3x32xf32> to vector<1x32xf32>
    %cst_429 = arith.constant dense<0.000000e+00> : vector<16xf32>
    %915 = vector.multi_reduction <add>, %912, %cst_429 [1] : vector<16x32xf32> to vector<16xf32>
    %916 = vector.shape_cast %915 : vector<16xf32> to vector<16x1xf32>
    %cst_430 = arith.constant 3.200000e+01 : f32
    %917 = vector.broadcast %cst_430 : f32 to vector<16x1xf32>
    %918 = arith.divf %916, %917 : vector<16x1xf32>
    %919 = vector.broadcast %918 : vector<16x1xf32> to vector<16x32xf32>
    %920 = arith.subf %912, %919 : vector<16x32xf32>
    %921 = arith.mulf %920, %920 : vector<16x32xf32>
    %cst_431 = arith.constant dense<0.000000e+00> : vector<16xf32>
    %922 = vector.multi_reduction <add>, %921, %cst_431 [1] : vector<16x32xf32> to vector<16xf32>
    %923 = vector.shape_cast %922 : vector<16xf32> to vector<16x1xf32>
    %cst_432 = arith.constant 3.200000e+01 : f32
    %924 = vector.broadcast %cst_432 : f32 to vector<16x1xf32>
    %925 = arith.divf %923, %924 : vector<16x1xf32>
    %926 = vector.broadcast %918 : vector<16x1xf32> to vector<16x32xf32>
    %927 = arith.subf %912, %926 : vector<16x32xf32>
    %cst_433 = arith.constant 9.99999974E-6 : f32
    %928 = vector.broadcast %cst_433 : f32 to vector<16x1xf32>
    %929 = arith.addf %925, %928 : vector<16x1xf32>
    %930 = math.rsqrt %929 : vector<16x1xf32>
    %931 = vector.broadcast %930 : vector<16x1xf32> to vector<16x32xf32>
    %932 = arith.mulf %927, %931 : vector<16x32xf32>
    %933 = vector.broadcast %913 : vector<1x32xf32> to vector<16x32xf32>
    %934 = arith.mulf %932, %933 : vector<16x32xf32>
    %935 = vector.broadcast %914 : vector<1x32xf32> to vector<16x32xf32>
    %936 = arith.addf %934, %935 : vector<16x32xf32>
    %c4_434 = arith.constant 4 : index
    %c0_435 = arith.constant 0 : index
    %c0_436 = arith.constant 0 : index
    %937 = vector.load %arg24[%c4_434, %c0_435, %c0_436] : memref<6x32x64xf32, #tpu.memory_space<vmem>>, vector<1x32x64xf32>
    %938 = vector.shape_cast %937 : vector<1x32x64xf32> to vector<32x64xf32>
    %c4_437 = arith.constant 4 : index
    %c0_438 = arith.constant 0 : index
    %c0_439 = arith.constant 0 : index
    %939 = vector.load %arg25[%c4_437, %c0_438, %c0_439] : memref<6x1x64xf32, #tpu.memory_space<vmem>>, vector<1x1x64xf32>
    %940 = vector.shape_cast %939 : vector<1x1x64xf32> to vector<1x64xf32>
    %cst_440 = arith.constant dense<0.000000e+00> : vector<16x64xf32>
    %941 = tpu.matmul %936, %938, %cst_440 {dimension_numbers = #tpu.dot_dimension_numbers<[1], [0], [0], [1], [0, 0, 1, 1], [], []>} : vector<16x32xf32>, vector<32x64xf32>, vector<16x64xf32> -> vector<16x64xf32>
    %942 = vector.broadcast %940 : vector<1x64xf32> to vector<16x64xf32>
    %943 = arith.addf %941, %942 : vector<16x64xf32>
    %cst_441 = arith.constant 0.000000e+00 : f32
    %944 = vector.broadcast %cst_441 : f32 to vector<16x64xf32>
    %945 = arith.maximumf %943, %944 : vector<16x64xf32>
    %c4_442 = arith.constant 4 : index
    %c0_443 = arith.constant 0 : index
    %c0_444 = arith.constant 0 : index
    %946 = vector.load %arg26[%c4_442, %c0_443, %c0_444] : memref<6x64x32xf32, #tpu.memory_space<vmem>>, vector<1x64x32xf32>
    %947 = vector.shape_cast %946 : vector<1x64x32xf32> to vector<64x32xf32>
    %c4_445 = arith.constant 4 : index
    %c0_446 = arith.constant 0 : index
    %c0_447 = arith.constant 0 : index
    %948 = vector.load %arg27[%c4_445, %c0_446, %c0_447] : memref<6x1x32xf32, #tpu.memory_space<vmem>>, vector<1x1x32xf32>
    %949 = vector.shape_cast %948 : vector<1x1x32xf32> to vector<1x32xf32>
    %cst_448 = arith.constant dense<0.000000e+00> : vector<16x32xf32>
    %950 = tpu.matmul %945, %947, %cst_448 {dimension_numbers = #tpu.dot_dimension_numbers<[1], [0], [0], [1], [0, 0, 1, 1], [], []>} : vector<16x64xf32>, vector<64x32xf32>, vector<16x32xf32> -> vector<16x32xf32>
    %951 = vector.broadcast %949 : vector<1x32xf32> to vector<16x32xf32>
    %952 = arith.addf %950, %951 : vector<16x32xf32>
    %953 = arith.addf %936, %952 : vector<16x32xf32>
    %954 = vector.extract_strided_slice %808 {offsets = [2, 0], sizes = [1, 32], strides = [1, 1]} : vector<3x32xf32> to vector<1x32xf32>
    %955 = vector.extract_strided_slice %810 {offsets = [2, 0], sizes = [1, 32], strides = [1, 1]} : vector<3x32xf32> to vector<1x32xf32>
    %cst_449 = arith.constant dense<0.000000e+00> : vector<16xf32>
    %956 = vector.multi_reduction <add>, %953, %cst_449 [1] : vector<16x32xf32> to vector<16xf32>
    %957 = vector.shape_cast %956 : vector<16xf32> to vector<16x1xf32>
    %cst_450 = arith.constant 3.200000e+01 : f32
    %958 = vector.broadcast %cst_450 : f32 to vector<16x1xf32>
    %959 = arith.divf %957, %958 : vector<16x1xf32>
    %960 = vector.broadcast %959 : vector<16x1xf32> to vector<16x32xf32>
    %961 = arith.subf %953, %960 : vector<16x32xf32>
    %962 = arith.mulf %961, %961 : vector<16x32xf32>
    %cst_451 = arith.constant dense<0.000000e+00> : vector<16xf32>
    %963 = vector.multi_reduction <add>, %962, %cst_451 [1] : vector<16x32xf32> to vector<16xf32>
    %964 = vector.shape_cast %963 : vector<16xf32> to vector<16x1xf32>
    %cst_452 = arith.constant 3.200000e+01 : f32
    %965 = vector.broadcast %cst_452 : f32 to vector<16x1xf32>
    %966 = arith.divf %964, %965 : vector<16x1xf32>
    %967 = vector.broadcast %959 : vector<16x1xf32> to vector<16x32xf32>
    %968 = arith.subf %953, %967 : vector<16x32xf32>
    %cst_453 = arith.constant 9.99999974E-6 : f32
    %969 = vector.broadcast %cst_453 : f32 to vector<16x1xf32>
    %970 = arith.addf %966, %969 : vector<16x1xf32>
    %971 = math.rsqrt %970 : vector<16x1xf32>
    %972 = vector.broadcast %971 : vector<16x1xf32> to vector<16x32xf32>
    %973 = arith.mulf %968, %972 : vector<16x32xf32>
    %974 = vector.broadcast %954 : vector<1x32xf32> to vector<16x32xf32>
    %975 = arith.mulf %973, %974 : vector<16x32xf32>
    %976 = vector.broadcast %955 : vector<1x32xf32> to vector<16x32xf32>
    %977 = arith.addf %975, %976 : vector<16x32xf32>
    %c5 = arith.constant 5 : index
    %c0_454 = arith.constant 0 : index
    %c0_455 = arith.constant 0 : index
    %978 = vector.load %arg28[%c5, %c0_454, %c0_455] : memref<6x3x32xf32, #tpu.memory_space<vmem>>, vector<1x3x32xf32>
    %979 = vector.shape_cast %978 : vector<1x3x32xf32> to vector<3x32xf32>
    %c5_456 = arith.constant 5 : index
    %c0_457 = arith.constant 0 : index
    %c0_458 = arith.constant 0 : index
    %980 = vector.load %arg29[%c5_456, %c0_457, %c0_458] : memref<6x3x32xf32, #tpu.memory_space<vmem>>, vector<1x3x32xf32>
    %981 = vector.shape_cast %980 : vector<1x3x32xf32> to vector<3x32xf32>
    %c5_459 = arith.constant 5 : index
    %c0_460 = arith.constant 0 : index
    %c0_461 = arith.constant 0 : index
    %982 = vector.load %arg14[%c5_459, %c0_460, %c0_461] : memref<6x32x96xf32, #tpu.memory_space<vmem>>, vector<1x32x96xf32>
    %983 = vector.shape_cast %982 : vector<1x32x96xf32> to vector<32x96xf32>
    %c5_462 = arith.constant 5 : index
    %c0_463 = arith.constant 0 : index
    %c0_464 = arith.constant 0 : index
    %984 = vector.load %arg15[%c5_462, %c0_463, %c0_464] : memref<6x1x96xf32, #tpu.memory_space<vmem>>, vector<1x1x96xf32>
    %985 = vector.shape_cast %984 : vector<1x1x96xf32> to vector<1x96xf32>
    %cst_465 = arith.constant dense<0.000000e+00> : vector<16x96xf32>
    %986 = tpu.matmul %977, %983, %cst_465 {dimension_numbers = #tpu.dot_dimension_numbers<[1], [0], [0], [1], [0, 0, 1, 1], [], []>} : vector<16x32xf32>, vector<32x96xf32>, vector<16x96xf32> -> vector<16x96xf32>
    %987 = vector.broadcast %985 : vector<1x96xf32> to vector<16x96xf32>
    %988 = arith.addf %986, %987 : vector<16x96xf32>
    %989 = vector.extract_strided_slice %988 {offsets = [0, 0], sizes = [16, 32], strides = [1, 1]} : vector<16x96xf32> to vector<16x32xf32>
    %990 = vector.shape_cast %989 : vector<16x32xf32> to vector<2x8x32xf32>
    %991 = vector.extract_strided_slice %988 {offsets = [0, 32], sizes = [16, 32], strides = [1, 1]} : vector<16x96xf32> to vector<16x32xf32>
    %992 = vector.shape_cast %991 : vector<16x32xf32> to vector<2x8x32xf32>
    %993 = vector.extract_strided_slice %988 {offsets = [0, 64], sizes = [16, 32], strides = [1, 1]} : vector<16x96xf32> to vector<16x32xf32>
    %994 = vector.shape_cast %993 : vector<16x32xf32> to vector<2x8x32xf32>
    %cst_466 = arith.constant dense<0.000000e+00> : vector<2x8x8xf32>
    %995 = tpu.matmul %990, %992, %cst_466 {dimension_numbers = #tpu.dot_dimension_numbers<[2], [2], [1], [1], [0, 0, 0, 1, 1, 1], [0], [0]>} : vector<2x8x32xf32>, vector<2x8x32xf32>, vector<2x8x8xf32> -> vector<2x8x8xf32>
    %cst_467 = arith.constant 0.176776692 : f32
    %996 = vector.broadcast %cst_467 : f32 to vector<2x8x8xf32>
    %997 = arith.mulf %995, %996 : vector<2x8x8xf32>
    %cst_468 = arith.constant dense<0xFF800000> : vector<2x8xf32>
    %998 = vector.multi_reduction <maximumf>, %997, %cst_468 [2] : vector<2x8x8xf32> to vector<2x8xf32>
    %999 = vector.shape_cast %998 : vector<2x8xf32> to vector<2x8x1xf32>
    %1000 = vector.broadcast %999 : vector<2x8x1xf32> to vector<2x8x8xf32>
    %1001 = arith.subf %997, %1000 : vector<2x8x8xf32>
    %1002 = math.exp %1001 : vector<2x8x8xf32>
    %cst_469 = arith.constant dense<0.000000e+00> : vector<2x8xf32>
    %1003 = vector.multi_reduction <add>, %1002, %cst_469 [2] : vector<2x8x8xf32> to vector<2x8xf32>
    %1004 = vector.shape_cast %1003 : vector<2x8xf32> to vector<2x8x1xf32>
    %1005 = tpu.reciprocal %1004 {approx = true} : vector<2x8x1xf32> -> vector<2x8x1xf32>
    %1006 = vector.broadcast %1005 : vector<2x8x1xf32> to vector<2x8x8xf32>
    %1007 = arith.mulf %1002, %1006 : vector<2x8x8xf32>
    %cst_470 = arith.constant dense<0.000000e+00> : vector<2x8x32xf32>
    %1008 = tpu.matmul %1007, %994, %cst_470 {dimension_numbers = #tpu.dot_dimension_numbers<[2], [1], [1], [2], [0, 0, 0, 1, 1, 2], [0], [0]>} : vector<2x8x8xf32>, vector<2x8x32xf32>, vector<2x8x32xf32> -> vector<2x8x32xf32>
    %1009 = vector.shape_cast %1008 : vector<2x8x32xf32> to vector<16x32xf32>
    %c5_471 = arith.constant 5 : index
    %c0_472 = arith.constant 0 : index
    %c0_473 = arith.constant 0 : index
    %1010 = vector.load %arg16[%c5_471, %c0_472, %c0_473] : memref<6x32x32xf32, #tpu.memory_space<vmem>>, vector<1x32x32xf32>
    %1011 = vector.shape_cast %1010 : vector<1x32x32xf32> to vector<32x32xf32>
    %c5_474 = arith.constant 5 : index
    %c0_475 = arith.constant 0 : index
    %c0_476 = arith.constant 0 : index
    %1012 = vector.load %arg17[%c5_474, %c0_475, %c0_476] : memref<6x1x32xf32, #tpu.memory_space<vmem>>, vector<1x1x32xf32>
    %1013 = vector.shape_cast %1012 : vector<1x1x32xf32> to vector<1x32xf32>
    %cst_477 = arith.constant dense<0.000000e+00> : vector<16x32xf32>
    %1014 = tpu.matmul %1009, %1011, %cst_477 {dimension_numbers = #tpu.dot_dimension_numbers<[1], [0], [0], [1], [0, 0, 1, 1], [], []>} : vector<16x32xf32>, vector<32x32xf32>, vector<16x32xf32> -> vector<16x32xf32>
    %1015 = vector.broadcast %1013 : vector<1x32xf32> to vector<16x32xf32>
    %1016 = arith.addf %1014, %1015 : vector<16x32xf32>
    %1017 = arith.addf %977, %1016 : vector<16x32xf32>
    %1018 = vector.extract_strided_slice %979 {offsets = [0, 0], sizes = [1, 32], strides = [1, 1]} : vector<3x32xf32> to vector<1x32xf32>
    %1019 = vector.extract_strided_slice %981 {offsets = [0, 0], sizes = [1, 32], strides = [1, 1]} : vector<3x32xf32> to vector<1x32xf32>
    %cst_478 = arith.constant dense<0.000000e+00> : vector<16xf32>
    %1020 = vector.multi_reduction <add>, %1017, %cst_478 [1] : vector<16x32xf32> to vector<16xf32>
    %1021 = vector.shape_cast %1020 : vector<16xf32> to vector<16x1xf32>
    %cst_479 = arith.constant 3.200000e+01 : f32
    %1022 = vector.broadcast %cst_479 : f32 to vector<16x1xf32>
    %1023 = arith.divf %1021, %1022 : vector<16x1xf32>
    %1024 = vector.broadcast %1023 : vector<16x1xf32> to vector<16x32xf32>
    %1025 = arith.subf %1017, %1024 : vector<16x32xf32>
    %1026 = arith.mulf %1025, %1025 : vector<16x32xf32>
    %cst_480 = arith.constant dense<0.000000e+00> : vector<16xf32>
    %1027 = vector.multi_reduction <add>, %1026, %cst_480 [1] : vector<16x32xf32> to vector<16xf32>
    %1028 = vector.shape_cast %1027 : vector<16xf32> to vector<16x1xf32>
    %cst_481 = arith.constant 3.200000e+01 : f32
    %1029 = vector.broadcast %cst_481 : f32 to vector<16x1xf32>
    %1030 = arith.divf %1028, %1029 : vector<16x1xf32>
    %1031 = vector.broadcast %1023 : vector<16x1xf32> to vector<16x32xf32>
    %1032 = arith.subf %1017, %1031 : vector<16x32xf32>
    %cst_482 = arith.constant 9.99999974E-6 : f32
    %1033 = vector.broadcast %cst_482 : f32 to vector<16x1xf32>
    %1034 = arith.addf %1030, %1033 : vector<16x1xf32>
    %1035 = math.rsqrt %1034 : vector<16x1xf32>
    %1036 = vector.broadcast %1035 : vector<16x1xf32> to vector<16x32xf32>
    %1037 = arith.mulf %1032, %1036 : vector<16x32xf32>
    %1038 = vector.broadcast %1018 : vector<1x32xf32> to vector<16x32xf32>
    %1039 = arith.mulf %1037, %1038 : vector<16x32xf32>
    %1040 = vector.broadcast %1019 : vector<1x32xf32> to vector<16x32xf32>
    %1041 = arith.addf %1039, %1040 : vector<16x32xf32>
    %c5_483 = arith.constant 5 : index
    %c0_484 = arith.constant 0 : index
    %c0_485 = arith.constant 0 : index
    %1042 = vector.load %arg18[%c5_483, %c0_484, %c0_485] : memref<6x32x32xf32, #tpu.memory_space<vmem>>, vector<1x32x32xf32>
    %1043 = vector.shape_cast %1042 : vector<1x32x32xf32> to vector<32x32xf32>
    %c5_486 = arith.constant 5 : index
    %c0_487 = arith.constant 0 : index
    %c0_488 = arith.constant 0 : index
    %1044 = vector.load %arg19[%c5_486, %c0_487, %c0_488] : memref<6x1x32xf32, #tpu.memory_space<vmem>>, vector<1x1x32xf32>
    %1045 = vector.shape_cast %1044 : vector<1x1x32xf32> to vector<1x32xf32>
    %cst_489 = arith.constant dense<0.000000e+00> : vector<16x32xf32>
    %1046 = tpu.matmul %1041, %1043, %cst_489 {dimension_numbers = #tpu.dot_dimension_numbers<[1], [0], [0], [1], [0, 0, 1, 1], [], []>} : vector<16x32xf32>, vector<32x32xf32>, vector<16x32xf32> -> vector<16x32xf32>
    %1047 = vector.broadcast %1045 : vector<1x32xf32> to vector<16x32xf32>
    %1048 = arith.addf %1046, %1047 : vector<16x32xf32>
    %1049 = vector.shape_cast %1048 : vector<16x32xf32> to vector<2x8x32xf32>
    %c5_490 = arith.constant 5 : index
    %c0_491 = arith.constant 0 : index
    %c0_492 = arith.constant 0 : index
    %1050 = vector.load %arg20[%c5_490, %c0_491, %c0_492] : memref<6x32x64xf32, #tpu.memory_space<vmem>>, vector<1x32x64xf32>
    %1051 = vector.shape_cast %1050 : vector<1x32x64xf32> to vector<32x64xf32>
    %c5_493 = arith.constant 5 : index
    %c0_494 = arith.constant 0 : index
    %c0_495 = arith.constant 0 : index
    %1052 = vector.load %arg21[%c5_493, %c0_494, %c0_495] : memref<6x1x64xf32, #tpu.memory_space<vmem>>, vector<1x1x64xf32>
    %1053 = vector.shape_cast %1052 : vector<1x1x64xf32> to vector<1x64xf32>
    %cst_496 = arith.constant dense<0.000000e+00> : vector<16x64xf32>
    %1054 = tpu.matmul %120, %1051, %cst_496 {dimension_numbers = #tpu.dot_dimension_numbers<[1], [0], [0], [1], [0, 0, 1, 1], [], []>} : vector<16x32xf32>, vector<32x64xf32>, vector<16x64xf32> -> vector<16x64xf32>
    %1055 = vector.broadcast %1053 : vector<1x64xf32> to vector<16x64xf32>
    %1056 = arith.addf %1054, %1055 : vector<16x64xf32>
    %1057 = vector.extract_strided_slice %1056 {offsets = [0, 0], sizes = [16, 32], strides = [1, 1]} : vector<16x64xf32> to vector<16x32xf32>
    %1058 = vector.shape_cast %1057 : vector<16x32xf32> to vector<2x8x32xf32>
    %1059 = vector.extract_strided_slice %1056 {offsets = [0, 32], sizes = [16, 32], strides = [1, 1]} : vector<16x64xf32> to vector<16x32xf32>
    %1060 = vector.shape_cast %1059 : vector<16x32xf32> to vector<2x8x32xf32>
    %cst_497 = arith.constant dense<0.000000e+00> : vector<2x8x8xf32>
    %1061 = tpu.matmul %1049, %1058, %cst_497 {dimension_numbers = #tpu.dot_dimension_numbers<[2], [2], [1], [1], [0, 0, 0, 1, 1, 1], [0], [0]>} : vector<2x8x32xf32>, vector<2x8x32xf32>, vector<2x8x8xf32> -> vector<2x8x8xf32>
    %cst_498 = arith.constant 0.176776692 : f32
    %1062 = vector.broadcast %cst_498 : f32 to vector<2x8x8xf32>
    %1063 = arith.mulf %1061, %1062 : vector<2x8x8xf32>
    %cst_499 = arith.constant dense<0xFF800000> : vector<2x8xf32>
    %1064 = vector.multi_reduction <maximumf>, %1063, %cst_499 [2] : vector<2x8x8xf32> to vector<2x8xf32>
    %1065 = vector.shape_cast %1064 : vector<2x8xf32> to vector<2x8x1xf32>
    %1066 = vector.broadcast %1065 : vector<2x8x1xf32> to vector<2x8x8xf32>
    %1067 = arith.subf %1063, %1066 : vector<2x8x8xf32>
    %1068 = math.exp %1067 : vector<2x8x8xf32>
    %cst_500 = arith.constant dense<0.000000e+00> : vector<2x8xf32>
    %1069 = vector.multi_reduction <add>, %1068, %cst_500 [2] : vector<2x8x8xf32> to vector<2x8xf32>
    %1070 = vector.shape_cast %1069 : vector<2x8xf32> to vector<2x8x1xf32>
    %1071 = tpu.reciprocal %1070 {approx = true} : vector<2x8x1xf32> -> vector<2x8x1xf32>
    %1072 = vector.broadcast %1071 : vector<2x8x1xf32> to vector<2x8x8xf32>
    %1073 = arith.mulf %1068, %1072 : vector<2x8x8xf32>
    %cst_501 = arith.constant dense<0.000000e+00> : vector<2x8x32xf32>
    %1074 = tpu.matmul %1073, %1060, %cst_501 {dimension_numbers = #tpu.dot_dimension_numbers<[2], [1], [1], [2], [0, 0, 0, 1, 1, 2], [0], [0]>} : vector<2x8x8xf32>, vector<2x8x32xf32>, vector<2x8x32xf32> -> vector<2x8x32xf32>
    %1075 = vector.shape_cast %1074 : vector<2x8x32xf32> to vector<16x32xf32>
    %c5_502 = arith.constant 5 : index
    %c0_503 = arith.constant 0 : index
    %c0_504 = arith.constant 0 : index
    %1076 = vector.load %arg22[%c5_502, %c0_503, %c0_504] : memref<6x32x32xf32, #tpu.memory_space<vmem>>, vector<1x32x32xf32>
    %1077 = vector.shape_cast %1076 : vector<1x32x32xf32> to vector<32x32xf32>
    %c5_505 = arith.constant 5 : index
    %c0_506 = arith.constant 0 : index
    %c0_507 = arith.constant 0 : index
    %1078 = vector.load %arg23[%c5_505, %c0_506, %c0_507] : memref<6x1x32xf32, #tpu.memory_space<vmem>>, vector<1x1x32xf32>
    %1079 = vector.shape_cast %1078 : vector<1x1x32xf32> to vector<1x32xf32>
    %cst_508 = arith.constant dense<0.000000e+00> : vector<16x32xf32>
    %1080 = tpu.matmul %1075, %1077, %cst_508 {dimension_numbers = #tpu.dot_dimension_numbers<[1], [0], [0], [1], [0, 0, 1, 1], [], []>} : vector<16x32xf32>, vector<32x32xf32>, vector<16x32xf32> -> vector<16x32xf32>
    %1081 = vector.broadcast %1079 : vector<1x32xf32> to vector<16x32xf32>
    %1082 = arith.addf %1080, %1081 : vector<16x32xf32>
    %1083 = arith.addf %1041, %1082 : vector<16x32xf32>
    %1084 = vector.extract_strided_slice %979 {offsets = [1, 0], sizes = [1, 32], strides = [1, 1]} : vector<3x32xf32> to vector<1x32xf32>
    %1085 = vector.extract_strided_slice %981 {offsets = [1, 0], sizes = [1, 32], strides = [1, 1]} : vector<3x32xf32> to vector<1x32xf32>
    %cst_509 = arith.constant dense<0.000000e+00> : vector<16xf32>
    %1086 = vector.multi_reduction <add>, %1083, %cst_509 [1] : vector<16x32xf32> to vector<16xf32>
    %1087 = vector.shape_cast %1086 : vector<16xf32> to vector<16x1xf32>
    %cst_510 = arith.constant 3.200000e+01 : f32
    %1088 = vector.broadcast %cst_510 : f32 to vector<16x1xf32>
    %1089 = arith.divf %1087, %1088 : vector<16x1xf32>
    %1090 = vector.broadcast %1089 : vector<16x1xf32> to vector<16x32xf32>
    %1091 = arith.subf %1083, %1090 : vector<16x32xf32>
    %1092 = arith.mulf %1091, %1091 : vector<16x32xf32>
    %cst_511 = arith.constant dense<0.000000e+00> : vector<16xf32>
    %1093 = vector.multi_reduction <add>, %1092, %cst_511 [1] : vector<16x32xf32> to vector<16xf32>
    %1094 = vector.shape_cast %1093 : vector<16xf32> to vector<16x1xf32>
    %cst_512 = arith.constant 3.200000e+01 : f32
    %1095 = vector.broadcast %cst_512 : f32 to vector<16x1xf32>
    %1096 = arith.divf %1094, %1095 : vector<16x1xf32>
    %1097 = vector.broadcast %1089 : vector<16x1xf32> to vector<16x32xf32>
    %1098 = arith.subf %1083, %1097 : vector<16x32xf32>
    %cst_513 = arith.constant 9.99999974E-6 : f32
    %1099 = vector.broadcast %cst_513 : f32 to vector<16x1xf32>
    %1100 = arith.addf %1096, %1099 : vector<16x1xf32>
    %1101 = math.rsqrt %1100 : vector<16x1xf32>
    %1102 = vector.broadcast %1101 : vector<16x1xf32> to vector<16x32xf32>
    %1103 = arith.mulf %1098, %1102 : vector<16x32xf32>
    %1104 = vector.broadcast %1084 : vector<1x32xf32> to vector<16x32xf32>
    %1105 = arith.mulf %1103, %1104 : vector<16x32xf32>
    %1106 = vector.broadcast %1085 : vector<1x32xf32> to vector<16x32xf32>
    %1107 = arith.addf %1105, %1106 : vector<16x32xf32>
    %c5_514 = arith.constant 5 : index
    %c0_515 = arith.constant 0 : index
    %c0_516 = arith.constant 0 : index
    %1108 = vector.load %arg24[%c5_514, %c0_515, %c0_516] : memref<6x32x64xf32, #tpu.memory_space<vmem>>, vector<1x32x64xf32>
    %1109 = vector.shape_cast %1108 : vector<1x32x64xf32> to vector<32x64xf32>
    %c5_517 = arith.constant 5 : index
    %c0_518 = arith.constant 0 : index
    %c0_519 = arith.constant 0 : index
    %1110 = vector.load %arg25[%c5_517, %c0_518, %c0_519] : memref<6x1x64xf32, #tpu.memory_space<vmem>>, vector<1x1x64xf32>
    %1111 = vector.shape_cast %1110 : vector<1x1x64xf32> to vector<1x64xf32>
    %cst_520 = arith.constant dense<0.000000e+00> : vector<16x64xf32>
    %1112 = tpu.matmul %1107, %1109, %cst_520 {dimension_numbers = #tpu.dot_dimension_numbers<[1], [0], [0], [1], [0, 0, 1, 1], [], []>} : vector<16x32xf32>, vector<32x64xf32>, vector<16x64xf32> -> vector<16x64xf32>
    %1113 = vector.broadcast %1111 : vector<1x64xf32> to vector<16x64xf32>
    %1114 = arith.addf %1112, %1113 : vector<16x64xf32>
    %cst_521 = arith.constant 0.000000e+00 : f32
    %1115 = vector.broadcast %cst_521 : f32 to vector<16x64xf32>
    %1116 = arith.maximumf %1114, %1115 : vector<16x64xf32>
    %c5_522 = arith.constant 5 : index
    %c0_523 = arith.constant 0 : index
    %c0_524 = arith.constant 0 : index
    %1117 = vector.load %arg26[%c5_522, %c0_523, %c0_524] : memref<6x64x32xf32, #tpu.memory_space<vmem>>, vector<1x64x32xf32>
    %1118 = vector.shape_cast %1117 : vector<1x64x32xf32> to vector<64x32xf32>
    %c5_525 = arith.constant 5 : index
    %c0_526 = arith.constant 0 : index
    %c0_527 = arith.constant 0 : index
    %1119 = vector.load %arg27[%c5_525, %c0_526, %c0_527] : memref<6x1x32xf32, #tpu.memory_space<vmem>>, vector<1x1x32xf32>
    %1120 = vector.shape_cast %1119 : vector<1x1x32xf32> to vector<1x32xf32>
    %cst_528 = arith.constant dense<0.000000e+00> : vector<16x32xf32>
    %1121 = tpu.matmul %1116, %1118, %cst_528 {dimension_numbers = #tpu.dot_dimension_numbers<[1], [0], [0], [1], [0, 0, 1, 1], [], []>} : vector<16x64xf32>, vector<64x32xf32>, vector<16x32xf32> -> vector<16x32xf32>
    %1122 = vector.broadcast %1120 : vector<1x32xf32> to vector<16x32xf32>
    %1123 = arith.addf %1121, %1122 : vector<16x32xf32>
    %1124 = arith.addf %1107, %1123 : vector<16x32xf32>
    %1125 = vector.extract_strided_slice %979 {offsets = [2, 0], sizes = [1, 32], strides = [1, 1]} : vector<3x32xf32> to vector<1x32xf32>
    %1126 = vector.extract_strided_slice %981 {offsets = [2, 0], sizes = [1, 32], strides = [1, 1]} : vector<3x32xf32> to vector<1x32xf32>
    %cst_529 = arith.constant dense<0.000000e+00> : vector<16xf32>
    %1127 = vector.multi_reduction <add>, %1124, %cst_529 [1] : vector<16x32xf32> to vector<16xf32>
    %1128 = vector.shape_cast %1127 : vector<16xf32> to vector<16x1xf32>
    %cst_530 = arith.constant 3.200000e+01 : f32
    %1129 = vector.broadcast %cst_530 : f32 to vector<16x1xf32>
    %1130 = arith.divf %1128, %1129 : vector<16x1xf32>
    %1131 = vector.broadcast %1130 : vector<16x1xf32> to vector<16x32xf32>
    %1132 = arith.subf %1124, %1131 : vector<16x32xf32>
    %1133 = arith.mulf %1132, %1132 : vector<16x32xf32>
    %cst_531 = arith.constant dense<0.000000e+00> : vector<16xf32>
    %1134 = vector.multi_reduction <add>, %1133, %cst_531 [1] : vector<16x32xf32> to vector<16xf32>
    %1135 = vector.shape_cast %1134 : vector<16xf32> to vector<16x1xf32>
    %cst_532 = arith.constant 3.200000e+01 : f32
    %1136 = vector.broadcast %cst_532 : f32 to vector<16x1xf32>
    %1137 = arith.divf %1135, %1136 : vector<16x1xf32>
    %1138 = vector.broadcast %1130 : vector<16x1xf32> to vector<16x32xf32>
    %1139 = arith.subf %1124, %1138 : vector<16x32xf32>
    %cst_533 = arith.constant 9.99999974E-6 : f32
    %1140 = vector.broadcast %cst_533 : f32 to vector<16x1xf32>
    %1141 = arith.addf %1137, %1140 : vector<16x1xf32>
    %1142 = math.rsqrt %1141 : vector<16x1xf32>
    %1143 = vector.broadcast %1142 : vector<16x1xf32> to vector<16x32xf32>
    %1144 = arith.mulf %1139, %1143 : vector<16x32xf32>
    %1145 = vector.broadcast %1125 : vector<1x32xf32> to vector<16x32xf32>
    %1146 = arith.mulf %1144, %1145 : vector<16x32xf32>
    %1147 = vector.broadcast %1126 : vector<1x32xf32> to vector<16x32xf32>
    %1148 = arith.addf %1146, %1147 : vector<16x32xf32>
    %c0_534 = arith.constant 0 : index
    %c0_535 = arith.constant 0 : index
    %1149 = vector.load %arg30[%c0_534, %c0_535] : memref<1x32xf32, #tpu.memory_space<vmem>>, vector<1x32xf32>
    %c0_536 = arith.constant 0 : index
    %c0_537 = arith.constant 0 : index
    %1150 = vector.load %arg31[%c0_536, %c0_537] : memref<1x32xf32, #tpu.memory_space<vmem>>, vector<1x32xf32>
    %cst_538 = arith.constant dense<0.000000e+00> : vector<16xf32>
    %1151 = vector.multi_reduction <add>, %1148, %cst_538 [1] : vector<16x32xf32> to vector<16xf32>
    %1152 = vector.shape_cast %1151 : vector<16xf32> to vector<16x1xf32>
    %cst_539 = arith.constant 3.200000e+01 : f32
    %1153 = vector.broadcast %cst_539 : f32 to vector<16x1xf32>
    %1154 = arith.divf %1152, %1153 : vector<16x1xf32>
    %1155 = vector.broadcast %1154 : vector<16x1xf32> to vector<16x32xf32>
    %1156 = arith.subf %1148, %1155 : vector<16x32xf32>
    %1157 = arith.mulf %1156, %1156 : vector<16x32xf32>
    %cst_540 = arith.constant dense<0.000000e+00> : vector<16xf32>
    %1158 = vector.multi_reduction <add>, %1157, %cst_540 [1] : vector<16x32xf32> to vector<16xf32>
    %1159 = vector.shape_cast %1158 : vector<16xf32> to vector<16x1xf32>
    %cst_541 = arith.constant 3.200000e+01 : f32
    %1160 = vector.broadcast %cst_541 : f32 to vector<16x1xf32>
    %1161 = arith.divf %1159, %1160 : vector<16x1xf32>
    %1162 = vector.broadcast %1154 : vector<16x1xf32> to vector<16x32xf32>
    %1163 = arith.subf %1148, %1162 : vector<16x32xf32>
    %cst_542 = arith.constant 9.99999974E-6 : f32
    %1164 = vector.broadcast %cst_542 : f32 to vector<16x1xf32>
    %1165 = arith.addf %1161, %1164 : vector<16x1xf32>
    %1166 = math.rsqrt %1165 : vector<16x1xf32>
    %1167 = vector.broadcast %1166 : vector<16x1xf32> to vector<16x32xf32>
    %1168 = arith.mulf %1163, %1167 : vector<16x32xf32>
    %1169 = vector.broadcast %1149 : vector<1x32xf32> to vector<16x32xf32>
    %1170 = arith.mulf %1168, %1169 : vector<16x32xf32>
    %1171 = vector.broadcast %1150 : vector<1x32xf32> to vector<16x32xf32>
    %1172 = arith.addf %1170, %1171 : vector<16x32xf32>
    %1173 = vector.shape_cast %1172 : vector<16x32xf32> to vector<2x8x32xf32>
    %c0_543 = arith.constant 0 : index
    %c0_544 = arith.constant 0 : index
    %c0_545 = arith.constant 0 : index
    %1174 = vector.load %arg32[%c0_543, %c0_544, %c0_545] : memref<2x8x32xf32, #tpu.memory_space<vmem>>, vector<2x8x32xf32>
    tpu.vector_store %arg32[%c0_543, %c0_544, %c0_545], %1173 {strides = array<i32>} : memref<2x8x32xf32, #tpu.memory_space<vmem>>, vector<2x8x32xf32>,
    return
  }
}

</mosaic_0001>

<bundles_post_ra>
// kernel: transformer_forward.1
= control target key start
LH: loop header
LB: loop body
LE: loop exit
PB: predicated region body
PF: predicated region fallthrough
CT: control target
= control target key end

     0   :  { %s12078_s6 = smov 1   ;;  %s12079_s10 = smov 2   ;;  %s13191_s0 = inlined_call_operand.smem [shape: u32[33], index: -1, kind: input, shape index: {}] }
   0x1   :  { %s12145_s5 = sld [smem:[%s13191_s0]]   ;;  %s12080_s14 = smov 3  }
   0x2   :  { %s12150_s9 = sld [smem:[%s13191_s0 + %s12078_s6]]   ;;  %s12081_s18 = smov 4  }
   0x3   :  { %s12155_s13 = sld [smem:[%s13191_s0 + %s12079_s10]]   ;;  %s12082_s22 = smov 5  }
   0x4   :  { %s12160_s17 = sld [smem:[%s13191_s0 + %s12080_s14]]   ;;  %s12083_s26 = smov 6  }
   0x5   :  { %s12165_s21 = sld [smem:[%s13191_s0 + %s12081_s18]]   ;;  %s12084_s30 = smov 7  }
   0x6   :  { %s12170_s25 = sld [smem:[%s13191_s0 + %s12082_s22]]   ;;  %s12085_s4 = smov 8  }
   0x7   :  { %s12175_s29 = sld [smem:[%s13191_s0 + %s12083_s26]]   ;;  %s12086_s10 = smov 9  }
   0x8   :  { %s12180_s3 = sld [smem:[%s13191_s0 + %s12084_s30]]   ;;  %s12087_s15 = smov 10  }
   0x9   :  { %s12185_s8 = sld [smem:[%s13191_s0 + %s12085_s4]]   ;;  %s12088_s20 = smov 11  }
   0xa   :  { %s12190_s14 = sld [smem:[%s13191_s0 + %s12086_s10]]   ;;  %s12089_s26 = smov 12  }
   0xb   :  { %s12195_s19 = sld [smem:[%s13191_s0 + %s12087_s15]]   ;;  %s12090_s1 = smov 13  }
   0xc   :  { %s12200_s24 = sld [smem:[%s13191_s0 + %s12088_s20]]   ;;  %s12091_s7 = smov 14  }
   0xd   :  { %s12205_s30 = sld [smem:[%s13191_s0 + %s12089_s26]]   ;;  %s12092_s15 = smov 15  }
   0xe   :  { %s12210_s6 = sld [smem:[%s13191_s0 + %s12090_s1]]   ;;  %s12093_s22 = smov 16  }
   0xf   :  { %13198 = sst [smem:[#allocation43_spill]] %s12185_s8  ;;  %s12094_s28 = smov 17  }
  0x10   :  { %13199 = sst [smem:[#allocation44_spill]] %s12190_s14 }
  0x11   :  { %13200 = sst [smem:[#allocation45_spill]] %s12195_s19 }
  0x12   :  { %13201 = sst [smem:[#allocation46_spill]] %s12200_s24 }
  0x13   :  { %13202 = sst [smem:[#allocation47_spill]] %s12205_s30 }
  0x14   :  { %13203 = sst [smem:[#allocation48_spill]] %s12210_s6 }
  0x15   :  { %s12215_s12 = sld [smem:[%s13191_s0 + %s12091_s7]]   ;;  %s12095_s7 = smov 18  }
  0x16   :  { %s12220_s20 = sld [smem:[%s13191_s0 + %s12092_s15]]   ;;  %s12096_s15 = smov 19  }
  0x17   :  { %s12225_s27 = sld [smem:[%s13191_s0 + %s12093_s22]]   ;;  %s12097_s22 = smov 20  }
  0x18   :  { %s12230_s4 = sld [smem:[%s13191_s0 + %s12094_s28]]   ;;  %s12098_s28 = smov 21  }
  0x19   :  { %s12235_s6 = sld [smem:[%s13191_s0 + %s12095_s7]]   ;;  %s12099_s7 = smov 22  }
  0x1a   :  { %s12240_s30 = sld [smem:[%s13191_s0 + %s12096_s15]]   ;;  %s12100_s15 = smov 23  }
  0x1b   :  { %s12245_s14 = sld [smem:[%s13191_s0 + %s12097_s22]]   ;;  %s12101_s22 = smov 24  }
  0x1c   :  { %s12250_s24 = sld [smem:[%s13191_s0 + %s12098_s28]]   ;;  %s12102_s28 = smov 25  }
  0x1d   :  { %s12255_s19 = sld [smem:[%s13191_s0 + %s12099_s7]]   ;;  %s12103_s7 = smov 26  }
  0x1e   :  { %s12260_s8 = sld [smem:[%s13191_s0 + %s12100_s15]]   ;;  %s12104_s15 = smov 27  }
  0x1f   :  { %13204 = sst [smem:[#allocation49_spill]] %s12235_s6 }
  0x20   :  { %s12275_s6 = sld [smem:[%s13191_s0 + %s12103_s7]]   ;;  %s12107_s7 = smov 30  }
  0x21   :  { %13205 = sst [smem:[#allocation50_spill]] %s12245_s14 }
  0x22   :  { %13206 = sst [smem:[#allocation51_spill]] %s12250_s24 }
  0x23   :  { %s12265_s14 = sld [smem:[%s13191_s0 + %s12101_s22]]   ;;  %s12105_s22 = smov 28  }
  0x24   :  { %13207 = sst [smem:[#allocation52_spill]] %s12260_s8 }
  0x25   :  { %s12270_s24 = sld [smem:[%s13191_s0 + %s12102_s28]]   ;;  %s12106_s28 = smov 29  }
  0x26   :  { %13210 = sst [smem:[#allocation55_spill]] %s12275_s6 }
  0x27   :  { %s12280_s8 = sld [smem:[%s13191_s0 + %s12104_s15]]   ;;  %s12108_s15 = smov 31  }
  0x28   :  { %s12295_s6 = sld [smem:[%s13191_s0 + %s12107_s7]]  }
  0x29   :  { %13208 = sst [smem:[#allocation53_spill]] %s12265_s14 }
  0x2a   :  { %s12285_s14 = sld [smem:[%s13191_s0 + %s12105_s22]]   ;;  %s12109_s22 = smov 32  }
  0x2b   :  { %13209 = sst [smem:[#allocation54_spill]] %s12270_s24 }
  0x2c   :  { %s12290_s24 = sld [smem:[%s13191_s0 + %s12106_s28]]  }
  0x2d   :  { %13211 = sst [smem:[#allocation56_spill]] %s12280_s8 }
  0x2e   :  { %s12300_s8 = sld [smem:[%s13191_s0 + %s12108_s15]]  }
  0x30   :  { %13212 = sst [smem:[#allocation57_spill]] %s12285_s14 }
  0x31   :  { %s12305_s14 = sld [smem:[%s13191_s0 + %s12109_s22]]  }
  0x32   :  { %70 = vsyncpa [#allocation3], 0 }
  0x33   :  { %71 = vsyncpa [#allocation6], 0 }
  0x34   :  { %72 = vsyncpa [#allocation9], 0 }
  0x35   :  { %73 = vsyncpa [#allocation12], 0 }
  0x36   :  { %74 = vsyncpa [#allocation15], 0 }
  0x37   :  { %75 = vsyncpa [#allocation18], 0 }
  0x38   :  { %76 = vsyncpa [#allocation21], 0 }
  0x39   :  { %77 = vsyncpa [#allocation24], 0 }
  0x3a   :  { %78 = vsyncpa [#allocation27], 0 }
  0x3b   :  { %79 = vsyncpa [#allocation30], 0 }
  0x3c   :  { %80 = vsyncpa [#allocation4], 0  ;;  %s12110_s28 = smov [#allocation5]   ;;  %s12111_s2 = smov [#allocation8]  }
  0x3d   :  { %s98_s1 = sshll.u32 %s12110_s28, 4  ;;  %s123_s7 = sshll.u32 %s12111_s2, 4  ;;  %s99_s1 = int_to_ptr.vmem [resolvable:$true] %s98_s1  ;;  %s124_s7 = int_to_ptr.vmem [resolvable:$true] %s123_s7 }
  0x3e   :  { %s11684_s10 = scalar_lea.vmem %s99_s1, 256  ;;  %p11689_p1 = scmp.lt.s32.totalorder %s99_s1, %s99_s1 }
  0x3f   :  { %p11685_p0 = scmp.ne.s32.totalorder %s99_s1, %s11684_s10  ;;  %p11690_p2 = scmp.lt.s32.totalorder %s11684_s10, %s11684_s10 }
  0x41   :  { %p11691_p3 = por %p11690_p2, %p11689_p1 }
  0x43   :  { %p11692_p4 = pnand %p11691_p3, %p11685_p0 }
  0x45   :  { %11695 = shalt.err (!%p11692_p4)
}
  0x46   :  { %s12112_s0 = smov 128   ;;  %s12113_s11 = smov 8  }
  0x47   :  { %104 = dma.hbm_to_vmem [thread:$0]  %s12150_s9, 256, %s99_s1, [#allocation6], %s12112_s0, %s12112_s0, %s12113_s11  }
  0x48   :  { %s11704_s15 = scalar_lea.vmem %s124_s7, 16  ;;  %s11708_s16 = scalar_lea.vmem %s124_s7, 32 }
  0x49   :  { %p11705_p5 = scmp.ne.s32.totalorder %s124_s7, %s11704_s15  ;;  %p11709_p6 = scmp.lt.s32.totalorder %s124_s7, %s124_s7 }
  0x4a   :  { %p11710_p7 = scmp.lt.s32.totalorder %s11708_s16, %s11704_s15 }
  0x4c   :  { %p11711_p8 = por %p11710_p7, %p11709_p6 }
  0x4e   :  { %p11712_p9 = pnand %p11711_p8, %p11705_p5 }
  0x50   :  { %11715 = shalt.err (!%p11712_p9)
}
  0x51   :  { %126 = dma.hbm_to_vmem [thread:$0]  %s12160_s17, 16, %s124_s7, [#allocation9]  }
  0x52   :  { %s12114_s18 = smov [#allocation11]   ;;  %s12115_s23 = smov [#allocation14]  }
  0x53   :  { %s145_s22 = sshll.u32 %s12114_s18, 4  ;;  %s167_s26 = sshll.u32 %s12115_s23, 4  ;;  %s146_s22 = int_to_ptr.vmem [resolvable:$true] %s145_s22  ;;  %s168_s26 = int_to_ptr.vmem [resolvable:$true] %s167_s26 }
  0x54   :  { %s11724_s28 = scalar_lea.vmem %s146_s22, 16  ;;  %s11728_s2 = scalar_lea.vmem %s146_s22, 32 }
  0x55   :  { %p11725_p10 = scmp.ne.s32.totalorder %s146_s22, %s11724_s28  ;;  %p11729_p11 = scmp.lt.s32.totalorder %s146_s22, %s146_s22 }
  0x56   :  { %p11730_p12 = scmp.lt.s32.totalorder %s11728_s2, %s11724_s28 }
  0x58   :  { %p11731_p13 = por %p11730_p12, %p11729_p11 }
  0x5a   :  { %p11732_p0 = pnand %p11731_p13, %p11725_p10 }
  0x5c   :  { %11735 = shalt.err (!%p11732_p0)
}
  0x5d   :  { %148 = dma.hbm_to_vmem [thread:$0]  %s12170_s25, 16, %s146_s22, [#allocation12]  }
  0x5e   :  { %s11744_s9 = scalar_lea.vmem %s168_s26, 16  ;;  %s11748_s1 = scalar_lea.vmem %s168_s26, 32 }
  0x5f   :  { %p11745_p1 = scmp.ne.s32.totalorder %s168_s26, %s11744_s9  ;;  %p11749_p2 = scmp.lt.s32.totalorder %s168_s26, %s168_s26 }
  0x60   :  { %p11750_p3 = scmp.lt.s32.totalorder %s11748_s1, %s11744_s9 }
  0x62   :  { %p11751_p4 = por %p11750_p3, %p11749_p2 }
  0x64   :  { %p11752_p5 = pnand %p11751_p4, %p11745_p1 }
  0x66   :  { %11755 = shalt.err (!%p11752_p5)
}
  0x67   :  { %170 = dma.hbm_to_vmem [thread:$0]  %s12180_s3, 16, %s168_s26, [#allocation15]  }
  0x68   :  { %s12116_s17 = smov [#allocation17]  }
  0x69   :  { %s200_s7 = sshll.u32 %s12116_s17, 4  ;;  %s201_s7 = int_to_ptr.vmem [resolvable:$true] %s200_s7 }
  0x6a   :  { %s11764_s10 = scalar_lea.vmem %s201_s7, 96  ;;  %p11769_p7 = scmp.lt.s32.totalorder %s201_s7, %s201_s7 }
  0x6b   :  { %p11765_p6 = scmp.ne.s32.totalorder %s201_s7, %s11764_s10  ;;  %p11770_p8 = scmp.lt.s32.totalorder %s11764_s10, %s11764_s10 }
  0x6d   :  { %p11771_p9 = por %p11770_p8, %p11769_p7 }
  0x6f   :  { %p11772_p10 = pnand %p11771_p9, %p11765_p6 }
  0x71   :  { %11775 = shalt.err (!%p11772_p10)
}
  0x72   :  { %s12117_s25 = smov 16   ;;  %s12118_s15 = smov 1  }
  0x73   :  { %206 = dma.hbm_to_vmem [thread:$0]  %s12220_s20, 96, %s201_s7, [#allocation18], %s12117_s25, %s12117_s25, %s12118_s15  }
  0x74   :  { %s12119_s16 = smov [#allocation20]   ;;  %s12120_s22 = smov [#allocation23]  }
  0x75   :  { %s224_s18 = sshll.u32 %s12119_s16, 4  ;;  %s248_s23 = sshll.u32 %s12120_s22, 4  ;;  %s225_s18 = int_to_ptr.vmem [resolvable:$true] %s224_s18  ;;  %s249_s23 = int_to_ptr.vmem [resolvable:$true] %s248_s23 }
  0x76   :  { %s11784_s3 = scalar_lea.vmem %s225_s18, 96  ;;  %p11789_p12 = scmp.lt.s32.totalorder %s225_s18, %s225_s18 }
  0x77   :  { %p11785_p11 = scmp.ne.s32.totalorder %s225_s18, %s11784_s3  ;;  %p11790_p13 = scmp.lt.s32.totalorder %s11784_s3, %s11784_s3 }
  0x79   :  { %p11791_p0 = por %p11790_p13, %p11789_p12 }
  0x7b   :  { %p11792_p1 = pnand %p11791_p0, %p11785_p11 }
  0x7d   :  { %11795 = shalt.err (!%p11792_p1)
}
  0x7e   :  { %230 = dma.hbm_to_vmem [thread:$0]  %s12230_s4, 96, %s225_s18, [#allocation21], %s12117_s25, %s12117_s25, %s12118_s15  }
  0x7f   :  { %s11804_s26 = scalar_lea.vmem %s249_s23, 96  ;;  %p11809_p3 = scmp.lt.s32.totalorder %s249_s23, %s249_s23 }
  0x80   :  { %p11805_p2 = scmp.ne.s32.totalorder %s249_s23, %s11804_s26  ;;  %p11810_p4 = scmp.lt.s32.totalorder %s11804_s26, %s11804_s26 }
  0x82   :  { %p11811_p5 = por %p11810_p4, %p11809_p3 }
  0x84   :  { %p11812_p6 = pnand %p11811_p5, %p11805_p2 }
  0x86   :  { %11815 = shalt.err (!%p11812_p6)
}
  0x87   :  { %254 = dma.hbm_to_vmem [thread:$0]  %s12240_s30, 96, %s249_s23, [#allocation24], %s12117_s25, %s12117_s25, %s12118_s15  }
  0x88   :  { %s12121_s20 = smov [#allocation26]   ;;  %s12122_s2 = smov [#allocation2]  }
  0x89   :  { %s274_s28 = sshll.u32 %s12121_s20, 4  ;;  %s86_s9 = sshll.u32 %s12122_s2, 4  ;;  %s275_s28 = int_to_ptr.vmem [resolvable:$true] %s274_s28  ;;  %s87_s9 = int_to_ptr.vmem [resolvable:$true] %s86_s9 }
  0x8a   :  { %s11824_s1 = scalar_lea.vmem %s275_s28, 3072  ;;  %p11829_p8 = scmp.lt.s32.totalorder %s275_s28, %s275_s28 }
  0x8b   :  { %p11825_p7 = scmp.ne.s32.totalorder %s275_s28, %s11824_s1  ;;  %p11830_p9 = scmp.lt.s32.totalorder %s11824_s1, %s11824_s1 }
  0x8d   :  { %p11831_p10 = por %p11830_p9, %p11829_p8 }
  0x8f   :  { %p11832_p11 = pnand %p11831_p10, %p11825_p7 }
  0x91   :  { %11835 = shalt.err (!%p11832_p11)
}
  0x92   :  { %280 = dma.hbm_to_vmem [thread:$0]  %s12255_s19, 3072, %s275_s28, [#allocation27], %s12112_s0, %s12112_s0, %s12113_s11  }
  0x93   :  { %s11844_s4 = scalar_lea.vmem %s87_s9, 256  ;;  %p11849_p13 = scmp.lt.s32.totalorder %s87_s9, %s87_s9 }
  0x94   :  { %p11845_p12 = scmp.ne.s32.totalorder %s87_s9, %s11844_s4  ;;  %p11850_p0 = scmp.lt.s32.totalorder %s11844_s4, %s11844_s4 }
  0x96   :  { %p11851_p1 = por %p11850_p0, %p11849_p13 }
  0x98   :  { %p11852_p2 = pnand %p11851_p1, %p11845_p12 }
  0x9a   :  { %11855 = shalt.err (!%p11852_p2)
}
  0x9b   :  { %92 = dma.hbm_to_vmem [thread:$0]  %s12145_s5, 256, %s87_s9, [#allocation3], %s12112_s0, %s12112_s0, %s12113_s11  }
  0x9c   :  { %s12123_s30 = smov [#allocation7]   ;;  %s12124_s7 = smov [#allocation10]  }
  0x9d   :  { %s110_s17 = sshll.u32 %s12123_s30, 4  ;;  %s132_s10 = sshll.u32 %s12124_s7, 4  ;;  %s111_s17 = int_to_ptr.vmem [resolvable:$true] %s110_s17  ;;  %s133_s10 = int_to_ptr.vmem [resolvable:$true] %s132_s10 }
  0x9e   :  { %s11864_s25 = scalar_lea.vmem %s111_s17, 512  ;;  %p11869_p4 = scmp.lt.s32.totalorder %s111_s17, %s111_s17 }
  0x9f   :  { %p11865_p3 = scmp.ne.s32.totalorder %s111_s17, %s11864_s25  ;;  %p11870_p5 = scmp.lt.s32.totalorder %s11864_s25, %s11864_s25 }
  0xa1   :  { %p11871_p6 = por %p11870_p5, %p11869_p4 }
  0xa3   :  { %p11872_p7 = pnand %p11871_p6, %p11865_p3 }
  0xa5   :  { %11875 = shalt.err (!%p11872_p7)
}
  0xa6   :  { %116 = dma.hbm_to_vmem [thread:$0]  %s12155_s13, 512, %s111_s17, [#allocation6], %s12112_s0, %s12112_s0, %s12113_s11  }
  0xa7   :  { %s11884_s19 = scalar_lea.vmem %s133_s10, 512  ;;  %p11889_p9 = scmp.lt.s32.totalorder %s133_s10, %s133_s10 }
  0xa8   :  { %p11885_p8 = scmp.ne.s32.totalorder %s133_s10, %s11884_s19  ;;  %p11890_p10 = scmp.lt.s32.totalorder %s11884_s19, %s11884_s19 }
  0xaa   :  { %p11891_p11 = por %p11890_p10, %p11889_p9 }
  0xac   :  { %p11892_p12 = pnand %p11891_p11, %p11885_p8 }
  0xae   :  { %11895 = shalt.err (!%p11892_p12)
}
  0xaf   :  { %138 = dma.hbm_to_vmem [thread:$0]  %s12165_s21, 512, %s133_s10, [#allocation9], %s12112_s0, %s12112_s0, %s12113_s11  }
  0xb0   :  { %s12125_s5 = smov [#allocation13]   ;;  %s12126_s16 = smov [#allocation16]  }
  0xb1   :  { %s154_s15 = sshll.u32 %s12125_s5, 4  ;;  %s188_s18 = sshll.u32 %s12126_s16, 4  ;;  %s155_s15 = int_to_ptr.vmem [resolvable:$true] %s154_s15  ;;  %s189_s18 = int_to_ptr.vmem [resolvable:$true] %s188_s18 }
  0xb2   :  { %s11904_s22 = scalar_lea.vmem %s155_s15, 512  ;;  %p11909_p0 = scmp.lt.s32.totalorder %s155_s15, %s155_s15 }
  0xb3   :  { %p11905_p13 = scmp.ne.s32.totalorder %s155_s15, %s11904_s22  ;;  %p11910_p1 = scmp.lt.s32.totalorder %s11904_s22, %s11904_s22 }
  0xb5   :  { %p11911_p2 = por %p11910_p1, %p11909_p0 }
  0xb7   :  { %p11912_p3 = pnand %p11911_p2, %p11905_p13 }
  0xb9   :  { %11915 = shalt.err (!%p11912_p3)
}
  0xba   :  { %160 = dma.hbm_to_vmem [thread:$0]  %s12175_s29, 512, %s155_s15, [#allocation12], %s12112_s0, %s12112_s0, %s12113_s11  }
  0xbb   :  { %s11924_s13 = scalar_lea.vmem %s189_s18, 3072  ;;  %p11929_p5 = scmp.lt.s32.totalorder %s189_s18, %s189_s18 }
  0xbc   :  { %p11925_p4 = scmp.ne.s32.totalorder %s189_s18, %s11924_s13  ;;  %p11930_p6 = scmp.lt.s32.totalorder %s11924_s13, %s11924_s13 }
  0xbe   :  { %p11931_p7 = por %p11930_p6, %p11929_p5 }
  0xc0   :  { %p11932_p8 = pnand %p11931_p7, %p11925_p4 }
  0xc2   :  { %11935 = shalt.err (!%p11932_p8)
}
  0xc3   :  { %194 = dma.hbm_to_vmem [thread:$0]  %s12215_s12, 3072, %s189_s18, [#allocation15], %s12112_s0, %s12112_s0, %s12113_s11  }
  0xc4   :  { %s12127_s21 = smov [#allocation19]   ;;  %s12128_s3 = smov [#allocation22]  }
  0xc5   :  { %s212_s23 = sshll.u32 %s12127_s21, 4  ;;  %s236_s26 = sshll.u32 %s12128_s3, 4  ;;  %s213_s23 = int_to_ptr.vmem [resolvable:$true] %s212_s23  ;;  %s237_s26 = int_to_ptr.vmem [resolvable:$true] %s236_s26 }
  0xc6   :  { %s11944_s20 = scalar_lea.vmem %s213_s23, 3072  ;;  %p11949_p10 = scmp.lt.s32.totalorder %s213_s23, %s213_s23 }
  0xc7   :  { %p11945_p9 = scmp.ne.s32.totalorder %s213_s23, %s11944_s20  ;;  %p11950_p11 = scmp.lt.s32.totalorder %s11944_s20, %s11944_s20 }
  0xc9   :  { %p11951_p12 = por %p11950_p11, %p11949_p10 }
  0xcb   :  { %p11952_p13 = pnand %p11951_p12, %p11945_p9 }
  0xcd   :  { %11955 = shalt.err (!%p11952_p13)
}
  0xce   :  { %218 = dma.hbm_to_vmem [thread:$0]  %s12225_s27, 3072, %s213_s23, [#allocation18], %s12112_s0, %s12112_s0, %s12113_s11  }
  0xcf   :  { %s11964_s29 = scalar_lea.vmem %s237_s26, 3072  ;;  %p11969_p1 = scmp.lt.s32.totalorder %s237_s26, %s237_s26 }
  0xd0   :  { %p11965_p0 = scmp.ne.s32.totalorder %s237_s26, %s11964_s29  ;;  %p11970_p2 = scmp.lt.s32.totalorder %s11964_s29, %s11964_s29 }
  0xd2   :  { %p11971_p3 = por %p11970_p2, %p11969_p1 }
  0xd4   :  { %p11972_p4 = pnand %p11971_p3, %p11965_p0 }
  0xd6   :  { %11975 = shalt.err (!%p11972_p4)
}
  0xd7   :  { %s13213_s12 = sld [smem:[#allocation49_spill]]  ;;  %s12129_s28 = smov [#allocation25]  }
  0xd8   :  { %s260_s2 = sshll.u32 %s12129_s28, 4  ;;  %s12130_s9 = smov [#allocation28]   ;;  %s261_s2 = int_to_ptr.vmem [resolvable:$true] %s260_s2 }
  0xd9   :  { %s288_s1 = sshll.u32 %s12130_s9, 4  ;;  %s11984_s4 = scalar_lea.vmem %s261_s2, 3072  ;;  %s289_s1 = int_to_ptr.vmem [resolvable:$true] %s288_s1 }
  0xda   :  { %p11985_p5 = scmp.ne.s32.totalorder %s261_s2, %s11984_s4  ;;  %p11989_p6 = scmp.lt.s32.totalorder %s261_s2, %s261_s2 }
  0xdb   :  { %p11990_p7 = scmp.lt.s32.totalorder %s11984_s4, %s11984_s4 }
  0xdd   :  { %242 = dma.hbm_to_vmem [thread:$0]  %s13213_s12, 3072, %s237_s26, [#allocation21], %s12112_s0, %s12112_s0, %s12113_s11  }
  0xde   :  { %p11991_p8 = por %p11990_p7, %p11989_p6 }
  0xe0   :  { %p11992_p9 = pnand %p11991_p8, %p11985_p5 }
  0xe2   :  { %11995 = shalt.err (!%p11992_p9)
}
  0xe3   :  { %s13214_s27 = sld [smem:[#allocation50_spill]]  ;;  %s12004_s30 = scalar_lea.vmem %s289_s1, 3072 }
  0xe4   :  { %p12005_p10 = scmp.ne.s32.totalorder %s289_s1, %s12004_s30  ;;  %p12009_p11 = scmp.lt.s32.totalorder %s289_s1, %s289_s1 }
  0xe5   :  { %p12010_p12 = scmp.lt.s32.totalorder %s12004_s30, %s12004_s30 }
  0xe7   :  { %p12011_p13 = por %p12010_p12, %p12009_p11 }
  0xe9   :  { %266 = dma.hbm_to_vmem [thread:$0]  %s13214_s27, 3072, %s261_s2, [#allocation24], %s12112_s0, %s12112_s0, %s12113_s11  }
  0xea   :  { %p12012_p0 = pnand %p12011_p13, %p12005_p10 }
  0xec   :  { %12015 = shalt.err (!%p12012_p0)
}
  0xed   :  { %s13215_s17 = sld [smem:[#allocation53_spill]]  ;;  %s12131_s7 = smov [#allocation29]  }
  0xee   :  { %s302_s10 = sshll.u32 %s12131_s7, 4  ;;  %s303_s10 = int_to_ptr.vmem [resolvable:$true] %s302_s10 }
  0xef   :  { %s12024_s25 = scalar_lea.vmem %s303_s10, 6144  ;;  %p12029_p2 = scmp.lt.s32.totalorder %s303_s10, %s303_s10 }
  0xf0   :  { %p12025_p1 = scmp.ne.s32.totalorder %s303_s10, %s12024_s25  ;;  %p12030_p3 = scmp.lt.s32.totalorder %s12024_s25, %s12024_s25 }
  0xf2   :  { %p12031_p4 = por %p12030_p3, %p12029_p2 }
  0xf3   :  { %294 = dma.hbm_to_vmem [thread:$0]  %s13215_s17, 3072, %s289_s1, [#allocation27], %s12112_s0, %s12112_s0, %s12113_s11  }
  0xf4   :  { %p12032_p5 = pnand %p12031_p4, %p12025_p1 }
  0xf6   :  { %12035 = shalt.err (!%p12032_p5)
}
  0xf7   :  { %s13216_s19 = sld [smem:[#allocation55_spill]] }
  0xfd   :  { %308 = dma.hbm_to_vmem [thread:$0]  %s13216_s19, 6144, %s303_s10, [#allocation30], %s12112_s0, %s12112_s0, %s12113_s11  }
  0xfe   :  { %12056 = dma.done.wait [#allocation3], 256  }
  0xff   :  { %12057 = vsyncadd [#allocation3], 4294967040 }
 0x100   :  { %12058 = dma.done.wait [#allocation6], 768  }
 0x101   :  { %12059 = vsyncadd [#allocation6], 4294966528 }
 0x102   :  { %12060 = dma.done.wait [#allocation9], 528  }
 0x103   :  { %12061 = vsyncadd [#allocation9], 4294966768 }
 0x104   :  { %12062 = dma.done.wait [#allocation12], 528  }
 0x105   :  { %12063 = vsyncadd [#allocation12], 4294966768 }
 0x106   :  { %12064 = dma.done.wait [#allocation15], 3088  }
 0x107   :  { %12065 = vsyncadd [#allocation15], 4294964208 }
 0x108   :  { %12066 = dma.done.wait [#allocation18], 3168  }
 0x109   :  { %12067 = vsyncadd [#allocation18], 4294964128 }
 0x10a   :  { %12068 = dma.done.wait [#allocation21], 3168  }
 0x10b   :  { %12069 = vsyncadd [#allocation21], 4294964128 }
 0x10c   :  { %12070 = dma.done.wait [#allocation24], 3168  }
 0x10d   :  { %12071 = vsyncadd [#allocation24], 4294964128 }
 0x10e   :  { %12072 = dma.done.wait [#allocation27], 6144  }
 0x10f   :  { %12073 = vsyncadd [#allocation27], 4294961152 }
 0x110   :  { %12074 = dma.done.wait [#allocation30], 6144  }
 0x111   :  { %12075 = vsyncadd [#allocation30], 4294961152  ;;  %vm388_vm0 = vcmask 261120   ;;  %v380_v0 = vld [vmem:[#allocation7 + $0x18] sm:$0xff]  ;;  %v379_v1 = vld [vmem:[#allocation7 + $0x10] sm:$0xff]  ;;  %v12132_v6 = vmov 0.0  }
 0x112   :  { %10603 = vmatprep.subr.mxu1 %v380_v0  ;;  %v12361_v2 = vld [vmem:[#allocation2] sm:$0xff]  ;;  %v378_v3 = vld [vmem:[#allocation7 + $0x8] sm:$0xff]  ;;  %10624 = vmatprep.subr.mxu0 %v12132_v6  ;;  %vm12133_vm1 = vmmov 0   ;;  %s12134_s5 = smov 96   ;;  %vm626_vm2 = vcmask 64512   ;;  %s12135_s15 = smov 64  }
 0x113   :  { %10604 = vmatpush3.msra.mxu1 %v380_v0  ;;  %10611 = vmatprep.mubr.msk.f32.mxu1 %vm388_vm0, %v12361_v2  ;;  %v377_v4 = vld [vmem:[#allocation7] sm:$0xff]  ;;  %v12365_v5 = vld [vmem:[#allocation2 + $0x8] sm:$0xff]  ;;  %v803_v39 = vld [vmem:[#allocation10 + $0x10] sm:$0xff]  ;;  %s13217_s16 = sld [smem:[#allocation43_spill]]  ;;  %vm1043_vm3 = vcmask 523264  }
 0x114   :  { %10605 = vmatprep.subr.mxu1 %v379_v1  ;;  %10626 = vmatprep.mubr.msk.f32.mxu0 %vm12133_vm1, %v12132_v6  ;;  %v9945_v8 = vld [vmem:[#allocation8] ss:$0 sm:$0xff]  ;;  %v802_v42 = vld [vmem:[#allocation10 + $0x8] sm:$0xff]  ;;  %v801_v43 = vld [vmem:[#allocation10] sm:$0xff]  ;;  %s13218_s18 = sld [smem:[#allocation45_spill]] }
 0x115   :  { %10606 = vmatpush3.msra.mxu1 %v379_v1  ;;  %v804_v33 = vld [vmem:[#allocation10 + $0x18] sm:$0xff]  ;;  %v9954_v48 = vld [vmem:[#allocation11] ss:$0 sm:$0xff]  ;;  %s13219_s22 = sld [smem:[#allocation46_spill]] }
 0x116   :  { %10607 = vmatprep.subr.mxu1 %v378_v3  ;;  %s13220_s13 = sld [smem:[#allocation44_spill]] }
 0x117   :  { %10608 = vmatpush3.msra.mxu1 %v378_v3  ;;  %s13221_s21 = sld [smem:[#allocation47_spill]] }
 0x118   :  { %10609 = vmatprep.subr.mxu1 %v377_v4  ;;  %s13222_s23 = sld [smem:[#allocation48_spill]] }
 0x119   :  { %10610 = vmatpush3.msra.mxu1 %v377_v4  ;;  %v936_v4 = vld [vmem:[#allocation13 + $0x10] sm:$0xff]  ;;  %s13223_s3 = sld [smem:[#allocation57_spill]] }
 0x11a   :  { %10612 = vmatmul.mubr.msk.f32.vlgmr.msra.gmra.mxu1 %vm388_vm0, %v12365_v5  ;;  %10614 = vmatprep.subr.mxu1 %v12132_v6  ;;  %s13224_s26 = sld [smem:[#allocation51_spill]] }
 0x11b   :  { %10616 = vmatprep.mubr.msk.f32.mxu1 %vm12133_vm1, %v12132_v6  ;;  %s13225_s20 = sld [smem:[#allocation52_spill]] }
 0x11c   :  { %s13226_s29 = sld [smem:[#allocation54_spill]] }
 0x11d   :  { %s13227_s12 = sld [smem:[#allocation56_spill]] }
 0x1da   :  { %v10613_v7 = vpop.f32.mrf.mxu1 }
 0x1db   :  { %v467_v11 = vadd.f32 %v10613_v7, %v9945_v8  ;;  %v934_v7 = vld [vmem:[#allocation13] sm:$0xff] }
 0x1dc   :  { %v461_v9 = vpop.f32.mrf.mxu1 }
 0x1dd   :  { %v462_v10 = vadd.f32 %v9945_v8, %v461_v9  ;;  %v1216_v8 = vld [vmem:[#allocation16 + $0x18] sm:$0xff] }
 0x1de   :  { %v1035_v9 = vld [vmem:[%s13217_s16 + $0x38] sm:$0xff] }
 0x1df   :  { %471 = vrot.lane.b32.xlu0 %v462_v10, %s12134_s5 }
 0x1e3   :  { %548 = vrot.lane.b32.xlu0 %v467_v11, %s12134_s5 }
 0x251   :  { %v472_v12 = vpop.permute.xlu0 %471 }
 0x252   :  { %10615 = vmatpush3.xpose.msk.msra.mxu1 %vm388_vm0, %v472_v12  ;;  %v1032_v12 = vld [vmem:[%s13217_s16 + $0x20] sm:$0xff] }
 0x253   :  { %10619 = vmatprep.subr.mxu1 %v12132_v6 }
 0x255   :  { %10617 = vmatmul.mubr.msk.f32.vlgmr.msra.gmra.mxu1 %vm388_vm0, %v462_v10  ;;  %v549_v13 = vpop.permute.xlu0 %548 }
 0x256   :  { %10620 = vmatpush3.xpose.msk.msra.mxu1 %vm388_vm0, %v549_v13  ;;  %10621 = vmatprep.mubr.msk.f32.mxu1 %vm12133_vm1, %v12132_v6 }
 0x257   :  { %10629 = vmatprep.subr.mxu1 %v12132_v6 }
 0x259   :  { %10622 = vmatmul.mubr.msk.f32.vlgmr.msra.gmra.mxu1 %vm388_vm0, %v467_v11 }
 0x25a   :  { %10631 = vmatprep.mubr.msk.f32.mxu1 %vm12133_vm1, %v12132_v6 }
 0x315   :  { %v543_v14 = vpop.f32.mrf.mxu1 }
 0x316   :  { %v624_v15 = vmul.f32 0.17677669, %v543_v14 }
 0x317   :  { %v10618_v16 = vpop.f32.mrf.mxu1 }
 0x318   :  { %v627_v17 = vsel %vm626_vm2, %v624_v15, -inf }
 0x319   :  { %628 = vmax.xlane.f32.xlu1 %v627_v17  ;;  %v620_v18 = vpop.f32.mrf.mxu1 }
 0x31a   :  { %v625_v19 = vmul.f32 0.17677669, %v620_v18  ;;  %v922_v18 = vlaneseq }
 0x31b   :  { %v10623_v20 = vpop.f32.mrf.mxu1 }
 0x31c   :  { %v630_v21 = vsel %vm626_vm2, %v625_v19, -inf  ;;  %v12407_v20 = vshrl.u32 %v922_v18, 7 }
 0x31d   :  { %631 = vmax.xlane.f32.xlu1 %v630_v21 }
 0x31e   :  { %v12410_v21 = vsub.s32 0, %v12407_v20 }
 0x32e   :  { %649 = vrot.lane.b32.xlu1 %v462_v10, %s12135_s15  ;;  %v1034_v10 = vld [vmem:[%s13217_s16 + $0x30] sm:$0xff] }
 0x3a2   :  { %v629_v22 = vpop.xlane.xlu1 %628 }
 0x3a3   :  { %v633_v23 = vsub.f32 %v624_v15, %v629_v22  ;;  %v12413_v22 = vld [vmem:[%s13218_s18] sm:$0x3] }
 0x3a5   :  { %v635_v24 = vmul.f32 1.442695, %v633_v23  ;;  %v12416_v23 = vld [vmem:[%s13219_s22] sm:$0x3] }
 0x3a6   :  { %v632_v25 = vpop.xlane.xlu1 %631 }
 0x3a7   :  { %11484 = vpow2.f32 %v635_v24  ;;  %v634_v26 = vsub.f32 %v625_v19, %v632_v25  ;;  %v925_v24 = vrot.slane %v12413_v22, %v12410_v21 }
 0x3a9   :  { %v637_v27 = vmul.f32 1.442695, %v634_v26 }
 0x3aa   :  { %v650_v28 = vpop.permute.xlu1 %649 }
 0x3ab   :  { %11486 = vpow2.f32 %v637_v27  ;;  %10625 = vmatpush3.msra.mxu0 %v650_v28  ;;  %v931_v27 = vrot.slane %v12416_v23, %v12410_v21 }
 0x3ac   :  { %10634 = vmatprep.subr.mxu0 %v804_v33 }
 0x3b4   :  { %v11485_v29 = vpop.eup %11484 }
 0x3b5   :  { %v639_v30 = vsel %vm626_vm2, %v11485_v29, 0.0 }
 0x3b6   :  { %640 = vadd.xlane.f32.xlu0 %v639_v30 }
 0x3b8   :  { %v11487_v31 = vpop.eup %11486 }
 0x3b9   :  { %v642_v32 = vsel %vm626_vm2, %v11487_v31, 0.0 }
 0x3ba   :  { %643 = vadd.xlane.f32.xlu1 %v642_v32 }
 0x3cb   :  { %725 = vrot.lane.b32.xlu1 %v467_v11, %s12135_s15  ;;  %v1033_v11 = vld [vmem:[%s13217_s16 + $0x28] sm:$0xff] }
 0x43f   :  { %v641_v34 = vpop.xlane.xlu0 %640 }
 0x440   :  { %11488 = vrcp.f32 %v641_v34  ;;  %v12428_v34 = vld [vmem:[#allocation5] sm:$0xff] }
 0x443   :  { %v644_v35 = vpop.xlane.xlu1 %643 }
 0x444   :  { %11490 = vrcp.f32 %v644_v35  ;;  %v1215_v35 = vld [vmem:[#allocation16 + $0x10] sm:$0xff] }
 0x447   :  { %v726_v36 = vpop.permute.xlu1 %725 }
 0x448   :  { %10630 = vmatpush3.msra.mxu1 %v726_v36  ;;  %v1214_v36 = vld [vmem:[#allocation16 + $0x8] sm:$0xff] }
 0x44d   :  { %v11489_v37 = vpop.eup %11488 }
 0x44e   :  { %v647_v38 = vmul.f32 %v11489_v37, %v11485_v29  ;;  %v1213_v37 = vld [vmem:[#allocation16] sm:$0xff] }
 0x450   :  { %10627 = vmatmul.mubr.msk.f32.vlgmr.msra.gmra.mxu0 %vm626_vm2, %v647_v38  ;;  %v12434_v38 = vld [vmem:[#allocation5 + $0x8] sm:$0xff] }
 0x451   :  { %v11491_v40 = vpop.eup %11490  ;;  %10635 = vmatpush3.msra.mxu0 %v804_v33 }
 0x452   :  { %v648_v41 = vmul.f32 %v11491_v40, %v11487_v31  ;;  %10636 = vmatprep.subr.mxu0 %v803_v39  ;;  %v1030_v40 = vld [vmem:[%s13217_s16 + $0x10] sm:$0xff] }
 0x453   :  { %10637 = vmatpush3.msra.mxu0 %v803_v39  ;;  %v1031_v39 = vld [vmem:[%s13217_s16 + $0x18] sm:$0xff] }
 0x454   :  { %10632 = vmatmul.mubr.msk.f32.vlgmr.msra.gmra.mxu1 %vm626_vm2, %v648_v41  ;;  %10638 = vmatprep.subr.mxu0 %v802_v42  ;;  %v1029_v41 = vld [vmem:[%s13217_s16 + $0x8] sm:$0xff] }
 0x455   :  { %10639 = vmatpush3.msra.mxu0 %v802_v42  ;;  %v1028_v42 = vld [vmem:[%s13217_s16] sm:$0xff] }
 0x456   :  { %10640 = vmatprep.subr.mxu0 %v801_v43 }
 0x457   :  { %10641 = vmatpush3.msra.mxu0 %v801_v43  ;;  %v9957_v43 = vld [vmem:[#allocation14] ss:$0 sm:$0xff] }
 0x458   :  { %10656 = vmatprep.subr.mxu0 %v1035_v9 }
 0x510   :  { %v721_v44 = vpop.f32.mrf.mxu0 }
 0x511   :  { %10642 = vmatprep.mubr.msk.f32.mxu0 %vm388_vm0, %v721_v44 }
 0x512   :  { %v10628_v45 = vpop.f32.mrf.mxu0 }
 0x514   :  { %v797_v46 = vpop.f32.mrf.mxu1 }
 0x515   :  { %10643 = vmatmul.mubr.msk.f32.vlgmr.msra.gmra.mxu0 %vm388_vm0, %v797_v46 }
 0x516   :  { %v10633_v47 = vpop.f32.mrf.mxu1  ;;  %10657 = vmatpush3.msra.mxu0 %v1035_v9 }
 0x517   :  { %10658 = vmatprep.subr.mxu0 %v1034_v10 }
 0x518   :  { %10659 = vmatpush3.msra.mxu0 %v1034_v10 }
 0x519   :  { %10660 = vmatprep.subr.mxu0 %v1033_v11 }
 0x51a   :  { %10661 = vmatpush3.msra.mxu0 %v1033_v11 }
 0x51b   :  { %10662 = vmatprep.subr.mxu0 %v1032_v12 }
 0x51c   :  { %10663 = vmatpush3.msra.mxu0 %v1032_v12 }
 0x51d   :  { %10664 = vmatprep.subr.mxu0 %v1031_v39 }
 0x51e   :  { %10665 = vmatpush3.msra.mxu0 %v1031_v39 }
 0x51f   :  { %10666 = vmatprep.subr.mxu0 %v1030_v40 }
 0x520   :  { %10667 = vmatpush3.msra.mxu0 %v1030_v40 }
 0x521   :  { %10668 = vmatprep.subr.mxu0 %v1029_v41 }
 0x522   :  { %10669 = vmatpush3.msra.mxu0 %v1029_v41 }
 0x523   :  { %10670 = vmatprep.subr.mxu0 %v1028_v42 }
 0x524   :  { %10671 = vmatpush3.msra.mxu0 %v1028_v42 }
 0x525   :  { %10696 = vmatprep.subr.mxu0 %v12132_v6 }
 0x5d5   :  { %v10644_v49 = vpop.f32.mrf.mxu0 }
 0x5d6   :  { %v890_v50 = vadd.f32 %v10644_v49, %v9954_v48 }
 0x5d7   :  { %v884_v51 = vpop.f32.mrf.mxu0 }
 0x5d8   :  { %v885_v52 = vadd.f32 %v9954_v48, %v884_v51  ;;  %v894_v53 = vadd.f32 %v890_v50, %v12365_v5  ;;  %v935_v5 = vld [vmem:[#allocation13 + $0x8] sm:$0xff]  ;;  %v9965_v50 = vld [vmem:[#allocation17] ss:$0 sm:$0xff] }
 0x5da   :  { %v898_v54 = vsel %vm388_vm0, %v894_v53, 0.0  ;;  %v893_v55 = vadd.f32 %v885_v52, %v12361_v2  ;;  %v937_v2 = vld [vmem:[#allocation13 + $0x18] sm:$0xff] }
 0x5db   :  { %899 = vadd.xlane.f32.xlu0 %v898_v54  ;;  %10645 = vmatprep.subr.mxu1 %v937_v2 }
 0x5dc   :  { %v895_v56 = vsel %vm388_vm0, %v893_v55, 0.0  ;;  %10646 = vmatpush3.msra.mxu1 %v937_v2 }
 0x5dd   :  { %896 = vadd.xlane.f32.xlu1 %v895_v56  ;;  %10647 = vmatprep.subr.mxu1 %v936_v4 }
 0x5de   :  { %10648 = vmatpush3.msra.mxu1 %v936_v4 }
 0x5df   :  { %10649 = vmatprep.subr.mxu1 %v935_v5 }
 0x5e0   :  { %10650 = vmatpush3.msra.mxu1 %v935_v5 }
 0x5e1   :  { %10651 = vmatprep.subr.mxu1 %v934_v7 }
 0x5e2   :  { %10652 = vmatpush3.msra.mxu1 %v934_v7 }
 0x5e3   :  { %10675 = vmatprep.subr.mxu1 %v1216_v8 }
 0x664   :  { %v900_v57 = vpop.xlane.xlu0 %899 }
 0x665   :  { %v903_v58 = vmul.f32 0.03125, %v900_v57 }
 0x666   :  { %v897_v59 = vpop.xlane.xlu1 %896 }
 0x667   :  { %v902_v60 = vmul.f32 0.03125, %v897_v59  ;;  %v905_v61 = vsub.f32 %v894_v53, %v903_v58 }
 0x669   :  { %v904_v62 = vsub.f32 %v893_v55, %v902_v60  ;;  %v907_v1 = vmul.f32 %v905_v61, %v905_v61 }
 0x66b   :  { %v906_v63 = vmul.f32 %v904_v62, %v904_v62  ;;  %v911_v3 = vsel %vm388_vm0, %v907_v1, 0.0 }
 0x66d   :  { %v908_v0 = vsel %vm388_vm0, %v906_v63, 0.0 }
 0x66e   :  { %909 = vadd.xlane.f32.xlu0 %v908_v0 }
 0x672   :  { %912 = vadd.xlane.f32.xlu0 %v911_v3  ;;  %v9960_v3 = vld [vmem:[%s13220_s13] ss:$0 sm:$0xff] }
 0x6f7   :  { %v910_v13 = vpop.xlane.xlu0 %909 }
 0x6f8   :  { %v914_v14 = vmul.f32 0.03125, %v910_v13 }
 0x6fa   :  { %v916_v15 = vadd.f32 1e-05, %v914_v14 }
 0x6fb   :  { %v913_v16 = vpop.xlane.xlu0 %912 }
 0x6fc   :  { %11492 = vrsqrt.f32 %v916_v15  ;;  %v915_v17 = vmul.f32 0.03125, %v913_v16 }
 0x6fe   :  { %v917_v19 = vadd.f32 1e-05, %v915_v17 }
 0x700   :  { %11494 = vrsqrt.f32 %v917_v19 }
 0x709   :  { %v11493_v25 = vpop.eup %11492 }
 0x70a   :  { %v920_v26 = vmul.f32 %v11493_v25, %v904_v62 }
 0x70c   :  { %v926_v28 = vmul.f32 %v925_v24, %v920_v26 }
 0x70d   :  { %v11495_v29 = vpop.eup %11494 }
 0x70e   :  { %v921_v30 = vmul.f32 %v11495_v29, %v905_v61  ;;  %v12422_v31 = vadd.f32 %v931_v27, %v926_v28 }
 0x710   :  { %v927_v32 = vmul.f32 %v925_v24, %v921_v30  ;;  %10653 = vmatprep.mubr.msk.f32.mxu1 %vm388_vm0, %v12422_v31 }
 0x712   :  { %v12426_v33 = vadd.f32 %v931_v27, %v927_v32 }
 0x714   :  { %10654 = vmatmul.mubr.msk.f32.vlgmr.msra.gmra.mxu1 %vm388_vm0, %v12426_v33 }
 0x715   :  { %10676 = vmatpush3.msra.mxu1 %v1216_v8  ;;  %10683 = vmatprep.mubr.msk.f32.mxu1 %vm388_vm0, %v12428_v34 }
 0x716   :  { %10677 = vmatprep.subr.mxu1 %v1215_v35 }
 0x717   :  { %10678 = vmatpush3.msra.mxu1 %v1215_v35 }
 0x718   :  { %10679 = vmatprep.subr.mxu1 %v1214_v36 }
 0x719   :  { %10680 = vmatpush3.msra.mxu1 %v1214_v36 }
 0x71a   :  { %10681 = vmatprep.subr.mxu1 %v1213_v37 }
 0x71b   :  { %10682 = vmatpush3.msra.mxu1 %v1213_v37 }
 0x71c   :  { %10684 = vmatmul.mubr.msk.f32.vlgmr.msra.gmra.mxu1 %vm388_vm0, %v12434_v38  ;;  %10686 = vmatprep.subr.mxu1 %v12132_v6 }
 0x71d   :  { %10688 = vmatprep.mubr.msk.f32.mxu1 %vm12133_vm1, %v12132_v6 }
 0x7d4   :  { %v10655_v44 = vpop.f32.mrf.mxu1 }
 0x7d5   :  { %v1023_v45 = vadd.f32 %v10655_v44, %v9957_v43 }
 0x7d6   :  { %v1017_v46 = vpop.f32.mrf.mxu1 }
 0x7d7   :  { %v1018_v47 = vadd.f32 %v9957_v43, %v1017_v46  ;;  %v1027_v49 = vmax.f32 %v1023_v45, 0.0  ;;  %v1638_v45 = vld [vmem:[#allocation19 + $0x18] sm:$0xff]  ;;  %v1637_v46 = vld [vmem:[#allocation19 + $0x10] sm:$0xff] }
 0x7d9   :  { %v1026_v48 = vmax.f32 %v1018_v47, 0.0  ;;  %v1636_v47 = vld [vmem:[#allocation19 + $0x8] sm:$0xff] }
 0x7db   :  { %10672 = vmatprep.mubr.msk.f32.mxu0 %vm1043_vm3, %v1026_v48  ;;  %v1635_v48 = vld [vmem:[#allocation19] sm:$0xff] }
 0x7dc   :  { %v10685_v51 = vpop.f32.mrf.mxu1  ;;  %10673 = vmatmul.mubr.msk.f32.vlgmr.msra.gmra.mxu0 %vm1043_vm3, %v1027_v49 }
 0x7dd   :  { %v1302_v52 = vadd.f32 %v10685_v51, %v9965_v50  ;;  %10698 = vmatprep.mubr.msk.f32.mxu0 %vm12133_vm1, %v12132_v6 }
 0x7de   :  { %v1296_v53 = vpop.f32.mrf.mxu1 }
 0x7df   :  { %v1297_v54 = vadd.f32 %v9965_v50, %v1296_v53  ;;  %1383 = vrot.lane.b32.xlu1 %v1302_v52, %s12134_s5 }
 0x7e1   :  { %1306 = vrot.lane.b32.xlu0 %v1297_v54, %s12134_s5 }
 0x851   :  { %v1384_v56 = vpop.permute.xlu1 %1383 }
 0x853   :  { %v1307_v55 = vpop.permute.xlu0 %1306 }
 0x854   :  { %10687 = vmatpush3.xpose.msk.msra.mxu1 %vm388_vm0, %v1307_v55 }
 0x855   :  { %10691 = vmatprep.subr.mxu1 %v12132_v6 }
 0x857   :  { %10689 = vmatmul.mubr.msk.f32.vlgmr.msra.gmra.mxu1 %vm388_vm0, %v1297_v54 }
 0x858   :  { %10692 = vmatpush3.xpose.msk.msra.mxu1 %vm388_vm0, %v1384_v56  ;;  %10693 = vmatprep.mubr.msk.f32.mxu1 %vm12133_vm1, %v12132_v6 }
 0x859   :  { %10701 = vmatprep.subr.mxu1 %v12132_v6 }
 0x85b   :  { %10694 = vmatmul.mubr.msk.f32.vlgmr.msra.gmra.mxu1 %vm388_vm0, %v1302_v52 }
 0x85c   :  { %10703 = vmatprep.mubr.msk.f32.mxu1 %vm12133_vm1, %v12132_v6 }
 0x89c   :  { %v10674_v1 = vpop.f32.mrf.mxu0 }
 0x89d   :  { %v1122_v2 = vadd.f32 %v10674_v1, %v9960_v3 }
 0x89e   :  { %v1116_v18 = vpop.f32.mrf.mxu0 }
 0x89f   :  { %v1126_v4 = vadd.f32 %v1122_v2, %v12426_v33  ;;  %v1117_v19 = vadd.f32 %v9960_v3, %v1116_v18 }
 0x8a1   :  { %v1130_v5 = vsel %vm388_vm0, %v1126_v4, 0.0  ;;  %v1125_v24 = vadd.f32 %v1117_v19, %v12422_v31 }
 0x8a3   :  { %v1127_v25 = vsel %vm388_vm0, %v1125_v24, 0.0 }
 0x917   :  { %v1378_v57 = vpop.f32.mrf.mxu1 }
 0x918   :  { %v1459_v58 = vmul.f32 0.17677669, %v1378_v57 }
 0x919   :  { %v10690_v59 = vpop.f32.mrf.mxu1 }
 0x91a   :  { %v1461_v60 = vsel %vm626_vm2, %v1459_v58, -inf  ;;  %v12480_v59 = vsub.s32 1, %v12407_v20 }
 0x91b   :  { %1462 = vmax.xlane.f32.xlu0 %v1461_v60  ;;  %v1455_v61 = vpop.f32.mrf.mxu1 }
 0x91c   :  { %v1460_v62 = vmul.f32 0.17677669, %v1455_v61  ;;  %v1156_v60 = vrot.slane %v12413_v22, %v12480_v59 }
 0x91d   :  { %v10695_v63 = vpop.f32.mrf.mxu1 }
 0x91e   :  { %v1464_v0 = vsel %vm626_vm2, %v1460_v62, -inf  ;;  %v1162_v63 = vrot.slane %v12416_v23, %v12480_v59 }
 0x91f   :  { %1465 = vmax.xlane.f32.xlu1 %v1464_v0 }
 0x930   :  { %1559 = vrot.lane.b32.xlu1 %v1302_v52, %s12135_s15 }
 0x954   :  { %1131 = vadd.xlane.f32.xlu1 %v1130_v5 }
 0x9a4   :  { %v1463_v7 = vpop.xlane.xlu0 %1462 }
 0x9a5   :  { %v1467_v8 = vsub.f32 %v1459_v58, %v1463_v7 }
 0x9a7   :  { %v1469_v9 = vmul.f32 1.442695, %v1467_v8 }
 0x9a8   :  { %v1466_v10 = vpop.xlane.xlu1 %1465 }
 0x9a9   :  { %11496 = vpow2.f32 %v1469_v9  ;;  %v1468_v11 = vsub.f32 %v1460_v62, %v1466_v10 }
 0x9ab   :  { %v1471_v12 = vmul.f32 1.442695, %v1468_v11  ;;  %v9974_v11 = vld [vmem:[#allocation20] ss:$0 sm:$0xff] }
 0x9ac   :  { %v1560_v13 = vpop.permute.xlu1 %1559 }
 0x9ad   :  { %11498 = vpow2.f32 %v1471_v12  ;;  %10702 = vmatpush3.msra.mxu1 %v1560_v13 }
 0x9b6   :  { %v11497_v14 = vpop.eup %11496 }
 0x9b7   :  { %v1473_v15 = vsel %vm626_vm2, %v11497_v14, 0.0 }
 0x9b8   :  { %1474 = vadd.xlane.f32.xlu0 %v1473_v15 }
 0x9ba   :  { %v11499_v16 = vpop.eup %11498 }
 0x9bb   :  { %v1476_v17 = vsel %vm626_vm2, %v11499_v16, 0.0 }
 0x9bc   :  { %1477 = vadd.xlane.f32.xlu0 %v1476_v17 }
 0x9d2   :  { %1483 = vrot.lane.b32.xlu0 %v1297_v54, %s12135_s15 }
 0x9dd   :  { %v1132_v35 = vpop.xlane.xlu1 %1131 }
 0x9de   :  { %v1134_v36 = vmul.f32 0.03125, %v1132_v35 }
 0x9e0   :  { %v1136_v39 = vsub.f32 %v1126_v4, %v1134_v36 }
 0x9e2   :  { %v1138_v43 = vmul.f32 %v1136_v39, %v1136_v39 }
 0x9e4   :  { %v1142_v44 = vsel %vm388_vm0, %v1138_v43, 0.0 }
 0x9f1   :  { %1128 = vadd.xlane.f32.xlu0 %v1127_v25 }
 0xa41   :  { %v1475_v26 = vpop.xlane.xlu0 %1474 }
 0xa42   :  { %11500 = vrcp.f32 %v1475_v26 }
 0xa45   :  { %v1478_v27 = vpop.xlane.xlu0 %1477 }
 0xa46   :  { %11502 = vrcp.f32 %v1478_v27 }
 0xa49   :  { %v1484_v28 = vpop.permute.xlu0 %1483 }
 0xa4a   :  { %10697 = vmatpush3.msra.mxu0 %v1484_v28 }
 0xa4b   :  { %10706 = vmatprep.subr.mxu0 %v1638_v45 }
 0xa4f   :  { %v11501_v29 = vpop.eup %11500 }
 0xa50   :  { %v1481_v30 = vmul.f32 %v11501_v29, %v11497_v14 }
 0xa52   :  { %10699 = vmatmul.mubr.msk.f32.vlgmr.msra.gmra.mxu0 %vm626_vm2, %v1481_v30  ;;  %v1862_v30 = vld [vmem:[#allocation25 + $0x18] sm:$0xff] }
 0xa53   :  { %v11503_v32 = vpop.eup %11502  ;;  %10707 = vmatpush3.msra.mxu0 %v1638_v45 }
 0xa54   :  { %v1482_v33 = vmul.f32 %v11503_v32, %v11499_v16  ;;  %10708 = vmatprep.subr.mxu0 %v1637_v46  ;;  %v1860_v32 = vld [vmem:[#allocation25 + $0x8] sm:$0xff] }
 0xa55   :  { %10709 = vmatpush3.msra.mxu0 %v1637_v46 }
 0xa56   :  { %10704 = vmatmul.mubr.msk.f32.vlgmr.msra.gmra.mxu1 %vm626_vm2, %v1482_v33  ;;  %10710 = vmatprep.subr.mxu0 %v1636_v47 }
 0xa57   :  { %10711 = vmatpush3.msra.mxu0 %v1636_v47 }
 0xa58   :  { %10712 = vmatprep.subr.mxu0 %v1635_v48 }
 0xa59   :  { %10713 = vmatpush3.msra.mxu0 %v1635_v48 }
 0xa5a   :  { %10728 = vmatprep.subr.mxu0 %v1862_v30 }
 0xa7a   :  { %v1129_v31 = vpop.xlane.xlu0 %1128 }
 0xa7b   :  { %v1133_v37 = vmul.f32 0.03125, %v1129_v31 }
 0xa7d   :  { %v1135_v40 = vsub.f32 %v1125_v24, %v1133_v37 }
 0xa7f   :  { %v1137_v41 = vmul.f32 %v1135_v40, %v1135_v40 }
 0xa81   :  { %v1139_v42 = vsel %vm388_vm0, %v1137_v41, 0.0 }
 0xa82   :  { %1140 = vadd.xlane.f32.xlu0 %v1139_v42 }
 0xa86   :  { %1143 = vadd.xlane.f32.xlu0 %v1142_v44 }
 0xb0b   :  { %v1141_v49 = vpop.xlane.xlu0 %1140 }
 0xb0c   :  { %v1145_v50 = vmul.f32 0.03125, %v1141_v49 }
 0xb0e   :  { %v1147_v51 = vadd.f32 1e-05, %v1145_v50 }
 0xb0f   :  { %v1144_v52 = vpop.xlane.xlu0 %1143 }
 0xb10   :  { %11504 = vrsqrt.f32 %v1147_v51  ;;  %v1146_v53 = vmul.f32 0.03125, %v1144_v52  ;;  %v9963_v51 = vld [vmem:[%s13221_s21] ss:$0 sm:$0xff] }
 0xb12   :  { %v1148_v54 = vadd.f32 1e-05, %v1146_v53  ;;  %v1555_v55 = vpop.f32.mrf.mxu0 }
 0xb13   :  { %10714 = vmatprep.mubr.msk.f32.mxu0 %vm388_vm0, %v1555_v55  ;;  %v1769_v55 = vld [vmem:[#allocation22 + $0x10] sm:$0xff] }
 0xb14   :  { %11506 = vrsqrt.f32 %v1148_v54  ;;  %v10700_v56 = vpop.f32.mrf.mxu0  ;;  %v1770_v54 = vld [vmem:[#allocation22 + $0x18] sm:$0xff] }
 0xb15   :  { %10717 = vmatprep.subr.mxu1 %v1770_v54 }
 0xb16   :  { %v1631_v57 = vpop.f32.mrf.mxu1  ;;  %10718 = vmatpush3.msra.mxu1 %v1770_v54 }
 0xb17   :  { %10715 = vmatmul.mubr.msk.f32.vlgmr.msra.gmra.mxu0 %vm388_vm0, %v1631_v57  ;;  %10719 = vmatprep.subr.mxu1 %v1769_v55 }
 0xb18   :  { %v10705_v58 = vpop.f32.mrf.mxu1  ;;  %10729 = vmatpush3.msra.mxu0 %v1862_v30  ;;  %10720 = vmatpush3.msra.mxu1 %v1769_v55 }
 0xb19   :  { %v1768_v58 = vld [vmem:[#allocation22 + $0x8] sm:$0xff] }
 0xb1a   :  { %10721 = vmatprep.subr.mxu1 %v1768_v58 }
 0xb1b   :  { %10722 = vmatpush3.msra.mxu1 %v1768_v58 }
 0xb1d   :  { %v11505_v61 = vpop.eup %11504 }
 0xb1e   :  { %v1151_v62 = vmul.f32 %v11505_v61, %v1135_v40  ;;  %v9964_v61 = vld [vmem:[%s13222_s23] ss:$0 sm:$0xff] }
 0xb20   :  { %v1157_v0 = vmul.f32 %v1156_v60, %v1151_v62  ;;  %v1767_v62 = vld [vmem:[#allocation22] sm:$0xff] }
 0xb21   :  { %v11507_v1 = vpop.eup %11506  ;;  %10723 = vmatprep.subr.mxu1 %v1767_v62 }
 0xb22   :  { %v1163_v3 = vadd.f32 %v1162_v63, %v1157_v0  ;;  %v1152_v2 = vmul.f32 %v11507_v1, %v1136_v39  ;;  %10724 = vmatpush3.msra.mxu1 %v1767_v62  ;;  %v2279_v62 = vld [vmem:[#allocation26] sm:$0xff] }
 0xb23   :  { %10739 = vmatprep.subr.mxu1 %v12132_v6 }
 0xb24   :  { %v1167_v4 = vsel %vm388_vm0, %v1163_v3, 0.0  ;;  %v1158_v5 = vmul.f32 %v1156_v60, %v1152_v2 }
 0xb25   :  { %1168 = vadd.xlane.f32.xlu0 %v1167_v4 }
 0xb26   :  { %v1164_v7 = vadd.f32 %v1162_v63, %v1158_v5 }
 0xb28   :  { %v1170_v8 = vsel %vm388_vm0, %v1164_v7, 0.0 }
 0xb29   :  { %1171 = vadd.xlane.f32.xlu1 %v1170_v8  ;;  %v12511_v8 = vld [vmem:[%s13223_s3] sm:$0x7] }
 0xbae   :  { %v1169_v10 = vpop.xlane.xlu0 %1168 }
 0xbaf   :  { %v1173_v12 = vmul.f32 0.03125, %v1169_v10  ;;  %v1758_v10 = vrot.slane %v12511_v8, %v12410_v21 }
 0xbb1   :  { %v1175_v16 = vsub.f32 %v1163_v3, %v1173_v12 }
 0xbb2   :  { %v1172_v9 = vpop.xlane.xlu1 %1171 }
 0xbb3   :  { %v1174_v22 = vmul.f32 0.03125, %v1172_v9  ;;  %v1177_v27 = vmul.f32 %v1175_v16, %v1175_v16 }
 0xbb5   :  { %v1176_v14 = vsub.f32 %v1164_v7, %v1174_v22  ;;  %v1179_v29 = vsel %vm388_vm0, %v1177_v27, 0.0  ;;  %v12516_v22 = vld [vmem:[%s12290_s24] sm:$0x7] }
 0xbb7   :  { %v1178_v25 = vmul.f32 %v1176_v14, %v1176_v14 }
 0xbb9   :  { %v1182_v28 = vsel %vm388_vm0, %v1178_v25, 0.0 }
 0xbd7   :  { %v10716_v13 = vpop.f32.mrf.mxu0 }
 0xbd8   :  { %v1724_v23 = vadd.f32 %v10716_v13, %v9974_v11 }
 0xbd9   :  { %v1718_v15 = vpop.f32.mrf.mxu0 }
 0xbda   :  { %v1719_v17 = vadd.f32 %v9974_v11, %v1718_v15  ;;  %v1728_v18 = vadd.f32 %v1724_v23, %v12434_v38  ;;  %v1861_v38 = vld [vmem:[#allocation25 + $0x10] sm:$0xff]  ;;  %v1764_v23 = vrot.slane %v12516_v22, %v12410_v21 }
 0xbdb   :  { %10730 = vmatprep.subr.mxu0 %v1861_v38 }
 0xbdc   :  { %v1732_v19 = vsel %vm388_vm0, %v1728_v18, 0.0  ;;  %v1727_v24 = vadd.f32 %v1719_v17, %v12428_v34  ;;  %10731 = vmatpush3.msra.mxu0 %v1861_v38  ;;  %v1859_v34 = vld [vmem:[#allocation25] sm:$0xff] }
 0xbdd   :  { %1733 = vadd.xlane.f32.xlu1 %v1732_v19  ;;  %10732 = vmatprep.subr.mxu0 %v1860_v32 }
 0xbde   :  { %v1729_v26 = vsel %vm388_vm0, %v1727_v24, 0.0  ;;  %10733 = vmatpush3.msra.mxu0 %v1860_v32 }
 0xbdf   :  { %1730 = vadd.xlane.f32.xlu0 %v1729_v26  ;;  %10734 = vmatprep.subr.mxu0 %v1859_v34 }
 0xbe0   :  { %10735 = vmatpush3.msra.mxu0 %v1859_v34 }
 0xbe1   :  { %1183 = vadd.xlane.f32.xlu1 %v1182_v28  ;;  %10749 = vmatprep.subr.mxu0 %v12132_v6  ;;  %v9977_v28 = vld [vmem:[#allocation23] ss:$0 sm:$0xff] }
 0xbe3   :  { %1180 = vadd.xlane.f32.xlu0 %v1179_v29 }
 0xc66   :  { %v1734_v33 = vpop.xlane.xlu1 %1733 }
 0xc67   :  { %v1736_v35 = vmul.f32 0.03125, %v1734_v33 }
 0xc68   :  { %v1731_v36 = vpop.xlane.xlu0 %1730 }
 0xc69   :  { %v1738_v31 = vsub.f32 %v1728_v18, %v1736_v35  ;;  %v1735_v37 = vmul.f32 0.03125, %v1731_v36  ;;  %v9980_v18 = vld [vmem:[%s13224_s26] ss:$0 sm:$0xff] }
 0xc6a   :  { %v1184_v39 = vpop.xlane.xlu1 %1183 }
 0xc6b   :  { %v1737_v40 = vsub.f32 %v1727_v24, %v1735_v37  ;;  %v1186_v41 = vmul.f32 0.03125, %v1184_v39  ;;  %v1740_v42 = vmul.f32 %v1738_v31, %v1738_v31 }
 0xc6c   :  { %v1181_v43 = vpop.xlane.xlu0 %1180 }
 0xc6d   :  { %v1188_v44 = vadd.f32 1e-05, %v1186_v41  ;;  %v1185_v45 = vmul.f32 0.03125, %v1181_v43  ;;  %v1744_v46 = vsel %vm388_vm0, %v1740_v42, 0.0  ;;  %v1739_v47 = vmul.f32 %v1737_v40, %v1737_v40 }
 0xc6e   :  { %1745 = vadd.xlane.f32.xlu1 %v1744_v46 }
 0xc6f   :  { %11508 = vrsqrt.f32 %v1188_v44  ;;  %v1187_v48 = vadd.f32 1e-05, %v1185_v45  ;;  %v1741_v49 = vsel %vm388_vm0, %v1739_v47, 0.0 }
 0xc70   :  { %1742 = vadd.xlane.f32.xlu0 %v1741_v49 }
 0xc71   :  { %11510 = vrsqrt.f32 %v1187_v48 }
 0xc7c   :  { %v11509_v50 = vpop.eup %11508 }
 0xc7d   :  { %v1192_v52 = vmul.f32 %v11509_v50, %v1176_v14 }
 0xc7e   :  { %v11511_v53 = vpop.eup %11510 }
 0xc7f   :  { %v1191_v56 = vmul.f32 %v11511_v53, %v1175_v16  ;;  %v1200_v57 = vmul.f32 %v9963_v51, %v1192_v52 }
 0xc81   :  { %v1199_v60 = vmul.f32 %v9963_v51, %v1191_v56  ;;  %v12501_v0 = vadd.f32 %v9964_v61, %v1200_v57  ;;  %v2282_v51 = vld [vmem:[#allocation26 + $0x18] sm:$0xff]  ;;  %v2281_v57 = vld [vmem:[#allocation26 + $0x10] sm:$0xff] }
 0xc83   :  { %v12499_v63 = vadd.f32 %v9964_v61, %v1199_v60  ;;  %v2280_v61 = vld [vmem:[#allocation26 + $0x8] sm:$0xff] }
 0xc85   :  { %10736 = vmatprep.mubr.msk.f32.mxu0 %vm388_vm0, %v12499_v63 }
 0xc86   :  { %10737 = vmatmul.mubr.msk.f32.vlgmr.msra.gmra.mxu0 %vm388_vm0, %v12501_v0 }
 0xc87   :  { %10751 = vmatprep.mubr.msk.f32.mxu0 %vm12133_vm1, %v12132_v6 }
 0xcf7   :  { %v1746_v1 = vpop.xlane.xlu1 %1745 }
 0xcf8   :  { %v1748_v3 = vmul.f32 0.03125, %v1746_v1 }
 0xcf9   :  { %v1743_v2 = vpop.xlane.xlu0 %1742 }
 0xcfa   :  { %v1750_v4 = vadd.f32 1e-05, %v1748_v3  ;;  %v1747_v5 = vmul.f32 0.03125, %v1743_v2 }
 0xcfc   :  { %11512 = vrsqrt.f32 %v1750_v4  ;;  %v1749_v7 = vadd.f32 1e-05, %v1747_v5  ;;  %v9989_v5 = vld [vmem:[%s13225_s20] ss:$0 sm:$0xff] }
 0xcfe   :  { %11514 = vrsqrt.f32 %v1749_v7 }
 0xd09   :  { %v11513_v9 = vpop.eup %11512 }
 0xd0a   :  { %v1754_v11 = vmul.f32 %v11513_v9, %v1738_v31 }
 0xd0b   :  { %v11515_v12 = vpop.eup %11514 }
 0xd0c   :  { %v1753_v13 = vmul.f32 %v11515_v12, %v1737_v40  ;;  %v1760_v14 = vmul.f32 %v1758_v10, %v1754_v11 }
 0xd0e   :  { %v1759_v15 = vmul.f32 %v1758_v10, %v1753_v13  ;;  %v12522_v17 = vadd.f32 %v1764_v23, %v1760_v14 }
 0xd10   :  { %v12520_v16 = vadd.f32 %v1764_v23, %v1759_v15 }
 0xd12   :  { %10725 = vmatprep.mubr.msk.f32.mxu1 %vm388_vm0, %v12520_v16 }
 0xd13   :  { %10726 = vmatmul.mubr.msk.f32.vlgmr.msra.gmra.mxu1 %vm388_vm0, %v12522_v17 }
 0xd14   :  { %10741 = vmatprep.mubr.msk.f32.mxu1 %vm12133_vm1, %v12132_v6 }
 0xd46   :  { %v10738_v19 = vpop.f32.mrf.mxu0 }
 0xd47   :  { %v1948_v24 = vadd.f32 %v10738_v19, %v9980_v18 }
 0xd48   :  { %v1942_v25 = vpop.f32.mrf.mxu0 }
 0xd49   :  { %v1943_v26 = vadd.f32 %v9980_v18, %v1942_v25 }
 0xd4b   :  { %10740 = vmatpush3.xpose.msk.msra.mxu1 %vm388_vm0, %v1943_v26 }
 0xd4c   :  { %10744 = vmatprep.subr.mxu1 %v12132_v6 }
 0xdd3   :  { %v10727_v27 = vpop.f32.mrf.mxu1 }
 0xdd4   :  { %v1856_v38 = vadd.f32 %v10727_v27, %v9977_v28 }
 0xdd5   :  { %v1850_v29 = vpop.f32.mrf.mxu1 }
 0xdd6   :  { %v1851_v30 = vadd.f32 %v9977_v28, %v1850_v29 }
 0xdd8   :  { %10742 = vmatmul.mubr.msk.f32.vlgmr.msra.gmra.mxu1 %vm388_vm0, %v1851_v30  ;;  %v2414_v30 = vld [vmem:[#allocation28 + $0x18] sm:$0xff] }
 0xdd9   :  { %10745 = vmatpush3.xpose.msk.msra.mxu1 %vm388_vm0, %v1948_v24  ;;  %10746 = vmatprep.mubr.msk.f32.mxu1 %vm12133_vm1, %v12132_v6 }
 0xdda   :  { %10754 = vmatprep.subr.mxu1 %v12132_v6 }
 0xddc   :  { %10747 = vmatmul.mubr.msk.f32.vlgmr.msra.gmra.mxu1 %vm388_vm0, %v1856_v38  ;;  %v2412_v38 = vld [vmem:[#allocation28 + $0x8] sm:$0xff] }
 0xddd   :  { %10756 = vmatprep.mubr.msk.f32.mxu1 %vm12133_vm1, %v12132_v6 }
 0xe98   :  { %v2023_v32 = vpop.f32.mrf.mxu1 }
 0xe99   :  { %v2103_v34 = vmul.f32 0.17677669, %v2023_v32  ;;  %v2411_v32 = vld [vmem:[#allocation28] sm:$0xff] }
 0xe9a   :  { %v10743_v33 = vpop.f32.mrf.mxu1 }
 0xe9b   :  { %v2105_v35 = vsel %vm626_vm2, %v2103_v34, -inf  ;;  %v2511_v33 = vld [vmem:[#allocation29 + $0x30] sm:$0xff] }
 0xe9c   :  { %2106 = vmax.xlane.f32.xlu0 %v2105_v35  ;;  %v2099_v36 = vpop.f32.mrf.mxu1  ;;  %v2510_v35 = vld [vmem:[#allocation29 + $0x28] sm:$0xff] }
 0xe9d   :  { %v2104_v31 = vmul.f32 0.17677669, %v2099_v36  ;;  %v2509_v36 = vld [vmem:[#allocation29 + $0x20] sm:$0xff] }
 0xe9e   :  { %v10748_v37 = vpop.f32.mrf.mxu1 }
 0xe9f   :  { %v2108_v39 = vsel %vm626_vm2, %v2104_v31, -inf }
 0xea0   :  { %2109 = vmax.xlane.f32.xlu1 %v2108_v39 }
 0xf25   :  { %v2107_v40 = vpop.xlane.xlu0 %2106 }
 0xf26   :  { %v2111_v41 = vsub.f32 %v2103_v34, %v2107_v40  ;;  %v2512_v34 = vld [vmem:[#allocation29 + $0x38] sm:$0xff] }
 0xf28   :  { %v2113_v42 = vmul.f32 1.442695, %v2111_v41 }
 0xf29   :  { %v2110_v43 = vpop.xlane.xlu1 %2109 }
 0xf2a   :  { %11516 = vpow2.f32 %v2113_v42  ;;  %v2112_v44 = vsub.f32 %v2104_v31, %v2110_v43 }
 0xf2c   :  { %v2115_v45 = vmul.f32 1.442695, %v2112_v44  ;;  %v2402_v44 = vrot.slane %v12511_v8, %v12480_v59 }
 0xf2e   :  { %11518 = vpow2.f32 %v2115_v45 }
 0xf37   :  { %v11517_v46 = vpop.eup %11516 }
 0xf38   :  { %v2117_v47 = vsel %vm626_vm2, %v11517_v46, 0.0 }
 0xf39   :  { %2118 = vadd.xlane.f32.xlu0 %v2117_v47 }
 0xf3b   :  { %v11519_v48 = vpop.eup %11518 }
 0xf3c   :  { %v2120_v49 = vsel %vm626_vm2, %v11519_v48, 0.0 }
 0xf3d   :  { %2121 = vadd.xlane.f32.xlu1 %v2120_v49  ;;  %v2408_v49 = vrot.slane %v12516_v22, %v12480_v59 }
 0xf4e   :  { %2203 = vrot.lane.b32.xlu1 %v1948_v24, %s12134_s5 }
 0xf4f   :  { %2127 = vrot.lane.b32.xlu0 %v1943_v26, %s12134_s5 }
 0xfc2   :  { %v2119_v50 = vpop.xlane.xlu0 %2118 }
 0xfc3   :  { %11520 = vrcp.f32 %v2119_v50 }
 0xfc6   :  { %v2128_v52 = vpop.permute.xlu0 %2127  ;;  %v2122_v53 = vpop.xlane.xlu1 %2121 }
 0xfc7   :  { %11522 = vrcp.f32 %v2122_v53  ;;  %10750 = vmatpush3.msra.mxu0 %v2128_v52  ;;  %v2508_v53 = vld [vmem:[#allocation29 + $0x18] sm:$0xff] }
 0xfc8   :  { %10759 = vmatprep.subr.mxu0 %v2282_v51 }
 0xfca   :  { %v2204_v54 = vpop.permute.xlu1 %2203 }
 0xfcb   :  { %10755 = vmatpush3.msra.mxu1 %v2204_v54  ;;  %v2507_v54 = vld [vmem:[#allocation29 + $0x10] sm:$0xff] }
 0xfcc   :  { %10770 = vmatprep.subr.mxu1 %v2414_v30 }
 0xfd0   :  { %v11521_v55 = vpop.eup %11520 }
 0xfd1   :  { %v2125_v56 = vmul.f32 %v11521_v55, %v11517_v46  ;;  %v2506_v55 = vld [vmem:[#allocation29 + $0x8] sm:$0xff] }
 0xfd3   :  { %10752 = vmatmul.mubr.msk.f32.vlgmr.msra.gmra.mxu0 %vm626_vm2, %v2125_v56  ;;  %v2505_v56 = vld [vmem:[#allocation29] sm:$0xff] }
 0xfd4   :  { %v11523_v58 = vpop.eup %11522  ;;  %10760 = vmatpush3.msra.mxu0 %v2282_v51 }
 0xfd5   :  { %v2126_v60 = vmul.f32 %v11523_v58, %v11519_v48  ;;  %10761 = vmatprep.subr.mxu0 %v2281_v57 }
 0xfd6   :  { %10762 = vmatpush3.msra.mxu0 %v2281_v57  ;;  %v9992_v57 = vld [vmem:[%s13226_s29] ss:$0 sm:$0xff] }
 0xfd7   :  { %10757 = vmatmul.mubr.msk.f32.vlgmr.msra.gmra.mxu1 %vm626_vm2, %v2126_v60  ;;  %10763 = vmatprep.subr.mxu0 %v2280_v61 }
 0xfd8   :  { %10764 = vmatpush3.msra.mxu0 %v2280_v61  ;;  %10771 = vmatpush3.msra.mxu1 %v2414_v30  ;;  %v2647_v30 = vld [vmem:[#allocation16 + $0x28] sm:$0xff] }
 0xfd9   :  { %10765 = vmatprep.subr.mxu0 %v2279_v62 }
 0xfda   :  { %10766 = vmatpush3.msra.mxu0 %v2279_v62 }
 0xfdb   :  { %10781 = vmatprep.subr.mxu0 %v2512_v34 }
0x1093   :  { %v2199_v1 = vpop.f32.mrf.mxu0 }
0x1094   :  { %10767 = vmatprep.mubr.msk.f32.mxu0 %vm388_vm0, %v2199_v1 }
0x1095   :  { %v10753_v3 = vpop.f32.mrf.mxu0 }
0x1097   :  { %v2275_v2 = vpop.f32.mrf.mxu1 }
0x1098   :  { %10768 = vmatmul.mubr.msk.f32.vlgmr.msra.gmra.mxu0 %vm388_vm0, %v2275_v2  ;;  %v9995_v2 = vld [vmem:[%s13227_s12] ss:$0 sm:$0xff] }
0x1099   :  { %v10758_v4 = vpop.f32.mrf.mxu1  ;;  %10782 = vmatpush3.msra.mxu0 %v2512_v34 }
0x109a   :  { %10783 = vmatprep.subr.mxu0 %v2511_v33 }
0x109b   :  { %10784 = vmatpush3.msra.mxu0 %v2511_v33 }
0x109c   :  { %10785 = vmatprep.subr.mxu0 %v2510_v35 }
0x109d   :  { %10786 = vmatpush3.msra.mxu0 %v2510_v35 }
0x109e   :  { %10787 = vmatprep.subr.mxu0 %v2509_v36 }
0x109f   :  { %10788 = vmatpush3.msra.mxu0 %v2509_v36 }
0x10a0   :  { %10789 = vmatprep.subr.mxu0 %v2508_v53 }
0x10a1   :  { %10790 = vmatpush3.msra.mxu0 %v2508_v53 }
0x10a2   :  { %10791 = vmatprep.subr.mxu0 %v2507_v54 }
0x10a3   :  { %10792 = vmatpush3.msra.mxu0 %v2507_v54 }
0x10a4   :  { %10793 = vmatprep.subr.mxu0 %v2506_v55 }
0x10a5   :  { %10794 = vmatpush3.msra.mxu0 %v2506_v55 }
0x10a6   :  { %10795 = vmatprep.subr.mxu0 %v2505_v56 }
0x10a7   :  { %10796 = vmatpush3.msra.mxu0 %v2505_v56 }
0x10a8   :  { %10821 = vmatprep.subr.mxu0 %v12132_v6 }
0x1158   :  { %v10769_v7 = vpop.f32.mrf.mxu0 }
0x1159   :  { %v2368_v9 = vadd.f32 %v10769_v7, %v9989_v5 }
0x115a   :  { %v2362_v10 = vpop.f32.mrf.mxu0 }
0x115b   :  { %v2363_v11 = vadd.f32 %v9989_v5, %v2362_v10  ;;  %v2372_v12 = vadd.f32 %v2368_v9, %v12522_v17 }
0x115d   :  { %v2376_v13 = vsel %vm388_vm0, %v2372_v12, 0.0  ;;  %v2371_v14 = vadd.f32 %v2363_v11, %v12520_v16  ;;  %v2413_v16 = vld [vmem:[#allocation28 + $0x10] sm:$0xff] }
0x115e   :  { %2377 = vadd.xlane.f32.xlu0 %v2376_v13  ;;  %10772 = vmatprep.subr.mxu1 %v2413_v16 }
0x115f   :  { %v2373_v23 = vsel %vm388_vm0, %v2371_v14, 0.0  ;;  %10773 = vmatpush3.msra.mxu1 %v2413_v16  ;;  %v2646_v16 = vld [vmem:[#allocation16 + $0x20] sm:$0xff] }
0x1160   :  { %2374 = vadd.xlane.f32.xlu1 %v2373_v23  ;;  %10774 = vmatprep.subr.mxu1 %v2412_v38 }
0x1161   :  { %10775 = vmatpush3.msra.mxu1 %v2412_v38 }
0x1162   :  { %10776 = vmatprep.subr.mxu1 %v2411_v32 }
0x1163   :  { %10777 = vmatpush3.msra.mxu1 %v2411_v32 }
0x11e7   :  { %v2378_v15 = vpop.xlane.xlu0 %2377 }
0x11e8   :  { %v2380_v18 = vmul.f32 0.03125, %v2378_v15 }
0x11e9   :  { %v2375_v19 = vpop.xlane.xlu1 %2374 }
0x11ea   :  { %v2382_v24 = vsub.f32 %v2372_v12, %v2380_v18  ;;  %v2379_v25 = vmul.f32 0.03125, %v2375_v19 }
0x11ec   :  { %v2381_v26 = vsub.f32 %v2371_v14, %v2379_v25  ;;  %v2384_v27 = vmul.f32 %v2382_v24, %v2382_v24 }
0x11ee   :  { %v2388_v28 = vsel %vm388_vm0, %v2384_v27, 0.0  ;;  %v2383_v29 = vmul.f32 %v2381_v26, %v2381_v26 }
0x11ef   :  { %2389 = vadd.xlane.f32.xlu1 %v2388_v28 }
0x11f0   :  { %v2385_v17 = vsel %vm388_vm0, %v2383_v29, 0.0  ;;  %v2649_v29 = vld [vmem:[#allocation16 + $0x38] sm:$0xff] }
0x11f1   :  { %2386 = vadd.xlane.f32.xlu0 %v2385_v17  ;;  %v2648_v17 = vld [vmem:[#allocation16 + $0x30] sm:$0xff]  ;;  %10800 = vmatprep.subr.mxu1 %v2649_v29 }
0x1278   :  { %v2390_v31 = vpop.xlane.xlu1 %2389 }
0x1279   :  { %v2392_v37 = vmul.f32 0.03125, %v2390_v31  ;;  %v12577_v31 = vsub.s32 2, %v12407_v20  ;;  %v10000_v20 = vld [vmem:[#allocation17 + $0x1] ss:$0 sm:$0xff] }
0x127a   :  { %v2387_v39 = vpop.xlane.xlu0 %2386 }
0x127b   :  { %v2394_v40 = vadd.f32 1e-05, %v2392_v37  ;;  %v2391_v41 = vmul.f32 0.03125, %v2387_v39  ;;  %v2632_v39 = vrot.slane %v12511_v8, %v12577_v31 }
0x127d   :  { %11524 = vrsqrt.f32 %v2394_v40  ;;  %v2393_v42 = vadd.f32 1e-05, %v2391_v41 }
0x127f   :  { %11526 = vrsqrt.f32 %v2393_v42 }
0x128a   :  { %v11525_v43 = vpop.eup %11524 }
0x128b   :  { %v2398_v45 = vmul.f32 %v11525_v43, %v2382_v24 }
0x128c   :  { %v11527_v46 = vpop.eup %11526 }
0x128d   :  { %v2397_v47 = vmul.f32 %v11527_v46, %v2381_v26  ;;  %v2404_v48 = vmul.f32 %v2402_v44, %v2398_v45 }
0x128f   :  { %v2403_v50 = vmul.f32 %v2402_v44, %v2397_v47  ;;  %v2410_v52 = vadd.f32 %v2408_v49, %v2404_v48  ;;  %v2638_v44 = vrot.slane %v12516_v22, %v12577_v31 }
0x1291   :  { %v2409_v51 = vadd.f32 %v2408_v49, %v2403_v50 }
0x1293   :  { %10778 = vmatprep.mubr.msk.f32.mxu1 %vm388_vm0, %v2409_v51 }
0x1294   :  { %10779 = vmatmul.mubr.msk.f32.vlgmr.msra.gmra.mxu1 %vm388_vm0, %v2410_v52 }
0x1295   :  { %10801 = vmatpush3.msra.mxu1 %v2649_v29 }
0x1296   :  { %10802 = vmatprep.subr.mxu1 %v2648_v17 }
0x1297   :  { %10803 = vmatpush3.msra.mxu1 %v2648_v17 }
0x1298   :  { %10804 = vmatprep.subr.mxu1 %v2647_v30 }
0x1299   :  { %10805 = vmatpush3.msra.mxu1 %v2647_v30 }
0x129a   :  { %10806 = vmatprep.subr.mxu1 %v2646_v16 }
0x129b   :  { %10807 = vmatpush3.msra.mxu1 %v2646_v16  ;;  %v3300_v16 = vld [vmem:[#allocation25 + $0x30] sm:$0xff] }
0x129c   :  { %10811 = vmatprep.subr.mxu1 %v12132_v6 }
0x1354   :  { %v10780_v58 = vpop.f32.mrf.mxu1 }
0x1355   :  { %v2500_v60 = vadd.f32 %v10780_v58, %v9992_v57 }
0x1356   :  { %v2494_v61 = vpop.f32.mrf.mxu1 }
0x1357   :  { %v2495_v62 = vadd.f32 %v9992_v57, %v2494_v61  ;;  %v2504_v3 = vmax.f32 %v2500_v60, 0.0 }
0x1359   :  { %v2503_v1 = vmax.f32 %v2495_v62, 0.0 }
0x135b   :  { %10797 = vmatprep.mubr.msk.f32.mxu0 %vm1043_vm3, %v2503_v1 }
0x135c   :  { %10798 = vmatmul.mubr.msk.f32.vlgmr.msra.gmra.mxu0 %vm1043_vm3, %v2504_v3 }
0x135d   :  { %10823 = vmatprep.mubr.msk.f32.mxu0 %vm12133_vm1, %v12132_v6 }
0x141c   :  { %v10799_v4 = vpop.f32.mrf.mxu0 }
0x141d   :  { %v2598_v5 = vadd.f32 %v10799_v4, %v9995_v2 }
0x141e   :  { %v2592_v7 = vpop.f32.mrf.mxu0 }
0x141f   :  { %v2593_v9 = vadd.f32 %v9995_v2, %v2592_v7  ;;  %v2602_v10 = vadd.f32 %v2598_v5, %v2410_v52 }
0x1421   :  { %v2606_v11 = vsel %vm388_vm0, %v2602_v10, 0.0  ;;  %v2601_v12 = vadd.f32 %v2593_v9, %v2409_v51 }
0x1422   :  { %2607 = vadd.xlane.f32.xlu1 %v2606_v11 }
0x1423   :  { %v2603_v13 = vsel %vm388_vm0, %v2601_v12, 0.0 }
0x1424   :  { %2604 = vadd.xlane.f32.xlu0 %v2603_v13 }
0x14ab   :  { %v2608_v14 = vpop.xlane.xlu1 %2607 }
0x14ac   :  { %v2610_v23 = vmul.f32 0.03125, %v2608_v14 }
0x14ad   :  { %v2605_v15 = vpop.xlane.xlu0 %2604 }
0x14ae   :  { %v2612_v18 = vsub.f32 %v2602_v10, %v2610_v23  ;;  %v2609_v19 = vmul.f32 0.03125, %v2605_v15 }
0x14b0   :  { %v2611_v24 = vsub.f32 %v2601_v12, %v2609_v19  ;;  %v2614_v25 = vmul.f32 %v2612_v18, %v2612_v18  ;;  %v3073_v12 = vld [vmem:[#allocation19 + $0x38] sm:$0xff]  ;;  %v3072_v19 = vld [vmem:[#allocation19 + $0x30] sm:$0xff] }
0x14b2   :  { %v2618_v26 = vsel %vm388_vm0, %v2614_v25, 0.0  ;;  %v2613_v27 = vmul.f32 %v2611_v24, %v2611_v24 }
0x14b3   :  { %2619 = vadd.xlane.f32.xlu1 %v2618_v26  ;;  %v3071_v26 = vld [vmem:[#allocation19 + $0x28] sm:$0xff] }
0x14b4   :  { %v2615_v28 = vsel %vm388_vm0, %v2613_v27, 0.0  ;;  %v3070_v27 = vld [vmem:[#allocation19 + $0x20] sm:$0xff] }
0x14b5   :  { %2616 = vadd.xlane.f32.xlu0 %v2615_v28  ;;  %v3301_v28 = vld [vmem:[#allocation25 + $0x38] sm:$0xff] }
0x153c   :  { %v2620_v38 = vpop.xlane.xlu1 %2619 }
0x153d   :  { %v2622_v32 = vmul.f32 0.03125, %v2620_v38 }
0x153e   :  { %v2617_v34 = vpop.xlane.xlu0 %2616 }
0x153f   :  { %v2624_v33 = vadd.f32 1e-05, %v2622_v32  ;;  %v2621_v35 = vmul.f32 0.03125, %v2617_v34  ;;  %v3299_v32 = vld [vmem:[#allocation25 + $0x28] sm:$0xff]  ;;  %v3298_v34 = vld [vmem:[#allocation25 + $0x20] sm:$0xff] }
0x1541   :  { %11528 = vrsqrt.f32 %v2624_v33  ;;  %v2623_v36 = vadd.f32 1e-05, %v2621_v35  ;;  %v10009_v33 = vld [vmem:[#allocation20 + $0x1] ss:$0 sm:$0xff] }
0x1543   :  { %11530 = vrsqrt.f32 %v2623_v36 }
0x154e   :  { %v11529_v37 = vpop.eup %11528 }
0x154f   :  { %v2628_v40 = vmul.f32 %v11529_v37, %v2612_v18 }
0x1550   :  { %v11531_v41 = vpop.eup %11530 }
0x1551   :  { %v2627_v42 = vmul.f32 %v11531_v41, %v2611_v24  ;;  %v2634_v43 = vmul.f32 %v2632_v39, %v2628_v40 }
0x1553   :  { %v2633_v45 = vmul.f32 %v2632_v39, %v2627_v42  ;;  %v12585_v47 = vadd.f32 %v2638_v44, %v2634_v43  ;;  %v10016_v43 = vld [vmem:[%s13224_s26 + $0x1] ss:$0 sm:$0xff] }
0x1555   :  { %v12583_v46 = vadd.f32 %v2638_v44, %v2633_v45 }
0x1557   :  { %10808 = vmatprep.mubr.msk.f32.mxu1 %vm388_vm0, %v12583_v46 }
0x1558   :  { %10809 = vmatmul.mubr.msk.f32.vlgmr.msra.gmra.mxu1 %vm388_vm0, %v12585_v47 }
0x1559   :  { %10813 = vmatprep.mubr.msk.f32.mxu1 %vm12133_vm1, %v12132_v6 }
0x1618   :  { %v10810_v8 = vpop.f32.mrf.mxu1 }
0x1619   :  { %v2736_v48 = vadd.f32 %v10810_v8, %v10000_v20 }
0x161a   :  { %v2730_v49 = vpop.f32.mrf.mxu1 }
0x161b   :  { %v2731_v50 = vadd.f32 %v10000_v20, %v2730_v49  ;;  %2817 = vrot.lane.b32.xlu1 %v2736_v48, %s12134_s5 }
0x161d   :  { %2740 = vrot.lane.b32.xlu0 %v2731_v50, %s12134_s5 }
0x168d   :  { %v2818_v51 = vpop.permute.xlu1 %2817 }
0x168f   :  { %v2741_v22 = vpop.permute.xlu0 %2740 }
0x1690   :  { %10812 = vmatpush3.xpose.msk.msra.mxu1 %vm388_vm0, %v2741_v22 }
0x1691   :  { %10816 = vmatprep.subr.mxu1 %v12132_v6 }
0x1693   :  { %10814 = vmatmul.mubr.msk.f32.vlgmr.msra.gmra.mxu1 %vm388_vm0, %v2731_v50 }
0x1694   :  { %10817 = vmatpush3.xpose.msk.msra.mxu1 %vm388_vm0, %v2818_v51  ;;  %10818 = vmatprep.mubr.msk.f32.mxu1 %vm12133_vm1, %v12132_v6 }
0x1695   :  { %10826 = vmatprep.subr.mxu1 %v12132_v6 }
0x1697   :  { %10819 = vmatmul.mubr.msk.f32.vlgmr.msra.gmra.mxu1 %vm388_vm0, %v2736_v48 }
0x1698   :  { %10828 = vmatprep.mubr.msk.f32.mxu1 %vm12133_vm1, %v12132_v6 }
0x1753   :  { %v2812_v52 = vpop.f32.mrf.mxu1 }
0x1754   :  { %v2893_v53 = vmul.f32 0.17677669, %v2812_v52 }
0x1755   :  { %v10815_v54 = vpop.f32.mrf.mxu1 }
0x1756   :  { %v2895_v55 = vsel %vm626_vm2, %v2893_v53, -inf  ;;  %v3207_v54 = vld [vmem:[#allocation22 + $0x38] sm:$0xff] }
0x1757   :  { %2896 = vmax.xlane.f32.xlu1 %v2895_v55  ;;  %v2889_v56 = vpop.f32.mrf.mxu1  ;;  %v3206_v55 = vld [vmem:[#allocation22 + $0x30] sm:$0xff] }
0x1758   :  { %v2894_v57 = vmul.f32 0.17677669, %v2889_v56  ;;  %v3205_v56 = vld [vmem:[#allocation22 + $0x28] sm:$0xff] }
0x1759   :  { %v10820_v58 = vpop.f32.mrf.mxu1 }
0x175a   :  { %v2898_v60 = vsel %vm626_vm2, %v2894_v57, -inf }
0x175b   :  { %2899 = vmax.xlane.f32.xlu0 %v2898_v60 }
0x17e0   :  { %v2897_v61 = vpop.xlane.xlu1 %2896 }
0x17e1   :  { %v2901_v62 = vsub.f32 %v2893_v53, %v2897_v61 }
0x17e3   :  { %v2903_v1 = vmul.f32 1.442695, %v2901_v62 }
0x17e4   :  { %v2900_v3 = vpop.xlane.xlu0 %2899 }
0x17e5   :  { %11532 = vpow2.f32 %v2903_v1  ;;  %v2902_v2 = vsub.f32 %v2894_v57, %v2900_v3  ;;  %v3204_v57 = vld [vmem:[#allocation22 + $0x20] sm:$0xff] }
0x17e7   :  { %v2905_v4 = vmul.f32 1.442695, %v2902_v2  ;;  %v12633_v2 = vld [vmem:[%s13223_s3 + $0x4] sm:$0x7] }
0x17e9   :  { %11534 = vpow2.f32 %v2905_v4 }
0x17f2   :  { %v11533_v5 = vpop.eup %11532 }
0x17f3   :  { %v2907_v7 = vsel %vm626_vm2, %v11533_v5, 0.0 }
0x17f4   :  { %2908 = vadd.xlane.f32.xlu0 %v2907_v7  ;;  %v12638_v7 = vld [vmem:[%s12290_s24 + $0x4] sm:$0x7] }
0x17f6   :  { %v11535_v9 = vpop.eup %11534 }
0x17f7   :  { %v2910_v10 = vsel %vm626_vm2, %v11535_v9, 0.0 }
0x17f8   :  { %2911 = vadd.xlane.f32.xlu1 %v2910_v10 }
0x1809   :  { %2993 = vrot.lane.b32.xlu1 %v2736_v48, %s12135_s15 }
0x180a   :  { %2917 = vrot.lane.b32.xlu0 %v2731_v50, %s12135_s15 }
0x187d   :  { %v2909_v11 = vpop.xlane.xlu0 %2908 }
0x187e   :  { %11536 = vrcp.f32 %v2909_v11 }
0x1881   :  { %v2912_v13 = vpop.xlane.xlu1 %2911  ;;  %v2918_v14 = vpop.permute.xlu0 %2917 }
0x1882   :  { %11538 = vrcp.f32 %v2912_v13  ;;  %10822 = vmatpush3.msra.mxu0 %v2918_v14  ;;  %v3200_v13 = vrot.slane %v12638_v7, %v12410_v21 }
0x1883   :  { %10831 = vmatprep.subr.mxu0 %v3073_v12 }
0x1885   :  { %v2994_v23 = vpop.permute.xlu1 %2993 }
0x1886   :  { %10827 = vmatpush3.msra.mxu1 %v2994_v23 }
0x1887   :  { %10842 = vmatprep.subr.mxu1 %v3207_v54 }
0x188b   :  { %v11537_v15 = vpop.eup %11536 }
0x188c   :  { %v2915_v18 = vmul.f32 %v11537_v15, %v11533_v5  ;;  %v3194_v5 = vrot.slane %v12633_v2, %v12410_v21 }
0x188e   :  { %10824 = vmatmul.mubr.msk.f32.vlgmr.msra.gmra.mxu0 %vm626_vm2, %v2915_v18 }
0x188f   :  { %v11539_v24 = vpop.eup %11538  ;;  %10832 = vmatpush3.msra.mxu0 %v3073_v12 }
0x1890   :  { %v2916_v25 = vmul.f32 %v11539_v24, %v11535_v9  ;;  %10833 = vmatprep.subr.mxu0 %v3072_v19 }
0x1891   :  { %10834 = vmatpush3.msra.mxu0 %v3072_v19 }
0x1892   :  { %10829 = vmatmul.mubr.msk.f32.vlgmr.msra.gmra.mxu1 %vm626_vm2, %v2916_v25  ;;  %10835 = vmatprep.subr.mxu0 %v3071_v26  ;;  %v10012_v25 = vld [vmem:[#allocation23 + $0x1] ss:$0 sm:$0xff] }
0x1893   :  { %10836 = vmatpush3.msra.mxu0 %v3071_v26  ;;  %10843 = vmatpush3.msra.mxu1 %v3207_v54  ;;  %v3714_v54 = vld [vmem:[#allocation26 + $0x20] sm:$0xff] }
0x1894   :  { %10837 = vmatprep.subr.mxu0 %v3070_v27  ;;  %10844 = vmatprep.subr.mxu1 %v3206_v55 }
0x1895   :  { %10838 = vmatpush3.msra.mxu0 %v3070_v27  ;;  %10845 = vmatpush3.msra.mxu1 %v3206_v55 }
0x1896   :  { %10853 = vmatprep.subr.mxu0 %v3301_v28  ;;  %10846 = vmatprep.subr.mxu1 %v3205_v56 }
0x1897   :  { %10847 = vmatpush3.msra.mxu1 %v3205_v56 }
0x1898   :  { %10848 = vmatprep.subr.mxu1 %v3204_v57 }
0x1899   :  { %10849 = vmatpush3.msra.mxu1 %v3204_v57 }
0x189a   :  { %10864 = vmatprep.subr.mxu1 %v12132_v6 }
0x194e   :  { %v2989_v29 = vpop.f32.mrf.mxu0 }
0x194f   :  { %10839 = vmatprep.mubr.msk.f32.mxu0 %vm388_vm0, %v2989_v29 }
0x1950   :  { %v10825_v17 = vpop.f32.mrf.mxu0 }
0x1952   :  { %v3065_v30 = vpop.f32.mrf.mxu1 }
0x1953   :  { %10840 = vmatmul.mubr.msk.f32.vlgmr.msra.gmra.mxu0 %vm388_vm0, %v3065_v30 }
0x1954   :  { %10854 = vmatpush3.msra.mxu0 %v3301_v28  ;;  %v10830_v38 = vpop.f32.mrf.mxu1  ;;  %10861 = vmatprep.mubr.msk.f32.mxu0 %vm388_vm0, %v12499_v63 }
0x1955   :  { %10855 = vmatprep.subr.mxu0 %v3300_v16 }
0x1956   :  { %10856 = vmatpush3.msra.mxu0 %v3300_v16 }
0x1957   :  { %10857 = vmatprep.subr.mxu0 %v3299_v32 }
0x1958   :  { %10858 = vmatpush3.msra.mxu0 %v3299_v32 }
0x1959   :  { %10859 = vmatprep.subr.mxu0 %v3298_v34 }
0x195a   :  { %10860 = vmatpush3.msra.mxu0 %v3298_v34 }
0x195b   :  { %10862 = vmatmul.mubr.msk.f32.vlgmr.msra.gmra.mxu0 %vm388_vm0, %v12501_v0  ;;  %10874 = vmatprep.subr.mxu0 %v12132_v6 }
0x195c   :  { %10876 = vmatprep.mubr.msk.f32.mxu0 %vm12133_vm1, %v12132_v6 }
0x1a13   :  { %v10841_v35 = vpop.f32.mrf.mxu0 }
0x1a14   :  { %v3160_v36 = vadd.f32 %v10841_v35, %v10009_v33 }
0x1a15   :  { %v3154_v37 = vpop.f32.mrf.mxu0 }
0x1a16   :  { %v3155_v39 = vadd.f32 %v10009_v33, %v3154_v37  ;;  %v3164_v40 = vadd.f32 %v3160_v36, %v12585_v47 }
0x1a18   :  { %v3168_v41 = vsel %vm388_vm0, %v3164_v40, 0.0  ;;  %v3163_v42 = vadd.f32 %v3155_v39, %v12583_v46 }
0x1a19   :  { %3169 = vadd.xlane.f32.xlu0 %v3168_v41 }
0x1a1a   :  { %v3165_v44 = vsel %vm388_vm0, %v3163_v42, 0.0 }
0x1a1b   :  { %v10863_v45 = vpop.f32.mrf.mxu0  ;;  %3166 = vadd.xlane.f32.xlu1 %v3165_v44 }
0x1a1c   :  { %v12627_v20 = vadd.f32 %v10863_v45, %v10016_v43 }
0x1a1d   :  { %v3376_v23 = vpop.f32.mrf.mxu0 }
0x1a1e   :  { %v3377_v19 = vadd.f32 %v10016_v43, %v3376_v23 }
0x1aa2   :  { %v3170_v8 = vpop.xlane.xlu0 %3169 }
0x1aa3   :  { %v3172_v48 = vmul.f32 0.03125, %v3170_v8 }
0x1aa4   :  { %v3167_v49 = vpop.xlane.xlu1 %3166 }
0x1aa5   :  { %v3174_v50 = vsub.f32 %v3164_v40, %v3172_v48  ;;  %v3171_v22 = vmul.f32 0.03125, %v3167_v49  ;;  %v3717_v48 = vld [vmem:[#allocation26 + $0x38] sm:$0xff] }
0x1aa7   :  { %v3173_v51 = vsub.f32 %v3163_v42, %v3171_v22  ;;  %v3176_v52 = vmul.f32 %v3174_v50, %v3174_v50 }
0x1aa9   :  { %v3180_v47 = vsel %vm388_vm0, %v3176_v52, 0.0  ;;  %v3175_v53 = vmul.f32 %v3173_v51, %v3173_v51 }
0x1aaa   :  { %3181 = vadd.xlane.f32.xlu1 %v3180_v47  ;;  %v3716_v47 = vld [vmem:[#allocation26 + $0x30] sm:$0xff] }
0x1aab   :  { %v3177_v46 = vsel %vm388_vm0, %v3175_v53, 0.0 }
0x1aac   :  { %3178 = vadd.xlane.f32.xlu0 %v3177_v46  ;;  %v3715_v46 = vld [vmem:[#allocation26 + $0x28] sm:$0xff] }
0x1b33   :  { %v3182_v58 = vpop.xlane.xlu1 %3181 }
0x1b34   :  { %v3184_v60 = vmul.f32 0.03125, %v3182_v58 }
0x1b35   :  { %v3179_v61 = vpop.xlane.xlu0 %3178 }
0x1b36   :  { %v3186_v62 = vadd.f32 1e-05, %v3184_v60  ;;  %v3183_v1 = vmul.f32 0.03125, %v3179_v61  ;;  %v10026_v60 = vld [vmem:[%s13225_s20 + $0x1] ss:$0 sm:$0xff] }
0x1b38   :  { %11540 = vrsqrt.f32 %v3186_v62  ;;  %v3185_v3 = vadd.f32 1e-05, %v3183_v1 }
0x1b3a   :  { %11542 = vrsqrt.f32 %v3185_v3 }
0x1b45   :  { %v11541_v4 = vpop.eup %11540 }
0x1b46   :  { %v3190_v9 = vmul.f32 %v11541_v4, %v3174_v50 }
0x1b47   :  { %v11543_v10 = vpop.eup %11542 }
0x1b48   :  { %v3189_v11 = vmul.f32 %v11543_v10, %v3173_v51  ;;  %v3196_v12 = vmul.f32 %v3194_v5, %v3190_v9 }
0x1b4a   :  { %v3195_v14 = vmul.f32 %v3194_v5, %v3189_v11  ;;  %v12644_v18 = vadd.f32 %v3200_v13, %v3196_v12 }
0x1b4c   :  { %v12642_v15 = vadd.f32 %v3200_v13, %v3195_v14 }
0x1b4e   :  { %10850 = vmatprep.mubr.msk.f32.mxu1 %vm388_vm0, %v12642_v15 }
0x1b4f   :  { %10851 = vmatmul.mubr.msk.f32.vlgmr.msra.gmra.mxu1 %vm388_vm0, %v12644_v18 }
0x1b50   :  { %10865 = vmatpush3.xpose.msk.msra.mxu1 %vm388_vm0, %v3377_v19  ;;  %10866 = vmatprep.mubr.msk.f32.mxu1 %vm12133_vm1, %v12132_v6 }
0x1b51   :  { %10869 = vmatprep.subr.mxu1 %v12132_v6 }
0x1c0f   :  { %v10852_v24 = vpop.f32.mrf.mxu1 }
0x1c10   :  { %v3294_v28 = vadd.f32 %v10852_v24, %v10012_v25 }
0x1c11   :  { %v3288_v26 = vpop.f32.mrf.mxu1 }
0x1c12   :  { %v3289_v27 = vadd.f32 %v10012_v25, %v3288_v26 }
0x1c14   :  { %10867 = vmatmul.mubr.msk.f32.vlgmr.msra.gmra.mxu1 %vm388_vm0, %v3289_v27  ;;  %v3851_v27 = vld [vmem:[#allocation28 + $0x38] sm:$0xff] }
0x1c15   :  { %10870 = vmatpush3.xpose.msk.msra.mxu1 %vm388_vm0, %v12627_v20  ;;  %10871 = vmatprep.mubr.msk.f32.mxu1 %vm12133_vm1, %v12132_v6 }
0x1c16   :  { %10879 = vmatprep.subr.mxu1 %v12132_v6 }
0x1c18   :  { %10872 = vmatmul.mubr.msk.f32.vlgmr.msra.gmra.mxu1 %vm388_vm0, %v3294_v28  ;;  %v3849_v28 = vld [vmem:[#allocation28 + $0x28] sm:$0xff] }
0x1c19   :  { %10881 = vmatprep.mubr.msk.f32.mxu1 %vm12133_vm1, %v12132_v6 }
0x1cd4   :  { %v3457_v29 = vpop.f32.mrf.mxu1 }
0x1cd5   :  { %v3537_v17 = vmul.f32 0.17677669, %v3457_v29  ;;  %v3848_v29 = vld [vmem:[#allocation28 + $0x20] sm:$0xff] }
0x1cd6   :  { %v10868_v30 = vpop.f32.mrf.mxu1 }
0x1cd7   :  { %v3539_v16 = vsel %vm626_vm2, %v3537_v17, -inf  ;;  %v3950_v30 = vld [vmem:[#allocation29 + $0x70] sm:$0xff] }
0x1cd8   :  { %3540 = vmax.xlane.f32.xlu0 %v3539_v16  ;;  %v3533_v38 = vpop.f32.mrf.mxu1  ;;  %v3949_v16 = vld [vmem:[#allocation29 + $0x68] sm:$0xff] }
0x1cd9   :  { %v3538_v32 = vmul.f32 0.17677669, %v3533_v38  ;;  %v3948_v38 = vld [vmem:[#allocation29 + $0x60] sm:$0xff] }
0x1cda   :  { %v10873_v34 = vpop.f32.mrf.mxu1 }
0x1cdb   :  { %v3542_v33 = vsel %vm626_vm2, %v3538_v32, -inf }
0x1cdc   :  { %3543 = vmax.xlane.f32.xlu1 %v3542_v33 }
0x1d61   :  { %v3541_v35 = vpop.xlane.xlu0 %3540 }
0x1d62   :  { %v3545_v36 = vsub.f32 %v3537_v17, %v3541_v35  ;;  %v3951_v17 = vld [vmem:[#allocation29 + $0x78] sm:$0xff] }
0x1d64   :  { %v3547_v37 = vmul.f32 1.442695, %v3545_v36 }
0x1d65   :  { %v3544_v39 = vpop.xlane.xlu1 %3543 }
0x1d66   :  { %11544 = vpow2.f32 %v3547_v37  ;;  %v3546_v40 = vsub.f32 %v3538_v32, %v3544_v39 }
0x1d68   :  { %v3549_v41 = vmul.f32 1.442695, %v3546_v40  ;;  %v3838_v40 = vrot.slane %v12633_v2, %v12480_v59 }
0x1d6a   :  { %11546 = vpow2.f32 %v3549_v41 }
0x1d73   :  { %v11545_v42 = vpop.eup %11544 }
0x1d74   :  { %v3551_v43 = vsel %vm626_vm2, %v11545_v42, 0.0 }
0x1d75   :  { %3552 = vadd.xlane.f32.xlu0 %v3551_v43 }
0x1d77   :  { %v11547_v44 = vpop.eup %11546 }
0x1d78   :  { %v3554_v45 = vsel %vm626_vm2, %v11547_v44, 0.0 }
0x1d79   :  { %3555 = vadd.xlane.f32.xlu1 %v3554_v45  ;;  %v3844_v45 = vrot.slane %v12638_v7, %v12480_v59 }
0x1d8a   :  { %3637 = vrot.lane.b32.xlu1 %v12627_v20, %s12134_s5 }
0x1d8b   :  { %3561 = vrot.lane.b32.xlu0 %v3377_v19, %s12134_s5 }
0x1dfe   :  { %v3553_v8 = vpop.xlane.xlu0 %3552 }
0x1dff   :  { %11548 = vrcp.f32 %v3553_v8 }
0x1e02   :  { %v3562_v49 = vpop.permute.xlu0 %3561  ;;  %v3556_v50 = vpop.xlane.xlu1 %3555 }
0x1e03   :  { %11550 = vrcp.f32 %v3556_v50  ;;  %10875 = vmatpush3.msra.mxu0 %v3562_v49  ;;  %v3947_v50 = vld [vmem:[#allocation29 + $0x58] sm:$0xff] }
0x1e04   :  { %10884 = vmatprep.subr.mxu0 %v3717_v48 }
0x1e06   :  { %v3638_v22 = vpop.permute.xlu1 %3637 }
0x1e07   :  { %10880 = vmatpush3.msra.mxu1 %v3638_v22  ;;  %v3946_v22 = vld [vmem:[#allocation29 + $0x50] sm:$0xff] }
0x1e08   :  { %10895 = vmatprep.subr.mxu1 %v3851_v27 }
0x1e0c   :  { %v11549_v51 = vpop.eup %11548 }
0x1e0d   :  { %v3559_v52 = vmul.f32 %v11549_v51, %v11545_v42  ;;  %v3945_v51 = vld [vmem:[#allocation29 + $0x48] sm:$0xff] }
0x1e0f   :  { %10877 = vmatmul.mubr.msk.f32.vlgmr.msra.gmra.mxu0 %vm626_vm2, %v3559_v52  ;;  %v3944_v52 = vld [vmem:[#allocation29 + $0x40] sm:$0xff] }
0x1e10   :  { %v11551_v53 = vpop.eup %11550  ;;  %10885 = vmatpush3.msra.mxu0 %v3717_v48 }
0x1e11   :  { %v3560_v20 = vmul.f32 %v11551_v53, %v11547_v44  ;;  %10886 = vmatprep.subr.mxu0 %v3716_v47 }
0x1e12   :  { %10887 = vmatpush3.msra.mxu0 %v3716_v47  ;;  %v10030_v47 = vld [vmem:[%s13226_s29 + $0x1] ss:$0 sm:$0xff] }
0x1e13   :  { %10882 = vmatmul.mubr.msk.f32.vlgmr.msra.gmra.mxu1 %vm626_vm2, %v3560_v20  ;;  %10888 = vmatprep.subr.mxu0 %v3715_v46 }
0x1e14   :  { %10889 = vmatpush3.msra.mxu0 %v3715_v46  ;;  %10896 = vmatpush3.msra.mxu1 %v3851_v27  ;;  %v4087_v27 = vld [vmem:[#allocation16 + $0x48] sm:$0xff] }
0x1e15   :  { %10890 = vmatprep.subr.mxu0 %v3714_v54 }
0x1e16   :  { %10891 = vmatpush3.msra.mxu0 %v3714_v54 }
0x1e17   :  { %10906 = vmatprep.subr.mxu0 %v3951_v17 }
0x1ecf   :  { %v3633_v55 = vpop.f32.mrf.mxu0 }
0x1ed0   :  { %10892 = vmatprep.mubr.msk.f32.mxu0 %vm388_vm0, %v3633_v55 }
0x1ed1   :  { %v10878_v56 = vpop.f32.mrf.mxu0 }
0x1ed3   :  { %v3709_v57 = vpop.f32.mrf.mxu1 }
0x1ed4   :  { %10893 = vmatmul.mubr.msk.f32.vlgmr.msra.gmra.mxu0 %vm388_vm0, %v3709_v57  ;;  %v10034_v57 = vld [vmem:[%s13227_s12 + $0x1] ss:$0 sm:$0xff] }
0x1ed5   :  { %v10883_v58 = vpop.f32.mrf.mxu1  ;;  %10907 = vmatpush3.msra.mxu0 %v3951_v17 }
0x1ed6   :  { %10908 = vmatprep.subr.mxu0 %v3950_v30 }
0x1ed7   :  { %10909 = vmatpush3.msra.mxu0 %v3950_v30 }
0x1ed8   :  { %10910 = vmatprep.subr.mxu0 %v3949_v16 }
0x1ed9   :  { %10911 = vmatpush3.msra.mxu0 %v3949_v16 }
0x1eda   :  { %10912 = vmatprep.subr.mxu0 %v3948_v38 }
0x1edb   :  { %10913 = vmatpush3.msra.mxu0 %v3948_v38 }
0x1edc   :  { %10914 = vmatprep.subr.mxu0 %v3947_v50 }
0x1edd   :  { %10915 = vmatpush3.msra.mxu0 %v3947_v50 }
0x1ede   :  { %10916 = vmatprep.subr.mxu0 %v3946_v22 }
0x1edf   :  { %10917 = vmatpush3.msra.mxu0 %v3946_v22 }
0x1ee0   :  { %10918 = vmatprep.subr.mxu0 %v3945_v51 }
0x1ee1   :  { %10919 = vmatpush3.msra.mxu0 %v3945_v51 }
0x1ee2   :  { %10920 = vmatprep.subr.mxu0 %v3944_v52 }
0x1ee3   :  { %10921 = vmatpush3.msra.mxu0 %v3944_v52 }
0x1ee4   :  { %10946 = vmatprep.subr.mxu0 %v12132_v6 }
0x1f94   :  { %v10894_v61 = vpop.f32.mrf.mxu0 }
0x1f95   :  { %v3804_v62 = vadd.f32 %v10894_v61, %v10026_v60 }
0x1f96   :  { %v3798_v1 = vpop.f32.mrf.mxu0 }
0x1f97   :  { %v3799_v3 = vadd.f32 %v10026_v60, %v3798_v1  ;;  %v3808_v4 = vadd.f32 %v3804_v62, %v12644_v18 }
0x1f99   :  { %v3812_v5 = vsel %vm388_vm0, %v3808_v4, 0.0  ;;  %v3807_v9 = vadd.f32 %v3799_v3, %v12642_v15  ;;  %v3850_v15 = vld [vmem:[#allocation28 + $0x30] sm:$0xff] }
0x1f9a   :  { %3813 = vadd.xlane.f32.xlu0 %v3812_v5  ;;  %10897 = vmatprep.subr.mxu1 %v3850_v15 }
0x1f9b   :  { %v3809_v10 = vsel %vm388_vm0, %v3807_v9, 0.0  ;;  %10898 = vmatpush3.msra.mxu1 %v3850_v15  ;;  %v4086_v15 = vld [vmem:[#allocation16 + $0x40] sm:$0xff] }
0x1f9c   :  { %3810 = vadd.xlane.f32.xlu1 %v3809_v10  ;;  %10899 = vmatprep.subr.mxu1 %v3849_v28 }
0x1f9d   :  { %10900 = vmatpush3.msra.mxu1 %v3849_v28 }
0x1f9e   :  { %10901 = vmatprep.subr.mxu1 %v3848_v29 }
0x1f9f   :  { %10902 = vmatpush3.msra.mxu1 %v3848_v29 }
0x2023   :  { %v3814_v11 = vpop.xlane.xlu0 %3813 }
0x2024   :  { %v3816_v12 = vmul.f32 0.03125, %v3814_v11 }
0x2025   :  { %v3811_v13 = vpop.xlane.xlu1 %3810 }
0x2026   :  { %v3818_v14 = vsub.f32 %v3808_v4, %v3816_v12  ;;  %v3815_v23 = vmul.f32 0.03125, %v3811_v13 }
0x2028   :  { %v3817_v19 = vsub.f32 %v3807_v9, %v3815_v23  ;;  %v3820_v24 = vmul.f32 %v3818_v14, %v3818_v14 }
0x202a   :  { %v3824_v25 = vsel %vm388_vm0, %v3820_v24, 0.0  ;;  %v3819_v26 = vmul.f32 %v3817_v19, %v3817_v19 }
0x202b   :  { %3825 = vadd.xlane.f32.xlu1 %v3824_v25 }
0x202c   :  { %v3821_v18 = vsel %vm388_vm0, %v3819_v26, 0.0  ;;  %v4089_v26 = vld [vmem:[#allocation16 + $0x58] sm:$0xff] }
0x202d   :  { %3822 = vadd.xlane.f32.xlu0 %v3821_v18  ;;  %v4088_v18 = vld [vmem:[#allocation16 + $0x50] sm:$0xff]  ;;  %10925 = vmatprep.subr.mxu1 %v4089_v26 }
0x20b4   :  { %v3826_v32 = vpop.xlane.xlu1 %3825 }
0x20b5   :  { %v3828_v34 = vmul.f32 0.03125, %v3826_v32 }
0x20b6   :  { %v3823_v33 = vpop.xlane.xlu0 %3822 }
0x20b7   :  { %v3830_v35 = vadd.f32 1e-05, %v3828_v34  ;;  %v3827_v36 = vmul.f32 0.03125, %v3823_v33  ;;  %v4072_v34 = vrot.slane %v12633_v2, %v12577_v31  ;;  %v10039_v2 = vld [vmem:[#allocation17 + $0x2] ss:$0 sm:$0xff] }
0x20b9   :  { %11552 = vrsqrt.f32 %v3830_v35  ;;  %v3829_v37 = vadd.f32 1e-05, %v3827_v36 }
0x20bb   :  { %11554 = vrsqrt.f32 %v3829_v37 }
0x20c6   :  { %v11553_v39 = vpop.eup %11552 }
0x20c7   :  { %v3834_v41 = vmul.f32 %v11553_v39, %v3818_v14  ;;  %v4078_v39 = vrot.slane %v12638_v7, %v12577_v31 }
0x20c8   :  { %v11555_v42 = vpop.eup %11554 }
0x20c9   :  { %v3833_v43 = vmul.f32 %v11555_v42, %v3817_v19  ;;  %v3840_v44 = vmul.f32 %v3838_v40, %v3834_v41 }
0x20cb   :  { %v3839_v8 = vmul.f32 %v3838_v40, %v3833_v43  ;;  %v3846_v49 = vadd.f32 %v3844_v45, %v3840_v44 }
0x20cd   :  { %v3845_v48 = vadd.f32 %v3844_v45, %v3839_v8 }
0x20cf   :  { %10903 = vmatprep.mubr.msk.f32.mxu1 %vm388_vm0, %v3845_v48 }
0x20d0   :  { %10904 = vmatmul.mubr.msk.f32.vlgmr.msra.gmra.mxu1 %vm388_vm0, %v3846_v49 }
0x20d1   :  { %10926 = vmatpush3.msra.mxu1 %v4089_v26 }
0x20d2   :  { %10927 = vmatprep.subr.mxu1 %v4088_v18 }
0x20d3   :  { %10928 = vmatpush3.msra.mxu1 %v4088_v18 }
0x20d4   :  { %10929 = vmatprep.subr.mxu1 %v4087_v27 }
0x20d5   :  { %10930 = vmatpush3.msra.mxu1 %v4087_v27 }
0x20d6   :  { %10931 = vmatprep.subr.mxu1 %v4086_v15 }
0x20d7   :  { %10932 = vmatpush3.msra.mxu1 %v4086_v15  ;;  %v4740_v15 = vld [vmem:[#allocation25 + $0x50] sm:$0xff] }
0x20d8   :  { %10936 = vmatprep.subr.mxu1 %v12132_v6 }
0x2190   :  { %v10905_v53 = vpop.f32.mrf.mxu1 }
0x2191   :  { %v3938_v20 = vadd.f32 %v10905_v53, %v10030_v47 }
0x2192   :  { %v3932_v46 = vpop.f32.mrf.mxu1 }
0x2193   :  { %v3933_v54 = vadd.f32 %v10030_v47, %v3932_v46  ;;  %v3942_v56 = vmax.f32 %v3938_v20, 0.0 }
0x2195   :  { %v3941_v55 = vmax.f32 %v3933_v54, 0.0 }
0x2197   :  { %10922 = vmatprep.mubr.msk.f32.mxu0 %vm1043_vm3, %v3941_v55 }
0x2198   :  { %10923 = vmatmul.mubr.msk.f32.vlgmr.msra.gmra.mxu0 %vm1043_vm3, %v3942_v56 }
0x2199   :  { %10948 = vmatprep.mubr.msk.f32.mxu0 %vm12133_vm1, %v12132_v6 }
0x2258   :  { %v10924_v58 = vpop.f32.mrf.mxu0 }
0x2259   :  { %v4038_v60 = vadd.f32 %v10924_v58, %v10034_v57 }
0x225a   :  { %v4032_v61 = vpop.f32.mrf.mxu0 }
0x225b   :  { %v4033_v62 = vadd.f32 %v10034_v57, %v4032_v61  ;;  %v4042_v1 = vadd.f32 %v4038_v60, %v3846_v49 }
0x225d   :  { %v4046_v3 = vsel %vm388_vm0, %v4042_v1, 0.0  ;;  %v4041_v4 = vadd.f32 %v4033_v62, %v3845_v48 }
0x225e   :  { %4047 = vadd.xlane.f32.xlu1 %v4046_v3 }
0x225f   :  { %v4043_v5 = vsel %vm388_vm0, %v4041_v4, 0.0 }
0x2260   :  { %4044 = vadd.xlane.f32.xlu0 %v4043_v5 }
0x22e7   :  { %v4048_v9 = vpop.xlane.xlu1 %4047 }
0x22e8   :  { %v4050_v10 = vmul.f32 0.03125, %v4048_v9 }
0x22e9   :  { %v4045_v11 = vpop.xlane.xlu0 %4044 }
0x22ea   :  { %v4052_v12 = vsub.f32 %v4042_v1, %v4050_v10  ;;  %v4049_v13 = vmul.f32 0.03125, %v4045_v11 }
0x22ec   :  { %v4051_v14 = vsub.f32 %v4041_v4, %v4049_v13  ;;  %v4054_v23 = vmul.f32 %v4052_v12, %v4052_v12  ;;  %v4513_v4 = vld [vmem:[#allocation19 + $0x58] sm:$0xff]  ;;  %v4512_v13 = vld [vmem:[#allocation19 + $0x50] sm:$0xff] }
0x22ee   :  { %v4058_v19 = vsel %vm388_vm0, %v4054_v23, 0.0  ;;  %v4053_v24 = vmul.f32 %v4051_v14, %v4051_v14 }
0x22ef   :  { %4059 = vadd.xlane.f32.xlu1 %v4058_v19  ;;  %v4511_v19 = vld [vmem:[#allocation19 + $0x48] sm:$0xff] }
0x22f0   :  { %v4055_v25 = vsel %vm388_vm0, %v4053_v24, 0.0  ;;  %v4510_v24 = vld [vmem:[#allocation19 + $0x40] sm:$0xff] }
0x22f1   :  { %4056 = vadd.xlane.f32.xlu0 %v4055_v25  ;;  %v4741_v25 = vld [vmem:[#allocation25 + $0x58] sm:$0xff] }
0x2378   :  { %v4060_v28 = vpop.xlane.xlu1 %4059 }
0x2379   :  { %v4062_v29 = vmul.f32 0.03125, %v4060_v28 }
0x237a   :  { %v4057_v17 = vpop.xlane.xlu0 %4056 }
0x237b   :  { %v4064_v30 = vadd.f32 1e-05, %v4062_v29  ;;  %v4061_v16 = vmul.f32 0.03125, %v4057_v17  ;;  %v4739_v29 = vld [vmem:[#allocation25 + $0x48] sm:$0xff]  ;;  %v4738_v17 = vld [vmem:[#allocation25 + $0x40] sm:$0xff] }
0x237d   :  { %11556 = vrsqrt.f32 %v4064_v30  ;;  %v4063_v38 = vadd.f32 1e-05, %v4061_v16  ;;  %v10048_v30 = vld [vmem:[#allocation20 + $0x2] ss:$0 sm:$0xff] }
0x237f   :  { %11558 = vrsqrt.f32 %v4063_v38 }
0x238a   :  { %v11557_v32 = vpop.eup %11556 }
0x238b   :  { %v4068_v33 = vmul.f32 %v11557_v32, %v4052_v12 }
0x238c   :  { %v11559_v35 = vpop.eup %11558 }
0x238d   :  { %v4067_v36 = vmul.f32 %v11559_v35, %v4051_v14  ;;  %v4074_v37 = vmul.f32 %v4072_v34, %v4068_v33 }
0x238f   :  { %v4073_v40 = vmul.f32 %v4072_v34, %v4067_v36  ;;  %v12705_v42 = vadd.f32 %v4078_v39, %v4074_v37  ;;  %v10055_v37 = vld [vmem:[%s13224_s26 + $0x2] ss:$0 sm:$0xff] }
0x2391   :  { %v12703_v41 = vadd.f32 %v4078_v39, %v4073_v40 }
0x2393   :  { %10933 = vmatprep.mubr.msk.f32.mxu1 %vm388_vm0, %v12703_v41 }
0x2394   :  { %10934 = vmatmul.mubr.msk.f32.vlgmr.msra.gmra.mxu1 %vm388_vm0, %v12705_v42 }
0x2395   :  { %10938 = vmatprep.mubr.msk.f32.mxu1 %vm12133_vm1, %v12132_v6 }
0x2454   :  { %v10935_v43 = vpop.f32.mrf.mxu1 }
0x2455   :  { %v4176_v44 = vadd.f32 %v10935_v43, %v10039_v2 }
0x2456   :  { %v4170_v45 = vpop.f32.mrf.mxu1 }
0x2457   :  { %v4171_v8 = vadd.f32 %v10039_v2, %v4170_v45  ;;  %4257 = vrot.lane.b32.xlu1 %v4176_v44, %s12134_s5 }
0x2459   :  { %4180 = vrot.lane.b32.xlu0 %v4171_v8, %s12134_s5 }
0x24c9   :  { %v4258_v48 = vpop.permute.xlu1 %4257 }
0x24cb   :  { %v4181_v7 = vpop.permute.xlu0 %4180 }
0x24cc   :  { %10937 = vmatpush3.xpose.msk.msra.mxu1 %vm388_vm0, %v4181_v7 }
0x24cd   :  { %10941 = vmatprep.subr.mxu1 %v12132_v6 }
0x24cf   :  { %10939 = vmatmul.mubr.msk.f32.vlgmr.msra.gmra.mxu1 %vm388_vm0, %v4171_v8 }
0x24d0   :  { %10942 = vmatpush3.xpose.msk.msra.mxu1 %vm388_vm0, %v4258_v48  ;;  %10943 = vmatprep.mubr.msk.f32.mxu1 %vm12133_vm1, %v12132_v6 }
0x24d1   :  { %10951 = vmatprep.subr.mxu1 %v12132_v6 }
0x24d3   :  { %10944 = vmatmul.mubr.msk.f32.vlgmr.msra.gmra.mxu1 %vm388_vm0, %v4176_v44 }
0x24d4   :  { %10953 = vmatprep.mubr.msk.f32.mxu1 %vm12133_vm1, %v12132_v6 }
0x258f   :  { %v4252_v49 = vpop.f32.mrf.mxu1 }
0x2590   :  { %v4333_v50 = vmul.f32 0.17677669, %v4252_v49 }
0x2591   :  { %v10940_v22 = vpop.f32.mrf.mxu1 }
0x2592   :  { %v4335_v51 = vsel %vm626_vm2, %v4333_v50, -inf  ;;  %v4647_v22 = vld [vmem:[#allocation22 + $0x58] sm:$0xff] }
0x2593   :  { %4336 = vmax.xlane.f32.xlu1 %v4335_v51  ;;  %v4329_v52 = vpop.f32.mrf.mxu1  ;;  %v4646_v51 = vld [vmem:[#allocation22 + $0x50] sm:$0xff] }
0x2594   :  { %v4334_v47 = vmul.f32 0.17677669, %v4329_v52  ;;  %v4645_v52 = vld [vmem:[#allocation22 + $0x48] sm:$0xff] }
0x2595   :  { %v10945_v53 = vpop.f32.mrf.mxu1 }
0x2596   :  { %v4338_v20 = vsel %vm626_vm2, %v4334_v47, -inf }
0x2597   :  { %4339 = vmax.xlane.f32.xlu0 %v4338_v20 }
0x261c   :  { %v4337_v46 = vpop.xlane.xlu1 %4336 }
0x261d   :  { %v4341_v54 = vsub.f32 %v4333_v50, %v4337_v46 }
0x261f   :  { %v4343_v55 = vmul.f32 1.442695, %v4341_v54 }
0x2620   :  { %v4340_v56 = vpop.xlane.xlu0 %4339 }
0x2621   :  { %11560 = vpow2.f32 %v4343_v55  ;;  %v4342_v57 = vsub.f32 %v4334_v47, %v4340_v56  ;;  %v4644_v47 = vld [vmem:[#allocation22 + $0x40] sm:$0xff] }
0x2623   :  { %v4345_v58 = vmul.f32 1.442695, %v4342_v57  ;;  %v12753_v57 = vld [vmem:[%s13223_s3 + $0x8] sm:$0x7] }
0x2625   :  { %11562 = vpow2.f32 %v4345_v58 }
0x262e   :  { %v11561_v60 = vpop.eup %11560 }
0x262f   :  { %v4347_v61 = vsel %vm626_vm2, %v11561_v60, 0.0 }
0x2630   :  { %4348 = vadd.xlane.f32.xlu0 %v4347_v61  ;;  %v12758_v61 = vld [vmem:[%s12290_s24 + $0x8] sm:$0x7] }
0x2632   :  { %v11563_v62 = vpop.eup %11562 }
0x2633   :  { %v4350_v1 = vsel %vm626_vm2, %v11563_v62, 0.0 }
0x2634   :  { %4351 = vadd.xlane.f32.xlu1 %v4350_v1 }
0x2645   :  { %4433 = vrot.lane.b32.xlu1 %v4176_v44, %s12135_s15 }
0x2646   :  { %4357 = vrot.lane.b32.xlu0 %v4171_v8, %s12135_s15 }
0x26b9   :  { %v4349_v3 = vpop.xlane.xlu0 %4348 }
0x26ba   :  { %11564 = vrcp.f32 %v4349_v3 }
0x26bd   :  { %v4352_v5 = vpop.xlane.xlu1 %4351  ;;  %v4358_v9 = vpop.permute.xlu0 %4357 }
0x26be   :  { %11566 = vrcp.f32 %v4352_v5  ;;  %10947 = vmatpush3.msra.mxu0 %v4358_v9  ;;  %v4640_v5 = vrot.slane %v12758_v61, %v12410_v21 }
0x26bf   :  { %10956 = vmatprep.subr.mxu0 %v4513_v4 }
0x26c1   :  { %v4434_v10 = vpop.permute.xlu1 %4433 }
0x26c2   :  { %10952 = vmatpush3.msra.mxu1 %v4434_v10 }
0x26c3   :  { %10967 = vmatprep.subr.mxu1 %v4647_v22 }
0x26c7   :  { %v11565_v11 = vpop.eup %11564 }
0x26c8   :  { %v4355_v12 = vmul.f32 %v11565_v11, %v11561_v60  ;;  %v4634_v60 = vrot.slane %v12753_v57, %v12410_v21 }
0x26ca   :  { %10949 = vmatmul.mubr.msk.f32.vlgmr.msra.gmra.mxu0 %vm626_vm2, %v4355_v12 }
0x26cb   :  { %v11567_v14 = vpop.eup %11566  ;;  %10957 = vmatpush3.msra.mxu0 %v4513_v4 }
0x26cc   :  { %v4356_v23 = vmul.f32 %v11567_v14, %v11563_v62  ;;  %10958 = vmatprep.subr.mxu0 %v4512_v13 }
0x26cd   :  { %10959 = vmatpush3.msra.mxu0 %v4512_v13 }
0x26ce   :  { %10954 = vmatmul.mubr.msk.f32.vlgmr.msra.gmra.mxu1 %vm626_vm2, %v4356_v23  ;;  %10960 = vmatprep.subr.mxu0 %v4511_v19  ;;  %v10051_v23 = vld [vmem:[#allocation23 + $0x2] ss:$0 sm:$0xff] }
0x26cf   :  { %10961 = vmatpush3.msra.mxu0 %v4511_v19  ;;  %10968 = vmatpush3.msra.mxu1 %v4647_v22  ;;  %v5154_v22 = vld [vmem:[#allocation26 + $0x40] sm:$0xff] }
0x26d0   :  { %10962 = vmatprep.subr.mxu0 %v4510_v24  ;;  %10969 = vmatprep.subr.mxu1 %v4646_v51 }
0x26d1   :  { %10963 = vmatpush3.msra.mxu0 %v4510_v24  ;;  %10970 = vmatpush3.msra.mxu1 %v4646_v51 }
0x26d2   :  { %10978 = vmatprep.subr.mxu0 %v4741_v25  ;;  %10971 = vmatprep.subr.mxu1 %v4645_v52 }
0x26d3   :  { %10972 = vmatpush3.msra.mxu1 %v4645_v52 }
0x26d4   :  { %10973 = vmatprep.subr.mxu1 %v4644_v47 }
0x26d5   :  { %10974 = vmatpush3.msra.mxu1 %v4644_v47 }
0x26d6   :  { %10989 = vmatprep.subr.mxu1 %v12132_v6 }
0x278a   :  { %v4429_v26 = vpop.f32.mrf.mxu0 }
0x278b   :  { %10964 = vmatprep.mubr.msk.f32.mxu0 %vm388_vm0, %v4429_v26 }
0x278c   :  { %v10950_v18 = vpop.f32.mrf.mxu0 }
0x278e   :  { %v4505_v27 = vpop.f32.mrf.mxu1 }
0x278f   :  { %10965 = vmatmul.mubr.msk.f32.vlgmr.msra.gmra.mxu0 %vm388_vm0, %v4505_v27 }
0x2790   :  { %10979 = vmatpush3.msra.mxu0 %v4741_v25  ;;  %v10955_v28 = vpop.f32.mrf.mxu1  ;;  %10986 = vmatprep.mubr.msk.f32.mxu0 %vm388_vm0, %v12499_v63 }
0x2791   :  { %10980 = vmatprep.subr.mxu0 %v4740_v15 }
0x2792   :  { %10981 = vmatpush3.msra.mxu0 %v4740_v15 }
0x2793   :  { %10982 = vmatprep.subr.mxu0 %v4739_v29 }
0x2794   :  { %10983 = vmatpush3.msra.mxu0 %v4739_v29 }
0x2795   :  { %10984 = vmatprep.subr.mxu0 %v4738_v17 }
0x2796   :  { %10985 = vmatpush3.msra.mxu0 %v4738_v17 }
0x2797   :  { %10987 = vmatmul.mubr.msk.f32.vlgmr.msra.gmra.mxu0 %vm388_vm0, %v12501_v0  ;;  %10999 = vmatprep.subr.mxu0 %v12132_v6 }
0x2798   :  { %11001 = vmatprep.mubr.msk.f32.mxu0 %vm12133_vm1, %v12132_v6 }
0x284f   :  { %v10966_v16 = vpop.f32.mrf.mxu0 }
0x2850   :  { %v4600_v38 = vadd.f32 %v10966_v16, %v10048_v30 }
0x2851   :  { %v4594_v32 = vpop.f32.mrf.mxu0 }
0x2852   :  { %v4595_v34 = vadd.f32 %v10048_v30, %v4594_v32  ;;  %v4604_v33 = vadd.f32 %v4600_v38, %v12705_v42 }
0x2854   :  { %v4608_v35 = vsel %vm388_vm0, %v4604_v33, 0.0  ;;  %v4603_v36 = vadd.f32 %v4595_v34, %v12703_v41 }
0x2855   :  { %4609 = vadd.xlane.f32.xlu0 %v4608_v35 }
0x2856   :  { %v4605_v39 = vsel %vm388_vm0, %v4603_v36, 0.0 }
0x2857   :  { %v10988_v40 = vpop.f32.mrf.mxu0  ;;  %4606 = vadd.xlane.f32.xlu1 %v4605_v39 }
0x2858   :  { %v12747_v2 = vadd.f32 %v10988_v40, %v10055_v37 }
0x2859   :  { %v4816_v10 = vpop.f32.mrf.mxu0 }
0x285a   :  { %v4817_v13 = vadd.f32 %v10055_v37, %v4816_v10 }
0x28de   :  { %v4610_v43 = vpop.xlane.xlu0 %4609 }
0x28df   :  { %v4612_v44 = vmul.f32 0.03125, %v4610_v43 }
0x28e0   :  { %v4607_v45 = vpop.xlane.xlu1 %4606 }
0x28e1   :  { %v4614_v8 = vsub.f32 %v4604_v33, %v4612_v44  ;;  %v4611_v7 = vmul.f32 0.03125, %v4607_v45  ;;  %v5157_v44 = vld [vmem:[#allocation26 + $0x58] sm:$0xff] }
0x28e3   :  { %v4613_v48 = vsub.f32 %v4603_v36, %v4611_v7  ;;  %v4616_v49 = vmul.f32 %v4614_v8, %v4614_v8 }
0x28e5   :  { %v4620_v42 = vsel %vm388_vm0, %v4616_v49, 0.0  ;;  %v4615_v50 = vmul.f32 %v4613_v48, %v4613_v48 }
0x28e6   :  { %4621 = vadd.xlane.f32.xlu1 %v4620_v42  ;;  %v5156_v42 = vld [vmem:[#allocation26 + $0x50] sm:$0xff] }
0x28e7   :  { %v4617_v41 = vsel %vm388_vm0, %v4615_v50, 0.0 }
0x28e8   :  { %4618 = vadd.xlane.f32.xlu0 %v4617_v41  ;;  %v5155_v41 = vld [vmem:[#allocation26 + $0x48] sm:$0xff] }
0x296f   :  { %v4622_v53 = vpop.xlane.xlu1 %4621 }
0x2970   :  { %v4624_v20 = vmul.f32 0.03125, %v4622_v53 }
0x2971   :  { %v4619_v46 = vpop.xlane.xlu0 %4618 }
0x2972   :  { %v4626_v54 = vadd.f32 1e-05, %v4624_v20  ;;  %v4623_v55 = vmul.f32 0.03125, %v4619_v46  ;;  %v10065_v20 = vld [vmem:[%s13225_s20 + $0x2] ss:$0 sm:$0xff] }
0x2974   :  { %11568 = vrsqrt.f32 %v4626_v54  ;;  %v4625_v56 = vadd.f32 1e-05, %v4623_v55 }
0x2976   :  { %11570 = vrsqrt.f32 %v4625_v56 }
0x2981   :  { %v11569_v58 = vpop.eup %11568 }
0x2982   :  { %v4630_v62 = vmul.f32 %v11569_v58, %v4614_v8 }
0x2983   :  { %v11571_v1 = vpop.eup %11570 }
0x2984   :  { %v4629_v3 = vmul.f32 %v11571_v1, %v4613_v48  ;;  %v4636_v4 = vmul.f32 %v4634_v60, %v4630_v62 }
0x2986   :  { %v4635_v9 = vmul.f32 %v4634_v60, %v4629_v3  ;;  %v12764_v12 = vadd.f32 %v4640_v5, %v4636_v4 }
0x2988   :  { %v12762_v11 = vadd.f32 %v4640_v5, %v4635_v9 }
0x298a   :  { %10975 = vmatprep.mubr.msk.f32.mxu1 %vm388_vm0, %v12762_v11 }
0x298b   :  { %10976 = vmatmul.mubr.msk.f32.vlgmr.msra.gmra.mxu1 %vm388_vm0, %v12764_v12 }
0x298c   :  { %10990 = vmatpush3.xpose.msk.msra.mxu1 %vm388_vm0, %v4817_v13  ;;  %10991 = vmatprep.mubr.msk.f32.mxu1 %vm12133_vm1, %v12132_v6 }
0x298d   :  { %10994 = vmatprep.subr.mxu1 %v12132_v6 }
0x2a4b   :  { %v10977_v14 = vpop.f32.mrf.mxu1 }
0x2a4c   :  { %v4734_v25 = vadd.f32 %v10977_v14, %v10051_v23 }
0x2a4d   :  { %v4728_v19 = vpop.f32.mrf.mxu1 }
0x2a4e   :  { %v4729_v24 = vadd.f32 %v10051_v23, %v4728_v19 }
0x2a50   :  { %10992 = vmatmul.mubr.msk.f32.vlgmr.msra.gmra.mxu1 %vm388_vm0, %v4729_v24  ;;  %v5291_v24 = vld [vmem:[#allocation28 + $0x58] sm:$0xff] }
0x2a51   :  { %10995 = vmatpush3.xpose.msk.msra.mxu1 %vm388_vm0, %v12747_v2  ;;  %10996 = vmatprep.mubr.msk.f32.mxu1 %vm12133_vm1, %v12132_v6 }
0x2a52   :  { %11004 = vmatprep.subr.mxu1 %v12132_v6 }
0x2a54   :  { %10997 = vmatmul.mubr.msk.f32.vlgmr.msra.gmra.mxu1 %vm388_vm0, %v4734_v25  ;;  %v5289_v25 = vld [vmem:[#allocation28 + $0x48] sm:$0xff] }
0x2a55   :  { %11006 = vmatprep.mubr.msk.f32.mxu1 %vm12133_vm1, %v12132_v6 }
0x2b10   :  { %v4897_v26 = vpop.f32.mrf.mxu1 }
0x2b11   :  { %v4977_v18 = vmul.f32 0.17677669, %v4897_v26  ;;  %v5288_v26 = vld [vmem:[#allocation28 + $0x40] sm:$0xff] }
0x2b12   :  { %v10993_v27 = vpop.f32.mrf.mxu1 }
0x2b13   :  { %v4979_v15 = vsel %vm626_vm2, %v4977_v18, -inf  ;;  %v5390_v27 = vld [vmem:[#allocation29 + $0xb0] sm:$0xff] }
0x2b14   :  { %4980 = vmax.xlane.f32.xlu0 %v4979_v15  ;;  %v4973_v28 = vpop.f32.mrf.mxu1  ;;  %v5389_v15 = vld [vmem:[#allocation29 + $0xa8] sm:$0xff] }
0x2b15   :  { %v4978_v29 = vmul.f32 0.17677669, %v4973_v28  ;;  %v5388_v28 = vld [vmem:[#allocation29 + $0xa0] sm:$0xff] }
0x2b16   :  { %v10998_v17 = vpop.f32.mrf.mxu1 }
0x2b17   :  { %v4982_v30 = vsel %vm626_vm2, %v4978_v29, -inf }
0x2b18   :  { %4983 = vmax.xlane.f32.xlu1 %v4982_v30 }
0x2b9d   :  { %v4981_v16 = vpop.xlane.xlu0 %4980 }
0x2b9e   :  { %v4985_v38 = vsub.f32 %v4977_v18, %v4981_v16  ;;  %v5391_v18 = vld [vmem:[#allocation29 + $0xb8] sm:$0xff] }
0x2ba0   :  { %v4987_v32 = vmul.f32 1.442695, %v4985_v38 }
0x2ba1   :  { %v4984_v34 = vpop.xlane.xlu1 %4983 }
0x2ba2   :  { %11572 = vpow2.f32 %v4987_v32  ;;  %v4986_v33 = vsub.f32 %v4978_v29, %v4984_v34 }
0x2ba4   :  { %v4989_v35 = vmul.f32 1.442695, %v4986_v33  ;;  %v5278_v33 = vrot.slane %v12753_v57, %v12480_v59 }
0x2ba6   :  { %11574 = vpow2.f32 %v4989_v35 }
0x2baf   :  { %v11573_v36 = vpop.eup %11572 }
0x2bb0   :  { %v4991_v37 = vsel %vm626_vm2, %v11573_v36, 0.0 }
0x2bb1   :  { %4992 = vadd.xlane.f32.xlu0 %v4991_v37 }
0x2bb3   :  { %v11575_v39 = vpop.eup %11574 }
0x2bb4   :  { %v4994_v40 = vsel %vm626_vm2, %v11575_v39, 0.0 }
0x2bb5   :  { %4995 = vadd.xlane.f32.xlu1 %v4994_v40  ;;  %v5284_v40 = vrot.slane %v12758_v61, %v12480_v59 }
0x2bc6   :  { %5077 = vrot.lane.b32.xlu1 %v12747_v2, %s12134_s5 }
0x2bc7   :  { %5001 = vrot.lane.b32.xlu0 %v4817_v13, %s12134_s5 }
0x2c3a   :  { %v4993_v43 = vpop.xlane.xlu0 %4992 }
0x2c3b   :  { %11576 = vrcp.f32 %v4993_v43 }
0x2c3e   :  { %v5002_v45 = vpop.permute.xlu0 %5001  ;;  %v4996_v8 = vpop.xlane.xlu1 %4995 }
0x2c3f   :  { %11578 = vrcp.f32 %v4996_v8  ;;  %11000 = vmatpush3.msra.mxu0 %v5002_v45  ;;  %v5387_v8 = vld [vmem:[#allocation29 + $0x98] sm:$0xff] }
0x2c40   :  { %11009 = vmatprep.subr.mxu0 %v5157_v44 }
0x2c42   :  { %v5078_v7 = vpop.permute.xlu1 %5077 }
0x2c43   :  { %11005 = vmatpush3.msra.mxu1 %v5078_v7  ;;  %v5386_v7 = vld [vmem:[#allocation29 + $0x90] sm:$0xff] }
0x2c44   :  { %11020 = vmatprep.subr.mxu1 %v5291_v24 }
0x2c48   :  { %v11577_v48 = vpop.eup %11576 }
0x2c49   :  { %v4999_v49 = vmul.f32 %v11577_v48, %v11573_v36  ;;  %v5385_v48 = vld [vmem:[#allocation29 + $0x88] sm:$0xff] }
0x2c4b   :  { %11002 = vmatmul.mubr.msk.f32.vlgmr.msra.gmra.mxu0 %vm626_vm2, %v4999_v49  ;;  %v5384_v49 = vld [vmem:[#allocation29 + $0x80] sm:$0xff] }
0x2c4c   :  { %v11579_v50 = vpop.eup %11578  ;;  %11010 = vmatpush3.msra.mxu0 %v5157_v44 }
0x2c4d   :  { %v5000_v2 = vmul.f32 %v11579_v50, %v11575_v39  ;;  %11011 = vmatprep.subr.mxu0 %v5156_v42 }
0x2c4e   :  { %11012 = vmatpush3.msra.mxu0 %v5156_v42  ;;  %v10069_v42 = vld [vmem:[%s13226_s29 + $0x2] ss:$0 sm:$0xff] }
0x2c4f   :  { %11007 = vmatmul.mubr.msk.f32.vlgmr.msra.gmra.mxu1 %vm626_vm2, %v5000_v2  ;;  %11013 = vmatprep.subr.mxu0 %v5155_v41 }
0x2c50   :  { %11014 = vmatpush3.msra.mxu0 %v5155_v41  ;;  %11021 = vmatpush3.msra.mxu1 %v5291_v24  ;;  %v5527_v24 = vld [vmem:[#allocation16 + $0x68] sm:$0xff] }
0x2c51   :  { %11015 = vmatprep.subr.mxu0 %v5154_v22 }
0x2c52   :  { %11016 = vmatpush3.msra.mxu0 %v5154_v22 }
0x2c53   :  { %11031 = vmatprep.subr.mxu0 %v5391_v18 }
0x2d0b   :  { %v5073_v51 = vpop.f32.mrf.mxu0 }
0x2d0c   :  { %11017 = vmatprep.mubr.msk.f32.mxu0 %vm388_vm0, %v5073_v51 }
0x2d0d   :  { %v11003_v52 = vpop.f32.mrf.mxu0 }
0x2d0f   :  { %v5149_v47 = vpop.f32.mrf.mxu1 }
0x2d10   :  { %11018 = vmatmul.mubr.msk.f32.vlgmr.msra.gmra.mxu0 %vm388_vm0, %v5149_v47  ;;  %v10073_v47 = vld [vmem:[%s13227_s12 + $0x2] ss:$0 sm:$0xff] }
0x2d11   :  { %v11008_v53 = vpop.f32.mrf.mxu1  ;;  %11032 = vmatpush3.msra.mxu0 %v5391_v18 }
0x2d12   :  { %11033 = vmatprep.subr.mxu0 %v5390_v27 }
0x2d13   :  { %11034 = vmatpush3.msra.mxu0 %v5390_v27 }
0x2d14   :  { %11035 = vmatprep.subr.mxu0 %v5389_v15 }
0x2d15   :  { %11036 = vmatpush3.msra.mxu0 %v5389_v15 }
0x2d16   :  { %11037 = vmatprep.subr.mxu0 %v5388_v28 }
0x2d17   :  { %11038 = vmatpush3.msra.mxu0 %v5388_v28 }
0x2d18   :  { %11039 = vmatprep.subr.mxu0 %v5387_v8 }
0x2d19   :  { %11040 = vmatpush3.msra.mxu0 %v5387_v8 }
0x2d1a   :  { %11041 = vmatprep.subr.mxu0 %v5386_v7 }
0x2d1b   :  { %11042 = vmatpush3.msra.mxu0 %v5386_v7 }
0x2d1c   :  { %11043 = vmatprep.subr.mxu0 %v5385_v48 }
0x2d1d   :  { %11044 = vmatpush3.msra.mxu0 %v5385_v48 }
0x2d1e   :  { %11045 = vmatprep.subr.mxu0 %v5384_v49 }
0x2d1f   :  { %11046 = vmatpush3.msra.mxu0 %v5384_v49 }
0x2d20   :  { %11071 = vmatprep.subr.mxu0 %v12132_v6 }
0x2dd0   :  { %v11019_v46 = vpop.f32.mrf.mxu0 }
0x2dd1   :  { %v5244_v54 = vadd.f32 %v11019_v46, %v10065_v20 }
0x2dd2   :  { %v5238_v55 = vpop.f32.mrf.mxu0 }
0x2dd3   :  { %v5239_v56 = vadd.f32 %v10065_v20, %v5238_v55  ;;  %v5248_v58 = vadd.f32 %v5244_v54, %v12764_v12 }
0x2dd5   :  { %v5252_v60 = vsel %vm388_vm0, %v5248_v58, 0.0  ;;  %v5247_v62 = vadd.f32 %v5239_v56, %v12762_v11  ;;  %v5290_v11 = vld [vmem:[#allocation28 + $0x50] sm:$0xff] }
0x2dd6   :  { %5253 = vadd.xlane.f32.xlu0 %v5252_v60  ;;  %11022 = vmatprep.subr.mxu1 %v5290_v11 }
0x2dd7   :  { %v5249_v1 = vsel %vm388_vm0, %v5247_v62, 0.0  ;;  %11023 = vmatpush3.msra.mxu1 %v5290_v11  ;;  %v5526_v11 = vld [vmem:[#allocation16 + $0x60] sm:$0xff] }
0x2dd8   :  { %5250 = vadd.xlane.f32.xlu1 %v5249_v1  ;;  %11024 = vmatprep.subr.mxu1 %v5289_v25 }
0x2dd9   :  { %11025 = vmatpush3.msra.mxu1 %v5289_v25 }
0x2dda   :  { %11026 = vmatprep.subr.mxu1 %v5288_v26 }
0x2ddb   :  { %11027 = vmatpush3.msra.mxu1 %v5288_v26 }
0x2e5f   :  { %v5254_v3 = vpop.xlane.xlu0 %5253 }
0x2e60   :  { %v5256_v4 = vmul.f32 0.03125, %v5254_v3 }
0x2e61   :  { %v5251_v5 = vpop.xlane.xlu1 %5250 }
0x2e62   :  { %v5258_v9 = vsub.f32 %v5248_v58, %v5256_v4  ;;  %v5255_v10 = vmul.f32 0.03125, %v5251_v5 }
0x2e64   :  { %v5257_v13 = vsub.f32 %v5247_v62, %v5255_v10  ;;  %v5260_v14 = vmul.f32 %v5258_v9, %v5258_v9 }
0x2e66   :  { %v5264_v23 = vsel %vm388_vm0, %v5260_v14, 0.0  ;;  %v5259_v19 = vmul.f32 %v5257_v13, %v5257_v13 }
0x2e67   :  { %5265 = vadd.xlane.f32.xlu1 %v5264_v23 }
0x2e68   :  { %v5261_v12 = vsel %vm388_vm0, %v5259_v19, 0.0  ;;  %v5529_v19 = vld [vmem:[#allocation16 + $0x78] sm:$0xff] }
0x2e69   :  { %5262 = vadd.xlane.f32.xlu0 %v5261_v12  ;;  %v5528_v12 = vld [vmem:[#allocation16 + $0x70] sm:$0xff]  ;;  %11050 = vmatprep.subr.mxu1 %v5529_v19 }
0x2ef0   :  { %v5266_v29 = vpop.xlane.xlu1 %5265 }
0x2ef1   :  { %v5268_v17 = vmul.f32 0.03125, %v5266_v29 }
0x2ef2   :  { %v5263_v30 = vpop.xlane.xlu0 %5262 }
0x2ef3   :  { %v5270_v16 = vadd.f32 1e-05, %v5268_v17  ;;  %v5267_v38 = vmul.f32 0.03125, %v5263_v30  ;;  %v5512_v17 = vrot.slane %v12753_v57, %v12577_v31  ;;  %v10078_v57 = vld [vmem:[#allocation17 + $0x3] ss:$0 sm:$0xff] }
0x2ef5   :  { %11580 = vrsqrt.f32 %v5270_v16  ;;  %v5269_v32 = vadd.f32 1e-05, %v5267_v38 }
0x2ef7   :  { %11582 = vrsqrt.f32 %v5269_v32 }
0x2f02   :  { %v11581_v34 = vpop.eup %11580 }
0x2f03   :  { %v5274_v35 = vmul.f32 %v11581_v34, %v5258_v9  ;;  %v5518_v34 = vrot.slane %v12758_v61, %v12577_v31 }
0x2f04   :  { %v11583_v36 = vpop.eup %11582 }
0x2f05   :  { %v5273_v37 = vmul.f32 %v11583_v36, %v5257_v13  ;;  %v5280_v39 = vmul.f32 %v5278_v33, %v5274_v35 }
0x2f07   :  { %v5279_v43 = vmul.f32 %v5278_v33, %v5273_v37  ;;  %v5286_v45 = vadd.f32 %v5284_v40, %v5280_v39 }
0x2f09   :  { %v5285_v44 = vadd.f32 %v5284_v40, %v5279_v43 }
0x2f0b   :  { %11028 = vmatprep.mubr.msk.f32.mxu1 %vm388_vm0, %v5285_v44 }
0x2f0c   :  { %11029 = vmatmul.mubr.msk.f32.vlgmr.msra.gmra.mxu1 %vm388_vm0, %v5286_v45 }
0x2f0d   :  { %11051 = vmatpush3.msra.mxu1 %v5529_v19 }
0x2f0e   :  { %11052 = vmatprep.subr.mxu1 %v5528_v12 }
0x2f0f   :  { %11053 = vmatpush3.msra.mxu1 %v5528_v12 }
0x2f10   :  { %11054 = vmatprep.subr.mxu1 %v5527_v24 }
0x2f11   :  { %11055 = vmatpush3.msra.mxu1 %v5527_v24 }
0x2f12   :  { %11056 = vmatprep.subr.mxu1 %v5526_v11 }
0x2f13   :  { %11057 = vmatpush3.msra.mxu1 %v5526_v11  ;;  %v6180_v11 = vld [vmem:[#allocation25 + $0x70] sm:$0xff] }
0x2f14   :  { %11061 = vmatprep.subr.mxu1 %v12132_v6 }
0x2fcc   :  { %v11030_v50 = vpop.f32.mrf.mxu1 }
0x2fcd   :  { %v5378_v2 = vadd.f32 %v11030_v50, %v10069_v42 }
0x2fce   :  { %v5372_v41 = vpop.f32.mrf.mxu1 }
0x2fcf   :  { %v5373_v22 = vadd.f32 %v10069_v42, %v5372_v41  ;;  %v5382_v52 = vmax.f32 %v5378_v2, 0.0 }
0x2fd1   :  { %v5381_v51 = vmax.f32 %v5373_v22, 0.0 }
0x2fd3   :  { %11047 = vmatprep.mubr.msk.f32.mxu0 %vm1043_vm3, %v5381_v51 }
0x2fd4   :  { %11048 = vmatmul.mubr.msk.f32.vlgmr.msra.gmra.mxu0 %vm1043_vm3, %v5382_v52 }
0x2fd5   :  { %11073 = vmatprep.mubr.msk.f32.mxu0 %vm12133_vm1, %v12132_v6 }
0x3094   :  { %v11049_v53 = vpop.f32.mrf.mxu0 }
0x3095   :  { %v5478_v20 = vadd.f32 %v11049_v53, %v10073_v47 }
0x3096   :  { %v5472_v46 = vpop.f32.mrf.mxu0 }
0x3097   :  { %v5473_v54 = vadd.f32 %v10073_v47, %v5472_v46  ;;  %v5482_v55 = vadd.f32 %v5478_v20, %v5286_v45 }
0x3099   :  { %v5481_v56 = vadd.f32 %v5473_v54, %v5285_v44  ;;  %v5486_v58 = vsel %vm388_vm0, %v5482_v55, 0.0 }
0x309a   :  { %5487 = vadd.xlane.f32.xlu1 %v5486_v58  ;;  %v5953_v58 = vld [vmem:[#allocation19 + $0x78] sm:$0xff] }
0x309b   :  { %v5483_v60 = vsel %vm388_vm0, %v5481_v56, 0.0 }
0x309c   :  { %5484 = vadd.xlane.f32.xlu0 %v5483_v60 }
0x3123   :  { %v5488_v62 = vpop.xlane.xlu1 %5487 }
0x3124   :  { %v5490_v1 = vmul.f32 0.03125, %v5488_v62 }
0x3125   :  { %v5485_v3 = vpop.xlane.xlu0 %5484 }
0x3126   :  { %v5492_v4 = vsub.f32 %v5482_v55, %v5490_v1  ;;  %v5489_v5 = vmul.f32 0.03125, %v5485_v3 }
0x3128   :  { %v5491_v9 = vsub.f32 %v5481_v56, %v5489_v5  ;;  %v5494_v10 = vmul.f32 %v5492_v4, %v5492_v4  ;;  %v5952_v5 = vld [vmem:[#allocation19 + $0x70] sm:$0xff] }
0x312a   :  { %v5498_v13 = vsel %vm388_vm0, %v5494_v10, 0.0  ;;  %v5493_v14 = vmul.f32 %v5491_v9, %v5491_v9 }
0x312b   :  { %5499 = vadd.xlane.f32.xlu1 %v5498_v13  ;;  %v5951_v13 = vld [vmem:[#allocation19 + $0x68] sm:$0xff] }
0x312c   :  { %v5495_v23 = vsel %vm388_vm0, %v5493_v14, 0.0  ;;  %v5950_v14 = vld [vmem:[#allocation19 + $0x60] sm:$0xff] }
0x312d   :  { %5496 = vadd.xlane.f32.xlu0 %v5495_v23  ;;  %v6181_v23 = vld [vmem:[#allocation25 + $0x78] sm:$0xff] }
0x31b4   :  { %v5500_v25 = vpop.xlane.xlu1 %5499 }
0x31b5   :  { %v5502_v26 = vmul.f32 0.03125, %v5500_v25 }
0x31b6   :  { %v5497_v18 = vpop.xlane.xlu0 %5496 }
0x31b7   :  { %v5504_v27 = vadd.f32 1e-05, %v5502_v26  ;;  %v5501_v15 = vmul.f32 0.03125, %v5497_v18  ;;  %v6179_v26 = vld [vmem:[#allocation25 + $0x68] sm:$0xff]  ;;  %v6178_v18 = vld [vmem:[#allocation25 + $0x60] sm:$0xff] }
0x31b9   :  { %11584 = vrsqrt.f32 %v5504_v27  ;;  %v5503_v28 = vadd.f32 1e-05, %v5501_v15  ;;  %v10087_v27 = vld [vmem:[#allocation20 + $0x3] ss:$0 sm:$0xff] }
0x31bb   :  { %11586 = vrsqrt.f32 %v5503_v28 }
0x31c6   :  { %v11585_v29 = vpop.eup %11584 }
0x31c7   :  { %v5508_v30 = vmul.f32 %v11585_v29, %v5492_v4 }
0x31c8   :  { %v11587_v16 = vpop.eup %11586 }
0x31c9   :  { %v5507_v38 = vmul.f32 %v11587_v16, %v5491_v9  ;;  %v5514_v32 = vmul.f32 %v5512_v17, %v5508_v30 }
0x31cb   :  { %v5513_v33 = vmul.f32 %v5512_v17, %v5507_v38  ;;  %v12825_v36 = vadd.f32 %v5518_v34, %v5514_v32  ;;  %v10094_v32 = vld [vmem:[%s13224_s26 + $0x3] ss:$0 sm:$0xff] }
0x31cd   :  { %v12823_v35 = vadd.f32 %v5518_v34, %v5513_v33 }
0x31cf   :  { %11058 = vmatprep.mubr.msk.f32.mxu1 %vm388_vm0, %v12823_v35 }
0x31d0   :  { %11059 = vmatmul.mubr.msk.f32.vlgmr.msra.gmra.mxu1 %vm388_vm0, %v12825_v36 }
0x31d1   :  { %11063 = vmatprep.mubr.msk.f32.mxu1 %vm12133_vm1, %v12132_v6 }
0x3290   :  { %v11060_v37 = vpop.f32.mrf.mxu1 }
0x3291   :  { %v5616_v39 = vadd.f32 %v11060_v37, %v10078_v57 }
0x3292   :  { %v5610_v40 = vpop.f32.mrf.mxu1 }
0x3293   :  { %v5611_v43 = vadd.f32 %v10078_v57, %v5610_v40  ;;  %5697 = vrot.lane.b32.xlu1 %v5616_v39, %s12134_s5 }
0x3295   :  { %5620 = vrot.lane.b32.xlu0 %v5611_v43, %s12134_s5 }
0x3305   :  { %v5698_v44 = vpop.permute.xlu1 %5697 }
0x3307   :  { %v5621_v61 = vpop.permute.xlu0 %5620 }
0x3308   :  { %11062 = vmatpush3.xpose.msk.msra.mxu1 %vm388_vm0, %v5621_v61 }
0x3309   :  { %11066 = vmatprep.subr.mxu1 %v12132_v6 }
0x330b   :  { %11064 = vmatmul.mubr.msk.f32.vlgmr.msra.gmra.mxu1 %vm388_vm0, %v5611_v43 }
0x330c   :  { %11067 = vmatpush3.xpose.msk.msra.mxu1 %vm388_vm0, %v5698_v44  ;;  %11068 = vmatprep.mubr.msk.f32.mxu1 %vm12133_vm1, %v12132_v6 }
0x330d   :  { %11076 = vmatprep.subr.mxu1 %v12132_v6 }
0x330f   :  { %11069 = vmatmul.mubr.msk.f32.vlgmr.msra.gmra.mxu1 %vm388_vm0, %v5616_v39 }
0x3310   :  { %11078 = vmatprep.mubr.msk.f32.mxu1 %vm12133_vm1, %v12132_v6 }
0x33cb   :  { %v5692_v45 = vpop.f32.mrf.mxu1 }
0x33cc   :  { %v5773_v8 = vmul.f32 0.17677669, %v5692_v45 }
0x33cd   :  { %v11065_v7 = vpop.f32.mrf.mxu1 }
0x33ce   :  { %v5775_v48 = vsel %vm626_vm2, %v5773_v8, -inf  ;;  %v6087_v7 = vld [vmem:[#allocation22 + $0x78] sm:$0xff] }
0x33cf   :  { %5776 = vmax.xlane.f32.xlu1 %v5775_v48  ;;  %v5769_v49 = vpop.f32.mrf.mxu1  ;;  %v6086_v48 = vld [vmem:[#allocation22 + $0x70] sm:$0xff] }
0x33d0   :  { %v5774_v42 = vmul.f32 0.17677669, %v5769_v49  ;;  %v6085_v49 = vld [vmem:[#allocation22 + $0x68] sm:$0xff] }
0x33d1   :  { %v11070_v50 = vpop.f32.mrf.mxu1 }
0x33d2   :  { %v5778_v2 = vsel %vm626_vm2, %v5774_v42, -inf }
0x33d3   :  { %5779 = vmax.xlane.f32.xlu0 %v5778_v2 }
0x3458   :  { %v5777_v41 = vpop.xlane.xlu1 %5776 }
0x3459   :  { %v5781_v22 = vsub.f32 %v5773_v8, %v5777_v41 }
0x345b   :  { %v5783_v51 = vmul.f32 1.442695, %v5781_v22 }
0x345c   :  { %v5780_v52 = vpop.xlane.xlu0 %5779 }
0x345d   :  { %11588 = vpow2.f32 %v5783_v51  ;;  %v5782_v47 = vsub.f32 %v5774_v42, %v5780_v52  ;;  %v6084_v42 = vld [vmem:[#allocation22 + $0x60] sm:$0xff] }
0x345f   :  { %v5785_v53 = vmul.f32 1.442695, %v5782_v47  ;;  %v12873_v47 = vld [vmem:[%s13223_s3 + $0xc] sm:$0x7] }
0x3461   :  { %11590 = vpow2.f32 %v5785_v53 }
0x346a   :  { %v11589_v20 = vpop.eup %11588 }
0x346b   :  { %v5787_v46 = vsel %vm626_vm2, %v11589_v20, 0.0 }
0x346c   :  { %5788 = vadd.xlane.f32.xlu0 %v5787_v46  ;;  %v12878_v46 = vld [vmem:[%s12290_s24 + $0xc] sm:$0x7] }
0x346e   :  { %v11591_v54 = vpop.eup %11590 }
0x346f   :  { %v5790_v55 = vsel %vm626_vm2, %v11591_v54, 0.0 }
0x3470   :  { %5791 = vadd.xlane.f32.xlu1 %v5790_v55 }
0x3481   :  { %5873 = vrot.lane.b32.xlu1 %v5616_v39, %s12135_s15 }
0x3482   :  { %5797 = vrot.lane.b32.xlu0 %v5611_v43, %s12135_s15 }
0x34f5   :  { %v5789_v56 = vpop.xlane.xlu0 %5788 }
0x34f6   :  { %11592 = vrcp.f32 %v5789_v56 }
0x34f9   :  { %v5792_v60 = vpop.xlane.xlu1 %5791  ;;  %v5798_v62 = vpop.permute.xlu0 %5797 }
0x34fa   :  { %11594 = vrcp.f32 %v5792_v60  ;;  %11072 = vmatpush3.msra.mxu0 %v5798_v62  ;;  %v6080_v60 = vrot.slane %v12878_v46, %v12410_v21 }
0x34fb   :  { %11081 = vmatprep.subr.mxu0 %v5953_v58 }
0x34fd   :  { %v5874_v1 = vpop.permute.xlu1 %5873 }
0x34fe   :  { %11077 = vmatpush3.msra.mxu1 %v5874_v1 }
0x34ff   :  { %11092 = vmatprep.subr.mxu1 %v6087_v7 }
0x3503   :  { %v11593_v3 = vpop.eup %11592 }
0x3504   :  { %v5795_v4 = vmul.f32 %v11593_v3, %v11589_v20  ;;  %v6074_v20 = vrot.slane %v12873_v47, %v12410_v21 }
0x3506   :  { %11074 = vmatmul.mubr.msk.f32.vlgmr.msra.gmra.mxu0 %vm626_vm2, %v5795_v4 }
0x3507   :  { %v11595_v9 = vpop.eup %11594  ;;  %11082 = vmatpush3.msra.mxu0 %v5953_v58 }
0x3508   :  { %v5796_v10 = vmul.f32 %v11595_v9, %v11591_v54  ;;  %11083 = vmatprep.subr.mxu0 %v5952_v5 }
0x3509   :  { %11084 = vmatpush3.msra.mxu0 %v5952_v5 }
0x350a   :  { %11079 = vmatmul.mubr.msk.f32.vlgmr.msra.gmra.mxu1 %vm626_vm2, %v5796_v10  ;;  %11085 = vmatprep.subr.mxu0 %v5951_v13  ;;  %v10090_v10 = vld [vmem:[#allocation23 + $0x3] ss:$0 sm:$0xff] }
0x350b   :  { %11086 = vmatpush3.msra.mxu0 %v5951_v13  ;;  %11093 = vmatpush3.msra.mxu1 %v6087_v7  ;;  %v6594_v7 = vld [vmem:[#allocation26 + $0x60] sm:$0xff] }
0x350c   :  { %11087 = vmatprep.subr.mxu0 %v5950_v14  ;;  %11094 = vmatprep.subr.mxu1 %v6086_v48 }
0x350d   :  { %11088 = vmatpush3.msra.mxu0 %v5950_v14  ;;  %11095 = vmatpush3.msra.mxu1 %v6086_v48 }
0x350e   :  { %11103 = vmatprep.subr.mxu0 %v6181_v23  ;;  %11096 = vmatprep.subr.mxu1 %v6085_v49 }
0x350f   :  { %11097 = vmatpush3.msra.mxu1 %v6085_v49 }
0x3510   :  { %11098 = vmatprep.subr.mxu1 %v6084_v42 }
0x3511   :  { %11099 = vmatpush3.msra.mxu1 %v6084_v42 }
0x3512   :  { %11114 = vmatprep.subr.mxu1 %v12132_v6 }
0x35c6   :  { %v5869_v19 = vpop.f32.mrf.mxu0 }
0x35c7   :  { %11089 = vmatprep.mubr.msk.f32.mxu0 %vm388_vm0, %v5869_v19 }
0x35c8   :  { %v11075_v12 = vpop.f32.mrf.mxu0 }
0x35ca   :  { %v5945_v24 = vpop.f32.mrf.mxu1 }
0x35cb   :  { %11090 = vmatmul.mubr.msk.f32.vlgmr.msra.gmra.mxu0 %vm388_vm0, %v5945_v24 }
0x35cc   :  { %11104 = vmatpush3.msra.mxu0 %v6181_v23  ;;  %v11080_v25 = vpop.f32.mrf.mxu1  ;;  %11111 = vmatprep.mubr.msk.f32.mxu0 %vm388_vm0, %v12499_v63 }
0x35cd   :  { %11105 = vmatprep.subr.mxu0 %v6180_v11 }
0x35ce   :  { %11106 = vmatpush3.msra.mxu0 %v6180_v11 }
0x35cf   :  { %11107 = vmatprep.subr.mxu0 %v6179_v26 }
0x35d0   :  { %11108 = vmatpush3.msra.mxu0 %v6179_v26 }
0x35d1   :  { %11109 = vmatprep.subr.mxu0 %v6178_v18 }
0x35d2   :  { %11110 = vmatpush3.msra.mxu0 %v6178_v18 }
0x35d3   :  { %11112 = vmatmul.mubr.msk.f32.vlgmr.msra.gmra.mxu0 %vm388_vm0, %v12501_v0  ;;  %11124 = vmatprep.subr.mxu0 %v12132_v6 }
0x35d4   :  { %11126 = vmatprep.mubr.msk.f32.mxu0 %vm12133_vm1, %v12132_v6 }
0x368b   :  { %v11091_v15 = vpop.f32.mrf.mxu0 }
0x368c   :  { %v6040_v28 = vadd.f32 %v11091_v15, %v10087_v27 }
0x368d   :  { %v6034_v29 = vpop.f32.mrf.mxu0 }
0x368e   :  { %v6044_v17 = vadd.f32 %v6040_v28, %v12825_v36  ;;  %v6035_v30 = vadd.f32 %v10087_v27, %v6034_v29 }
0x3690   :  { %v6043_v16 = vadd.f32 %v6035_v30, %v12823_v35  ;;  %v6048_v38 = vsel %vm388_vm0, %v6044_v17, 0.0 }
0x3691   :  { %6049 = vadd.xlane.f32.xlu0 %v6048_v38 }
0x3692   :  { %v6045_v34 = vsel %vm388_vm0, %v6043_v16, 0.0 }
0x3693   :  { %v11113_v33 = vpop.f32.mrf.mxu0  ;;  %6046 = vadd.xlane.f32.xlu1 %v6045_v34 }
0x3694   :  { %v12867_v57 = vadd.f32 %v11113_v33, %v10094_v32 }
0x3695   :  { %v6256_v1 = vpop.f32.mrf.mxu0 }
0x3696   :  { %v6257_v5 = vadd.f32 %v10094_v32, %v6256_v1 }
0x371a   :  { %v6050_v37 = vpop.xlane.xlu0 %6049 }
0x371b   :  { %v6052_v39 = vmul.f32 0.03125, %v6050_v37 }
0x371c   :  { %v6047_v40 = vpop.xlane.xlu1 %6046 }
0x371d   :  { %v6054_v43 = vsub.f32 %v6044_v17, %v6052_v39  ;;  %v6051_v61 = vmul.f32 0.03125, %v6047_v40  ;;  %v6597_v39 = vld [vmem:[#allocation26 + $0x78] sm:$0xff] }
0x371f   :  { %v6053_v44 = vsub.f32 %v6043_v16, %v6051_v61  ;;  %v6056_v36 = vmul.f32 %v6054_v43, %v6054_v43 }
0x3721   :  { %v6060_v45 = vsel %vm388_vm0, %v6056_v36, 0.0  ;;  %v6055_v35 = vmul.f32 %v6053_v44, %v6053_v44 }
0x3722   :  { %6061 = vadd.xlane.f32.xlu1 %v6060_v45  ;;  %v6596_v45 = vld [vmem:[#allocation26 + $0x70] sm:$0xff] }
0x3723   :  { %v6057_v8 = vsel %vm388_vm0, %v6055_v35, 0.0 }
0x3724   :  { %6058 = vadd.xlane.f32.xlu0 %v6057_v8  ;;  %v6595_v8 = vld [vmem:[#allocation26 + $0x68] sm:$0xff] }
0x37ab   :  { %v6062_v50 = vpop.xlane.xlu1 %6061 }
0x37ac   :  { %v6064_v2 = vmul.f32 0.03125, %v6062_v50 }
0x37ad   :  { %v6059_v41 = vpop.xlane.xlu0 %6058 }
0x37ae   :  { %v6066_v22 = vadd.f32 1e-05, %v6064_v2  ;;  %v6063_v51 = vmul.f32 0.03125, %v6059_v41  ;;  %v10104_v2 = vld [vmem:[%s13225_s20 + $0x3] ss:$0 sm:$0xff] }
0x37b0   :  { %11596 = vrsqrt.f32 %v6066_v22  ;;  %v6065_v52 = vadd.f32 1e-05, %v6063_v51 }
0x37b2   :  { %11598 = vrsqrt.f32 %v6065_v52 }
0x37bd   :  { %v11597_v53 = vpop.eup %11596 }
0x37be   :  { %v6070_v54 = vmul.f32 %v11597_v53, %v6054_v43 }
0x37bf   :  { %v11599_v55 = vpop.eup %11598 }
0x37c0   :  { %v6069_v56 = vmul.f32 %v11599_v55, %v6053_v44  ;;  %v6076_v58 = vmul.f32 %v6074_v20, %v6070_v54 }
0x37c2   :  { %v6075_v62 = vmul.f32 %v6074_v20, %v6069_v56  ;;  %v12884_v4 = vadd.f32 %v6080_v60, %v6076_v58 }
0x37c4   :  { %v12882_v3 = vadd.f32 %v6080_v60, %v6075_v62 }
0x37c6   :  { %11100 = vmatprep.mubr.msk.f32.mxu1 %vm388_vm0, %v12882_v3 }
0x37c7   :  { %11101 = vmatmul.mubr.msk.f32.vlgmr.msra.gmra.mxu1 %vm388_vm0, %v12884_v4 }
0x37c8   :  { %11115 = vmatpush3.xpose.msk.msra.mxu1 %vm388_vm0, %v6257_v5  ;;  %11116 = vmatprep.mubr.msk.f32.mxu1 %vm12133_vm1, %v12132_v6 }
0x37c9   :  { %11119 = vmatprep.subr.mxu1 %v12132_v6 }
0x3887   :  { %v11102_v9 = vpop.f32.mrf.mxu1 }
0x3888   :  { %v6174_v23 = vadd.f32 %v11102_v9, %v10090_v10 }
0x3889   :  { %v6168_v13 = vpop.f32.mrf.mxu1 }
0x388a   :  { %v6169_v14 = vadd.f32 %v10090_v10, %v6168_v13 }
0x388c   :  { %11117 = vmatmul.mubr.msk.f32.vlgmr.msra.gmra.mxu1 %vm388_vm0, %v6169_v14  ;;  %v6730_v14 = vld [vmem:[#allocation28 + $0x70] sm:$0xff] }
0x388d   :  { %11120 = vmatpush3.xpose.msk.msra.mxu1 %vm388_vm0, %v12867_v57  ;;  %11121 = vmatprep.mubr.msk.f32.mxu1 %vm12133_vm1, %v12132_v6 }
0x388e   :  { %11129 = vmatprep.subr.mxu1 %v12132_v6 }
0x3890   :  { %11122 = vmatmul.mubr.msk.f32.vlgmr.msra.gmra.mxu1 %vm388_vm0, %v6174_v23  ;;  %v6729_v23 = vld [vmem:[#allocation28 + $0x68] sm:$0xff] }
0x3891   :  { %11131 = vmatprep.mubr.msk.f32.mxu1 %vm12133_vm1, %v12132_v6 }
0x394c   :  { %v6337_v19 = vpop.f32.mrf.mxu1 }
0x394d   :  { %v6417_v12 = vmul.f32 0.17677669, %v6337_v19  ;;  %v6728_v19 = vld [vmem:[#allocation28 + $0x60] sm:$0xff] }
0x394e   :  { %v11118_v24 = vpop.f32.mrf.mxu1 }
0x394f   :  { %v6419_v11 = vsel %vm626_vm2, %v6417_v12, -inf  ;;  %v6830_v24 = vld [vmem:[#allocation29 + $0xf0] sm:$0xff] }
0x3950   :  { %6420 = vmax.xlane.f32.xlu0 %v6419_v11  ;;  %v6413_v25 = vpop.f32.mrf.mxu1  ;;  %v6829_v11 = vld [vmem:[#allocation29 + $0xe8] sm:$0xff] }
0x3951   :  { %v6418_v26 = vmul.f32 0.17677669, %v6413_v25  ;;  %v6828_v25 = vld [vmem:[#allocation29 + $0xe0] sm:$0xff] }
0x3952   :  { %v11123_v18 = vpop.f32.mrf.mxu1 }
0x3953   :  { %v6422_v27 = vsel %vm626_vm2, %v6418_v26, -inf }
0x3954   :  { %6423 = vmax.xlane.f32.xlu1 %v6422_v27 }
0x39d9   :  { %v6421_v15 = vpop.xlane.xlu0 %6420 }
0x39da   :  { %v6425_v28 = vsub.f32 %v6417_v12, %v6421_v15  ;;  %v6831_v12 = vld [vmem:[#allocation29 + $0xf8] sm:$0xff] }
0x39dc   :  { %v6427_v29 = vmul.f32 1.442695, %v6425_v28 }
0x39dd   :  { %v6424_v17 = vpop.xlane.xlu1 %6423 }
0x39de   :  { %11600 = vpow2.f32 %v6427_v29  ;;  %v6426_v30 = vsub.f32 %v6418_v26, %v6424_v17 }
0x39e0   :  { %v6429_v16 = vmul.f32 1.442695, %v6426_v30  ;;  %v6718_v30 = vrot.slane %v12873_v47, %v12480_v59 }
0x39e2   :  { %11602 = vpow2.f32 %v6429_v16 }
0x39eb   :  { %v11601_v38 = vpop.eup %11600 }
0x39ec   :  { %v6431_v32 = vsel %vm626_vm2, %v11601_v38, 0.0 }
0x39ed   :  { %6432 = vadd.xlane.f32.xlu0 %v6431_v32 }
0x39ef   :  { %v11603_v34 = vpop.eup %11602 }
0x39f0   :  { %v6434_v33 = vsel %vm626_vm2, %v11603_v34, 0.0 }
0x39f1   :  { %6435 = vadd.xlane.f32.xlu1 %v6434_v33  ;;  %v6724_v33 = vrot.slane %v12878_v46, %v12480_v59 }
0x3a02   :  { %6517 = vrot.lane.b32.xlu1 %v12867_v57, %s12134_s5 }
0x3a03   :  { %6441 = vrot.lane.b32.xlu0 %v6257_v5, %s12134_s5 }
0x3a76   :  { %v6433_v37 = vpop.xlane.xlu0 %6432 }
0x3a77   :  { %11604 = vrcp.f32 %v6433_v37 }
0x3a7a   :  { %v6442_v40 = vpop.permute.xlu0 %6441  ;;  %v6436_v43 = vpop.xlane.xlu1 %6435 }
0x3a7b   :  { %11606 = vrcp.f32 %v6436_v43  ;;  %11125 = vmatpush3.msra.mxu0 %v6442_v40  ;;  %v6827_v43 = vld [vmem:[#allocation29 + $0xd8] sm:$0xff] }
0x3a7c   :  { %11134 = vmatprep.subr.mxu0 %v6597_v39 }
0x3a7e   :  { %v6518_v61 = vpop.permute.xlu1 %6517 }
0x3a7f   :  { %11130 = vmatpush3.msra.mxu1 %v6518_v61  ;;  %v6826_v61 = vld [vmem:[#allocation29 + $0xd0] sm:$0xff] }
0x3a84   :  { %v11605_v44 = vpop.eup %11604 }
0x3a85   :  { %v6439_v36 = vmul.f32 %v11605_v44, %v11601_v38  ;;  %v6825_v44 = vld [vmem:[#allocation29 + $0xc8] sm:$0xff] }
0x3a87   :  { %11127 = vmatmul.mubr.msk.f32.vlgmr.msra.gmra.mxu0 %vm626_vm2, %v6439_v36  ;;  %v6824_v36 = vld [vmem:[#allocation29 + $0xc0] sm:$0xff] }
0x3a88   :  { %v11607_v35 = vpop.eup %11606  ;;  %11135 = vmatpush3.msra.mxu0 %v6597_v39 }
0x3a89   :  { %v6440_v57 = vmul.f32 %v11607_v35, %v11603_v34  ;;  %11136 = vmatprep.subr.mxu0 %v6596_v45 }
0x3a8a   :  { %11137 = vmatpush3.msra.mxu0 %v6596_v45  ;;  %v10108_v45 = vld [vmem:[%s13226_s29 + $0x3] ss:$0 sm:$0xff] }
0x3a8b   :  { %11132 = vmatmul.mubr.msk.f32.vlgmr.msra.gmra.mxu1 %vm626_vm2, %v6440_v57  ;;  %11138 = vmatprep.subr.mxu0 %v6595_v8 }
0x3a8c   :  { %11139 = vmatpush3.msra.mxu0 %v6595_v8 }
0x3a8d   :  { %11140 = vmatprep.subr.mxu0 %v6594_v7 }
0x3a8e   :  { %11141 = vmatpush3.msra.mxu0 %v6594_v7 }
0x3a8f   :  { %11156 = vmatprep.subr.mxu0 %v6831_v12 }
0x3b47   :  { %v6513_v48 = vpop.f32.mrf.mxu0 }
0x3b48   :  { %11142 = vmatprep.mubr.msk.f32.mxu0 %vm388_vm0, %v6513_v48 }
0x3b49   :  { %v11128_v49 = vpop.f32.mrf.mxu0 }
0x3b4b   :  { %v6589_v42 = vpop.f32.mrf.mxu1 }
0x3b4c   :  { %11143 = vmatmul.mubr.msk.f32.vlgmr.msra.gmra.mxu0 %vm388_vm0, %v6589_v42  ;;  %v10112_v42 = vld [vmem:[%s13227_s12 + $0x3] ss:$0 sm:$0xff] }
0x3b4d   :  { %v11133_v50 = vpop.f32.mrf.mxu1  ;;  %11157 = vmatpush3.msra.mxu0 %v6831_v12 }
0x3b4e   :  { %11158 = vmatprep.subr.mxu0 %v6830_v24 }
0x3b4f   :  { %11159 = vmatpush3.msra.mxu0 %v6830_v24 }
0x3b50   :  { %11160 = vmatprep.subr.mxu0 %v6829_v11 }
0x3b51   :  { %11161 = vmatpush3.msra.mxu0 %v6829_v11 }
0x3b52   :  { %11162 = vmatprep.subr.mxu0 %v6828_v25 }
0x3b53   :  { %11163 = vmatpush3.msra.mxu0 %v6828_v25 }
0x3b54   :  { %11164 = vmatprep.subr.mxu0 %v6827_v43 }
0x3b55   :  { %11165 = vmatpush3.msra.mxu0 %v6827_v43 }
0x3b56   :  { %11166 = vmatprep.subr.mxu0 %v6826_v61 }
0x3b57   :  { %11167 = vmatpush3.msra.mxu0 %v6826_v61 }
0x3b58   :  { %11168 = vmatprep.subr.mxu0 %v6825_v44 }
0x3b59   :  { %11169 = vmatpush3.msra.mxu0 %v6825_v44 }
0x3b5a   :  { %11170 = vmatprep.subr.mxu0 %v6824_v36 }
0x3b5b   :  { %11171 = vmatpush3.msra.mxu0 %v6824_v36 }
0x3b5c   :  { %11196 = vmatprep.subr.mxu0 %v12132_v6 }
0x3c0c   :  { %v11144_v41 = vpop.f32.mrf.mxu0 }
0x3c0d   :  { %v6684_v22 = vadd.f32 %v11144_v41, %v10104_v2 }
0x3c0e   :  { %v6678_v51 = vpop.f32.mrf.mxu0 }
0x3c0f   :  { %v6688_v52 = vadd.f32 %v6684_v22, %v12884_v4  ;;  %v6679_v53 = vadd.f32 %v10104_v2, %v6678_v51 }
0x3c11   :  { %v6687_v20 = vadd.f32 %v6679_v53, %v12882_v3  ;;  %v6692_v54 = vsel %vm388_vm0, %v6688_v52, 0.0  ;;  %v6731_v3 = vld [vmem:[#allocation28 + $0x78] sm:$0xff] }
0x3c12   :  { %6693 = vadd.xlane.f32.xlu0 %v6692_v54  ;;  %11145 = vmatprep.subr.mxu1 %v6731_v3 }
0x3c13   :  { %v6689_v55 = vsel %vm388_vm0, %v6687_v20, 0.0  ;;  %11146 = vmatpush3.msra.mxu1 %v6731_v3  ;;  %v6967_v3 = vld [vmem:[#allocation16 + $0x88] sm:$0xff] }
0x3c14   :  { %6690 = vadd.xlane.f32.xlu1 %v6689_v55  ;;  %11147 = vmatprep.subr.mxu1 %v6730_v14 }
0x3c15   :  { %11148 = vmatpush3.msra.mxu1 %v6730_v14  ;;  %v6966_v14 = vld [vmem:[#allocation16 + $0x80] sm:$0xff] }
0x3c16   :  { %11149 = vmatprep.subr.mxu1 %v6729_v23 }
0x3c17   :  { %11150 = vmatpush3.msra.mxu1 %v6729_v23 }
0x3c18   :  { %11151 = vmatprep.subr.mxu1 %v6728_v19 }
0x3c19   :  { %11152 = vmatpush3.msra.mxu1 %v6728_v19 }
0x3c9b   :  { %v6694_v56 = vpop.xlane.xlu0 %6693 }
0x3c9c   :  { %v6696_v58 = vmul.f32 0.03125, %v6694_v56 }
0x3c9d   :  { %v6691_v60 = vpop.xlane.xlu1 %6690 }
0x3c9e   :  { %v6698_v62 = vsub.f32 %v6688_v52, %v6696_v58  ;;  %v6695_v1 = vmul.f32 0.03125, %v6691_v60 }
0x3ca0   :  { %v6697_v5 = vsub.f32 %v6687_v20, %v6695_v1  ;;  %v6700_v9 = vmul.f32 %v6698_v62, %v6698_v62 }
0x3ca2   :  { %v6704_v10 = vsel %vm388_vm0, %v6700_v9, 0.0  ;;  %v6699_v13 = vmul.f32 %v6697_v5, %v6697_v5 }
0x3ca3   :  { %6705 = vadd.xlane.f32.xlu1 %v6704_v10 }
0x3ca4   :  { %v6701_v4 = vsel %vm388_vm0, %v6699_v13, 0.0  ;;  %v6969_v13 = vld [vmem:[#allocation16 + $0x98] sm:$0xff] }
0x3ca5   :  { %6702 = vadd.xlane.f32.xlu0 %v6701_v4  ;;  %v6968_v4 = vld [vmem:[#allocation16 + $0x90] sm:$0xff]  ;;  %11175 = vmatprep.subr.mxu1 %v6969_v13 }
0x3d2c   :  { %v6706_v26 = vpop.xlane.xlu1 %6705 }
0x3d2d   :  { %v6708_v18 = vmul.f32 0.03125, %v6706_v26 }
0x3d2e   :  { %v6703_v27 = vpop.xlane.xlu0 %6702 }
0x3d2f   :  { %v6710_v15 = vadd.f32 1e-05, %v6708_v18  ;;  %v6707_v28 = vmul.f32 0.03125, %v6703_v27  ;;  %v6952_v18 = vrot.slane %v12873_v47, %v12577_v31  ;;  %v10117_v47 = vld [vmem:[#allocation17 + $0x4] ss:$0 sm:$0xff] }
0x3d31   :  { %11608 = vrsqrt.f32 %v6710_v15  ;;  %v6709_v29 = vadd.f32 1e-05, %v6707_v28 }
0x3d33   :  { %11610 = vrsqrt.f32 %v6709_v29 }
0x3d3e   :  { %v11609_v17 = vpop.eup %11608 }
0x3d3f   :  { %v6714_v16 = vmul.f32 %v11609_v17, %v6698_v62  ;;  %v6958_v17 = vrot.slane %v12878_v46, %v12577_v31 }
0x3d40   :  { %v11611_v38 = vpop.eup %11610 }
0x3d41   :  { %v6713_v32 = vmul.f32 %v11611_v38, %v6697_v5  ;;  %v6720_v34 = vmul.f32 %v6718_v30, %v6714_v16 }
0x3d43   :  { %v6719_v37 = vmul.f32 %v6718_v30, %v6713_v32  ;;  %v6726_v40 = vadd.f32 %v6724_v33, %v6720_v34 }
0x3d45   :  { %v6725_v39 = vadd.f32 %v6724_v33, %v6719_v37 }
0x3d47   :  { %11153 = vmatprep.mubr.msk.f32.mxu1 %vm388_vm0, %v6725_v39 }
0x3d48   :  { %11154 = vmatmul.mubr.msk.f32.vlgmr.msra.gmra.mxu1 %vm388_vm0, %v6726_v40 }
0x3d49   :  { %11176 = vmatpush3.msra.mxu1 %v6969_v13 }
0x3d4a   :  { %11177 = vmatprep.subr.mxu1 %v6968_v4 }
0x3d4b   :  { %11178 = vmatpush3.msra.mxu1 %v6968_v4 }
0x3d4c   :  { %11179 = vmatprep.subr.mxu1 %v6967_v3 }
0x3d4d   :  { %11180 = vmatpush3.msra.mxu1 %v6967_v3 }
0x3d4e   :  { %11181 = vmatprep.subr.mxu1 %v6966_v14 }
0x3d4f   :  { %11182 = vmatpush3.msra.mxu1 %v6966_v14  ;;  %v7620_v14 = vld [vmem:[#allocation25 + $0x90] sm:$0xff] }
0x3d50   :  { %11186 = vmatprep.subr.mxu1 %v12132_v6 }
0x3e08   :  { %v11155_v35 = vpop.f32.mrf.mxu1 }
0x3e09   :  { %v6818_v57 = vadd.f32 %v11155_v35, %v10108_v45 }
0x3e0a   :  { %v6812_v8 = vpop.f32.mrf.mxu1 }
0x3e0b   :  { %v6813_v7 = vadd.f32 %v10108_v45, %v6812_v8  ;;  %v6822_v49 = vmax.f32 %v6818_v57, 0.0 }
0x3e0d   :  { %v6821_v48 = vmax.f32 %v6813_v7, 0.0 }
0x3e0f   :  { %11172 = vmatprep.mubr.msk.f32.mxu0 %vm1043_vm3, %v6821_v48 }
0x3e10   :  { %11173 = vmatmul.mubr.msk.f32.vlgmr.msra.gmra.mxu0 %vm1043_vm3, %v6822_v49 }
0x3e11   :  { %11198 = vmatprep.mubr.msk.f32.mxu0 %vm12133_vm1, %v12132_v6 }
0x3ed0   :  { %v11174_v50 = vpop.f32.mrf.mxu0 }
0x3ed1   :  { %v6918_v2 = vadd.f32 %v11174_v50, %v10112_v42 }
0x3ed2   :  { %v6912_v41 = vpop.f32.mrf.mxu0 }
0x3ed3   :  { %v6922_v22 = vadd.f32 %v6918_v2, %v6726_v40  ;;  %v6913_v51 = vadd.f32 %v10112_v42, %v6912_v41 }
0x3ed5   :  { %v6921_v52 = vadd.f32 %v6913_v51, %v6725_v39  ;;  %v6926_v53 = vsel %vm388_vm0, %v6922_v22, 0.0 }
0x3ed6   :  { %6927 = vadd.xlane.f32.xlu1 %v6926_v53  ;;  %v7393_v53 = vld [vmem:[#allocation19 + $0x98] sm:$0xff] }
0x3ed7   :  { %v6923_v20 = vsel %vm388_vm0, %v6921_v52, 0.0 }
0x3ed8   :  { %6924 = vadd.xlane.f32.xlu0 %v6923_v20 }
0x3f5f   :  { %v6928_v54 = vpop.xlane.xlu1 %6927 }
0x3f60   :  { %v6930_v55 = vmul.f32 0.03125, %v6928_v54 }
0x3f61   :  { %v6925_v56 = vpop.xlane.xlu0 %6924 }
0x3f62   :  { %v6932_v58 = vsub.f32 %v6922_v22, %v6930_v55  ;;  %v6929_v60 = vmul.f32 0.03125, %v6925_v56 }
0x3f64   :  { %v6931_v62 = vsub.f32 %v6921_v52, %v6929_v60  ;;  %v6934_v1 = vmul.f32 %v6932_v58, %v6932_v58  ;;  %v7392_v60 = vld [vmem:[#allocation19 + $0x90] sm:$0xff] }
0x3f66   :  { %v6938_v5 = vsel %vm388_vm0, %v6934_v1, 0.0  ;;  %v6933_v9 = vmul.f32 %v6931_v62, %v6931_v62 }
0x3f67   :  { %6939 = vadd.xlane.f32.xlu1 %v6938_v5  ;;  %v7391_v5 = vld [vmem:[#allocation19 + $0x88] sm:$0xff] }
0x3f68   :  { %v6935_v10 = vsel %vm388_vm0, %v6933_v9, 0.0  ;;  %v7390_v9 = vld [vmem:[#allocation19 + $0x80] sm:$0xff] }
0x3f69   :  { %6936 = vadd.xlane.f32.xlu0 %v6935_v10  ;;  %v7621_v10 = vld [vmem:[#allocation25 + $0x98] sm:$0xff] }
0x3ff0   :  { %v6940_v23 = vpop.xlane.xlu1 %6939 }
0x3ff1   :  { %v6942_v19 = vmul.f32 0.03125, %v6940_v23 }
0x3ff2   :  { %v6937_v12 = vpop.xlane.xlu0 %6936 }
0x3ff3   :  { %v6944_v24 = vadd.f32 1e-05, %v6942_v19  ;;  %v6941_v11 = vmul.f32 0.03125, %v6937_v12  ;;  %v7619_v19 = vld [vmem:[#allocation25 + $0x88] sm:$0xff]  ;;  %v7618_v12 = vld [vmem:[#allocation25 + $0x80] sm:$0xff] }
0x3ff5   :  { %11612 = vrsqrt.f32 %v6944_v24  ;;  %v6943_v25 = vadd.f32 1e-05, %v6941_v11  ;;  %v10126_v24 = vld [vmem:[#allocation20 + $0x4] ss:$0 sm:$0xff] }
0x3ff7   :  { %11614 = vrsqrt.f32 %v6943_v25 }
0x4002   :  { %v11613_v26 = vpop.eup %11612 }
0x4003   :  { %v6948_v27 = vmul.f32 %v11613_v26, %v6932_v58 }
0x4004   :  { %v11615_v15 = vpop.eup %11614 }
0x4005   :  { %v6947_v28 = vmul.f32 %v11615_v15, %v6931_v62  ;;  %v6954_v29 = vmul.f32 %v6952_v18, %v6948_v27 }
0x4007   :  { %v6953_v30 = vmul.f32 %v6952_v18, %v6947_v28  ;;  %v12945_v38 = vadd.f32 %v6958_v17, %v6954_v29  ;;  %v10133_v29 = vld [vmem:[%s13224_s26 + $0x4] ss:$0 sm:$0xff] }
0x4009   :  { %v12943_v16 = vadd.f32 %v6958_v17, %v6953_v30 }
0x400b   :  { %11183 = vmatprep.mubr.msk.f32.mxu1 %vm388_vm0, %v12943_v16 }
0x400c   :  { %11184 = vmatmul.mubr.msk.f32.vlgmr.msra.gmra.mxu1 %vm388_vm0, %v12945_v38 }
0x400d   :  { %11188 = vmatprep.mubr.msk.f32.mxu1 %vm12133_vm1, %v12132_v6 }
0x40cc   :  { %v11185_v32 = vpop.f32.mrf.mxu1 }
0x40cd   :  { %v7056_v34 = vadd.f32 %v11185_v32, %v10117_v47 }
0x40ce   :  { %v7050_v33 = vpop.f32.mrf.mxu1 }
0x40cf   :  { %v7051_v37 = vadd.f32 %v10117_v47, %v7050_v33  ;;  %7137 = vrot.lane.b32.xlu1 %v7056_v34, %s12134_s5 }
0x40d1   :  { %7060 = vrot.lane.b32.xlu0 %v7051_v37, %s12134_s5 }
0x4141   :  { %v7138_v39 = vpop.permute.xlu1 %7137 }
0x4143   :  { %v7061_v46 = vpop.permute.xlu0 %7060 }
0x4144   :  { %11187 = vmatpush3.xpose.msk.msra.mxu1 %vm388_vm0, %v7061_v46 }
0x4145   :  { %11191 = vmatprep.subr.mxu1 %v12132_v6 }
0x4147   :  { %11189 = vmatmul.mubr.msk.f32.vlgmr.msra.gmra.mxu1 %vm388_vm0, %v7051_v37 }
0x4148   :  { %11192 = vmatpush3.xpose.msk.msra.mxu1 %vm388_vm0, %v7138_v39  ;;  %11193 = vmatprep.mubr.msk.f32.mxu1 %vm12133_vm1, %v12132_v6 }
0x4149   :  { %11201 = vmatprep.subr.mxu1 %v12132_v6 }
0x414b   :  { %11194 = vmatmul.mubr.msk.f32.vlgmr.msra.gmra.mxu1 %vm388_vm0, %v7056_v34 }
0x414c   :  { %11203 = vmatprep.mubr.msk.f32.mxu1 %vm12133_vm1, %v12132_v6 }
0x4207   :  { %v7132_v40 = vpop.f32.mrf.mxu1 }
0x4208   :  { %v7213_v43 = vmul.f32 0.17677669, %v7132_v40 }
0x4209   :  { %v11190_v61 = vpop.f32.mrf.mxu1 }
0x420a   :  { %v7215_v44 = vsel %vm626_vm2, %v7213_v43, -inf  ;;  %v7527_v61 = vld [vmem:[#allocation22 + $0x98] sm:$0xff] }
0x420b   :  { %7216 = vmax.xlane.f32.xlu1 %v7215_v44  ;;  %v7209_v36 = vpop.f32.mrf.mxu1  ;;  %v7526_v44 = vld [vmem:[#allocation22 + $0x90] sm:$0xff] }
0x420c   :  { %v7214_v45 = vmul.f32 0.17677669, %v7209_v36  ;;  %v7525_v36 = vld [vmem:[#allocation22 + $0x88] sm:$0xff] }
0x420d   :  { %v11195_v35 = vpop.f32.mrf.mxu1 }
0x420e   :  { %v7218_v57 = vsel %vm626_vm2, %v7214_v45, -inf }
0x420f   :  { %7219 = vmax.xlane.f32.xlu0 %v7218_v57 }
0x4294   :  { %v7217_v8 = vpop.xlane.xlu1 %7216 }
0x4295   :  { %v7221_v7 = vsub.f32 %v7213_v43, %v7217_v8 }
0x4297   :  { %v7223_v48 = vmul.f32 1.442695, %v7221_v7 }
0x4298   :  { %v7220_v49 = vpop.xlane.xlu0 %7219 }
0x4299   :  { %11616 = vpow2.f32 %v7223_v48  ;;  %v7222_v42 = vsub.f32 %v7214_v45, %v7220_v49  ;;  %v7524_v45 = vld [vmem:[#allocation22 + $0x80] sm:$0xff] }
0x429b   :  { %v7225_v50 = vmul.f32 1.442695, %v7222_v42  ;;  %v12993_v42 = vld [vmem:[%s13223_s3 + $0x10] sm:$0x7] }
0x429d   :  { %11618 = vpow2.f32 %v7225_v50 }
0x42a6   :  { %v11617_v2 = vpop.eup %11616 }
0x42a7   :  { %v7227_v41 = vsel %vm626_vm2, %v11617_v2, 0.0 }
0x42a8   :  { %7228 = vadd.xlane.f32.xlu0 %v7227_v41  ;;  %v12998_v41 = vld [vmem:[%s12290_s24 + $0x10] sm:$0x7] }
0x42aa   :  { %v11619_v22 = vpop.eup %11618 }
0x42ab   :  { %v7230_v51 = vsel %vm626_vm2, %v11619_v22, 0.0 }
0x42ac   :  { %7231 = vadd.xlane.f32.xlu1 %v7230_v51 }
0x42bd   :  { %7313 = vrot.lane.b32.xlu1 %v7056_v34, %s12135_s15 }
0x42be   :  { %7237 = vrot.lane.b32.xlu0 %v7051_v37, %s12135_s15 }
0x4331   :  { %v7229_v52 = vpop.xlane.xlu0 %7228 }
0x4332   :  { %11620 = vrcp.f32 %v7229_v52 }
0x4335   :  { %v7232_v20 = vpop.xlane.xlu1 %7231  ;;  %v7238_v54 = vpop.permute.xlu0 %7237 }
0x4336   :  { %11622 = vrcp.f32 %v7232_v20  ;;  %11197 = vmatpush3.msra.mxu0 %v7238_v54  ;;  %v7520_v20 = vrot.slane %v12998_v41, %v12410_v21 }
0x4337   :  { %11206 = vmatprep.subr.mxu0 %v7393_v53 }
0x4339   :  { %v7314_v55 = vpop.permute.xlu1 %7313 }
0x433a   :  { %11202 = vmatpush3.msra.mxu1 %v7314_v55 }
0x433b   :  { %11217 = vmatprep.subr.mxu1 %v7527_v61 }
0x433f   :  { %v11621_v56 = vpop.eup %11620 }
0x4340   :  { %v7235_v58 = vmul.f32 %v11621_v56, %v11617_v2  ;;  %v7514_v2 = vrot.slane %v12993_v42, %v12410_v21 }
0x4342   :  { %11199 = vmatmul.mubr.msk.f32.vlgmr.msra.gmra.mxu0 %vm626_vm2, %v7235_v58 }
0x4343   :  { %v11623_v62 = vpop.eup %11622  ;;  %11207 = vmatpush3.msra.mxu0 %v7393_v53 }
0x4344   :  { %v7236_v1 = vmul.f32 %v11623_v62, %v11619_v22  ;;  %11208 = vmatprep.subr.mxu0 %v7392_v60 }
0x4345   :  { %11209 = vmatpush3.msra.mxu0 %v7392_v60 }
0x4346   :  { %11204 = vmatmul.mubr.msk.f32.vlgmr.msra.gmra.mxu1 %vm626_vm2, %v7236_v1  ;;  %11210 = vmatprep.subr.mxu0 %v7391_v5  ;;  %v10129_v1 = vld [vmem:[#allocation23 + $0x4] ss:$0 sm:$0xff] }
0x4347   :  { %11211 = vmatpush3.msra.mxu0 %v7391_v5  ;;  %11218 = vmatpush3.msra.mxu1 %v7527_v61  ;;  %v8034_v61 = vld [vmem:[#allocation26 + $0x80] sm:$0xff] }
0x4348   :  { %11212 = vmatprep.subr.mxu0 %v7390_v9  ;;  %11219 = vmatprep.subr.mxu1 %v7526_v44 }
0x4349   :  { %11213 = vmatpush3.msra.mxu0 %v7390_v9  ;;  %11220 = vmatpush3.msra.mxu1 %v7526_v44 }
0x434a   :  { %11228 = vmatprep.subr.mxu0 %v7621_v10  ;;  %11221 = vmatprep.subr.mxu1 %v7525_v36 }
0x434b   :  { %11222 = vmatpush3.msra.mxu1 %v7525_v36 }
0x434c   :  { %11223 = vmatprep.subr.mxu1 %v7524_v45 }
0x434d   :  { %11224 = vmatpush3.msra.mxu1 %v7524_v45 }
0x434e   :  { %11239 = vmatprep.subr.mxu1 %v12132_v6 }
0x4402   :  { %v7309_v13 = vpop.f32.mrf.mxu0 }
0x4403   :  { %11214 = vmatprep.mubr.msk.f32.mxu0 %vm388_vm0, %v7309_v13 }
0x4404   :  { %v11200_v4 = vpop.f32.mrf.mxu0 }
0x4406   :  { %v7385_v3 = vpop.f32.mrf.mxu1 }
0x4407   :  { %11215 = vmatmul.mubr.msk.f32.vlgmr.msra.gmra.mxu0 %vm388_vm0, %v7385_v3 }
0x4408   :  { %11229 = vmatpush3.msra.mxu0 %v7621_v10  ;;  %v11205_v23 = vpop.f32.mrf.mxu1  ;;  %11236 = vmatprep.mubr.msk.f32.mxu0 %vm388_vm0, %v12499_v63 }
0x4409   :  { %11230 = vmatprep.subr.mxu0 %v7620_v14 }
0x440a   :  { %11231 = vmatpush3.msra.mxu0 %v7620_v14 }
0x440b   :  { %11232 = vmatprep.subr.mxu0 %v7619_v19 }
0x440c   :  { %11233 = vmatpush3.msra.mxu0 %v7619_v19 }
0x440d   :  { %11234 = vmatprep.subr.mxu0 %v7618_v12 }
0x440e   :  { %11235 = vmatpush3.msra.mxu0 %v7618_v12 }
0x440f   :  { %11237 = vmatmul.mubr.msk.f32.vlgmr.msra.gmra.mxu0 %vm388_vm0, %v12501_v0  ;;  %11249 = vmatprep.subr.mxu0 %v12132_v6 }
0x4410   :  { %11251 = vmatprep.mubr.msk.f32.mxu0 %vm12133_vm1, %v12132_v6 }
0x44c7   :  { %v11216_v11 = vpop.f32.mrf.mxu0 }
0x44c8   :  { %v7480_v25 = vadd.f32 %v11216_v11, %v10126_v24 }
0x44c9   :  { %v7474_v26 = vpop.f32.mrf.mxu0 }
0x44ca   :  { %v7484_v18 = vadd.f32 %v7480_v25, %v12945_v38  ;;  %v7475_v27 = vadd.f32 %v10126_v24, %v7474_v26 }
0x44cc   :  { %v7483_v15 = vadd.f32 %v7475_v27, %v12943_v16  ;;  %v7488_v28 = vsel %vm388_vm0, %v7484_v18, 0.0 }
0x44cd   :  { %7489 = vadd.xlane.f32.xlu0 %v7488_v28 }
0x44ce   :  { %v7485_v17 = vsel %vm388_vm0, %v7483_v15, 0.0 }
0x44cf   :  { %v11238_v30 = vpop.f32.mrf.mxu0  ;;  %7486 = vadd.xlane.f32.xlu1 %v7485_v17 }
0x44d0   :  { %v12987_v47 = vadd.f32 %v11238_v30, %v10133_v29 }
0x44d1   :  { %v7696_v55 = vpop.f32.mrf.mxu0 }
0x44d2   :  { %v7697_v60 = vadd.f32 %v10133_v29, %v7696_v55 }
0x4556   :  { %v7490_v32 = vpop.xlane.xlu0 %7489 }
0x4557   :  { %v7492_v34 = vmul.f32 0.03125, %v7490_v32 }
0x4558   :  { %v7487_v33 = vpop.xlane.xlu1 %7486 }
0x4559   :  { %v7494_v37 = vsub.f32 %v7484_v18, %v7492_v34  ;;  %v7491_v46 = vmul.f32 0.03125, %v7487_v33  ;;  %v8037_v34 = vld [vmem:[#allocation26 + $0x98] sm:$0xff] }
0x455b   :  { %v7493_v39 = vsub.f32 %v7483_v15, %v7491_v46  ;;  %v7496_v38 = vmul.f32 %v7494_v37, %v7494_v37 }
0x455d   :  { %v7500_v40 = vsel %vm388_vm0, %v7496_v38, 0.0  ;;  %v7495_v16 = vmul.f32 %v7493_v39, %v7493_v39 }
0x455e   :  { %7501 = vadd.xlane.f32.xlu1 %v7500_v40  ;;  %v8036_v40 = vld [vmem:[#allocation26 + $0x90] sm:$0xff] }
0x455f   :  { %v7497_v43 = vsel %vm388_vm0, %v7495_v16, 0.0 }
0x4560   :  { %7498 = vadd.xlane.f32.xlu0 %v7497_v43  ;;  %v8035_v43 = vld [vmem:[#allocation26 + $0x88] sm:$0xff] }
0x45e7   :  { %v7502_v35 = vpop.xlane.xlu1 %7501 }
0x45e8   :  { %v7504_v57 = vmul.f32 0.03125, %v7502_v35 }
0x45e9   :  { %v7499_v8 = vpop.xlane.xlu0 %7498 }
0x45ea   :  { %v7506_v7 = vadd.f32 1e-05, %v7504_v57  ;;  %v7503_v48 = vmul.f32 0.03125, %v7499_v8  ;;  %v10143_v57 = vld [vmem:[%s13225_s20 + $0x4] ss:$0 sm:$0xff] }
0x45ec   :  { %11624 = vrsqrt.f32 %v7506_v7  ;;  %v7505_v49 = vadd.f32 1e-05, %v7503_v48 }
0x45ee   :  { %11626 = vrsqrt.f32 %v7505_v49 }
0x45f9   :  { %v11625_v50 = vpop.eup %11624 }
0x45fa   :  { %v7510_v22 = vmul.f32 %v11625_v50, %v7494_v37 }
0x45fb   :  { %v11627_v51 = vpop.eup %11626 }
0x45fc   :  { %v7509_v52 = vmul.f32 %v11627_v51, %v7493_v39  ;;  %v7516_v53 = vmul.f32 %v7514_v2, %v7510_v22 }
0x45fe   :  { %v7515_v54 = vmul.f32 %v7514_v2, %v7509_v52  ;;  %v13004_v58 = vadd.f32 %v7520_v20, %v7516_v53 }
0x4600   :  { %v13002_v56 = vadd.f32 %v7520_v20, %v7515_v54 }
0x4602   :  { %11225 = vmatprep.mubr.msk.f32.mxu1 %vm388_vm0, %v13002_v56 }
0x4603   :  { %11226 = vmatmul.mubr.msk.f32.vlgmr.msra.gmra.mxu1 %vm388_vm0, %v13004_v58 }
0x4604   :  { %11240 = vmatpush3.xpose.msk.msra.mxu1 %vm388_vm0, %v7697_v60  ;;  %11241 = vmatprep.mubr.msk.f32.mxu1 %vm12133_vm1, %v12132_v6 }
0x4605   :  { %11244 = vmatprep.subr.mxu1 %v12132_v6 }
0x46c3   :  { %v11227_v62 = vpop.f32.mrf.mxu1 }
0x46c4   :  { %v7614_v10 = vadd.f32 %v11227_v62, %v10129_v1 }
0x46c5   :  { %v7608_v5 = vpop.f32.mrf.mxu1 }
0x46c6   :  { %v7609_v9 = vadd.f32 %v10129_v1, %v7608_v5 }
0x46c8   :  { %11242 = vmatmul.mubr.msk.f32.vlgmr.msra.gmra.mxu1 %vm388_vm0, %v7609_v9  ;;  %v8170_v9 = vld [vmem:[#allocation28 + $0x90] sm:$0xff] }
0x46c9   :  { %11245 = vmatpush3.xpose.msk.msra.mxu1 %vm388_vm0, %v12987_v47  ;;  %11246 = vmatprep.mubr.msk.f32.mxu1 %vm12133_vm1, %v12132_v6 }
0x46ca   :  { %11254 = vmatprep.subr.mxu1 %v12132_v6 }
0x46cc   :  { %11247 = vmatmul.mubr.msk.f32.vlgmr.msra.gmra.mxu1 %vm388_vm0, %v7614_v10  ;;  %v8169_v10 = vld [vmem:[#allocation28 + $0x88] sm:$0xff] }
0x46cd   :  { %11256 = vmatprep.mubr.msk.f32.mxu1 %vm12133_vm1, %v12132_v6 }
0x4788   :  { %v7777_v13 = vpop.f32.mrf.mxu1 }
0x4789   :  { %v7857_v4 = vmul.f32 0.17677669, %v7777_v13  ;;  %v8168_v13 = vld [vmem:[#allocation28 + $0x80] sm:$0xff] }
0x478a   :  { %v11243_v3 = vpop.f32.mrf.mxu1 }
0x478b   :  { %v7859_v14 = vsel %vm626_vm2, %v7857_v4, -inf  ;;  %v8270_v3 = vld [vmem:[#allocation29 + $0x130] sm:$0xff] }
0x478c   :  { %7860 = vmax.xlane.f32.xlu0 %v7859_v14  ;;  %v7853_v23 = vpop.f32.mrf.mxu1  ;;  %v8269_v14 = vld [vmem:[#allocation29 + $0x128] sm:$0xff] }
0x478d   :  { %v7858_v19 = vmul.f32 0.17677669, %v7853_v23  ;;  %v8268_v23 = vld [vmem:[#allocation29 + $0x120] sm:$0xff] }
0x478e   :  { %v11248_v12 = vpop.f32.mrf.mxu1 }
0x478f   :  { %v7862_v24 = vsel %vm626_vm2, %v7858_v19, -inf }
0x4790   :  { %7863 = vmax.xlane.f32.xlu1 %v7862_v24 }
0x4815   :  { %v7861_v11 = vpop.xlane.xlu0 %7860 }
0x4816   :  { %v7865_v25 = vsub.f32 %v7857_v4, %v7861_v11  ;;  %v8271_v4 = vld [vmem:[#allocation29 + $0x138] sm:$0xff] }
0x4818   :  { %v7867_v26 = vmul.f32 1.442695, %v7865_v25 }
0x4819   :  { %v7864_v18 = vpop.xlane.xlu1 %7863 }
0x481a   :  { %11628 = vpow2.f32 %v7867_v26  ;;  %v7866_v27 = vsub.f32 %v7858_v19, %v7864_v18 }
0x481c   :  { %v7869_v15 = vmul.f32 1.442695, %v7866_v27  ;;  %v8158_v27 = vrot.slane %v12993_v42, %v12480_v59 }
0x481e   :  { %11630 = vpow2.f32 %v7869_v15 }
0x4827   :  { %v11629_v28 = vpop.eup %11628 }
0x4828   :  { %v7871_v29 = vsel %vm626_vm2, %v11629_v28, 0.0 }
0x4829   :  { %7872 = vadd.xlane.f32.xlu0 %v7871_v29 }
0x482b   :  { %v11631_v17 = vpop.eup %11630 }
0x482c   :  { %v7874_v30 = vsel %vm626_vm2, %v11631_v17, 0.0 }
0x482d   :  { %7875 = vadd.xlane.f32.xlu1 %v7874_v30  ;;  %v8164_v30 = vrot.slane %v12998_v41, %v12480_v59 }
0x483e   :  { %7957 = vrot.lane.b32.xlu1 %v12987_v47, %s12134_s5 }
0x483f   :  { %7881 = vrot.lane.b32.xlu0 %v7697_v60, %s12134_s5 }
0x48b2   :  { %v7873_v32 = vpop.xlane.xlu0 %7872 }
0x48b3   :  { %11632 = vrcp.f32 %v7873_v32 }
0x48b6   :  { %v7882_v33 = vpop.permute.xlu0 %7881  ;;  %v7876_v37 = vpop.xlane.xlu1 %7875 }
0x48b7   :  { %11634 = vrcp.f32 %v7876_v37  ;;  %11250 = vmatpush3.msra.mxu0 %v7882_v33  ;;  %v8267_v37 = vld [vmem:[#allocation29 + $0x118] sm:$0xff] }
0x48b8   :  { %11259 = vmatprep.subr.mxu0 %v8037_v34 }
0x48ba   :  { %v7958_v46 = vpop.permute.xlu1 %7957 }
0x48bb   :  { %11255 = vmatpush3.msra.mxu1 %v7958_v46  ;;  %v8266_v46 = vld [vmem:[#allocation29 + $0x110] sm:$0xff] }
0x48c0   :  { %v11633_v39 = vpop.eup %11632 }
0x48c1   :  { %v7879_v38 = vmul.f32 %v11633_v39, %v11629_v28  ;;  %v8265_v39 = vld [vmem:[#allocation29 + $0x108] sm:$0xff] }
0x48c3   :  { %11252 = vmatmul.mubr.msk.f32.vlgmr.msra.gmra.mxu0 %vm626_vm2, %v7879_v38  ;;  %v8264_v38 = vld [vmem:[#allocation29 + $0x100] sm:$0xff] }
0x48c4   :  { %v11635_v16 = vpop.eup %11634  ;;  %11260 = vmatpush3.msra.mxu0 %v8037_v34 }
0x48c5   :  { %v7880_v47 = vmul.f32 %v11635_v16, %v11631_v17  ;;  %11261 = vmatprep.subr.mxu0 %v8036_v40 }
0x48c6   :  { %11262 = vmatpush3.msra.mxu0 %v8036_v40  ;;  %v10147_v40 = vld [vmem:[%s13226_s29 + $0x4] ss:$0 sm:$0xff] }
0x48c7   :  { %11257 = vmatmul.mubr.msk.f32.vlgmr.msra.gmra.mxu1 %vm626_vm2, %v7880_v47  ;;  %11263 = vmatprep.subr.mxu0 %v8035_v43 }
0x48c8   :  { %11264 = vmatpush3.msra.mxu0 %v8035_v43 }
0x48c9   :  { %11265 = vmatprep.subr.mxu0 %v8034_v61 }
0x48ca   :  { %11266 = vmatpush3.msra.mxu0 %v8034_v61 }
0x48cb   :  { %11281 = vmatprep.subr.mxu0 %v8271_v4 }
0x4983   :  { %v7953_v44 = vpop.f32.mrf.mxu0 }
0x4984   :  { %11267 = vmatprep.mubr.msk.f32.mxu0 %vm388_vm0, %v7953_v44 }
0x4985   :  { %v11253_v36 = vpop.f32.mrf.mxu0 }
0x4987   :  { %v8029_v45 = vpop.f32.mrf.mxu1 }
0x4988   :  { %11268 = vmatmul.mubr.msk.f32.vlgmr.msra.gmra.mxu0 %vm388_vm0, %v8029_v45  ;;  %v10151_v45 = vld [vmem:[%s13227_s12 + $0x4] ss:$0 sm:$0xff] }
0x4989   :  { %v11258_v35 = vpop.f32.mrf.mxu1  ;;  %11282 = vmatpush3.msra.mxu0 %v8271_v4 }
0x498a   :  { %11283 = vmatprep.subr.mxu0 %v8270_v3 }
0x498b   :  { %11284 = vmatpush3.msra.mxu0 %v8270_v3 }
0x498c   :  { %11285 = vmatprep.subr.mxu0 %v8269_v14 }
0x498d   :  { %11286 = vmatpush3.msra.mxu0 %v8269_v14 }
0x498e   :  { %11287 = vmatprep.subr.mxu0 %v8268_v23 }
0x498f   :  { %11288 = vmatpush3.msra.mxu0 %v8268_v23 }
0x4990   :  { %11289 = vmatprep.subr.mxu0 %v8267_v37 }
0x4991   :  { %11290 = vmatpush3.msra.mxu0 %v8267_v37 }
0x4992   :  { %11291 = vmatprep.subr.mxu0 %v8266_v46 }
0x4993   :  { %11292 = vmatpush3.msra.mxu0 %v8266_v46 }
0x4994   :  { %11293 = vmatprep.subr.mxu0 %v8265_v39 }
0x4995   :  { %11294 = vmatpush3.msra.mxu0 %v8265_v39 }
0x4996   :  { %11295 = vmatprep.subr.mxu0 %v8264_v38 }
0x4997   :  { %11296 = vmatpush3.msra.mxu0 %v8264_v38 }
0x4998   :  { %11321 = vmatprep.subr.mxu0 %v12132_v6 }
0x4a48   :  { %v11269_v8 = vpop.f32.mrf.mxu0 }
0x4a49   :  { %v8124_v7 = vadd.f32 %v11269_v8, %v10143_v57 }
0x4a4a   :  { %v8118_v48 = vpop.f32.mrf.mxu0 }
0x4a4b   :  { %v8128_v49 = vadd.f32 %v8124_v7, %v13004_v58  ;;  %v8119_v50 = vadd.f32 %v10143_v57, %v8118_v48 }
0x4a4d   :  { %v8127_v2 = vadd.f32 %v8119_v50, %v13002_v56  ;;  %v8132_v22 = vsel %vm388_vm0, %v8128_v49, 0.0  ;;  %v8171_v56 = vld [vmem:[#allocation28 + $0x98] sm:$0xff] }
0x4a4e   :  { %8133 = vadd.xlane.f32.xlu0 %v8132_v22  ;;  %11270 = vmatprep.subr.mxu1 %v8171_v56 }
0x4a4f   :  { %v8129_v51 = vsel %vm388_vm0, %v8127_v2, 0.0  ;;  %11271 = vmatpush3.msra.mxu1 %v8171_v56  ;;  %v8407_v56 = vld [vmem:[#allocation16 + $0xa8] sm:$0xff] }
0x4a50   :  { %8130 = vadd.xlane.f32.xlu1 %v8129_v51  ;;  %11272 = vmatprep.subr.mxu1 %v8170_v9 }
0x4a51   :  { %11273 = vmatpush3.msra.mxu1 %v8170_v9  ;;  %v8406_v9 = vld [vmem:[#allocation16 + $0xa0] sm:$0xff] }
0x4a52   :  { %11274 = vmatprep.subr.mxu1 %v8169_v10 }
0x4a53   :  { %11275 = vmatpush3.msra.mxu1 %v8169_v10 }
0x4a54   :  { %11276 = vmatprep.subr.mxu1 %v8168_v13 }
0x4a55   :  { %11277 = vmatpush3.msra.mxu1 %v8168_v13 }
0x4ad7   :  { %v8134_v52 = vpop.xlane.xlu0 %8133 }
0x4ad8   :  { %v8136_v53 = vmul.f32 0.03125, %v8134_v52 }
0x4ad9   :  { %v8131_v20 = vpop.xlane.xlu1 %8130 }
0x4ada   :  { %v8138_v54 = vsub.f32 %v8128_v49, %v8136_v53  ;;  %v8135_v55 = vmul.f32 0.03125, %v8131_v20 }
0x4adc   :  { %v8137_v60 = vsub.f32 %v8127_v2, %v8135_v55  ;;  %v8140_v62 = vmul.f32 %v8138_v54, %v8138_v54 }
0x4ade   :  { %v8144_v1 = vsel %vm388_vm0, %v8140_v62, 0.0  ;;  %v8139_v5 = vmul.f32 %v8137_v60, %v8137_v60 }
0x4adf   :  { %8145 = vadd.xlane.f32.xlu1 %v8144_v1 }
0x4ae0   :  { %v8141_v58 = vsel %vm388_vm0, %v8139_v5, 0.0  ;;  %v8409_v5 = vld [vmem:[#allocation16 + $0xb8] sm:$0xff] }
0x4ae1   :  { %8142 = vadd.xlane.f32.xlu0 %v8141_v58  ;;  %v8408_v58 = vld [vmem:[#allocation16 + $0xb0] sm:$0xff]  ;;  %11300 = vmatprep.subr.mxu1 %v8409_v5 }
0x4b68   :  { %v8146_v19 = vpop.xlane.xlu1 %8145 }
0x4b69   :  { %v8148_v12 = vmul.f32 0.03125, %v8146_v19 }
0x4b6a   :  { %v8143_v24 = vpop.xlane.xlu0 %8142 }
0x4b6b   :  { %v8150_v11 = vadd.f32 1e-05, %v8148_v12  ;;  %v8147_v25 = vmul.f32 0.03125, %v8143_v24  ;;  %v8392_v12 = vrot.slane %v12993_v42, %v12577_v31  ;;  %v10156_v42 = vld [vmem:[#allocation17 + $0x5] ss:$0 sm:$0xff] }
0x4b6d   :  { %11636 = vrsqrt.f32 %v8150_v11  ;;  %v8149_v26 = vadd.f32 1e-05, %v8147_v25 }
0x4b6f   :  { %11638 = vrsqrt.f32 %v8149_v26 }
0x4b7a   :  { %v11637_v18 = vpop.eup %11636 }
0x4b7b   :  { %v8154_v15 = vmul.f32 %v11637_v18, %v8138_v54  ;;  %v8398_v18 = vrot.slane %v12998_v41, %v12577_v31 }
0x4b7c   :  { %v11639_v28 = vpop.eup %11638 }
0x4b7d   :  { %v8153_v29 = vmul.f32 %v11639_v28, %v8137_v60  ;;  %v8160_v17 = vmul.f32 %v8158_v27, %v8154_v15 }
0x4b7f   :  { %v8159_v32 = vmul.f32 %v8158_v27, %v8153_v29  ;;  %v8166_v33 = vadd.f32 %v8164_v30, %v8160_v17 }
0x4b81   :  { %v8165_v34 = vadd.f32 %v8164_v30, %v8159_v32 }
0x4b83   :  { %11278 = vmatprep.mubr.msk.f32.mxu1 %vm388_vm0, %v8165_v34 }
0x4b84   :  { %11279 = vmatmul.mubr.msk.f32.vlgmr.msra.gmra.mxu1 %vm388_vm0, %v8166_v33 }
0x4b85   :  { %11301 = vmatpush3.msra.mxu1 %v8409_v5 }
0x4b86   :  { %11302 = vmatprep.subr.mxu1 %v8408_v58 }
0x4b87   :  { %11303 = vmatpush3.msra.mxu1 %v8408_v58 }
0x4b88   :  { %11304 = vmatprep.subr.mxu1 %v8407_v56 }
0x4b89   :  { %11305 = vmatpush3.msra.mxu1 %v8407_v56 }
0x4b8a   :  { %11306 = vmatprep.subr.mxu1 %v8406_v9 }
0x4b8b   :  { %11307 = vmatpush3.msra.mxu1 %v8406_v9  ;;  %v9060_v9 = vld [vmem:[#allocation25 + $0xb0] sm:$0xff] }
0x4b8c   :  { %11311 = vmatprep.subr.mxu1 %v12132_v6 }
0x4c44   :  { %v11280_v16 = vpop.f32.mrf.mxu1 }
0x4c45   :  { %v8258_v47 = vadd.f32 %v11280_v16, %v10147_v40 }
0x4c46   :  { %v8252_v43 = vpop.f32.mrf.mxu1 }
0x4c47   :  { %v8253_v61 = vadd.f32 %v10147_v40, %v8252_v43  ;;  %v8262_v36 = vmax.f32 %v8258_v47, 0.0 }
0x4c49   :  { %v8261_v44 = vmax.f32 %v8253_v61, 0.0 }
0x4c4b   :  { %11297 = vmatprep.mubr.msk.f32.mxu0 %vm1043_vm3, %v8261_v44 }
0x4c4c   :  { %11298 = vmatmul.mubr.msk.f32.vlgmr.msra.gmra.mxu0 %vm1043_vm3, %v8262_v36 }
0x4c4d   :  { %11323 = vmatprep.mubr.msk.f32.mxu0 %vm12133_vm1, %v12132_v6 }
0x4d0c   :  { %v11299_v35 = vpop.f32.mrf.mxu0 }
0x4d0d   :  { %v8358_v57 = vadd.f32 %v11299_v35, %v10151_v45 }
0x4d0e   :  { %v8352_v8 = vpop.f32.mrf.mxu0 }
0x4d0f   :  { %v8362_v7 = vadd.f32 %v8358_v57, %v8166_v33  ;;  %v8353_v48 = vadd.f32 %v10151_v45, %v8352_v8 }
0x4d11   :  { %v8361_v49 = vadd.f32 %v8353_v48, %v8165_v34  ;;  %v8366_v50 = vsel %vm388_vm0, %v8362_v7, 0.0 }
0x4d12   :  { %8367 = vadd.xlane.f32.xlu1 %v8366_v50  ;;  %v8833_v50 = vld [vmem:[#allocation19 + $0xb8] sm:$0xff] }
0x4d13   :  { %v8363_v2 = vsel %vm388_vm0, %v8361_v49, 0.0 }
0x4d14   :  { %8364 = vadd.xlane.f32.xlu0 %v8363_v2 }
0x4d9b   :  { %v8368_v22 = vpop.xlane.xlu1 %8367 }
0x4d9c   :  { %v8370_v51 = vmul.f32 0.03125, %v8368_v22 }
0x4d9d   :  { %v8365_v52 = vpop.xlane.xlu0 %8364 }
0x4d9e   :  { %v8372_v53 = vsub.f32 %v8362_v7, %v8370_v51  ;;  %v8369_v20 = vmul.f32 0.03125, %v8365_v52 }
0x4da0   :  { %v8371_v54 = vsub.f32 %v8361_v49, %v8369_v20  ;;  %v8374_v55 = vmul.f32 %v8372_v53, %v8372_v53  ;;  %v8832_v20 = vld [vmem:[#allocation19 + $0xb0] sm:$0xff] }
0x4da2   :  { %v8378_v60 = vsel %vm388_vm0, %v8374_v55, 0.0  ;;  %v8373_v62 = vmul.f32 %v8371_v54, %v8371_v54 }
0x4da3   :  { %8379 = vadd.xlane.f32.xlu1 %v8378_v60  ;;  %v8831_v60 = vld [vmem:[#allocation19 + $0xa8] sm:$0xff] }
0x4da4   :  { %v8375_v1 = vsel %vm388_vm0, %v8373_v62, 0.0  ;;  %v8830_v62 = vld [vmem:[#allocation19 + $0xa0] sm:$0xff] }
0x4da5   :  { %8376 = vadd.xlane.f32.xlu0 %v8375_v1  ;;  %v9061_v1 = vld [vmem:[#allocation25 + $0xb8] sm:$0xff] }
0x4e2c   :  { %v8380_v10 = vpop.xlane.xlu1 %8379 }
0x4e2d   :  { %v8382_v13 = vmul.f32 0.03125, %v8380_v10 }
0x4e2e   :  { %v8377_v4 = vpop.xlane.xlu0 %8376 }
0x4e2f   :  { %v8384_v3 = vadd.f32 1e-05, %v8382_v13  ;;  %v8381_v14 = vmul.f32 0.03125, %v8377_v4  ;;  %v9059_v13 = vld [vmem:[#allocation25 + $0xa8] sm:$0xff]  ;;  %v9058_v4 = vld [vmem:[#allocation25 + $0xa0] sm:$0xff] }
0x4e31   :  { %11640 = vrsqrt.f32 %v8384_v3  ;;  %v8383_v23 = vadd.f32 1e-05, %v8381_v14  ;;  %v10165_v3 = vld [vmem:[#allocation20 + $0x5] ss:$0 sm:$0xff] }
0x4e33   :  { %11642 = vrsqrt.f32 %v8383_v23 }
0x4e3e   :  { %v11641_v19 = vpop.eup %11640 }
0x4e3f   :  { %v8388_v24 = vmul.f32 %v11641_v19, %v8372_v53 }
0x4e40   :  { %v11643_v11 = vpop.eup %11642 }
0x4e41   :  { %v8387_v25 = vmul.f32 %v11643_v11, %v8371_v54  ;;  %v8394_v26 = vmul.f32 %v8392_v12, %v8388_v24 }
0x4e43   :  { %v8393_v27 = vmul.f32 %v8392_v12, %v8387_v25  ;;  %v13065_v28 = vadd.f32 %v8398_v18, %v8394_v26  ;;  %v10172_v25 = vld [vmem:[%s13224_s26 + $0x5] ss:$0 sm:$0xff] }
0x4e45   :  { %v13063_v15 = vadd.f32 %v8398_v18, %v8393_v27 }
0x4e47   :  { %11308 = vmatprep.mubr.msk.f32.mxu1 %vm388_vm0, %v13063_v15 }
0x4e48   :  { %11309 = vmatmul.mubr.msk.f32.vlgmr.msra.gmra.mxu1 %vm388_vm0, %v13065_v28 }
0x4e49   :  { %11313 = vmatprep.mubr.msk.f32.mxu1 %vm12133_vm1, %v12132_v6 }
0x4f08   :  { %v11310_v29 = vpop.f32.mrf.mxu1 }
0x4f09   :  { %v8496_v17 = vadd.f32 %v11310_v29, %v10156_v42 }
0x4f0a   :  { %v8490_v30 = vpop.f32.mrf.mxu1 }
0x4f0b   :  { %v8491_v32 = vadd.f32 %v10156_v42, %v8490_v30  ;;  %8577 = vrot.lane.b32.xlu1 %v8496_v17, %s12134_s5 }
0x4f0d   :  { %8500 = vrot.lane.b32.xlu0 %v8491_v32, %s12134_s5 }
0x4f7d   :  { %v8578_v34 = vpop.permute.xlu1 %8577 }
0x4f7f   :  { %v8501_v41 = vpop.permute.xlu0 %8500 }
0x4f80   :  { %11312 = vmatpush3.xpose.msk.msra.mxu1 %vm388_vm0, %v8501_v41 }
0x4f81   :  { %11316 = vmatprep.subr.mxu1 %v12132_v6 }
0x4f83   :  { %11314 = vmatmul.mubr.msk.f32.vlgmr.msra.gmra.mxu1 %vm388_vm0, %v8491_v32 }
0x4f84   :  { %11317 = vmatpush3.xpose.msk.msra.mxu1 %vm388_vm0, %v8578_v34  ;;  %11318 = vmatprep.mubr.msk.f32.mxu1 %vm12133_vm1, %v12132_v6 }
0x4f85   :  { %11326 = vmatprep.subr.mxu1 %v12132_v6 }
0x4f87   :  { %11319 = vmatmul.mubr.msk.f32.vlgmr.msra.gmra.mxu1 %vm388_vm0, %v8496_v17 }
0x4f88   :  { %11328 = vmatprep.mubr.msk.f32.mxu1 %vm12133_vm1, %v12132_v6 }
0x5043   :  { %v8572_v33 = vpop.f32.mrf.mxu1 }
0x5044   :  { %v8653_v37 = vmul.f32 0.17677669, %v8572_v33  ;;  %v8967_v33 = vld [vmem:[#allocation22 + $0xb8] sm:$0xff] }
0x5045   :  { %v11315_v46 = vpop.f32.mrf.mxu1 }
0x5046   :  { %v8655_v39 = vsel %vm626_vm2, %v8653_v37, -inf  ;;  %v8965_v46 = vld [vmem:[#allocation22 + $0xa8] sm:$0xff] }
0x5047   :  { %8656 = vmax.xlane.f32.xlu1 %v8655_v39  ;;  %v8649_v38 = vpop.f32.mrf.mxu1  ;;  %v8964_v39 = vld [vmem:[#allocation22 + $0xa0] sm:$0xff] }
0x5048   :  { %v8654_v40 = vmul.f32 0.17677669, %v8649_v38 }
0x5049   :  { %v11320_v16 = vpop.f32.mrf.mxu1 }
0x504a   :  { %v8658_v47 = vsel %vm626_vm2, %v8654_v40, -inf }
0x504b   :  { %8659 = vmax.xlane.f32.xlu0 %v8658_v47 }
0x50d0   :  { %v8657_v43 = vpop.xlane.xlu1 %8656 }
0x50d1   :  { %v8661_v61 = vsub.f32 %v8653_v37, %v8657_v43  ;;  %v8966_v37 = vld [vmem:[#allocation22 + $0xb0] sm:$0xff] }
0x50d3   :  { %v8663_v44 = vmul.f32 1.442695, %v8661_v61 }
0x50d4   :  { %v8660_v36 = vpop.xlane.xlu0 %8659 }
0x50d5   :  { %11644 = vpow2.f32 %v8663_v44  ;;  %v8662_v45 = vsub.f32 %v8654_v40, %v8660_v36  ;;  %v13113_v44 = vld [vmem:[%s13223_s3 + $0x14] sm:$0x7] }
0x50d7   :  { %v8665_v35 = vmul.f32 1.442695, %v8662_v45  ;;  %v8954_v45 = vrot.slane %v13113_v44, %v12410_v21 }
0x50d9   :  { %11646 = vpow2.f32 %v8665_v35  ;;  %v13118_v35 = vld [vmem:[%s12290_s24 + $0x14] sm:$0x7]  ;;  %s12136_s24 = smov [#allocation31]  }
0x50da   :  { %s9892_s28 = sshll.u32 %s12136_s24, 4  ;;  %s9893_s28 = int_to_ptr.vmem [resolvable:$true] %s9892_s28 }
0x50db   :  { %s12036_s2 = scalar_lea.vmem %s9893_s28, 256  ;;  %p12041_p7 = scmp.lt.s32.totalorder %s9893_s28, %s9893_s28 }
0x50dc   :  { %p12037_p6 = scmp.ne.s32.totalorder %s9893_s28, %s12036_s2  ;;  %p12042_p8 = scmp.lt.s32.totalorder %s12036_s2, %s12036_s2 }
0x50de   :  { %p12043_p9 = por %p12042_p8, %p12041_p7 }
0x50e0   :  { %p12044_p10 = pnand %p12043_p9, %p12037_p6 }
0x50e2   :  { %v11645_v57 = vpop.eup %11644 }
0x50e3   :  { %v8667_v8 = vsel %vm626_vm2, %v11645_v57, 0.0 }
0x50e4   :  { %8668 = vadd.xlane.f32.xlu0 %v8667_v8 }
0x50e6   :  { %v11647_v7 = vpop.eup %11646 }
0x50e7   :  { %v8670_v48 = vsel %vm626_vm2, %v11647_v7, 0.0 }
0x50e8   :  { %8671 = vadd.xlane.f32.xlu1 %v8670_v48 }
0x50f9   :  { %8753 = vrot.lane.b32.xlu1 %v8496_v17, %s12135_s15 }
0x50fa   :  { %8677 = vrot.lane.b32.xlu0 %v8491_v32, %s12135_s15 }
0x516d   :  { %v8669_v49 = vpop.xlane.xlu0 %8668 }
0x516e   :  { %11648 = vrcp.f32 %v8669_v49  ;;  %v8960_v49 = vrot.slane %v13118_v35, %v12410_v21 }
0x5171   :  { %v8672_v2 = vpop.xlane.xlu1 %8671  ;;  %v8678_v22 = vpop.permute.xlu0 %8677 }
0x5172   :  { %11650 = vrcp.f32 %v8672_v2  ;;  %11322 = vmatpush3.msra.mxu0 %v8678_v22 }
0x5173   :  { %11331 = vmatprep.subr.mxu0 %v8833_v50 }
0x5175   :  { %v8754_v51 = vpop.permute.xlu1 %8753 }
0x5176   :  { %11327 = vmatpush3.msra.mxu1 %v8754_v51 }
0x5177   :  { %11342 = vmatprep.subr.mxu1 %v8967_v33 }
0x517b   :  { %v11649_v52 = vpop.eup %11648 }
0x517c   :  { %v8675_v53 = vmul.f32 %v11649_v52, %v11645_v57 }
0x517e   :  { %11324 = vmatmul.mubr.msk.f32.vlgmr.msra.gmra.mxu0 %vm626_vm2, %v8675_v53  ;;  %v10168_v53 = vld [vmem:[#allocation23 + $0x5] ss:$0 sm:$0xff] }
0x517f   :  { %v11651_v54 = vpop.eup %11650  ;;  %11332 = vmatpush3.msra.mxu0 %v8833_v50 }
0x5180   :  { %v8676_v55 = vmul.f32 %v11651_v54, %v11647_v7  ;;  %11333 = vmatprep.subr.mxu0 %v8832_v20 }
0x5181   :  { %11334 = vmatpush3.msra.mxu0 %v8832_v20 }
0x5182   :  { %11329 = vmatmul.mubr.msk.f32.vlgmr.msra.gmra.mxu1 %vm626_vm2, %v8676_v55  ;;  %11335 = vmatprep.subr.mxu0 %v8831_v60 }
0x5183   :  { %11336 = vmatpush3.msra.mxu0 %v8831_v60  ;;  %11343 = vmatpush3.msra.mxu1 %v8967_v33 }
0x5184   :  { %11337 = vmatprep.subr.mxu0 %v8830_v62  ;;  %11344 = vmatprep.subr.mxu1 %v8966_v37 }
0x5185   :  { %11338 = vmatpush3.msra.mxu0 %v8830_v62  ;;  %11345 = vmatpush3.msra.mxu1 %v8966_v37  ;;  %v10182_v37 = vld [vmem:[%s13225_s20 + $0x5] ss:$0 sm:$0xff] }
0x5186   :  { %11353 = vmatprep.subr.mxu0 %v9061_v1  ;;  %11346 = vmatprep.subr.mxu1 %v8965_v46 }
0x5187   :  { %11347 = vmatpush3.msra.mxu1 %v8965_v46 }
0x5188   :  { %11348 = vmatprep.subr.mxu1 %v8964_v39 }
0x5189   :  { %11349 = vmatpush3.msra.mxu1 %v8964_v39 }
0x518a   :  { %11364 = vmatprep.subr.mxu1 %v12132_v6 }
0x523e   :  { %v8749_v5 = vpop.f32.mrf.mxu0 }
0x523f   :  { %11339 = vmatprep.mubr.msk.f32.mxu0 %vm388_vm0, %v8749_v5 }
0x5240   :  { %v11325_v58 = vpop.f32.mrf.mxu0 }
0x5242   :  { %v8825_v56 = vpop.f32.mrf.mxu1 }
0x5243   :  { %11340 = vmatmul.mubr.msk.f32.vlgmr.msra.gmra.mxu0 %vm388_vm0, %v8825_v56 }
0x5244   :  { %11354 = vmatpush3.msra.mxu0 %v9061_v1  ;;  %v11330_v10 = vpop.f32.mrf.mxu1  ;;  %11361 = vmatprep.mubr.msk.f32.mxu0 %vm388_vm0, %v12499_v63 }
0x5245   :  { %11355 = vmatprep.subr.mxu0 %v9060_v9 }
0x5246   :  { %11356 = vmatpush3.msra.mxu0 %v9060_v9 }
0x5247   :  { %11357 = vmatprep.subr.mxu0 %v9059_v13 }
0x5248   :  { %11358 = vmatpush3.msra.mxu0 %v9059_v13 }
0x5249   :  { %11359 = vmatprep.subr.mxu0 %v9058_v4 }
0x524a   :  { %11360 = vmatpush3.msra.mxu0 %v9058_v4 }
0x524b   :  { %11362 = vmatmul.mubr.msk.f32.vlgmr.msra.gmra.mxu0 %vm388_vm0, %v12501_v0  ;;  %11374 = vmatprep.subr.mxu0 %v12132_v6 }
0x524c   :  { %11376 = vmatprep.mubr.msk.f32.mxu0 %vm12133_vm1, %v12132_v6 }
0x5303   :  { %v11341_v14 = vpop.f32.mrf.mxu0 }
0x5304   :  { %v8920_v63 = vadd.f32 %v11341_v14, %v10165_v3 }
0x5305   :  { %v8914_v23 = vpop.f32.mrf.mxu0 }
0x5306   :  { %v8924_v19 = vadd.f32 %v8920_v63, %v13065_v28  ;;  %v8915_v12 = vadd.f32 %v10165_v3, %v8914_v23 }
0x5308   :  { %v8923_v24 = vadd.f32 %v8915_v12, %v13063_v15  ;;  %v8928_v11 = vsel %vm388_vm0, %v8924_v19, 0.0 }
0x5309   :  { %8929 = vadd.xlane.f32.xlu0 %v8928_v11 }
0x530a   :  { %v8925_v0 = vsel %vm388_vm0, %v8923_v24, 0.0 }
0x530b   :  { %v11363_v26 = vpop.f32.mrf.mxu0  ;;  %8926 = vadd.xlane.f32.xlu1 %v8925_v0 }
0x530c   :  { %v13107_v18 = vadd.f32 %v11363_v26, %v10172_v25 }
0x530d   :  { %v9136_v2 = vpop.f32.mrf.mxu0 }
0x530e   :  { %v9137_v52 = vadd.f32 %v10172_v25, %v9136_v2  ;;  %v9477_v25 = vld [vmem:[#allocation26 + $0xb8] sm:$0xff] }
0x5392   :  { %v8930_v27 = vpop.xlane.xlu0 %8929 }
0x5393   :  { %v8932_v42 = vmul.f32 0.03125, %v8930_v27 }
0x5394   :  { %v8927_v29 = vpop.xlane.xlu1 %8926 }
0x5395   :  { %v8934_v17 = vsub.f32 %v8924_v19, %v8932_v42  ;;  %v8931_v30 = vmul.f32 0.03125, %v8927_v29 }
0x5397   :  { %v8933_v32 = vsub.f32 %v8923_v24, %v8931_v30  ;;  %v8936_v28 = vmul.f32 %v8934_v17, %v8934_v17 }
0x5399   :  { %v8940_v41 = vsel %vm388_vm0, %v8936_v28, 0.0  ;;  %v8935_v15 = vmul.f32 %v8933_v32, %v8933_v32  ;;  %v9474_v28 = vld [vmem:[#allocation26 + $0xa0] sm:$0xff] }
0x539a   :  { %8941 = vadd.xlane.f32.xlu1 %v8940_v41 }
0x539b   :  { %v8937_v34 = vsel %vm388_vm0, %v8935_v15, 0.0 }
0x539c   :  { %8938 = vadd.xlane.f32.xlu0 %v8937_v34 }
0x5423   :  { %v8942_v38 = vpop.xlane.xlu1 %8941 }
0x5424   :  { %v8944_v40 = vmul.f32 0.03125, %v8942_v38 }
0x5425   :  { %v8939_v16 = vpop.xlane.xlu0 %8938 }
0x5426   :  { %v8946_v47 = vadd.f32 1e-05, %v8944_v40  ;;  %v8943_v43 = vmul.f32 0.03125, %v8939_v16 }
0x5428   :  { %11652 = vrsqrt.f32 %v8946_v47  ;;  %v8945_v61 = vadd.f32 1e-05, %v8943_v43 }
0x542a   :  { %11654 = vrsqrt.f32 %v8945_v61 }
0x5435   :  { %v11653_v36 = vpop.eup %11652 }
0x5436   :  { %v8950_v57 = vmul.f32 %v11653_v36, %v8934_v17  ;;  %v9476_v17 = vld [vmem:[#allocation26 + $0xb0] sm:$0xff] }
0x5437   :  { %v11655_v8 = vpop.eup %11654 }
0x5438   :  { %v8949_v7 = vmul.f32 %v11655_v8, %v8933_v32  ;;  %v8956_v48 = vmul.f32 %v8954_v45, %v8950_v57  ;;  %v9475_v32 = vld [vmem:[#allocation26 + $0xa8] sm:$0xff] }
0x543a   :  { %v8955_v50 = vmul.f32 %v8954_v45, %v8949_v7  ;;  %v13124_v51 = vadd.f32 %v8960_v49, %v8956_v48 }
0x543c   :  { %v13122_v22 = vadd.f32 %v8960_v49, %v8955_v50 }
0x543e   :  { %11350 = vmatprep.mubr.msk.f32.mxu1 %vm388_vm0, %v13122_v22 }
0x543f   :  { %11351 = vmatmul.mubr.msk.f32.vlgmr.msra.gmra.mxu1 %vm388_vm0, %v13124_v51 }
0x5440   :  { %11365 = vmatpush3.xpose.msk.msra.mxu1 %vm388_vm0, %v9137_v52  ;;  %11366 = vmatprep.mubr.msk.f32.mxu1 %vm12133_vm1, %v12132_v6 }
0x5441   :  { %11369 = vmatprep.subr.mxu1 %v12132_v6 }
0x54ff   :  { %v11352_v21 = vpop.f32.mrf.mxu1 }
0x5500   :  { %v9054_v55 = vadd.f32 %v11352_v21, %v10168_v53  ;;  %v9609_v21 = vld [vmem:[#allocation28 + $0xa8] sm:$0xff] }
0x5501   :  { %v9048_v20 = vpop.f32.mrf.mxu1 }
0x5502   :  { %v9049_v54 = vadd.f32 %v10168_v53, %v9048_v20  ;;  %v9608_v53 = vld [vmem:[#allocation28 + $0xa0] sm:$0xff]  ;;  %v9711_v20 = vld [vmem:[#allocation29 + $0x178] sm:$0xff] }
0x5504   :  { %11367 = vmatmul.mubr.msk.f32.vlgmr.msra.gmra.mxu1 %vm388_vm0, %v9049_v54  ;;  %v9710_v54 = vld [vmem:[#allocation29 + $0x170] sm:$0xff] }
0x5505   :  { %11370 = vmatpush3.xpose.msk.msra.mxu1 %vm388_vm0, %v13107_v18  ;;  %11371 = vmatprep.mubr.msk.f32.mxu1 %vm12133_vm1, %v12132_v6 }
0x5506   :  { %11379 = vmatprep.subr.mxu1 %v12132_v6 }
0x5508   :  { %11372 = vmatmul.mubr.msk.f32.vlgmr.msra.gmra.mxu1 %vm388_vm0, %v9054_v55  ;;  %v9709_v55 = vld [vmem:[#allocation29 + $0x168] sm:$0xff] }
0x5509   :  { %11381 = vmatprep.mubr.msk.f32.mxu1 %vm12133_vm1, %v12132_v6 }
0x55c4   :  { %v9217_v60 = vpop.f32.mrf.mxu1 }
0x55c5   :  { %v9297_v62 = vmul.f32 0.17677669, %v9217_v60  ;;  %v9708_v60 = vld [vmem:[#allocation29 + $0x160] sm:$0xff] }
0x55c6   :  { %v11368_v1 = vpop.f32.mrf.mxu1 }
0x55c7   :  { %v9299_v5 = vsel %vm626_vm2, %v9297_v62, -inf }
0x55c8   :  { %9300 = vmax.xlane.f32.xlu0 %v9299_v5  ;;  %v9293_v58 = vpop.f32.mrf.mxu1 }
0x55c9   :  { %v9298_v56 = vmul.f32 0.17677669, %v9293_v58 }
0x55ca   :  { %v11373_v9 = vpop.f32.mrf.mxu1 }
0x55cb   :  { %v9302_v10 = vsel %vm626_vm2, %v9298_v56, -inf }
0x55cc   :  { %9303 = vmax.xlane.f32.xlu1 %v9302_v10 }
0x5651   :  { %v9301_v13 = vpop.xlane.xlu0 %9300 }
0x5652   :  { %v9305_v4 = vsub.f32 %v9297_v62, %v9301_v13  ;;  %v9598_v13 = vrot.slane %v13113_v44, %v12480_v59 }
0x5654   :  { %v9307_v3 = vmul.f32 1.442695, %v9305_v4 }
0x5655   :  { %v9304_v14 = vpop.xlane.xlu1 %9303 }
0x5656   :  { %11656 = vpow2.f32 %v9307_v3  ;;  %v9306_v63 = vsub.f32 %v9298_v56, %v9304_v14 }
0x5658   :  { %v9309_v23 = vmul.f32 1.442695, %v9306_v63 }
0x565a   :  { %11658 = vpow2.f32 %v9309_v23  ;;  %v9604_v23 = vrot.slane %v13118_v35, %v12480_v59  ;;  %v10186_v59 = vld [vmem:[%s13226_s29 + $0x5] ss:$0 sm:$0xff] }
0x5663   :  { %v11657_v6 = vpop.eup %11656 }
0x5664   :  { %v9311_v19 = vsel %vm626_vm2, %v11657_v6, 0.0 }
0x5665   :  { %9312 = vadd.xlane.f32.xlu0 %v9311_v19 }
0x5667   :  { %v11659_v12 = vpop.eup %11658 }
0x5668   :  { %v9314_v24 = vsel %vm626_vm2, %v11659_v12, 0.0 }
0x5669   :  { %9315 = vadd.xlane.f32.xlu1 %v9314_v24  ;;  %v9707_v24 = vld [vmem:[#allocation29 + $0x158] sm:$0xff] }
0x567a   :  { %9397 = vrot.lane.b32.xlu1 %v13107_v18, %s12134_s5 }
0x567b   :  { %9321 = vrot.lane.b32.xlu0 %v9137_v52, %s12134_s5  ;;  %v9610_v52 = vld [vmem:[#allocation28 + $0xb0] sm:$0xff] }
0x56ee   :  { %v9313_v11 = vpop.xlane.xlu0 %9312 }
0x56ef   :  { %11660 = vrcp.f32 %v9313_v11  ;;  %v9706_v11 = vld [vmem:[#allocation29 + $0x150] sm:$0xff] }
0x56f2   :  { %v9322_v0 = vpop.permute.xlu0 %9321  ;;  %v9316_v26 = vpop.xlane.xlu1 %9315 }
0x56f3   :  { %11662 = vrcp.f32 %v9316_v26  ;;  %11375 = vmatpush3.msra.mxu0 %v9322_v0  ;;  %v9704_v0 = vld [vmem:[#allocation29 + $0x140] sm:$0xff] }
0x56f4   :  { %11384 = vmatprep.subr.mxu0 %v9477_v25 }
0x56f6   :  { %v9398_v27 = vpop.permute.xlu1 %9397 }
0x56f7   :  { %11380 = vmatpush3.msra.mxu1 %v9398_v27 }
0x56fc   :  { %v11661_v42 = vpop.eup %11660 }
0x56fd   :  { %v9319_v29 = vmul.f32 %v11661_v42, %v11657_v6 }
0x56ff   :  { %11377 = vmatmul.mubr.msk.f32.vlgmr.msra.gmra.mxu0 %vm626_vm2, %v9319_v29 }
0x5700   :  { %v11663_v30 = vpop.eup %11662  ;;  %11385 = vmatpush3.msra.mxu0 %v9477_v25  ;;  %v9705_v25 = vld [vmem:[#allocation29 + $0x148] sm:$0xff] }
0x5701   :  { %v9320_v18 = vmul.f32 %v11663_v30, %v11659_v12  ;;  %11386 = vmatprep.subr.mxu0 %v9476_v17 }
0x5702   :  { %11387 = vmatpush3.msra.mxu0 %v9476_v17 }
0x5703   :  { %11382 = vmatmul.mubr.msk.f32.vlgmr.msra.gmra.mxu1 %vm626_vm2, %v9320_v18  ;;  %11388 = vmatprep.subr.mxu0 %v9475_v32  ;;  %v10190_v18 = vld [vmem:[%s13227_s12 + $0x5] ss:$0 sm:$0xff] }
0x5704   :  { %11389 = vmatpush3.msra.mxu0 %v9475_v32 }
0x5705   :  { %11390 = vmatprep.subr.mxu0 %v9474_v28 }
0x5706   :  { %11391 = vmatpush3.msra.mxu0 %v9474_v28 }
0x5707   :  { %11406 = vmatprep.subr.mxu0 %v9711_v20 }
0x57bf   :  { %v9393_v41 = vpop.f32.mrf.mxu0 }
0x57c0   :  { %11392 = vmatprep.mubr.msk.f32.mxu0 %vm388_vm0, %v9393_v41 }
0x57c1   :  { %v11378_v15 = vpop.f32.mrf.mxu0 }
0x57c3   :  { %v9469_v34 = vpop.f32.mrf.mxu1 }
0x57c4   :  { %11393 = vmatmul.mubr.msk.f32.vlgmr.msra.gmra.mxu0 %vm388_vm0, %v9469_v34 }
0x57c5   :  { %v11383_v33 = vpop.f32.mrf.mxu1  ;;  %11407 = vmatpush3.msra.mxu0 %v9711_v20 }
0x57c6   :  { %11408 = vmatprep.subr.mxu0 %v9710_v54 }
0x57c7   :  { %11409 = vmatpush3.msra.mxu0 %v9710_v54 }
0x57c8   :  { %11410 = vmatprep.subr.mxu0 %v9709_v55 }
0x57c9   :  { %11411 = vmatpush3.msra.mxu0 %v9709_v55 }
0x57ca   :  { %11412 = vmatprep.subr.mxu0 %v9708_v60 }
0x57cb   :  { %11413 = vmatpush3.msra.mxu0 %v9708_v60 }
0x57cc   :  { %11414 = vmatprep.subr.mxu0 %v9707_v24 }
0x57cd   :  { %11415 = vmatpush3.msra.mxu0 %v9707_v24 }
0x57ce   :  { %11416 = vmatprep.subr.mxu0 %v9706_v11 }
0x57cf   :  { %11417 = vmatpush3.msra.mxu0 %v9706_v11  ;;  %v10193_v11 = vld [vmem:[%s12295_s6] ss:$0 sm:$0xff] }
0x57d0   :  { %11418 = vmatprep.subr.mxu0 %v9705_v25 }
0x57d1   :  { %11419 = vmatpush3.msra.mxu0 %v9705_v25 }
0x57d2   :  { %11420 = vmatprep.subr.mxu0 %v9704_v0 }
0x57d3   :  { %11421 = vmatpush3.msra.mxu0 %v9704_v0 }
0x5884   :  { %v11394_v46 = vpop.f32.mrf.mxu0 }
0x5885   :  { %v9564_v39 = vadd.f32 %v11394_v46, %v10182_v37 }
0x5886   :  { %v9558_v38 = vpop.f32.mrf.mxu0 }
0x5887   :  { %v9568_v40 = vadd.f32 %v9564_v39, %v13124_v51  ;;  %v9559_v16 = vadd.f32 %v10182_v37, %v9558_v38 }
0x5889   :  { %v9567_v47 = vadd.f32 %v9559_v16, %v13122_v22  ;;  %v9572_v43 = vsel %vm388_vm0, %v9568_v40, 0.0  ;;  %v9611_v22 = vld [vmem:[#allocation28 + $0xb8] sm:$0xff] }
0x588a   :  { %9573 = vadd.xlane.f32.xlu0 %v9572_v43  ;;  %11395 = vmatprep.subr.mxu1 %v9611_v22 }
0x588b   :  { %v9569_v61 = vsel %vm388_vm0, %v9567_v47, 0.0  ;;  %11396 = vmatpush3.msra.mxu1 %v9611_v22 }
0x588c   :  { %9570 = vadd.xlane.f32.xlu1 %v9569_v61  ;;  %11397 = vmatprep.subr.mxu1 %v9610_v52 }
0x588d   :  { %11398 = vmatpush3.msra.mxu1 %v9610_v52 }
0x588e   :  { %11399 = vmatprep.subr.mxu1 %v9609_v21 }
0x588f   :  { %11400 = vmatpush3.msra.mxu1 %v9609_v21  ;;  %v9838_v21 = vrot.slane %v13118_v35, %v12577_v31 }
0x5890   :  { %11401 = vmatprep.subr.mxu1 %v9608_v53 }
0x5891   :  { %11402 = vmatpush3.msra.mxu1 %v9608_v53 }
0x5913   :  { %v9574_v36 = vpop.xlane.xlu0 %9573 }
0x5914   :  { %v9576_v45 = vmul.f32 0.03125, %v9574_v36 }
0x5915   :  { %v9571_v57 = vpop.xlane.xlu1 %9570 }
0x5916   :  { %v9578_v8 = vsub.f32 %v9568_v40, %v9576_v45  ;;  %v9575_v7 = vmul.f32 0.03125, %v9571_v57 }
0x5918   :  { %v9577_v48 = vsub.f32 %v9567_v47, %v9575_v7  ;;  %v9580_v49 = vmul.f32 %v9578_v8, %v9578_v8 }
0x591a   :  { %v9584_v50 = vsel %vm388_vm0, %v9580_v49, 0.0  ;;  %v9579_v2 = vmul.f32 %v9577_v48, %v9577_v48 }
0x591b   :  { %9585 = vadd.xlane.f32.xlu1 %v9584_v50 }
0x591c   :  { %v9581_v51 = vsel %vm388_vm0, %v9579_v2, 0.0 }
0x591d   :  { %9582 = vadd.xlane.f32.xlu0 %v9581_v51  ;;  %v9832_v51 = vrot.slane %v13113_v44, %v12577_v31 }
0x59a4   :  { %v9586_v62 = vpop.xlane.xlu1 %9585 }
0x59a5   :  { %v9588_v1 = vmul.f32 0.03125, %v9586_v62 }
0x59a6   :  { %v9583_v5 = vpop.xlane.xlu0 %9582 }
0x59a7   :  { %v9590_v58 = vadd.f32 1e-05, %v9588_v1  ;;  %v9587_v56 = vmul.f32 0.03125, %v9583_v5 }
0x59a9   :  { %11664 = vrsqrt.f32 %v9590_v58  ;;  %v9589_v9 = vadd.f32 1e-05, %v9587_v56 }
0x59ab   :  { %11666 = vrsqrt.f32 %v9589_v9 }
0x59b6   :  { %v11665_v10 = vpop.eup %11664 }
0x59b7   :  { %v9594_v4 = vmul.f32 %v11665_v10, %v9578_v8 }
0x59b8   :  { %v11667_v3 = vpop.eup %11666 }
0x59b9   :  { %v9593_v14 = vmul.f32 %v11667_v3, %v9577_v48  ;;  %v9600_v63 = vmul.f32 %v9598_v13, %v9594_v4 }
0x59bb   :  { %v9599_v6 = vmul.f32 %v9598_v13, %v9593_v14  ;;  %v9606_v12 = vadd.f32 %v9604_v23, %v9600_v63 }
0x59bd   :  { %v9605_v19 = vadd.f32 %v9604_v23, %v9599_v6 }
0x59bf   :  { %11403 = vmatprep.mubr.msk.f32.mxu1 %vm388_vm0, %v9605_v19 }
0x59c0   :  { %11404 = vmatmul.mubr.msk.f32.vlgmr.msra.gmra.mxu1 %vm388_vm0, %v9606_v12 }
0x5a80   :  { %v11405_v26 = vpop.f32.mrf.mxu1 }
0x5a81   :  { %v9698_v27 = vadd.f32 %v11405_v26, %v10186_v59 }
0x5a82   :  { %v9692_v42 = vpop.f32.mrf.mxu1 }
0x5a83   :  { %v9693_v29 = vadd.f32 %v10186_v59, %v9692_v42  ;;  %v9702_v30 = vmax.f32 %v9698_v27, 0.0  ;;  %v10194_v59 = vld [vmem:[%s12300_s8] ss:$0 sm:$0xff] }
0x5a85   :  { %v9701_v17 = vmax.f32 %v9693_v29, 0.0 }
0x5a87   :  { %11422 = vmatprep.mubr.msk.f32.mxu0 %vm1043_vm3, %v9701_v17 }
0x5a88   :  { %11423 = vmatmul.mubr.msk.f32.vlgmr.msra.gmra.mxu0 %vm1043_vm3, %v9702_v30 }
0x5b48   :  { %v11424_v32 = vpop.f32.mrf.mxu0 }
0x5b49   :  { %v9798_v28 = vadd.f32 %v11424_v32, %v10190_v18 }
0x5b4a   :  { %v9792_v41 = vpop.f32.mrf.mxu0 }
0x5b4b   :  { %v9802_v15 = vadd.f32 %v9798_v28, %v9606_v12  ;;  %v9793_v34 = vadd.f32 %v10190_v18, %v9792_v41 }
0x5b4d   :  { %v9801_v33 = vadd.f32 %v9793_v34, %v9605_v19  ;;  %v9806_v37 = vsel %vm388_vm0, %v9802_v15, 0.0 }
0x5b4e   :  { %9807 = vadd.xlane.f32.xlu1 %v9806_v37 }
0x5b4f   :  { %v9803_v46 = vsel %vm388_vm0, %v9801_v33, 0.0 }
0x5b50   :  { %9804 = vadd.xlane.f32.xlu0 %v9803_v46 }
0x5bd7   :  { %v9808_v39 = vpop.xlane.xlu1 %9807 }
0x5bd8   :  { %v9810_v38 = vmul.f32 0.03125, %v9808_v39 }
0x5bd9   :  { %v9805_v40 = vpop.xlane.xlu0 %9804 }
0x5bda   :  { %v9812_v16 = vsub.f32 %v9802_v15, %v9810_v38  ;;  %v9809_v47 = vmul.f32 0.03125, %v9805_v40 }
0x5bdc   :  { %v9811_v43 = vsub.f32 %v9801_v33, %v9809_v47  ;;  %v9814_v61 = vmul.f32 %v9812_v16, %v9812_v16 }
0x5bde   :  { %v9818_v36 = vsel %vm388_vm0, %v9814_v61, 0.0  ;;  %v9813_v45 = vmul.f32 %v9811_v43, %v9811_v43 }
0x5bdf   :  { %9819 = vadd.xlane.f32.xlu1 %v9818_v36 }
0x5be0   :  { %v9815_v57 = vsel %vm388_vm0, %v9813_v45, 0.0 }
0x5be1   :  { %9816 = vadd.xlane.f32.xlu0 %v9815_v57 }
0x5c68   :  { %v9820_v8 = vpop.xlane.xlu1 %9819 }
0x5c69   :  { %v9822_v7 = vmul.f32 0.03125, %v9820_v8 }
0x5c6a   :  { %v9817_v48 = vpop.xlane.xlu0 %9816 }
0x5c6b   :  { %v9824_v49 = vadd.f32 1e-05, %v9822_v7  ;;  %v9821_v50 = vmul.f32 0.03125, %v9817_v48 }
0x5c6d   :  { %11668 = vrsqrt.f32 %v9824_v49  ;;  %v9823_v2 = vadd.f32 1e-05, %v9821_v50 }
0x5c6f   :  { %11670 = vrsqrt.f32 %v9823_v2 }
0x5c7a   :  { %v11669_v22 = vpop.eup %11668 }
0x5c7b   :  { %v9828_v52 = vmul.f32 %v11669_v22, %v9812_v16 }
0x5c7c   :  { %v11671_v53 = vpop.eup %11670 }
0x5c7d   :  { %v9834_v20 = vmul.f32 %v9832_v51, %v9828_v52  ;;  %v9827_v54 = vmul.f32 %v11671_v53, %v9811_v43 }
0x5c7f   :  { %v9840_v55 = vadd.f32 %v9838_v21, %v9834_v20  ;;  %v9833_v60 = vmul.f32 %v9832_v51, %v9827_v54 }
0x5c81   :  { %v9846_v62 = vsel %vm388_vm0, %v9840_v55, 0.0  ;;  %v9839_v1 = vadd.f32 %v9838_v21, %v9833_v60 }
0x5c82   :  { %9847 = vadd.xlane.f32.xlu1 %v9846_v62 }
0x5c83   :  { %v9843_v5 = vsel %vm388_vm0, %v9839_v1, 0.0 }
0x5c84   :  { %9844 = vadd.xlane.f32.xlu0 %v9843_v5 }
0x5d0b   :  { %v9848_v58 = vpop.xlane.xlu1 %9847 }
0x5d0c   :  { %v9850_v56 = vmul.f32 0.03125, %v9848_v58 }
0x5d0d   :  { %v9845_v44 = vpop.xlane.xlu0 %9844 }
0x5d0e   :  { %v9852_v9 = vsub.f32 %v9840_v55, %v9850_v56  ;;  %v9849_v10 = vmul.f32 0.03125, %v9845_v44 }
0x5d10   :  { %v9851_v13 = vsub.f32 %v9839_v1, %v9849_v10  ;;  %v9854_v31 = vmul.f32 %v9852_v9, %v9852_v9 }
0x5d12   :  { %v9858_v35 = vsel %vm388_vm0, %v9854_v31, 0.0  ;;  %v9853_v4 = vmul.f32 %v9851_v13, %v9851_v13 }
0x5d13   :  { %9859 = vadd.xlane.f32.xlu1 %v9858_v35 }
0x5d14   :  { %v9855_v3 = vsel %vm388_vm0, %v9853_v4, 0.0 }
0x5d15   :  { %9856 = vadd.xlane.f32.xlu0 %v9855_v3 }
0x5d9c   :  { %v9860_v14 = vpop.xlane.xlu1 %9859 }
0x5d9d   :  { %v9862_v63 = vmul.f32 0.03125, %v9860_v14 }
0x5d9e   :  { %v9857_v23 = vpop.xlane.xlu0 %9856 }
0x5d9f   :  { %v9864_v6 = vadd.f32 1e-05, %v9862_v63  ;;  %v9861_v19 = vmul.f32 0.03125, %v9857_v23 }
0x5da1   :  { %11672 = vrsqrt.f32 %v9864_v6  ;;  %v9863_v12 = vadd.f32 1e-05, %v9861_v19 }
0x5da3   :  { %11674 = vrsqrt.f32 %v9863_v12 }
0x5dae   :  { %v11673_v24 = vpop.eup %11672 }
0x5daf   :  { %v9868_v25 = vmul.f32 %v11673_v24, %v9852_v9 }
0x5db0   :  { %v11675_v0 = vpop.eup %11674 }
0x5db1   :  { %v9867_v26 = vmul.f32 %v11675_v0, %v9851_v13  ;;  %v9876_v27 = vmul.f32 %v10193_v11, %v9868_v25 }
0x5db3   :  { %v9875_v42 = vmul.f32 %v10193_v11, %v9867_v26  ;;  %v9884_v29 = vadd.f32 %v10194_v59, %v9876_v27 }
0x5db5   :  { %v9883_v17 = vadd.f32 %v10194_v59, %v9875_v42  ;;  %9886 = vst.msk [vmem:[#allocation31 + $0x8] sm:$0xff] %vm388_vm0, %v9884_v29 }
0x5db7   :  { %9885 = vst.msk [vmem:[#allocation31] sm:$0xff] %vm388_vm0, %v9883_v17 }
0x5db8   :  { %12047 = shalt.err (!%p12044_p10)
}
0x5db9   :  { %9898 = dma.vmem_to_hbm [thread:$0]  %s9893_s28, 256, %s12305_s14, [#allocation4], %s12112_s0, %s12112_s0, %s12113_s11  }
0x5dba   :  { %12076 = dma.done.wait [#allocation4], 256  }
0x5dbb   :  { %12077 = vsyncadd [#allocation4], 4294967040 }
0x5dbc   :  { %9902 = vsyncpa [#allocation3], 1 }
0x5dbd   :  { %9903 = vsyncpa [#allocation6], 1 }
0x5dbe   :  { %9904 = vsyncpa [#allocation9], 1 }
0x5dbf   :  { %9905 = vsyncpa [#allocation12], 1 }
0x5dc0   :  { %9906 = vsyncpa [#allocation15], 1 }
0x5dc1   :  { %9907 = vsyncpa [#allocation18], 1 }
0x5dc2   :  { %9908 = vsyncpa [#allocation21], 1 }
0x5dc3   :  { %9909 = vsyncpa [#allocation24], 1 }
0x5dc4   :  { %9910 = vsyncpa [#allocation27], 1 }
0x5dc5   :  { %9911 = vsyncpa [#allocation30], 1 }
0x5dc6   :  { %9912 = vsyncpa [#allocation4], 1 }

</bundles_post_ra>
